<compile_context>
chip_gen: v6e
topology: v6e:2x2x1
jax: 0.10.0
libtpu: 0.0.40
codegen_flags: <defaults>
</compile_context>

<pallas_src>
import jax
import jax.numpy as jnp
from jax import lax
from jax.experimental import pallas as pl
from jax.experimental.pallas import tpu as pltpu

# ---- model dims (from Net1.__init__) ---------------------------------------
IN_DIM = 2
HID_DIM = 10
OUT_DIM = 2
N_LAYERS = 11                                    # fc1 .. fc11
DIMS = [IN_DIM] + [HID_DIM] * (N_LAYERS - 1) + [OUT_DIM]

# Flat parameter layout (PyTorch convention: W[l] is (out, in), row-major).
W_OFFS = [0]
B_OFFS = [0]
for _l in range(N_LAYERS):
    W_OFFS.append(W_OFFS[-1] + DIMS[_l] * DIMS[_l + 1])
    B_OFFS.append(B_OFFS[-1] + DIMS[_l + 1])
W_SIZE = W_OFFS[-1]                              # 940
B_SIZE = B_OFFS[-1]                              # 102

MID_W_OFF = W_OFFS[1]                            # fc2..fc10 (all 10x10) start here
MID_B_OFF = B_OFFS[1]
N_MID_LAYERS = 9
LAYERS_PER_ITER = 3                              # fori_loop: 3 iters x 3 layers unrolled

SUBLANES = 8                                     # batch rows on the sublane axis
MIN_LANES = 128                                  # 1 vreg of batch per feature
WIDE_LANES = 256                                 # 2 vregs of batch per feature


def _elu(x):
    # ELU, alpha=1.0 (PyTorch default).  exp(+large) -> inf in the discarded
    # branch is benign for this forward pass.
    # TODO(synk): switch to an expm1/clamped form before adding a grad path.
    return jnp.where(x > 0, x, jnp.exp(x) - 1.0)


def mlp_kernel(w_ref, b_ref, x_ref, o_ref):
    """w_ref: SMEM (W_SIZE,) f32, b_ref: SMEM (B_SIZE,) f32,
       x_ref: VMEM (IN_DIM, 8, L) f32, o_ref: VMEM (OUT_DIM, 8, L) f32."""
    x0 = x_ref[0]
    x1 = x_ref[1]

    # ---- fc1: 2 -> 10, ELU (fully unrolled scalar-broadcast FMAs) ----------
    h = []
    for j in range(HID_DIM):
        acc = x0 * w_ref[W_OFFS[0] + j * IN_DIM + 0]
        acc = acc + x1 * w_ref[W_OFFS[0] + j * IN_DIM + 1]
        acc = acc + b_ref[B_OFFS[0] + j]
        h.append(_elu(acc))
    h = tuple(h)

    # ---- fc2 .. fc10: nine 10 -> 10 ELU layers ------------------------------
    def hidden_layer(layer_idx, hh):
        # layer_idx in [0, 9): dynamic scalar offsets into the flat SMEM params.
        w_base = MID_W_OFF + layer_idx * (HID_DIM * HID_DIM)
        b_base = MID_B_OFF + layer_idx * HID_DIM
        out = []
        for j in range(HID_DIM):
            acc = hh[0] * w_ref[w_base + j * HID_DIM]
            for i in range(1, HID_DIM):
                acc = acc + hh[i] * w_ref[w_base + j * HID_DIM + i]
            acc = acc + b_ref[b_base + j]
            out.append(_elu(acc))
        return tuple(out)

    def loop_body(t, hh):
        base = t * LAYERS_PER_ITER
        for u in range(LAYERS_PER_ITER):           # 3 layers unrolled per iter
            hh = hidden_layer(base + u, hh)
        return hh

    h = lax.fori_loop(0, N_MID_LAYERS // LAYERS_PER_ITER, loop_body, h)

    # ---- fc11: 10 -> 2 (no ELU) ---------------------------------------------
    logits = []
    for j in range(OUT_DIM):
        acc = h[0] * w_ref[W_OFFS[10] + j * HID_DIM]
        for i in range(1, HID_DIM):
            acc = acc + h[i] * w_ref[W_OFFS[10] + j * HID_DIM + i]
        acc = acc + b_ref[B_OFFS[10] + j]
        logits.append(acc)

    # log_softmax over the 2 classes: elementwise across the batch slab.
    l0, l1 = logits
    m = jnp.maximum(l0, l1)
    lse = m + jnp.log(jnp.exp(l0 - m) + jnp.exp(l1 - m))
    o_ref[0] = l0 - lse
    o_ref[1] = l1 - lse


def _block_lanes_for(lanes_needed):
    # Use 256-lane slabs only when the batch still yields >= 2 grid steps,
    # so both TensorCores (v7x megacore) get work via the "parallel" axis.
    if lanes_needed >= 2 * WIDE_LANES:
        return WIDE_LANES
    return MIN_LANES


@jax.jit
def net1_forward(x, w_flat, b_flat):
    """x: (B, 2) float32.  Returns (B, 2) log-probabilities (Net1.forward)."""
    B = x.shape[0]
    lanes_needed = -(-B // SUBLANES)
    block_lanes = _block_lanes_for(lanes_needed)
    lanes_total = -(-lanes_needed // block_lanes) * block_lanes
    n_tiles = lanes_total // block_lanes
    Bp = lanes_total * SUBLANES

    # (B, 2) -> (2, Bp) -> (2, 8, Bp/8): batch mapped onto (sublane, lane).
    # NOTE: an upstream producer emitting x already in this layout (and
    # consuming the output in it) would remove these two small XLA layout ops.
    xT = jnp.zeros((IN_DIM, Bp), jnp.float32).at[:, :B].set(
        x.astype(jnp.float32).T)
    x3 = xT.reshape(IN_DIM, SUBLANES, lanes_total)

    flops = 2 * W_SIZE * Bp
    transcendentals = (HID_DIM * (N_LAYERS - 1) + 3) * Bp
    bytes_accessed = 4 * ((IN_DIM + OUT_DIM) * Bp + W_SIZE + B_SIZE)

    out3 = pl.pallas_call(
        mlp_kernel,
        out_shape=jax.ShapeDtypeStruct(
            (OUT_DIM, SUBLANES, lanes_total), jnp.float32),
        grid=(n_tiles,),
        in_specs=[
            pl.BlockSpec(memory_space=pltpu.MemorySpace.SMEM),   # weights (resident)
            pl.BlockSpec(memory_space=pltpu.MemorySpace.SMEM),   # biases  (resident)
            pl.BlockSpec((IN_DIM, SUBLANES, block_lanes), lambda i: (0, 0, i)),
        ],
        out_specs=pl.BlockSpec((OUT_DIM, SUBLANES, block_lanes),
                               lambda i: (0, 0, i)),
        compiler_params=pltpu.CompilerParams(
            dimension_semantics=("parallel",)),
        cost_estimate=pl.CostEstimate(flops=flops,
                                      transcendentals=transcendentals,
                                      bytes_accessed=bytes_accessed),
    )(w_flat, b_flat, x3)

    outT = out3.reshape(OUT_DIM, Bp)
    return outT[:, :B].T


def init_params(key):
    """Flat params mimicking nn.Linear's U(-1/sqrt(fan_in), 1/sqrt(fan_in))."""
    w_flat = jnp.zeros((W_SIZE,), jnp.float32)
    b_flat = jnp.zeros((B_SIZE,), jnp.float32)
    for l in range(N_LAYERS):
        fi, fo = DIMS[l], DIMS[l + 1]
        key, kw, kb = jax.random.split(key, 3)
        bound = 1.0 / (fi ** 0.5)
        w = jax.random.uniform(kw, (fo, fi), jnp.float32, -bound, bound)
        b = jax.random.uniform(kb, (fo,), jnp.float32, -bound, bound)
        w_flat = w_flat.at[W_OFFS[l]:W_OFFS[l] + fo * fi].set(w.reshape(-1))
        b_flat = b_flat.at[B_OFFS[l]:B_OFFS[l] + fo].set(b)
    return w_flat, b_flat


def reference_forward(x, w_flat, b_flat):
    """Pure-JAX reference using the same flat parameters."""
    h = x.astype(jnp.float32)
    for l in range(N_LAYERS):
        fi, fo = DIMS[l], DIMS[l + 1]
        w = w_flat[W_OFFS[l]:W_OFFS[l] + fo * fi].reshape(fo, fi)
        b = b_flat[B_OFFS[l]:B_OFFS[l] + fo]
        h = h @ w.T + b
        if l < N_LAYERS - 1:
            h = _elu(h)
    return jax.nn.log_softmax(h, axis=1)


if __name__ == "__main__":
    key = jax.random.PRNGKey(0)
    k_param, k_x = jax.random.split(key)

    w_flat, b_flat = init_params(k_param)

    # Small deterministic batch: pads to a single (8, 128) slab per feature,
    # i.e. one grid step — keeps the check fast in both HW and interpret modes.
    B = 200
    x = jax.random.normal(k_x, (B, IN_DIM), jnp.float32)

    out = jax.block_until_ready(net1_forward(x, w_flat, b_flat))
    ref = reference_forward(x, w_flat, b_flat)

    assert out.shape == (B, OUT_DIM)
    assert bool(jnp.all(jnp.isfinite(out)))
    assert jnp.allclose(out, ref, atol=1e-4, rtol=1e-4), (
        float(jnp.max(jnp.abs(out - ref))))

    print("KERNEL_OK")
</pallas_src>

<mosaic_0001>
module attributes {stable_mosaic.version = 11 : i64} {
  func.func @mlp_kernel(%arg0: i32, %arg1: memref<940xf32, #tpu.memory_space<smem>>, %arg2: memref<102xf32, #tpu.memory_space<smem>>, %arg3: memref<2x8x128xf32, #tpu.memory_space<vmem>>, %arg4: memref<2x8x128xf32, #tpu.memory_space<vmem>>) attributes {dimension_semantics = [#tpu.dimension_semantics<parallel>], iteration_bounds = array<i64: 1>, scalar_prefetch = 0 : i64, scratch_operands = 0 : i64, tpu.core_type = #tpu.core_type<tc>, window_params = [{transform_indices = @transform_0, window_bounds = array<i64: 940>}, {transform_indices = @transform_1, window_bounds = array<i64: 102>}, {transform_indices = @transform_2, window_bounds = array<i64: 2, 8, 128>}, {transform_indices = @transform_3, window_bounds = array<i64: 2, 8, 128>}]} {
    %c0 = arith.constant 0 : index
    %c0_0 = arith.constant 0 : index
    %c0_1 = arith.constant 0 : index
    %0 = vector.load %arg3[%c0, %c0_0, %c0_1] : memref<2x8x128xf32, #tpu.memory_space<vmem>>, vector<1x8x128xf32>
    %1 = vector.shape_cast %0 : vector<1x8x128xf32> to vector<8x128xf32>
    %c1 = arith.constant 1 : index
    %c0_2 = arith.constant 0 : index
    %c0_3 = arith.constant 0 : index
    %2 = vector.load %arg3[%c1, %c0_2, %c0_3] : memref<2x8x128xf32, #tpu.memory_space<vmem>>, vector<1x8x128xf32>
    %3 = vector.shape_cast %2 : vector<1x8x128xf32> to vector<8x128xf32>
    %c0_4 = arith.constant 0 : index
    %4 = memref.load %arg1[%c0_4] : memref<940xf32, #tpu.memory_space<smem>>
    %5 = vector.broadcast %4 : f32 to vector<8x128xf32>
    %6 = arith.mulf %1, %5 : vector<8x128xf32>
    %c1_5 = arith.constant 1 : index
    %7 = memref.load %arg1[%c1_5] : memref<940xf32, #tpu.memory_space<smem>>
    %8 = vector.broadcast %7 : f32 to vector<8x128xf32>
    %9 = arith.mulf %3, %8 : vector<8x128xf32>
    %10 = arith.addf %6, %9 : vector<8x128xf32>
    %c0_6 = arith.constant 0 : index
    %11 = memref.load %arg2[%c0_6] : memref<102xf32, #tpu.memory_space<smem>>
    %12 = vector.broadcast %11 : f32 to vector<8x128xf32>
    %13 = arith.addf %10, %12 : vector<8x128xf32>
    %cst = arith.constant 0.000000e+00 : f32
    %14 = vector.broadcast %cst : f32 to vector<8x128xf32>
    %15 = arith.cmpf ogt, %13, %14 : vector<8x128xf32>
    %16 = math.exp %13 : vector<8x128xf32>
    %cst_7 = arith.constant 1.000000e+00 : f32
    %17 = vector.broadcast %cst_7 : f32 to vector<8x128xf32>
    %18 = arith.subf %16, %17 : vector<8x128xf32>
    %19 = arith.select %15, %13, %18 : vector<8x128xi1>, vector<8x128xf32>
    %c2 = arith.constant 2 : index
    %20 = memref.load %arg1[%c2] : memref<940xf32, #tpu.memory_space<smem>>
    %21 = vector.broadcast %20 : f32 to vector<8x128xf32>
    %22 = arith.mulf %1, %21 : vector<8x128xf32>
    %c3 = arith.constant 3 : index
    %23 = memref.load %arg1[%c3] : memref<940xf32, #tpu.memory_space<smem>>
    %24 = vector.broadcast %23 : f32 to vector<8x128xf32>
    %25 = arith.mulf %3, %24 : vector<8x128xf32>
    %26 = arith.addf %22, %25 : vector<8x128xf32>
    %c1_8 = arith.constant 1 : index
    %27 = memref.load %arg2[%c1_8] : memref<102xf32, #tpu.memory_space<smem>>
    %28 = vector.broadcast %27 : f32 to vector<8x128xf32>
    %29 = arith.addf %26, %28 : vector<8x128xf32>
    %cst_9 = arith.constant 0.000000e+00 : f32
    %30 = vector.broadcast %cst_9 : f32 to vector<8x128xf32>
    %31 = arith.cmpf ogt, %29, %30 : vector<8x128xf32>
    %32 = math.exp %29 : vector<8x128xf32>
    %cst_10 = arith.constant 1.000000e+00 : f32
    %33 = vector.broadcast %cst_10 : f32 to vector<8x128xf32>
    %34 = arith.subf %32, %33 : vector<8x128xf32>
    %35 = arith.select %31, %29, %34 : vector<8x128xi1>, vector<8x128xf32>
    %c4 = arith.constant 4 : index
    %36 = memref.load %arg1[%c4] : memref<940xf32, #tpu.memory_space<smem>>
    %37 = vector.broadcast %36 : f32 to vector<8x128xf32>
    %38 = arith.mulf %1, %37 : vector<8x128xf32>
    %c5 = arith.constant 5 : index
    %39 = memref.load %arg1[%c5] : memref<940xf32, #tpu.memory_space<smem>>
    %40 = vector.broadcast %39 : f32 to vector<8x128xf32>
    %41 = arith.mulf %3, %40 : vector<8x128xf32>
    %42 = arith.addf %38, %41 : vector<8x128xf32>
    %c2_11 = arith.constant 2 : index
    %43 = memref.load %arg2[%c2_11] : memref<102xf32, #tpu.memory_space<smem>>
    %44 = vector.broadcast %43 : f32 to vector<8x128xf32>
    %45 = arith.addf %42, %44 : vector<8x128xf32>
    %cst_12 = arith.constant 0.000000e+00 : f32
    %46 = vector.broadcast %cst_12 : f32 to vector<8x128xf32>
    %47 = arith.cmpf ogt, %45, %46 : vector<8x128xf32>
    %48 = math.exp %45 : vector<8x128xf32>
    %cst_13 = arith.constant 1.000000e+00 : f32
    %49 = vector.broadcast %cst_13 : f32 to vector<8x128xf32>
    %50 = arith.subf %48, %49 : vector<8x128xf32>
    %51 = arith.select %47, %45, %50 : vector<8x128xi1>, vector<8x128xf32>
    %c6 = arith.constant 6 : index
    %52 = memref.load %arg1[%c6] : memref<940xf32, #tpu.memory_space<smem>>
    %53 = vector.broadcast %52 : f32 to vector<8x128xf32>
    %54 = arith.mulf %1, %53 : vector<8x128xf32>
    %c7 = arith.constant 7 : index
    %55 = memref.load %arg1[%c7] : memref<940xf32, #tpu.memory_space<smem>>
    %56 = vector.broadcast %55 : f32 to vector<8x128xf32>
    %57 = arith.mulf %3, %56 : vector<8x128xf32>
    %58 = arith.addf %54, %57 : vector<8x128xf32>
    %c3_14 = arith.constant 3 : index
    %59 = memref.load %arg2[%c3_14] : memref<102xf32, #tpu.memory_space<smem>>
    %60 = vector.broadcast %59 : f32 to vector<8x128xf32>
    %61 = arith.addf %58, %60 : vector<8x128xf32>
    %cst_15 = arith.constant 0.000000e+00 : f32
    %62 = vector.broadcast %cst_15 : f32 to vector<8x128xf32>
    %63 = arith.cmpf ogt, %61, %62 : vector<8x128xf32>
    %64 = math.exp %61 : vector<8x128xf32>
    %cst_16 = arith.constant 1.000000e+00 : f32
    %65 = vector.broadcast %cst_16 : f32 to vector<8x128xf32>
    %66 = arith.subf %64, %65 : vector<8x128xf32>
    %67 = arith.select %63, %61, %66 : vector<8x128xi1>, vector<8x128xf32>
    %c8 = arith.constant 8 : index
    %68 = memref.load %arg1[%c8] : memref<940xf32, #tpu.memory_space<smem>>
    %69 = vector.broadcast %68 : f32 to vector<8x128xf32>
    %70 = arith.mulf %1, %69 : vector<8x128xf32>
    %c9 = arith.constant 9 : index
    %71 = memref.load %arg1[%c9] : memref<940xf32, #tpu.memory_space<smem>>
    %72 = vector.broadcast %71 : f32 to vector<8x128xf32>
    %73 = arith.mulf %3, %72 : vector<8x128xf32>
    %74 = arith.addf %70, %73 : vector<8x128xf32>
    %c4_17 = arith.constant 4 : index
    %75 = memref.load %arg2[%c4_17] : memref<102xf32, #tpu.memory_space<smem>>
    %76 = vector.broadcast %75 : f32 to vector<8x128xf32>
    %77 = arith.addf %74, %76 : vector<8x128xf32>
    %cst_18 = arith.constant 0.000000e+00 : f32
    %78 = vector.broadcast %cst_18 : f32 to vector<8x128xf32>
    %79 = arith.cmpf ogt, %77, %78 : vector<8x128xf32>
    %80 = math.exp %77 : vector<8x128xf32>
    %cst_19 = arith.constant 1.000000e+00 : f32
    %81 = vector.broadcast %cst_19 : f32 to vector<8x128xf32>
    %82 = arith.subf %80, %81 : vector<8x128xf32>
    %83 = arith.select %79, %77, %82 : vector<8x128xi1>, vector<8x128xf32>
    %c10 = arith.constant 10 : index
    %84 = memref.load %arg1[%c10] : memref<940xf32, #tpu.memory_space<smem>>
    %85 = vector.broadcast %84 : f32 to vector<8x128xf32>
    %86 = arith.mulf %1, %85 : vector<8x128xf32>
    %c11 = arith.constant 11 : index
    %87 = memref.load %arg1[%c11] : memref<940xf32, #tpu.memory_space<smem>>
    %88 = vector.broadcast %87 : f32 to vector<8x128xf32>
    %89 = arith.mulf %3, %88 : vector<8x128xf32>
    %90 = arith.addf %86, %89 : vector<8x128xf32>
    %c5_20 = arith.constant 5 : index
    %91 = memref.load %arg2[%c5_20] : memref<102xf32, #tpu.memory_space<smem>>
    %92 = vector.broadcast %91 : f32 to vector<8x128xf32>
    %93 = arith.addf %90, %92 : vector<8x128xf32>
    %cst_21 = arith.constant 0.000000e+00 : f32
    %94 = vector.broadcast %cst_21 : f32 to vector<8x128xf32>
    %95 = arith.cmpf ogt, %93, %94 : vector<8x128xf32>
    %96 = math.exp %93 : vector<8x128xf32>
    %cst_22 = arith.constant 1.000000e+00 : f32
    %97 = vector.broadcast %cst_22 : f32 to vector<8x128xf32>
    %98 = arith.subf %96, %97 : vector<8x128xf32>
    %99 = arith.select %95, %93, %98 : vector<8x128xi1>, vector<8x128xf32>
    %c12 = arith.constant 12 : index
    %100 = memref.load %arg1[%c12] : memref<940xf32, #tpu.memory_space<smem>>
    %101 = vector.broadcast %100 : f32 to vector<8x128xf32>
    %102 = arith.mulf %1, %101 : vector<8x128xf32>
    %c13 = arith.constant 13 : index
    %103 = memref.load %arg1[%c13] : memref<940xf32, #tpu.memory_space<smem>>
    %104 = vector.broadcast %103 : f32 to vector<8x128xf32>
    %105 = arith.mulf %3, %104 : vector<8x128xf32>
    %106 = arith.addf %102, %105 : vector<8x128xf32>
    %c6_23 = arith.constant 6 : index
    %107 = memref.load %arg2[%c6_23] : memref<102xf32, #tpu.memory_space<smem>>
    %108 = vector.broadcast %107 : f32 to vector<8x128xf32>
    %109 = arith.addf %106, %108 : vector<8x128xf32>
    %cst_24 = arith.constant 0.000000e+00 : f32
    %110 = vector.broadcast %cst_24 : f32 to vector<8x128xf32>
    %111 = arith.cmpf ogt, %109, %110 : vector<8x128xf32>
    %112 = math.exp %109 : vector<8x128xf32>
    %cst_25 = arith.constant 1.000000e+00 : f32
    %113 = vector.broadcast %cst_25 : f32 to vector<8x128xf32>
    %114 = arith.subf %112, %113 : vector<8x128xf32>
    %115 = arith.select %111, %109, %114 : vector<8x128xi1>, vector<8x128xf32>
    %c14 = arith.constant 14 : index
    %116 = memref.load %arg1[%c14] : memref<940xf32, #tpu.memory_space<smem>>
    %117 = vector.broadcast %116 : f32 to vector<8x128xf32>
    %118 = arith.mulf %1, %117 : vector<8x128xf32>
    %c15 = arith.constant 15 : index
    %119 = memref.load %arg1[%c15] : memref<940xf32, #tpu.memory_space<smem>>
    %120 = vector.broadcast %119 : f32 to vector<8x128xf32>
    %121 = arith.mulf %3, %120 : vector<8x128xf32>
    %122 = arith.addf %118, %121 : vector<8x128xf32>
    %c7_26 = arith.constant 7 : index
    %123 = memref.load %arg2[%c7_26] : memref<102xf32, #tpu.memory_space<smem>>
    %124 = vector.broadcast %123 : f32 to vector<8x128xf32>
    %125 = arith.addf %122, %124 : vector<8x128xf32>
    %cst_27 = arith.constant 0.000000e+00 : f32
    %126 = vector.broadcast %cst_27 : f32 to vector<8x128xf32>
    %127 = arith.cmpf ogt, %125, %126 : vector<8x128xf32>
    %128 = math.exp %125 : vector<8x128xf32>
    %cst_28 = arith.constant 1.000000e+00 : f32
    %129 = vector.broadcast %cst_28 : f32 to vector<8x128xf32>
    %130 = arith.subf %128, %129 : vector<8x128xf32>
    %131 = arith.select %127, %125, %130 : vector<8x128xi1>, vector<8x128xf32>
    %c16 = arith.constant 16 : index
    %132 = memref.load %arg1[%c16] : memref<940xf32, #tpu.memory_space<smem>>
    %133 = vector.broadcast %132 : f32 to vector<8x128xf32>
    %134 = arith.mulf %1, %133 : vector<8x128xf32>
    %c17 = arith.constant 17 : index
    %135 = memref.load %arg1[%c17] : memref<940xf32, #tpu.memory_space<smem>>
    %136 = vector.broadcast %135 : f32 to vector<8x128xf32>
    %137 = arith.mulf %3, %136 : vector<8x128xf32>
    %138 = arith.addf %134, %137 : vector<8x128xf32>
    %c8_29 = arith.constant 8 : index
    %139 = memref.load %arg2[%c8_29] : memref<102xf32, #tpu.memory_space<smem>>
    %140 = vector.broadcast %139 : f32 to vector<8x128xf32>
    %141 = arith.addf %138, %140 : vector<8x128xf32>
    %cst_30 = arith.constant 0.000000e+00 : f32
    %142 = vector.broadcast %cst_30 : f32 to vector<8x128xf32>
    %143 = arith.cmpf ogt, %141, %142 : vector<8x128xf32>
    %144 = math.exp %141 : vector<8x128xf32>
    %cst_31 = arith.constant 1.000000e+00 : f32
    %145 = vector.broadcast %cst_31 : f32 to vector<8x128xf32>
    %146 = arith.subf %144, %145 : vector<8x128xf32>
    %147 = arith.select %143, %141, %146 : vector<8x128xi1>, vector<8x128xf32>
    %c18 = arith.constant 18 : index
    %148 = memref.load %arg1[%c18] : memref<940xf32, #tpu.memory_space<smem>>
    %149 = vector.broadcast %148 : f32 to vector<8x128xf32>
    %150 = arith.mulf %1, %149 : vector<8x128xf32>
    %c19 = arith.constant 19 : index
    %151 = memref.load %arg1[%c19] : memref<940xf32, #tpu.memory_space<smem>>
    %152 = vector.broadcast %151 : f32 to vector<8x128xf32>
    %153 = arith.mulf %3, %152 : vector<8x128xf32>
    %154 = arith.addf %150, %153 : vector<8x128xf32>
    %c9_32 = arith.constant 9 : index
    %155 = memref.load %arg2[%c9_32] : memref<102xf32, #tpu.memory_space<smem>>
    %156 = vector.broadcast %155 : f32 to vector<8x128xf32>
    %157 = arith.addf %154, %156 : vector<8x128xf32>
    %cst_33 = arith.constant 0.000000e+00 : f32
    %158 = vector.broadcast %cst_33 : f32 to vector<8x128xf32>
    %159 = arith.cmpf ogt, %157, %158 : vector<8x128xf32>
    %160 = math.exp %157 : vector<8x128xf32>
    %cst_34 = arith.constant 1.000000e+00 : f32
    %161 = vector.broadcast %cst_34 : f32 to vector<8x128xf32>
    %162 = arith.subf %160, %161 : vector<8x128xf32>
    %163 = arith.select %159, %157, %162 : vector<8x128xi1>, vector<8x128xf32>
    %c0_i32 = arith.constant 0 : i32
    %c3_i32 = arith.constant 3 : i32
    %164 = arith.addi %c0_i32, %c3_i32 : i32
    %c1_i32 = arith.constant 1 : i32
    %165:10 = scf.for %arg5 = %c0_i32 to %164 step %c1_i32 iter_args(%arg6 = %19, %arg7 = %35, %arg8 = %51, %arg9 = %67, %arg10 = %83, %arg11 = %99, %arg12 = %115, %arg13 = %131, %arg14 = %147, %arg15 = %163) -> (vector<8x128xf32>, vector<8x128xf32>, vector<8x128xf32>, vector<8x128xf32>, vector<8x128xf32>, vector<8x128xf32>, vector<8x128xf32>, vector<8x128xf32>, vector<8x128xf32>, vector<8x128xf32>)  : i32 {
      %c3_i32_42 = arith.constant 3 : i32
      %266 = arith.muli %arg5, %c3_i32_42 : i32
      %c0_i32_43 = arith.constant 0 : i32
      %267 = arith.addi %266, %c0_i32_43 : i32
      %c100_i32 = arith.constant 100 : i32
      %268 = arith.muli %267, %c100_i32 : i32
      %c20_i32 = arith.constant 20 : i32
      %269 = arith.addi %c20_i32, %268 : i32
      %c10_i32 = arith.constant 10 : i32
      %270 = arith.muli %267, %c10_i32 : i32
      %c10_i32_44 = arith.constant 10 : i32
      %271 = arith.addi %c10_i32_44, %270 : i32
      %c0_i32_45 = arith.constant 0 : i32
      %272 = arith.addi %269, %c0_i32_45 : i32
      %273 = arith.index_cast %272 : i32 to index
      %274 = memref.load %arg1[%273] : memref<940xf32, #tpu.memory_space<smem>>
      %275 = vector.broadcast %274 : f32 to vector<8x128xf32>
      %276 = arith.mulf %arg6, %275 : vector<8x128xf32>
      %c0_i32_46 = arith.constant 0 : i32
      %277 = arith.addi %269, %c0_i32_46 : i32
      %c1_i32_47 = arith.constant 1 : i32
      %278 = arith.addi %277, %c1_i32_47 : i32
      %279 = arith.index_cast %278 : i32 to index
      %280 = memref.load %arg1[%279] : memref<940xf32, #tpu.memory_space<smem>>
      %281 = vector.broadcast %280 : f32 to vector<8x128xf32>
      %282 = arith.mulf %arg7, %281 : vector<8x128xf32>
      %283 = arith.addf %276, %282 : vector<8x128xf32>
      %c0_i32_48 = arith.constant 0 : i32
      %284 = arith.addi %269, %c0_i32_48 : i32
      %c2_i32 = arith.constant 2 : i32
      %285 = arith.addi %284, %c2_i32 : i32
      %286 = arith.index_cast %285 : i32 to index
      %287 = memref.load %arg1[%286] : memref<940xf32, #tpu.memory_space<smem>>
      %288 = vector.broadcast %287 : f32 to vector<8x128xf32>
      %289 = arith.mulf %arg8, %288 : vector<8x128xf32>
      %290 = arith.addf %283, %289 : vector<8x128xf32>
      %c0_i32_49 = arith.constant 0 : i32
      %291 = arith.addi %269, %c0_i32_49 : i32
      %c3_i32_50 = arith.constant 3 : i32
      %292 = arith.addi %291, %c3_i32_50 : i32
      %293 = arith.index_cast %292 : i32 to index
      %294 = memref.load %arg1[%293] : memref<940xf32, #tpu.memory_space<smem>>
      %295 = vector.broadcast %294 : f32 to vector<8x128xf32>
      %296 = arith.mulf %arg9, %295 : vector<8x128xf32>
      %297 = arith.addf %290, %296 : vector<8x128xf32>
      %c0_i32_51 = arith.constant 0 : i32
      %298 = arith.addi %269, %c0_i32_51 : i32
      %c4_i32 = arith.constant 4 : i32
      %299 = arith.addi %298, %c4_i32 : i32
      %300 = arith.index_cast %299 : i32 to index
      %301 = memref.load %arg1[%300] : memref<940xf32, #tpu.memory_space<smem>>
      %302 = vector.broadcast %301 : f32 to vector<8x128xf32>
      %303 = arith.mulf %arg10, %302 : vector<8x128xf32>
      %304 = arith.addf %297, %303 : vector<8x128xf32>
      %c0_i32_52 = arith.constant 0 : i32
      %305 = arith.addi %269, %c0_i32_52 : i32
      %c5_i32 = arith.constant 5 : i32
      %306 = arith.addi %305, %c5_i32 : i32
      %307 = arith.index_cast %306 : i32 to index
      %308 = memref.load %arg1[%307] : memref<940xf32, #tpu.memory_space<smem>>
      %309 = vector.broadcast %308 : f32 to vector<8x128xf32>
      %310 = arith.mulf %arg11, %309 : vector<8x128xf32>
      %311 = arith.addf %304, %310 : vector<8x128xf32>
      %c0_i32_53 = arith.constant 0 : i32
      %312 = arith.addi %269, %c0_i32_53 : i32
      %c6_i32 = arith.constant 6 : i32
      %313 = arith.addi %312, %c6_i32 : i32
      %314 = arith.index_cast %313 : i32 to index
      %315 = memref.load %arg1[%314] : memref<940xf32, #tpu.memory_space<smem>>
      %316 = vector.broadcast %315 : f32 to vector<8x128xf32>
      %317 = arith.mulf %arg12, %316 : vector<8x128xf32>
      %318 = arith.addf %311, %317 : vector<8x128xf32>
      %c0_i32_54 = arith.constant 0 : i32
      %319 = arith.addi %269, %c0_i32_54 : i32
      %c7_i32 = arith.constant 7 : i32
      %320 = arith.addi %319, %c7_i32 : i32
      %321 = arith.index_cast %320 : i32 to index
      %322 = memref.load %arg1[%321] : memref<940xf32, #tpu.memory_space<smem>>
      %323 = vector.broadcast %322 : f32 to vector<8x128xf32>
      %324 = arith.mulf %arg13, %323 : vector<8x128xf32>
      %325 = arith.addf %318, %324 : vector<8x128xf32>
      %c0_i32_55 = arith.constant 0 : i32
      %326 = arith.addi %269, %c0_i32_55 : i32
      %c8_i32 = arith.constant 8 : i32
      %327 = arith.addi %326, %c8_i32 : i32
      %328 = arith.index_cast %327 : i32 to index
      %329 = memref.load %arg1[%328] : memref<940xf32, #tpu.memory_space<smem>>
      %330 = vector.broadcast %329 : f32 to vector<8x128xf32>
      %331 = arith.mulf %arg14, %330 : vector<8x128xf32>
      %332 = arith.addf %325, %331 : vector<8x128xf32>
      %c0_i32_56 = arith.constant 0 : i32
      %333 = arith.addi %269, %c0_i32_56 : i32
      %c9_i32 = arith.constant 9 : i32
      %334 = arith.addi %333, %c9_i32 : i32
      %335 = arith.index_cast %334 : i32 to index
      %336 = memref.load %arg1[%335] : memref<940xf32, #tpu.memory_space<smem>>
      %337 = vector.broadcast %336 : f32 to vector<8x128xf32>
      %338 = arith.mulf %arg15, %337 : vector<8x128xf32>
      %339 = arith.addf %332, %338 : vector<8x128xf32>
      %c0_i32_57 = arith.constant 0 : i32
      %340 = arith.addi %271, %c0_i32_57 : i32
      %341 = arith.index_cast %340 : i32 to index
      %342 = memref.load %arg2[%341] : memref<102xf32, #tpu.memory_space<smem>>
      %343 = vector.broadcast %342 : f32 to vector<8x128xf32>
      %344 = arith.addf %339, %343 : vector<8x128xf32>
      %cst_58 = arith.constant 0.000000e+00 : f32
      %345 = vector.broadcast %cst_58 : f32 to vector<8x128xf32>
      %346 = arith.cmpf ogt, %344, %345 : vector<8x128xf32>
      %347 = math.exp %344 : vector<8x128xf32>
      %cst_59 = arith.constant 1.000000e+00 : f32
      %348 = vector.broadcast %cst_59 : f32 to vector<8x128xf32>
      %349 = arith.subf %347, %348 : vector<8x128xf32>
      %350 = arith.select %346, %344, %349 : vector<8x128xi1>, vector<8x128xf32>
      %c10_i32_60 = arith.constant 10 : i32
      %351 = arith.addi %269, %c10_i32_60 : i32
      %352 = arith.index_cast %351 : i32 to index
      %353 = memref.load %arg1[%352] : memref<940xf32, #tpu.memory_space<smem>>
      %354 = vector.broadcast %353 : f32 to vector<8x128xf32>
      %355 = arith.mulf %arg6, %354 : vector<8x128xf32>
      %c10_i32_61 = arith.constant 10 : i32
      %356 = arith.addi %269, %c10_i32_61 : i32
      %c1_i32_62 = arith.constant 1 : i32
      %357 = arith.addi %356, %c1_i32_62 : i32
      %358 = arith.index_cast %357 : i32 to index
      %359 = memref.load %arg1[%358] : memref<940xf32, #tpu.memory_space<smem>>
      %360 = vector.broadcast %359 : f32 to vector<8x128xf32>
      %361 = arith.mulf %arg7, %360 : vector<8x128xf32>
      %362 = arith.addf %355, %361 : vector<8x128xf32>
      %c10_i32_63 = arith.constant 10 : i32
      %363 = arith.addi %269, %c10_i32_63 : i32
      %c2_i32_64 = arith.constant 2 : i32
      %364 = arith.addi %363, %c2_i32_64 : i32
      %365 = arith.index_cast %364 : i32 to index
      %366 = memref.load %arg1[%365] : memref<940xf32, #tpu.memory_space<smem>>
      %367 = vector.broadcast %366 : f32 to vector<8x128xf32>
      %368 = arith.mulf %arg8, %367 : vector<8x128xf32>
      %369 = arith.addf %362, %368 : vector<8x128xf32>
      %c10_i32_65 = arith.constant 10 : i32
      %370 = arith.addi %269, %c10_i32_65 : i32
      %c3_i32_66 = arith.constant 3 : i32
      %371 = arith.addi %370, %c3_i32_66 : i32
      %372 = arith.index_cast %371 : i32 to index
      %373 = memref.load %arg1[%372] : memref<940xf32, #tpu.memory_space<smem>>
      %374 = vector.broadcast %373 : f32 to vector<8x128xf32>
      %375 = arith.mulf %arg9, %374 : vector<8x128xf32>
      %376 = arith.addf %369, %375 : vector<8x128xf32>
      %c10_i32_67 = arith.constant 10 : i32
      %377 = arith.addi %269, %c10_i32_67 : i32
      %c4_i32_68 = arith.constant 4 : i32
      %378 = arith.addi %377, %c4_i32_68 : i32
      %379 = arith.index_cast %378 : i32 to index
      %380 = memref.load %arg1[%379] : memref<940xf32, #tpu.memory_space<smem>>
      %381 = vector.broadcast %380 : f32 to vector<8x128xf32>
      %382 = arith.mulf %arg10, %381 : vector<8x128xf32>
      %383 = arith.addf %376, %382 : vector<8x128xf32>
      %c10_i32_69 = arith.constant 10 : i32
      %384 = arith.addi %269, %c10_i32_69 : i32
      %c5_i32_70 = arith.constant 5 : i32
      %385 = arith.addi %384, %c5_i32_70 : i32
      %386 = arith.index_cast %385 : i32 to index
      %387 = memref.load %arg1[%386] : memref<940xf32, #tpu.memory_space<smem>>
      %388 = vector.broadcast %387 : f32 to vector<8x128xf32>
      %389 = arith.mulf %arg11, %388 : vector<8x128xf32>
      %390 = arith.addf %383, %389 : vector<8x128xf32>
      %c10_i32_71 = arith.constant 10 : i32
      %391 = arith.addi %269, %c10_i32_71 : i32
      %c6_i32_72 = arith.constant 6 : i32
      %392 = arith.addi %391, %c6_i32_72 : i32
      %393 = arith.index_cast %392 : i32 to index
      %394 = memref.load %arg1[%393] : memref<940xf32, #tpu.memory_space<smem>>
      %395 = vector.broadcast %394 : f32 to vector<8x128xf32>
      %396 = arith.mulf %arg12, %395 : vector<8x128xf32>
      %397 = arith.addf %390, %396 : vector<8x128xf32>
      %c10_i32_73 = arith.constant 10 : i32
      %398 = arith.addi %269, %c10_i32_73 : i32
      %c7_i32_74 = arith.constant 7 : i32
      %399 = arith.addi %398, %c7_i32_74 : i32
      %400 = arith.index_cast %399 : i32 to index
      %401 = memref.load %arg1[%400] : memref<940xf32, #tpu.memory_space<smem>>
      %402 = vector.broadcast %401 : f32 to vector<8x128xf32>
      %403 = arith.mulf %arg13, %402 : vector<8x128xf32>
      %404 = arith.addf %397, %403 : vector<8x128xf32>
      %c10_i32_75 = arith.constant 10 : i32
      %405 = arith.addi %269, %c10_i32_75 : i32
      %c8_i32_76 = arith.constant 8 : i32
      %406 = arith.addi %405, %c8_i32_76 : i32
      %407 = arith.index_cast %406 : i32 to index
      %408 = memref.load %arg1[%407] : memref<940xf32, #tpu.memory_space<smem>>
      %409 = vector.broadcast %408 : f32 to vector<8x128xf32>
      %410 = arith.mulf %arg14, %409 : vector<8x128xf32>
      %411 = arith.addf %404, %410 : vector<8x128xf32>
      %c10_i32_77 = arith.constant 10 : i32
      %412 = arith.addi %269, %c10_i32_77 : i32
      %c9_i32_78 = arith.constant 9 : i32
      %413 = arith.addi %412, %c9_i32_78 : i32
      %414 = arith.index_cast %413 : i32 to index
      %415 = memref.load %arg1[%414] : memref<940xf32, #tpu.memory_space<smem>>
      %416 = vector.broadcast %415 : f32 to vector<8x128xf32>
      %417 = arith.mulf %arg15, %416 : vector<8x128xf32>
      %418 = arith.addf %411, %417 : vector<8x128xf32>
      %c1_i32_79 = arith.constant 1 : i32
      %419 = arith.addi %271, %c1_i32_79 : i32
      %420 = arith.index_cast %419 : i32 to index
      %421 = memref.load %arg2[%420] : memref<102xf32, #tpu.memory_space<smem>>
      %422 = vector.broadcast %421 : f32 to vector<8x128xf32>
      %423 = arith.addf %418, %422 : vector<8x128xf32>
      %cst_80 = arith.constant 0.000000e+00 : f32
      %424 = vector.broadcast %cst_80 : f32 to vector<8x128xf32>
      %425 = arith.cmpf ogt, %423, %424 : vector<8x128xf32>
      %426 = math.exp %423 : vector<8x128xf32>
      %cst_81 = arith.constant 1.000000e+00 : f32
      %427 = vector.broadcast %cst_81 : f32 to vector<8x128xf32>
      %428 = arith.subf %426, %427 : vector<8x128xf32>
      %429 = arith.select %425, %423, %428 : vector<8x128xi1>, vector<8x128xf32>
      %c20_i32_82 = arith.constant 20 : i32
      %430 = arith.addi %269, %c20_i32_82 : i32
      %431 = arith.index_cast %430 : i32 to index
      %432 = memref.load %arg1[%431] : memref<940xf32, #tpu.memory_space<smem>>
      %433 = vector.broadcast %432 : f32 to vector<8x128xf32>
      %434 = arith.mulf %arg6, %433 : vector<8x128xf32>
      %c20_i32_83 = arith.constant 20 : i32
      %435 = arith.addi %269, %c20_i32_83 : i32
      %c1_i32_84 = arith.constant 1 : i32
      %436 = arith.addi %435, %c1_i32_84 : i32
      %437 = arith.index_cast %436 : i32 to index
      %438 = memref.load %arg1[%437] : memref<940xf32, #tpu.memory_space<smem>>
      %439 = vector.broadcast %438 : f32 to vector<8x128xf32>
      %440 = arith.mulf %arg7, %439 : vector<8x128xf32>
      %441 = arith.addf %434, %440 : vector<8x128xf32>
      %c20_i32_85 = arith.constant 20 : i32
      %442 = arith.addi %269, %c20_i32_85 : i32
      %c2_i32_86 = arith.constant 2 : i32
      %443 = arith.addi %442, %c2_i32_86 : i32
      %444 = arith.index_cast %443 : i32 to index
      %445 = memref.load %arg1[%444] : memref<940xf32, #tpu.memory_space<smem>>
      %446 = vector.broadcast %445 : f32 to vector<8x128xf32>
      %447 = arith.mulf %arg8, %446 : vector<8x128xf32>
      %448 = arith.addf %441, %447 : vector<8x128xf32>
      %c20_i32_87 = arith.constant 20 : i32
      %449 = arith.addi %269, %c20_i32_87 : i32
      %c3_i32_88 = arith.constant 3 : i32
      %450 = arith.addi %449, %c3_i32_88 : i32
      %451 = arith.index_cast %450 : i32 to index
      %452 = memref.load %arg1[%451] : memref<940xf32, #tpu.memory_space<smem>>
      %453 = vector.broadcast %452 : f32 to vector<8x128xf32>
      %454 = arith.mulf %arg9, %453 : vector<8x128xf32>
      %455 = arith.addf %448, %454 : vector<8x128xf32>
      %c20_i32_89 = arith.constant 20 : i32
      %456 = arith.addi %269, %c20_i32_89 : i32
      %c4_i32_90 = arith.constant 4 : i32
      %457 = arith.addi %456, %c4_i32_90 : i32
      %458 = arith.index_cast %457 : i32 to index
      %459 = memref.load %arg1[%458] : memref<940xf32, #tpu.memory_space<smem>>
      %460 = vector.broadcast %459 : f32 to vector<8x128xf32>
      %461 = arith.mulf %arg10, %460 : vector<8x128xf32>
      %462 = arith.addf %455, %461 : vector<8x128xf32>
      %c20_i32_91 = arith.constant 20 : i32
      %463 = arith.addi %269, %c20_i32_91 : i32
      %c5_i32_92 = arith.constant 5 : i32
      %464 = arith.addi %463, %c5_i32_92 : i32
      %465 = arith.index_cast %464 : i32 to index
      %466 = memref.load %arg1[%465] : memref<940xf32, #tpu.memory_space<smem>>
      %467 = vector.broadcast %466 : f32 to vector<8x128xf32>
      %468 = arith.mulf %arg11, %467 : vector<8x128xf32>
      %469 = arith.addf %462, %468 : vector<8x128xf32>
      %c20_i32_93 = arith.constant 20 : i32
      %470 = arith.addi %269, %c20_i32_93 : i32
      %c6_i32_94 = arith.constant 6 : i32
      %471 = arith.addi %470, %c6_i32_94 : i32
      %472 = arith.index_cast %471 : i32 to index
      %473 = memref.load %arg1[%472] : memref<940xf32, #tpu.memory_space<smem>>
      %474 = vector.broadcast %473 : f32 to vector<8x128xf32>
      %475 = arith.mulf %arg12, %474 : vector<8x128xf32>
      %476 = arith.addf %469, %475 : vector<8x128xf32>
      %c20_i32_95 = arith.constant 20 : i32
      %477 = arith.addi %269, %c20_i32_95 : i32
      %c7_i32_96 = arith.constant 7 : i32
      %478 = arith.addi %477, %c7_i32_96 : i32
      %479 = arith.index_cast %478 : i32 to index
      %480 = memref.load %arg1[%479] : memref<940xf32, #tpu.memory_space<smem>>
      %481 = vector.broadcast %480 : f32 to vector<8x128xf32>
      %482 = arith.mulf %arg13, %481 : vector<8x128xf32>
      %483 = arith.addf %476, %482 : vector<8x128xf32>
      %c20_i32_97 = arith.constant 20 : i32
      %484 = arith.addi %269, %c20_i32_97 : i32
      %c8_i32_98 = arith.constant 8 : i32
      %485 = arith.addi %484, %c8_i32_98 : i32
      %486 = arith.index_cast %485 : i32 to index
      %487 = memref.load %arg1[%486] : memref<940xf32, #tpu.memory_space<smem>>
      %488 = vector.broadcast %487 : f32 to vector<8x128xf32>
      %489 = arith.mulf %arg14, %488 : vector<8x128xf32>
      %490 = arith.addf %483, %489 : vector<8x128xf32>
      %c20_i32_99 = arith.constant 20 : i32
      %491 = arith.addi %269, %c20_i32_99 : i32
      %c9_i32_100 = arith.constant 9 : i32
      %492 = arith.addi %491, %c9_i32_100 : i32
      %493 = arith.index_cast %492 : i32 to index
      %494 = memref.load %arg1[%493] : memref<940xf32, #tpu.memory_space<smem>>
      %495 = vector.broadcast %494 : f32 to vector<8x128xf32>
      %496 = arith.mulf %arg15, %495 : vector<8x128xf32>
      %497 = arith.addf %490, %496 : vector<8x128xf32>
      %c2_i32_101 = arith.constant 2 : i32
      %498 = arith.addi %271, %c2_i32_101 : i32
      %499 = arith.index_cast %498 : i32 to index
      %500 = memref.load %arg2[%499] : memref<102xf32, #tpu.memory_space<smem>>
      %501 = vector.broadcast %500 : f32 to vector<8x128xf32>
      %502 = arith.addf %497, %501 : vector<8x128xf32>
      %cst_102 = arith.constant 0.000000e+00 : f32
      %503 = vector.broadcast %cst_102 : f32 to vector<8x128xf32>
      %504 = arith.cmpf ogt, %502, %503 : vector<8x128xf32>
      %505 = math.exp %502 : vector<8x128xf32>
      %cst_103 = arith.constant 1.000000e+00 : f32
      %506 = vector.broadcast %cst_103 : f32 to vector<8x128xf32>
      %507 = arith.subf %505, %506 : vector<8x128xf32>
      %508 = arith.select %504, %502, %507 : vector<8x128xi1>, vector<8x128xf32>
      %c30_i32 = arith.constant 30 : i32
      %509 = arith.addi %269, %c30_i32 : i32
      %510 = arith.index_cast %509 : i32 to index
      %511 = memref.load %arg1[%510] : memref<940xf32, #tpu.memory_space<smem>>
      %512 = vector.broadcast %511 : f32 to vector<8x128xf32>
      %513 = arith.mulf %arg6, %512 : vector<8x128xf32>
      %c30_i32_104 = arith.constant 30 : i32
      %514 = arith.addi %269, %c30_i32_104 : i32
      %c1_i32_105 = arith.constant 1 : i32
      %515 = arith.addi %514, %c1_i32_105 : i32
      %516 = arith.index_cast %515 : i32 to index
      %517 = memref.load %arg1[%516] : memref<940xf32, #tpu.memory_space<smem>>
      %518 = vector.broadcast %517 : f32 to vector<8x128xf32>
      %519 = arith.mulf %arg7, %518 : vector<8x128xf32>
      %520 = arith.addf %513, %519 : vector<8x128xf32>
      %c30_i32_106 = arith.constant 30 : i32
      %521 = arith.addi %269, %c30_i32_106 : i32
      %c2_i32_107 = arith.constant 2 : i32
      %522 = arith.addi %521, %c2_i32_107 : i32
      %523 = arith.index_cast %522 : i32 to index
      %524 = memref.load %arg1[%523] : memref<940xf32, #tpu.memory_space<smem>>
      %525 = vector.broadcast %524 : f32 to vector<8x128xf32>
      %526 = arith.mulf %arg8, %525 : vector<8x128xf32>
      %527 = arith.addf %520, %526 : vector<8x128xf32>
      %c30_i32_108 = arith.constant 30 : i32
      %528 = arith.addi %269, %c30_i32_108 : i32
      %c3_i32_109 = arith.constant 3 : i32
      %529 = arith.addi %528, %c3_i32_109 : i32
      %530 = arith.index_cast %529 : i32 to index
      %531 = memref.load %arg1[%530] : memref<940xf32, #tpu.memory_space<smem>>
      %532 = vector.broadcast %531 : f32 to vector<8x128xf32>
      %533 = arith.mulf %arg9, %532 : vector<8x128xf32>
      %534 = arith.addf %527, %533 : vector<8x128xf32>
      %c30_i32_110 = arith.constant 30 : i32
      %535 = arith.addi %269, %c30_i32_110 : i32
      %c4_i32_111 = arith.constant 4 : i32
      %536 = arith.addi %535, %c4_i32_111 : i32
      %537 = arith.index_cast %536 : i32 to index
      %538 = memref.load %arg1[%537] : memref<940xf32, #tpu.memory_space<smem>>
      %539 = vector.broadcast %538 : f32 to vector<8x128xf32>
      %540 = arith.mulf %arg10, %539 : vector<8x128xf32>
      %541 = arith.addf %534, %540 : vector<8x128xf32>
      %c30_i32_112 = arith.constant 30 : i32
      %542 = arith.addi %269, %c30_i32_112 : i32
      %c5_i32_113 = arith.constant 5 : i32
      %543 = arith.addi %542, %c5_i32_113 : i32
      %544 = arith.index_cast %543 : i32 to index
      %545 = memref.load %arg1[%544] : memref<940xf32, #tpu.memory_space<smem>>
      %546 = vector.broadcast %545 : f32 to vector<8x128xf32>
      %547 = arith.mulf %arg11, %546 : vector<8x128xf32>
      %548 = arith.addf %541, %547 : vector<8x128xf32>
      %c30_i32_114 = arith.constant 30 : i32
      %549 = arith.addi %269, %c30_i32_114 : i32
      %c6_i32_115 = arith.constant 6 : i32
      %550 = arith.addi %549, %c6_i32_115 : i32
      %551 = arith.index_cast %550 : i32 to index
      %552 = memref.load %arg1[%551] : memref<940xf32, #tpu.memory_space<smem>>
      %553 = vector.broadcast %552 : f32 to vector<8x128xf32>
      %554 = arith.mulf %arg12, %553 : vector<8x128xf32>
      %555 = arith.addf %548, %554 : vector<8x128xf32>
      %c30_i32_116 = arith.constant 30 : i32
      %556 = arith.addi %269, %c30_i32_116 : i32
      %c7_i32_117 = arith.constant 7 : i32
      %557 = arith.addi %556, %c7_i32_117 : i32
      %558 = arith.index_cast %557 : i32 to index
      %559 = memref.load %arg1[%558] : memref<940xf32, #tpu.memory_space<smem>>
      %560 = vector.broadcast %559 : f32 to vector<8x128xf32>
      %561 = arith.mulf %arg13, %560 : vector<8x128xf32>
      %562 = arith.addf %555, %561 : vector<8x128xf32>
      %c30_i32_118 = arith.constant 30 : i32
      %563 = arith.addi %269, %c30_i32_118 : i32
      %c8_i32_119 = arith.constant 8 : i32
      %564 = arith.addi %563, %c8_i32_119 : i32
      %565 = arith.index_cast %564 : i32 to index
      %566 = memref.load %arg1[%565] : memref<940xf32, #tpu.memory_space<smem>>
      %567 = vector.broadcast %566 : f32 to vector<8x128xf32>
      %568 = arith.mulf %arg14, %567 : vector<8x128xf32>
      %569 = arith.addf %562, %568 : vector<8x128xf32>
      %c30_i32_120 = arith.constant 30 : i32
      %570 = arith.addi %269, %c30_i32_120 : i32
      %c9_i32_121 = arith.constant 9 : i32
      %571 = arith.addi %570, %c9_i32_121 : i32
      %572 = arith.index_cast %571 : i32 to index
      %573 = memref.load %arg1[%572] : memref<940xf32, #tpu.memory_space<smem>>
      %574 = vector.broadcast %573 : f32 to vector<8x128xf32>
      %575 = arith.mulf %arg15, %574 : vector<8x128xf32>
      %576 = arith.addf %569, %575 : vector<8x128xf32>
      %c3_i32_122 = arith.constant 3 : i32
      %577 = arith.addi %271, %c3_i32_122 : i32
      %578 = arith.index_cast %577 : i32 to index
      %579 = memref.load %arg2[%578] : memref<102xf32, #tpu.memory_space<smem>>
      %580 = vector.broadcast %579 : f32 to vector<8x128xf32>
      %581 = arith.addf %576, %580 : vector<8x128xf32>
      %cst_123 = arith.constant 0.000000e+00 : f32
      %582 = vector.broadcast %cst_123 : f32 to vector<8x128xf32>
      %583 = arith.cmpf ogt, %581, %582 : vector<8x128xf32>
      %584 = math.exp %581 : vector<8x128xf32>
      %cst_124 = arith.constant 1.000000e+00 : f32
      %585 = vector.broadcast %cst_124 : f32 to vector<8x128xf32>
      %586 = arith.subf %584, %585 : vector<8x128xf32>
      %587 = arith.select %583, %581, %586 : vector<8x128xi1>, vector<8x128xf32>
      %c40_i32 = arith.constant 40 : i32
      %588 = arith.addi %269, %c40_i32 : i32
      %589 = arith.index_cast %588 : i32 to index
      %590 = memref.load %arg1[%589] : memref<940xf32, #tpu.memory_space<smem>>
      %591 = vector.broadcast %590 : f32 to vector<8x128xf32>
      %592 = arith.mulf %arg6, %591 : vector<8x128xf32>
      %c40_i32_125 = arith.constant 40 : i32
      %593 = arith.addi %269, %c40_i32_125 : i32
      %c1_i32_126 = arith.constant 1 : i32
      %594 = arith.addi %593, %c1_i32_126 : i32
      %595 = arith.index_cast %594 : i32 to index
      %596 = memref.load %arg1[%595] : memref<940xf32, #tpu.memory_space<smem>>
      %597 = vector.broadcast %596 : f32 to vector<8x128xf32>
      %598 = arith.mulf %arg7, %597 : vector<8x128xf32>
      %599 = arith.addf %592, %598 : vector<8x128xf32>
      %c40_i32_127 = arith.constant 40 : i32
      %600 = arith.addi %269, %c40_i32_127 : i32
      %c2_i32_128 = arith.constant 2 : i32
      %601 = arith.addi %600, %c2_i32_128 : i32
      %602 = arith.index_cast %601 : i32 to index
      %603 = memref.load %arg1[%602] : memref<940xf32, #tpu.memory_space<smem>>
      %604 = vector.broadcast %603 : f32 to vector<8x128xf32>
      %605 = arith.mulf %arg8, %604 : vector<8x128xf32>
      %606 = arith.addf %599, %605 : vector<8x128xf32>
      %c40_i32_129 = arith.constant 40 : i32
      %607 = arith.addi %269, %c40_i32_129 : i32
      %c3_i32_130 = arith.constant 3 : i32
      %608 = arith.addi %607, %c3_i32_130 : i32
      %609 = arith.index_cast %608 : i32 to index
      %610 = memref.load %arg1[%609] : memref<940xf32, #tpu.memory_space<smem>>
      %611 = vector.broadcast %610 : f32 to vector<8x128xf32>
      %612 = arith.mulf %arg9, %611 : vector<8x128xf32>
      %613 = arith.addf %606, %612 : vector<8x128xf32>
      %c40_i32_131 = arith.constant 40 : i32
      %614 = arith.addi %269, %c40_i32_131 : i32
      %c4_i32_132 = arith.constant 4 : i32
      %615 = arith.addi %614, %c4_i32_132 : i32
      %616 = arith.index_cast %615 : i32 to index
      %617 = memref.load %arg1[%616] : memref<940xf32, #tpu.memory_space<smem>>
      %618 = vector.broadcast %617 : f32 to vector<8x128xf32>
      %619 = arith.mulf %arg10, %618 : vector<8x128xf32>
      %620 = arith.addf %613, %619 : vector<8x128xf32>
      %c40_i32_133 = arith.constant 40 : i32
      %621 = arith.addi %269, %c40_i32_133 : i32
      %c5_i32_134 = arith.constant 5 : i32
      %622 = arith.addi %621, %c5_i32_134 : i32
      %623 = arith.index_cast %622 : i32 to index
      %624 = memref.load %arg1[%623] : memref<940xf32, #tpu.memory_space<smem>>
      %625 = vector.broadcast %624 : f32 to vector<8x128xf32>
      %626 = arith.mulf %arg11, %625 : vector<8x128xf32>
      %627 = arith.addf %620, %626 : vector<8x128xf32>
      %c40_i32_135 = arith.constant 40 : i32
      %628 = arith.addi %269, %c40_i32_135 : i32
      %c6_i32_136 = arith.constant 6 : i32
      %629 = arith.addi %628, %c6_i32_136 : i32
      %630 = arith.index_cast %629 : i32 to index
      %631 = memref.load %arg1[%630] : memref<940xf32, #tpu.memory_space<smem>>
      %632 = vector.broadcast %631 : f32 to vector<8x128xf32>
      %633 = arith.mulf %arg12, %632 : vector<8x128xf32>
      %634 = arith.addf %627, %633 : vector<8x128xf32>
      %c40_i32_137 = arith.constant 40 : i32
      %635 = arith.addi %269, %c40_i32_137 : i32
      %c7_i32_138 = arith.constant 7 : i32
      %636 = arith.addi %635, %c7_i32_138 : i32
      %637 = arith.index_cast %636 : i32 to index
      %638 = memref.load %arg1[%637] : memref<940xf32, #tpu.memory_space<smem>>
      %639 = vector.broadcast %638 : f32 to vector<8x128xf32>
      %640 = arith.mulf %arg13, %639 : vector<8x128xf32>
      %641 = arith.addf %634, %640 : vector<8x128xf32>
      %c40_i32_139 = arith.constant 40 : i32
      %642 = arith.addi %269, %c40_i32_139 : i32
      %c8_i32_140 = arith.constant 8 : i32
      %643 = arith.addi %642, %c8_i32_140 : i32
      %644 = arith.index_cast %643 : i32 to index
      %645 = memref.load %arg1[%644] : memref<940xf32, #tpu.memory_space<smem>>
      %646 = vector.broadcast %645 : f32 to vector<8x128xf32>
      %647 = arith.mulf %arg14, %646 : vector<8x128xf32>
      %648 = arith.addf %641, %647 : vector<8x128xf32>
      %c40_i32_141 = arith.constant 40 : i32
      %649 = arith.addi %269, %c40_i32_141 : i32
      %c9_i32_142 = arith.constant 9 : i32
      %650 = arith.addi %649, %c9_i32_142 : i32
      %651 = arith.index_cast %650 : i32 to index
      %652 = memref.load %arg1[%651] : memref<940xf32, #tpu.memory_space<smem>>
      %653 = vector.broadcast %652 : f32 to vector<8x128xf32>
      %654 = arith.mulf %arg15, %653 : vector<8x128xf32>
      %655 = arith.addf %648, %654 : vector<8x128xf32>
      %c4_i32_143 = arith.constant 4 : i32
      %656 = arith.addi %271, %c4_i32_143 : i32
      %657 = arith.index_cast %656 : i32 to index
      %658 = memref.load %arg2[%657] : memref<102xf32, #tpu.memory_space<smem>>
      %659 = vector.broadcast %658 : f32 to vector<8x128xf32>
      %660 = arith.addf %655, %659 : vector<8x128xf32>
      %cst_144 = arith.constant 0.000000e+00 : f32
      %661 = vector.broadcast %cst_144 : f32 to vector<8x128xf32>
      %662 = arith.cmpf ogt, %660, %661 : vector<8x128xf32>
      %663 = math.exp %660 : vector<8x128xf32>
      %cst_145 = arith.constant 1.000000e+00 : f32
      %664 = vector.broadcast %cst_145 : f32 to vector<8x128xf32>
      %665 = arith.subf %663, %664 : vector<8x128xf32>
      %666 = arith.select %662, %660, %665 : vector<8x128xi1>, vector<8x128xf32>
      %c50_i32 = arith.constant 50 : i32
      %667 = arith.addi %269, %c50_i32 : i32
      %668 = arith.index_cast %667 : i32 to index
      %669 = memref.load %arg1[%668] : memref<940xf32, #tpu.memory_space<smem>>
      %670 = vector.broadcast %669 : f32 to vector<8x128xf32>
      %671 = arith.mulf %arg6, %670 : vector<8x128xf32>
      %c50_i32_146 = arith.constant 50 : i32
      %672 = arith.addi %269, %c50_i32_146 : i32
      %c1_i32_147 = arith.constant 1 : i32
      %673 = arith.addi %672, %c1_i32_147 : i32
      %674 = arith.index_cast %673 : i32 to index
      %675 = memref.load %arg1[%674] : memref<940xf32, #tpu.memory_space<smem>>
      %676 = vector.broadcast %675 : f32 to vector<8x128xf32>
      %677 = arith.mulf %arg7, %676 : vector<8x128xf32>
      %678 = arith.addf %671, %677 : vector<8x128xf32>
      %c50_i32_148 = arith.constant 50 : i32
      %679 = arith.addi %269, %c50_i32_148 : i32
      %c2_i32_149 = arith.constant 2 : i32
      %680 = arith.addi %679, %c2_i32_149 : i32
      %681 = arith.index_cast %680 : i32 to index
      %682 = memref.load %arg1[%681] : memref<940xf32, #tpu.memory_space<smem>>
      %683 = vector.broadcast %682 : f32 to vector<8x128xf32>
      %684 = arith.mulf %arg8, %683 : vector<8x128xf32>
      %685 = arith.addf %678, %684 : vector<8x128xf32>
      %c50_i32_150 = arith.constant 50 : i32
      %686 = arith.addi %269, %c50_i32_150 : i32
      %c3_i32_151 = arith.constant 3 : i32
      %687 = arith.addi %686, %c3_i32_151 : i32
      %688 = arith.index_cast %687 : i32 to index
      %689 = memref.load %arg1[%688] : memref<940xf32, #tpu.memory_space<smem>>
      %690 = vector.broadcast %689 : f32 to vector<8x128xf32>
      %691 = arith.mulf %arg9, %690 : vector<8x128xf32>
      %692 = arith.addf %685, %691 : vector<8x128xf32>
      %c50_i32_152 = arith.constant 50 : i32
      %693 = arith.addi %269, %c50_i32_152 : i32
      %c4_i32_153 = arith.constant 4 : i32
      %694 = arith.addi %693, %c4_i32_153 : i32
      %695 = arith.index_cast %694 : i32 to index
      %696 = memref.load %arg1[%695] : memref<940xf32, #tpu.memory_space<smem>>
      %697 = vector.broadcast %696 : f32 to vector<8x128xf32>
      %698 = arith.mulf %arg10, %697 : vector<8x128xf32>
      %699 = arith.addf %692, %698 : vector<8x128xf32>
      %c50_i32_154 = arith.constant 50 : i32
      %700 = arith.addi %269, %c50_i32_154 : i32
      %c5_i32_155 = arith.constant 5 : i32
      %701 = arith.addi %700, %c5_i32_155 : i32
      %702 = arith.index_cast %701 : i32 to index
      %703 = memref.load %arg1[%702] : memref<940xf32, #tpu.memory_space<smem>>
      %704 = vector.broadcast %703 : f32 to vector<8x128xf32>
      %705 = arith.mulf %arg11, %704 : vector<8x128xf32>
      %706 = arith.addf %699, %705 : vector<8x128xf32>
      %c50_i32_156 = arith.constant 50 : i32
      %707 = arith.addi %269, %c50_i32_156 : i32
      %c6_i32_157 = arith.constant 6 : i32
      %708 = arith.addi %707, %c6_i32_157 : i32
      %709 = arith.index_cast %708 : i32 to index
      %710 = memref.load %arg1[%709] : memref<940xf32, #tpu.memory_space<smem>>
      %711 = vector.broadcast %710 : f32 to vector<8x128xf32>
      %712 = arith.mulf %arg12, %711 : vector<8x128xf32>
      %713 = arith.addf %706, %712 : vector<8x128xf32>
      %c50_i32_158 = arith.constant 50 : i32
      %714 = arith.addi %269, %c50_i32_158 : i32
      %c7_i32_159 = arith.constant 7 : i32
      %715 = arith.addi %714, %c7_i32_159 : i32
      %716 = arith.index_cast %715 : i32 to index
      %717 = memref.load %arg1[%716] : memref<940xf32, #tpu.memory_space<smem>>
      %718 = vector.broadcast %717 : f32 to vector<8x128xf32>
      %719 = arith.mulf %arg13, %718 : vector<8x128xf32>
      %720 = arith.addf %713, %719 : vector<8x128xf32>
      %c50_i32_160 = arith.constant 50 : i32
      %721 = arith.addi %269, %c50_i32_160 : i32
      %c8_i32_161 = arith.constant 8 : i32
      %722 = arith.addi %721, %c8_i32_161 : i32
      %723 = arith.index_cast %722 : i32 to index
      %724 = memref.load %arg1[%723] : memref<940xf32, #tpu.memory_space<smem>>
      %725 = vector.broadcast %724 : f32 to vector<8x128xf32>
      %726 = arith.mulf %arg14, %725 : vector<8x128xf32>
      %727 = arith.addf %720, %726 : vector<8x128xf32>
      %c50_i32_162 = arith.constant 50 : i32
      %728 = arith.addi %269, %c50_i32_162 : i32
      %c9_i32_163 = arith.constant 9 : i32
      %729 = arith.addi %728, %c9_i32_163 : i32
      %730 = arith.index_cast %729 : i32 to index
      %731 = memref.load %arg1[%730] : memref<940xf32, #tpu.memory_space<smem>>
      %732 = vector.broadcast %731 : f32 to vector<8x128xf32>
      %733 = arith.mulf %arg15, %732 : vector<8x128xf32>
      %734 = arith.addf %727, %733 : vector<8x128xf32>
      %c5_i32_164 = arith.constant 5 : i32
      %735 = arith.addi %271, %c5_i32_164 : i32
      %736 = arith.index_cast %735 : i32 to index
      %737 = memref.load %arg2[%736] : memref<102xf32, #tpu.memory_space<smem>>
      %738 = vector.broadcast %737 : f32 to vector<8x128xf32>
      %739 = arith.addf %734, %738 : vector<8x128xf32>
      %cst_165 = arith.constant 0.000000e+00 : f32
      %740 = vector.broadcast %cst_165 : f32 to vector<8x128xf32>
      %741 = arith.cmpf ogt, %739, %740 : vector<8x128xf32>
      %742 = math.exp %739 : vector<8x128xf32>
      %cst_166 = arith.constant 1.000000e+00 : f32
      %743 = vector.broadcast %cst_166 : f32 to vector<8x128xf32>
      %744 = arith.subf %742, %743 : vector<8x128xf32>
      %745 = arith.select %741, %739, %744 : vector<8x128xi1>, vector<8x128xf32>
      %c60_i32 = arith.constant 60 : i32
      %746 = arith.addi %269, %c60_i32 : i32
      %747 = arith.index_cast %746 : i32 to index
      %748 = memref.load %arg1[%747] : memref<940xf32, #tpu.memory_space<smem>>
      %749 = vector.broadcast %748 : f32 to vector<8x128xf32>
      %750 = arith.mulf %arg6, %749 : vector<8x128xf32>
      %c60_i32_167 = arith.constant 60 : i32
      %751 = arith.addi %269, %c60_i32_167 : i32
      %c1_i32_168 = arith.constant 1 : i32
      %752 = arith.addi %751, %c1_i32_168 : i32
      %753 = arith.index_cast %752 : i32 to index
      %754 = memref.load %arg1[%753] : memref<940xf32, #tpu.memory_space<smem>>
      %755 = vector.broadcast %754 : f32 to vector<8x128xf32>
      %756 = arith.mulf %arg7, %755 : vector<8x128xf32>
      %757 = arith.addf %750, %756 : vector<8x128xf32>
      %c60_i32_169 = arith.constant 60 : i32
      %758 = arith.addi %269, %c60_i32_169 : i32
      %c2_i32_170 = arith.constant 2 : i32
      %759 = arith.addi %758, %c2_i32_170 : i32
      %760 = arith.index_cast %759 : i32 to index
      %761 = memref.load %arg1[%760] : memref<940xf32, #tpu.memory_space<smem>>
      %762 = vector.broadcast %761 : f32 to vector<8x128xf32>
      %763 = arith.mulf %arg8, %762 : vector<8x128xf32>
      %764 = arith.addf %757, %763 : vector<8x128xf32>
      %c60_i32_171 = arith.constant 60 : i32
      %765 = arith.addi %269, %c60_i32_171 : i32
      %c3_i32_172 = arith.constant 3 : i32
      %766 = arith.addi %765, %c3_i32_172 : i32
      %767 = arith.index_cast %766 : i32 to index
      %768 = memref.load %arg1[%767] : memref<940xf32, #tpu.memory_space<smem>>
      %769 = vector.broadcast %768 : f32 to vector<8x128xf32>
      %770 = arith.mulf %arg9, %769 : vector<8x128xf32>
      %771 = arith.addf %764, %770 : vector<8x128xf32>
      %c60_i32_173 = arith.constant 60 : i32
      %772 = arith.addi %269, %c60_i32_173 : i32
      %c4_i32_174 = arith.constant 4 : i32
      %773 = arith.addi %772, %c4_i32_174 : i32
      %774 = arith.index_cast %773 : i32 to index
      %775 = memref.load %arg1[%774] : memref<940xf32, #tpu.memory_space<smem>>
      %776 = vector.broadcast %775 : f32 to vector<8x128xf32>
      %777 = arith.mulf %arg10, %776 : vector<8x128xf32>
      %778 = arith.addf %771, %777 : vector<8x128xf32>
      %c60_i32_175 = arith.constant 60 : i32
      %779 = arith.addi %269, %c60_i32_175 : i32
      %c5_i32_176 = arith.constant 5 : i32
      %780 = arith.addi %779, %c5_i32_176 : i32
      %781 = arith.index_cast %780 : i32 to index
      %782 = memref.load %arg1[%781] : memref<940xf32, #tpu.memory_space<smem>>
      %783 = vector.broadcast %782 : f32 to vector<8x128xf32>
      %784 = arith.mulf %arg11, %783 : vector<8x128xf32>
      %785 = arith.addf %778, %784 : vector<8x128xf32>
      %c60_i32_177 = arith.constant 60 : i32
      %786 = arith.addi %269, %c60_i32_177 : i32
      %c6_i32_178 = arith.constant 6 : i32
      %787 = arith.addi %786, %c6_i32_178 : i32
      %788 = arith.index_cast %787 : i32 to index
      %789 = memref.load %arg1[%788] : memref<940xf32, #tpu.memory_space<smem>>
      %790 = vector.broadcast %789 : f32 to vector<8x128xf32>
      %791 = arith.mulf %arg12, %790 : vector<8x128xf32>
      %792 = arith.addf %785, %791 : vector<8x128xf32>
      %c60_i32_179 = arith.constant 60 : i32
      %793 = arith.addi %269, %c60_i32_179 : i32
      %c7_i32_180 = arith.constant 7 : i32
      %794 = arith.addi %793, %c7_i32_180 : i32
      %795 = arith.index_cast %794 : i32 to index
      %796 = memref.load %arg1[%795] : memref<940xf32, #tpu.memory_space<smem>>
      %797 = vector.broadcast %796 : f32 to vector<8x128xf32>
      %798 = arith.mulf %arg13, %797 : vector<8x128xf32>
      %799 = arith.addf %792, %798 : vector<8x128xf32>
      %c60_i32_181 = arith.constant 60 : i32
      %800 = arith.addi %269, %c60_i32_181 : i32
      %c8_i32_182 = arith.constant 8 : i32
      %801 = arith.addi %800, %c8_i32_182 : i32
      %802 = arith.index_cast %801 : i32 to index
      %803 = memref.load %arg1[%802] : memref<940xf32, #tpu.memory_space<smem>>
      %804 = vector.broadcast %803 : f32 to vector<8x128xf32>
      %805 = arith.mulf %arg14, %804 : vector<8x128xf32>
      %806 = arith.addf %799, %805 : vector<8x128xf32>
      %c60_i32_183 = arith.constant 60 : i32
      %807 = arith.addi %269, %c60_i32_183 : i32
      %c9_i32_184 = arith.constant 9 : i32
      %808 = arith.addi %807, %c9_i32_184 : i32
      %809 = arith.index_cast %808 : i32 to index
      %810 = memref.load %arg1[%809] : memref<940xf32, #tpu.memory_space<smem>>
      %811 = vector.broadcast %810 : f32 to vector<8x128xf32>
      %812 = arith.mulf %arg15, %811 : vector<8x128xf32>
      %813 = arith.addf %806, %812 : vector<8x128xf32>
      %c6_i32_185 = arith.constant 6 : i32
      %814 = arith.addi %271, %c6_i32_185 : i32
      %815 = arith.index_cast %814 : i32 to index
      %816 = memref.load %arg2[%815] : memref<102xf32, #tpu.memory_space<smem>>
      %817 = vector.broadcast %816 : f32 to vector<8x128xf32>
      %818 = arith.addf %813, %817 : vector<8x128xf32>
      %cst_186 = arith.constant 0.000000e+00 : f32
      %819 = vector.broadcast %cst_186 : f32 to vector<8x128xf32>
      %820 = arith.cmpf ogt, %818, %819 : vector<8x128xf32>
      %821 = math.exp %818 : vector<8x128xf32>
      %cst_187 = arith.constant 1.000000e+00 : f32
      %822 = vector.broadcast %cst_187 : f32 to vector<8x128xf32>
      %823 = arith.subf %821, %822 : vector<8x128xf32>
      %824 = arith.select %820, %818, %823 : vector<8x128xi1>, vector<8x128xf32>
      %c70_i32 = arith.constant 70 : i32
      %825 = arith.addi %269, %c70_i32 : i32
      %826 = arith.index_cast %825 : i32 to index
      %827 = memref.load %arg1[%826] : memref<940xf32, #tpu.memory_space<smem>>
      %828 = vector.broadcast %827 : f32 to vector<8x128xf32>
      %829 = arith.mulf %arg6, %828 : vector<8x128xf32>
      %c70_i32_188 = arith.constant 70 : i32
      %830 = arith.addi %269, %c70_i32_188 : i32
      %c1_i32_189 = arith.constant 1 : i32
      %831 = arith.addi %830, %c1_i32_189 : i32
      %832 = arith.index_cast %831 : i32 to index
      %833 = memref.load %arg1[%832] : memref<940xf32, #tpu.memory_space<smem>>
      %834 = vector.broadcast %833 : f32 to vector<8x128xf32>
      %835 = arith.mulf %arg7, %834 : vector<8x128xf32>
      %836 = arith.addf %829, %835 : vector<8x128xf32>
      %c70_i32_190 = arith.constant 70 : i32
      %837 = arith.addi %269, %c70_i32_190 : i32
      %c2_i32_191 = arith.constant 2 : i32
      %838 = arith.addi %837, %c2_i32_191 : i32
      %839 = arith.index_cast %838 : i32 to index
      %840 = memref.load %arg1[%839] : memref<940xf32, #tpu.memory_space<smem>>
      %841 = vector.broadcast %840 : f32 to vector<8x128xf32>
      %842 = arith.mulf %arg8, %841 : vector<8x128xf32>
      %843 = arith.addf %836, %842 : vector<8x128xf32>
      %c70_i32_192 = arith.constant 70 : i32
      %844 = arith.addi %269, %c70_i32_192 : i32
      %c3_i32_193 = arith.constant 3 : i32
      %845 = arith.addi %844, %c3_i32_193 : i32
      %846 = arith.index_cast %845 : i32 to index
      %847 = memref.load %arg1[%846] : memref<940xf32, #tpu.memory_space<smem>>
      %848 = vector.broadcast %847 : f32 to vector<8x128xf32>
      %849 = arith.mulf %arg9, %848 : vector<8x128xf32>
      %850 = arith.addf %843, %849 : vector<8x128xf32>
      %c70_i32_194 = arith.constant 70 : i32
      %851 = arith.addi %269, %c70_i32_194 : i32
      %c4_i32_195 = arith.constant 4 : i32
      %852 = arith.addi %851, %c4_i32_195 : i32
      %853 = arith.index_cast %852 : i32 to index
      %854 = memref.load %arg1[%853] : memref<940xf32, #tpu.memory_space<smem>>
      %855 = vector.broadcast %854 : f32 to vector<8x128xf32>
      %856 = arith.mulf %arg10, %855 : vector<8x128xf32>
      %857 = arith.addf %850, %856 : vector<8x128xf32>
      %c70_i32_196 = arith.constant 70 : i32
      %858 = arith.addi %269, %c70_i32_196 : i32
      %c5_i32_197 = arith.constant 5 : i32
      %859 = arith.addi %858, %c5_i32_197 : i32
      %860 = arith.index_cast %859 : i32 to index
      %861 = memref.load %arg1[%860] : memref<940xf32, #tpu.memory_space<smem>>
      %862 = vector.broadcast %861 : f32 to vector<8x128xf32>
      %863 = arith.mulf %arg11, %862 : vector<8x128xf32>
      %864 = arith.addf %857, %863 : vector<8x128xf32>
      %c70_i32_198 = arith.constant 70 : i32
      %865 = arith.addi %269, %c70_i32_198 : i32
      %c6_i32_199 = arith.constant 6 : i32
      %866 = arith.addi %865, %c6_i32_199 : i32
      %867 = arith.index_cast %866 : i32 to index
      %868 = memref.load %arg1[%867] : memref<940xf32, #tpu.memory_space<smem>>
      %869 = vector.broadcast %868 : f32 to vector<8x128xf32>
      %870 = arith.mulf %arg12, %869 : vector<8x128xf32>
      %871 = arith.addf %864, %870 : vector<8x128xf32>
      %c70_i32_200 = arith.constant 70 : i32
      %872 = arith.addi %269, %c70_i32_200 : i32
      %c7_i32_201 = arith.constant 7 : i32
      %873 = arith.addi %872, %c7_i32_201 : i32
      %874 = arith.index_cast %873 : i32 to index
      %875 = memref.load %arg1[%874] : memref<940xf32, #tpu.memory_space<smem>>
      %876 = vector.broadcast %875 : f32 to vector<8x128xf32>
      %877 = arith.mulf %arg13, %876 : vector<8x128xf32>
      %878 = arith.addf %871, %877 : vector<8x128xf32>
      %c70_i32_202 = arith.constant 70 : i32
      %879 = arith.addi %269, %c70_i32_202 : i32
      %c8_i32_203 = arith.constant 8 : i32
      %880 = arith.addi %879, %c8_i32_203 : i32
      %881 = arith.index_cast %880 : i32 to index
      %882 = memref.load %arg1[%881] : memref<940xf32, #tpu.memory_space<smem>>
      %883 = vector.broadcast %882 : f32 to vector<8x128xf32>
      %884 = arith.mulf %arg14, %883 : vector<8x128xf32>
      %885 = arith.addf %878, %884 : vector<8x128xf32>
      %c70_i32_204 = arith.constant 70 : i32
      %886 = arith.addi %269, %c70_i32_204 : i32
      %c9_i32_205 = arith.constant 9 : i32
      %887 = arith.addi %886, %c9_i32_205 : i32
      %888 = arith.index_cast %887 : i32 to index
      %889 = memref.load %arg1[%888] : memref<940xf32, #tpu.memory_space<smem>>
      %890 = vector.broadcast %889 : f32 to vector<8x128xf32>
      %891 = arith.mulf %arg15, %890 : vector<8x128xf32>
      %892 = arith.addf %885, %891 : vector<8x128xf32>
      %c7_i32_206 = arith.constant 7 : i32
      %893 = arith.addi %271, %c7_i32_206 : i32
      %894 = arith.index_cast %893 : i32 to index
      %895 = memref.load %arg2[%894] : memref<102xf32, #tpu.memory_space<smem>>
      %896 = vector.broadcast %895 : f32 to vector<8x128xf32>
      %897 = arith.addf %892, %896 : vector<8x128xf32>
      %cst_207 = arith.constant 0.000000e+00 : f32
      %898 = vector.broadcast %cst_207 : f32 to vector<8x128xf32>
      %899 = arith.cmpf ogt, %897, %898 : vector<8x128xf32>
      %900 = math.exp %897 : vector<8x128xf32>
      %cst_208 = arith.constant 1.000000e+00 : f32
      %901 = vector.broadcast %cst_208 : f32 to vector<8x128xf32>
      %902 = arith.subf %900, %901 : vector<8x128xf32>
      %903 = arith.select %899, %897, %902 : vector<8x128xi1>, vector<8x128xf32>
      %c80_i32 = arith.constant 80 : i32
      %904 = arith.addi %269, %c80_i32 : i32
      %905 = arith.index_cast %904 : i32 to index
      %906 = memref.load %arg1[%905] : memref<940xf32, #tpu.memory_space<smem>>
      %907 = vector.broadcast %906 : f32 to vector<8x128xf32>
      %908 = arith.mulf %arg6, %907 : vector<8x128xf32>
      %c80_i32_209 = arith.constant 80 : i32
      %909 = arith.addi %269, %c80_i32_209 : i32
      %c1_i32_210 = arith.constant 1 : i32
      %910 = arith.addi %909, %c1_i32_210 : i32
      %911 = arith.index_cast %910 : i32 to index
      %912 = memref.load %arg1[%911] : memref<940xf32, #tpu.memory_space<smem>>
      %913 = vector.broadcast %912 : f32 to vector<8x128xf32>
      %914 = arith.mulf %arg7, %913 : vector<8x128xf32>
      %915 = arith.addf %908, %914 : vector<8x128xf32>
      %c80_i32_211 = arith.constant 80 : i32
      %916 = arith.addi %269, %c80_i32_211 : i32
      %c2_i32_212 = arith.constant 2 : i32
      %917 = arith.addi %916, %c2_i32_212 : i32
      %918 = arith.index_cast %917 : i32 to index
      %919 = memref.load %arg1[%918] : memref<940xf32, #tpu.memory_space<smem>>
      %920 = vector.broadcast %919 : f32 to vector<8x128xf32>
      %921 = arith.mulf %arg8, %920 : vector<8x128xf32>
      %922 = arith.addf %915, %921 : vector<8x128xf32>
      %c80_i32_213 = arith.constant 80 : i32
      %923 = arith.addi %269, %c80_i32_213 : i32
      %c3_i32_214 = arith.constant 3 : i32
      %924 = arith.addi %923, %c3_i32_214 : i32
      %925 = arith.index_cast %924 : i32 to index
      %926 = memref.load %arg1[%925] : memref<940xf32, #tpu.memory_space<smem>>
      %927 = vector.broadcast %926 : f32 to vector<8x128xf32>
      %928 = arith.mulf %arg9, %927 : vector<8x128xf32>
      %929 = arith.addf %922, %928 : vector<8x128xf32>
      %c80_i32_215 = arith.constant 80 : i32
      %930 = arith.addi %269, %c80_i32_215 : i32
      %c4_i32_216 = arith.constant 4 : i32
      %931 = arith.addi %930, %c4_i32_216 : i32
      %932 = arith.index_cast %931 : i32 to index
      %933 = memref.load %arg1[%932] : memref<940xf32, #tpu.memory_space<smem>>
      %934 = vector.broadcast %933 : f32 to vector<8x128xf32>
      %935 = arith.mulf %arg10, %934 : vector<8x128xf32>
      %936 = arith.addf %929, %935 : vector<8x128xf32>
      %c80_i32_217 = arith.constant 80 : i32
      %937 = arith.addi %269, %c80_i32_217 : i32
      %c5_i32_218 = arith.constant 5 : i32
      %938 = arith.addi %937, %c5_i32_218 : i32
      %939 = arith.index_cast %938 : i32 to index
      %940 = memref.load %arg1[%939] : memref<940xf32, #tpu.memory_space<smem>>
      %941 = vector.broadcast %940 : f32 to vector<8x128xf32>
      %942 = arith.mulf %arg11, %941 : vector<8x128xf32>
      %943 = arith.addf %936, %942 : vector<8x128xf32>
      %c80_i32_219 = arith.constant 80 : i32
      %944 = arith.addi %269, %c80_i32_219 : i32
      %c6_i32_220 = arith.constant 6 : i32
      %945 = arith.addi %944, %c6_i32_220 : i32
      %946 = arith.index_cast %945 : i32 to index
      %947 = memref.load %arg1[%946] : memref<940xf32, #tpu.memory_space<smem>>
      %948 = vector.broadcast %947 : f32 to vector<8x128xf32>
      %949 = arith.mulf %arg12, %948 : vector<8x128xf32>
      %950 = arith.addf %943, %949 : vector<8x128xf32>
      %c80_i32_221 = arith.constant 80 : i32
      %951 = arith.addi %269, %c80_i32_221 : i32
      %c7_i32_222 = arith.constant 7 : i32
      %952 = arith.addi %951, %c7_i32_222 : i32
      %953 = arith.index_cast %952 : i32 to index
      %954 = memref.load %arg1[%953] : memref<940xf32, #tpu.memory_space<smem>>
      %955 = vector.broadcast %954 : f32 to vector<8x128xf32>
      %956 = arith.mulf %arg13, %955 : vector<8x128xf32>
      %957 = arith.addf %950, %956 : vector<8x128xf32>
      %c80_i32_223 = arith.constant 80 : i32
      %958 = arith.addi %269, %c80_i32_223 : i32
      %c8_i32_224 = arith.constant 8 : i32
      %959 = arith.addi %958, %c8_i32_224 : i32
      %960 = arith.index_cast %959 : i32 to index
      %961 = memref.load %arg1[%960] : memref<940xf32, #tpu.memory_space<smem>>
      %962 = vector.broadcast %961 : f32 to vector<8x128xf32>
      %963 = arith.mulf %arg14, %962 : vector<8x128xf32>
      %964 = arith.addf %957, %963 : vector<8x128xf32>
      %c80_i32_225 = arith.constant 80 : i32
      %965 = arith.addi %269, %c80_i32_225 : i32
      %c9_i32_226 = arith.constant 9 : i32
      %966 = arith.addi %965, %c9_i32_226 : i32
      %967 = arith.index_cast %966 : i32 to index
      %968 = memref.load %arg1[%967] : memref<940xf32, #tpu.memory_space<smem>>
      %969 = vector.broadcast %968 : f32 to vector<8x128xf32>
      %970 = arith.mulf %arg15, %969 : vector<8x128xf32>
      %971 = arith.addf %964, %970 : vector<8x128xf32>
      %c8_i32_227 = arith.constant 8 : i32
      %972 = arith.addi %271, %c8_i32_227 : i32
      %973 = arith.index_cast %972 : i32 to index
      %974 = memref.load %arg2[%973] : memref<102xf32, #tpu.memory_space<smem>>
      %975 = vector.broadcast %974 : f32 to vector<8x128xf32>
      %976 = arith.addf %971, %975 : vector<8x128xf32>
      %cst_228 = arith.constant 0.000000e+00 : f32
      %977 = vector.broadcast %cst_228 : f32 to vector<8x128xf32>
      %978 = arith.cmpf ogt, %976, %977 : vector<8x128xf32>
      %979 = math.exp %976 : vector<8x128xf32>
      %cst_229 = arith.constant 1.000000e+00 : f32
      %980 = vector.broadcast %cst_229 : f32 to vector<8x128xf32>
      %981 = arith.subf %979, %980 : vector<8x128xf32>
      %982 = arith.select %978, %976, %981 : vector<8x128xi1>, vector<8x128xf32>
      %c90_i32 = arith.constant 90 : i32
      %983 = arith.addi %269, %c90_i32 : i32
      %984 = arith.index_cast %983 : i32 to index
      %985 = memref.load %arg1[%984] : memref<940xf32, #tpu.memory_space<smem>>
      %986 = vector.broadcast %985 : f32 to vector<8x128xf32>
      %987 = arith.mulf %arg6, %986 : vector<8x128xf32>
      %c90_i32_230 = arith.constant 90 : i32
      %988 = arith.addi %269, %c90_i32_230 : i32
      %c1_i32_231 = arith.constant 1 : i32
      %989 = arith.addi %988, %c1_i32_231 : i32
      %990 = arith.index_cast %989 : i32 to index
      %991 = memref.load %arg1[%990] : memref<940xf32, #tpu.memory_space<smem>>
      %992 = vector.broadcast %991 : f32 to vector<8x128xf32>
      %993 = arith.mulf %arg7, %992 : vector<8x128xf32>
      %994 = arith.addf %987, %993 : vector<8x128xf32>
      %c90_i32_232 = arith.constant 90 : i32
      %995 = arith.addi %269, %c90_i32_232 : i32
      %c2_i32_233 = arith.constant 2 : i32
      %996 = arith.addi %995, %c2_i32_233 : i32
      %997 = arith.index_cast %996 : i32 to index
      %998 = memref.load %arg1[%997] : memref<940xf32, #tpu.memory_space<smem>>
      %999 = vector.broadcast %998 : f32 to vector<8x128xf32>
      %1000 = arith.mulf %arg8, %999 : vector<8x128xf32>
      %1001 = arith.addf %994, %1000 : vector<8x128xf32>
      %c90_i32_234 = arith.constant 90 : i32
      %1002 = arith.addi %269, %c90_i32_234 : i32
      %c3_i32_235 = arith.constant 3 : i32
      %1003 = arith.addi %1002, %c3_i32_235 : i32
      %1004 = arith.index_cast %1003 : i32 to index
      %1005 = memref.load %arg1[%1004] : memref<940xf32, #tpu.memory_space<smem>>
      %1006 = vector.broadcast %1005 : f32 to vector<8x128xf32>
      %1007 = arith.mulf %arg9, %1006 : vector<8x128xf32>
      %1008 = arith.addf %1001, %1007 : vector<8x128xf32>
      %c90_i32_236 = arith.constant 90 : i32
      %1009 = arith.addi %269, %c90_i32_236 : i32
      %c4_i32_237 = arith.constant 4 : i32
      %1010 = arith.addi %1009, %c4_i32_237 : i32
      %1011 = arith.index_cast %1010 : i32 to index
      %1012 = memref.load %arg1[%1011] : memref<940xf32, #tpu.memory_space<smem>>
      %1013 = vector.broadcast %1012 : f32 to vector<8x128xf32>
      %1014 = arith.mulf %arg10, %1013 : vector<8x128xf32>
      %1015 = arith.addf %1008, %1014 : vector<8x128xf32>
      %c90_i32_238 = arith.constant 90 : i32
      %1016 = arith.addi %269, %c90_i32_238 : i32
      %c5_i32_239 = arith.constant 5 : i32
      %1017 = arith.addi %1016, %c5_i32_239 : i32
      %1018 = arith.index_cast %1017 : i32 to index
      %1019 = memref.load %arg1[%1018] : memref<940xf32, #tpu.memory_space<smem>>
      %1020 = vector.broadcast %1019 : f32 to vector<8x128xf32>
      %1021 = arith.mulf %arg11, %1020 : vector<8x128xf32>
      %1022 = arith.addf %1015, %1021 : vector<8x128xf32>
      %c90_i32_240 = arith.constant 90 : i32
      %1023 = arith.addi %269, %c90_i32_240 : i32
      %c6_i32_241 = arith.constant 6 : i32
      %1024 = arith.addi %1023, %c6_i32_241 : i32
      %1025 = arith.index_cast %1024 : i32 to index
      %1026 = memref.load %arg1[%1025] : memref<940xf32, #tpu.memory_space<smem>>
      %1027 = vector.broadcast %1026 : f32 to vector<8x128xf32>
      %1028 = arith.mulf %arg12, %1027 : vector<8x128xf32>
      %1029 = arith.addf %1022, %1028 : vector<8x128xf32>
      %c90_i32_242 = arith.constant 90 : i32
      %1030 = arith.addi %269, %c90_i32_242 : i32
      %c7_i32_243 = arith.constant 7 : i32
      %1031 = arith.addi %1030, %c7_i32_243 : i32
      %1032 = arith.index_cast %1031 : i32 to index
      %1033 = memref.load %arg1[%1032] : memref<940xf32, #tpu.memory_space<smem>>
      %1034 = vector.broadcast %1033 : f32 to vector<8x128xf32>
      %1035 = arith.mulf %arg13, %1034 : vector<8x128xf32>
      %1036 = arith.addf %1029, %1035 : vector<8x128xf32>
      %c90_i32_244 = arith.constant 90 : i32
      %1037 = arith.addi %269, %c90_i32_244 : i32
      %c8_i32_245 = arith.constant 8 : i32
      %1038 = arith.addi %1037, %c8_i32_245 : i32
      %1039 = arith.index_cast %1038 : i32 to index
      %1040 = memref.load %arg1[%1039] : memref<940xf32, #tpu.memory_space<smem>>
      %1041 = vector.broadcast %1040 : f32 to vector<8x128xf32>
      %1042 = arith.mulf %arg14, %1041 : vector<8x128xf32>
      %1043 = arith.addf %1036, %1042 : vector<8x128xf32>
      %c90_i32_246 = arith.constant 90 : i32
      %1044 = arith.addi %269, %c90_i32_246 : i32
      %c9_i32_247 = arith.constant 9 : i32
      %1045 = arith.addi %1044, %c9_i32_247 : i32
      %1046 = arith.index_cast %1045 : i32 to index
      %1047 = memref.load %arg1[%1046] : memref<940xf32, #tpu.memory_space<smem>>
      %1048 = vector.broadcast %1047 : f32 to vector<8x128xf32>
      %1049 = arith.mulf %arg15, %1048 : vector<8x128xf32>
      %1050 = arith.addf %1043, %1049 : vector<8x128xf32>
      %c9_i32_248 = arith.constant 9 : i32
      %1051 = arith.addi %271, %c9_i32_248 : i32
      %1052 = arith.index_cast %1051 : i32 to index
      %1053 = memref.load %arg2[%1052] : memref<102xf32, #tpu.memory_space<smem>>
      %1054 = vector.broadcast %1053 : f32 to vector<8x128xf32>
      %1055 = arith.addf %1050, %1054 : vector<8x128xf32>
      %cst_249 = arith.constant 0.000000e+00 : f32
      %1056 = vector.broadcast %cst_249 : f32 to vector<8x128xf32>
      %1057 = arith.cmpf ogt, %1055, %1056 : vector<8x128xf32>
      %1058 = math.exp %1055 : vector<8x128xf32>
      %cst_250 = arith.constant 1.000000e+00 : f32
      %1059 = vector.broadcast %cst_250 : f32 to vector<8x128xf32>
      %1060 = arith.subf %1058, %1059 : vector<8x128xf32>
      %1061 = arith.select %1057, %1055, %1060 : vector<8x128xi1>, vector<8x128xf32>
      %c1_i32_251 = arith.constant 1 : i32
      %1062 = arith.addi %266, %c1_i32_251 : i32
      %c100_i32_252 = arith.constant 100 : i32
      %1063 = arith.muli %1062, %c100_i32_252 : i32
      %c20_i32_253 = arith.constant 20 : i32
      %1064 = arith.addi %c20_i32_253, %1063 : i32
      %c10_i32_254 = arith.constant 10 : i32
      %1065 = arith.muli %1062, %c10_i32_254 : i32
      %c10_i32_255 = arith.constant 10 : i32
      %1066 = arith.addi %c10_i32_255, %1065 : i32
      %c0_i32_256 = arith.constant 0 : i32
      %1067 = arith.addi %1064, %c0_i32_256 : i32
      %1068 = arith.index_cast %1067 : i32 to index
      %1069 = memref.load %arg1[%1068] : memref<940xf32, #tpu.memory_space<smem>>
      %1070 = vector.broadcast %1069 : f32 to vector<8x128xf32>
      %1071 = arith.mulf %350, %1070 : vector<8x128xf32>
      %c0_i32_257 = arith.constant 0 : i32
      %1072 = arith.addi %1064, %c0_i32_257 : i32
      %c1_i32_258 = arith.constant 1 : i32
      %1073 = arith.addi %1072, %c1_i32_258 : i32
      %1074 = arith.index_cast %1073 : i32 to index
      %1075 = memref.load %arg1[%1074] : memref<940xf32, #tpu.memory_space<smem>>
      %1076 = vector.broadcast %1075 : f32 to vector<8x128xf32>
      %1077 = arith.mulf %429, %1076 : vector<8x128xf32>
      %1078 = arith.addf %1071, %1077 : vector<8x128xf32>
      %c0_i32_259 = arith.constant 0 : i32
      %1079 = arith.addi %1064, %c0_i32_259 : i32
      %c2_i32_260 = arith.constant 2 : i32
      %1080 = arith.addi %1079, %c2_i32_260 : i32
      %1081 = arith.index_cast %1080 : i32 to index
      %1082 = memref.load %arg1[%1081] : memref<940xf32, #tpu.memory_space<smem>>
      %1083 = vector.broadcast %1082 : f32 to vector<8x128xf32>
      %1084 = arith.mulf %508, %1083 : vector<8x128xf32>
      %1085 = arith.addf %1078, %1084 : vector<8x128xf32>
      %c0_i32_261 = arith.constant 0 : i32
      %1086 = arith.addi %1064, %c0_i32_261 : i32
      %c3_i32_262 = arith.constant 3 : i32
      %1087 = arith.addi %1086, %c3_i32_262 : i32
      %1088 = arith.index_cast %1087 : i32 to index
      %1089 = memref.load %arg1[%1088] : memref<940xf32, #tpu.memory_space<smem>>
      %1090 = vector.broadcast %1089 : f32 to vector<8x128xf32>
      %1091 = arith.mulf %587, %1090 : vector<8x128xf32>
      %1092 = arith.addf %1085, %1091 : vector<8x128xf32>
      %c0_i32_263 = arith.constant 0 : i32
      %1093 = arith.addi %1064, %c0_i32_263 : i32
      %c4_i32_264 = arith.constant 4 : i32
      %1094 = arith.addi %1093, %c4_i32_264 : i32
      %1095 = arith.index_cast %1094 : i32 to index
      %1096 = memref.load %arg1[%1095] : memref<940xf32, #tpu.memory_space<smem>>
      %1097 = vector.broadcast %1096 : f32 to vector<8x128xf32>
      %1098 = arith.mulf %666, %1097 : vector<8x128xf32>
      %1099 = arith.addf %1092, %1098 : vector<8x128xf32>
      %c0_i32_265 = arith.constant 0 : i32
      %1100 = arith.addi %1064, %c0_i32_265 : i32
      %c5_i32_266 = arith.constant 5 : i32
      %1101 = arith.addi %1100, %c5_i32_266 : i32
      %1102 = arith.index_cast %1101 : i32 to index
      %1103 = memref.load %arg1[%1102] : memref<940xf32, #tpu.memory_space<smem>>
      %1104 = vector.broadcast %1103 : f32 to vector<8x128xf32>
      %1105 = arith.mulf %745, %1104 : vector<8x128xf32>
      %1106 = arith.addf %1099, %1105 : vector<8x128xf32>
      %c0_i32_267 = arith.constant 0 : i32
      %1107 = arith.addi %1064, %c0_i32_267 : i32
      %c6_i32_268 = arith.constant 6 : i32
      %1108 = arith.addi %1107, %c6_i32_268 : i32
      %1109 = arith.index_cast %1108 : i32 to index
      %1110 = memref.load %arg1[%1109] : memref<940xf32, #tpu.memory_space<smem>>
      %1111 = vector.broadcast %1110 : f32 to vector<8x128xf32>
      %1112 = arith.mulf %824, %1111 : vector<8x128xf32>
      %1113 = arith.addf %1106, %1112 : vector<8x128xf32>
      %c0_i32_269 = arith.constant 0 : i32
      %1114 = arith.addi %1064, %c0_i32_269 : i32
      %c7_i32_270 = arith.constant 7 : i32
      %1115 = arith.addi %1114, %c7_i32_270 : i32
      %1116 = arith.index_cast %1115 : i32 to index
      %1117 = memref.load %arg1[%1116] : memref<940xf32, #tpu.memory_space<smem>>
      %1118 = vector.broadcast %1117 : f32 to vector<8x128xf32>
      %1119 = arith.mulf %903, %1118 : vector<8x128xf32>
      %1120 = arith.addf %1113, %1119 : vector<8x128xf32>
      %c0_i32_271 = arith.constant 0 : i32
      %1121 = arith.addi %1064, %c0_i32_271 : i32
      %c8_i32_272 = arith.constant 8 : i32
      %1122 = arith.addi %1121, %c8_i32_272 : i32
      %1123 = arith.index_cast %1122 : i32 to index
      %1124 = memref.load %arg1[%1123] : memref<940xf32, #tpu.memory_space<smem>>
      %1125 = vector.broadcast %1124 : f32 to vector<8x128xf32>
      %1126 = arith.mulf %982, %1125 : vector<8x128xf32>
      %1127 = arith.addf %1120, %1126 : vector<8x128xf32>
      %c0_i32_273 = arith.constant 0 : i32
      %1128 = arith.addi %1064, %c0_i32_273 : i32
      %c9_i32_274 = arith.constant 9 : i32
      %1129 = arith.addi %1128, %c9_i32_274 : i32
      %1130 = arith.index_cast %1129 : i32 to index
      %1131 = memref.load %arg1[%1130] : memref<940xf32, #tpu.memory_space<smem>>
      %1132 = vector.broadcast %1131 : f32 to vector<8x128xf32>
      %1133 = arith.mulf %1061, %1132 : vector<8x128xf32>
      %1134 = arith.addf %1127, %1133 : vector<8x128xf32>
      %c0_i32_275 = arith.constant 0 : i32
      %1135 = arith.addi %1066, %c0_i32_275 : i32
      %1136 = arith.index_cast %1135 : i32 to index
      %1137 = memref.load %arg2[%1136] : memref<102xf32, #tpu.memory_space<smem>>
      %1138 = vector.broadcast %1137 : f32 to vector<8x128xf32>
      %1139 = arith.addf %1134, %1138 : vector<8x128xf32>
      %cst_276 = arith.constant 0.000000e+00 : f32
      %1140 = vector.broadcast %cst_276 : f32 to vector<8x128xf32>
      %1141 = arith.cmpf ogt, %1139, %1140 : vector<8x128xf32>
      %1142 = math.exp %1139 : vector<8x128xf32>
      %cst_277 = arith.constant 1.000000e+00 : f32
      %1143 = vector.broadcast %cst_277 : f32 to vector<8x128xf32>
      %1144 = arith.subf %1142, %1143 : vector<8x128xf32>
      %1145 = arith.select %1141, %1139, %1144 : vector<8x128xi1>, vector<8x128xf32>
      %c10_i32_278 = arith.constant 10 : i32
      %1146 = arith.addi %1064, %c10_i32_278 : i32
      %1147 = arith.index_cast %1146 : i32 to index
      %1148 = memref.load %arg1[%1147] : memref<940xf32, #tpu.memory_space<smem>>
      %1149 = vector.broadcast %1148 : f32 to vector<8x128xf32>
      %1150 = arith.mulf %350, %1149 : vector<8x128xf32>
      %c10_i32_279 = arith.constant 10 : i32
      %1151 = arith.addi %1064, %c10_i32_279 : i32
      %c1_i32_280 = arith.constant 1 : i32
      %1152 = arith.addi %1151, %c1_i32_280 : i32
      %1153 = arith.index_cast %1152 : i32 to index
      %1154 = memref.load %arg1[%1153] : memref<940xf32, #tpu.memory_space<smem>>
      %1155 = vector.broadcast %1154 : f32 to vector<8x128xf32>
      %1156 = arith.mulf %429, %1155 : vector<8x128xf32>
      %1157 = arith.addf %1150, %1156 : vector<8x128xf32>
      %c10_i32_281 = arith.constant 10 : i32
      %1158 = arith.addi %1064, %c10_i32_281 : i32
      %c2_i32_282 = arith.constant 2 : i32
      %1159 = arith.addi %1158, %c2_i32_282 : i32
      %1160 = arith.index_cast %1159 : i32 to index
      %1161 = memref.load %arg1[%1160] : memref<940xf32, #tpu.memory_space<smem>>
      %1162 = vector.broadcast %1161 : f32 to vector<8x128xf32>
      %1163 = arith.mulf %508, %1162 : vector<8x128xf32>
      %1164 = arith.addf %1157, %1163 : vector<8x128xf32>
      %c10_i32_283 = arith.constant 10 : i32
      %1165 = arith.addi %1064, %c10_i32_283 : i32
      %c3_i32_284 = arith.constant 3 : i32
      %1166 = arith.addi %1165, %c3_i32_284 : i32
      %1167 = arith.index_cast %1166 : i32 to index
      %1168 = memref.load %arg1[%1167] : memref<940xf32, #tpu.memory_space<smem>>
      %1169 = vector.broadcast %1168 : f32 to vector<8x128xf32>
      %1170 = arith.mulf %587, %1169 : vector<8x128xf32>
      %1171 = arith.addf %1164, %1170 : vector<8x128xf32>
      %c10_i32_285 = arith.constant 10 : i32
      %1172 = arith.addi %1064, %c10_i32_285 : i32
      %c4_i32_286 = arith.constant 4 : i32
      %1173 = arith.addi %1172, %c4_i32_286 : i32
      %1174 = arith.index_cast %1173 : i32 to index
      %1175 = memref.load %arg1[%1174] : memref<940xf32, #tpu.memory_space<smem>>
      %1176 = vector.broadcast %1175 : f32 to vector<8x128xf32>
      %1177 = arith.mulf %666, %1176 : vector<8x128xf32>
      %1178 = arith.addf %1171, %1177 : vector<8x128xf32>
      %c10_i32_287 = arith.constant 10 : i32
      %1179 = arith.addi %1064, %c10_i32_287 : i32
      %c5_i32_288 = arith.constant 5 : i32
      %1180 = arith.addi %1179, %c5_i32_288 : i32
      %1181 = arith.index_cast %1180 : i32 to index
      %1182 = memref.load %arg1[%1181] : memref<940xf32, #tpu.memory_space<smem>>
      %1183 = vector.broadcast %1182 : f32 to vector<8x128xf32>
      %1184 = arith.mulf %745, %1183 : vector<8x128xf32>
      %1185 = arith.addf %1178, %1184 : vector<8x128xf32>
      %c10_i32_289 = arith.constant 10 : i32
      %1186 = arith.addi %1064, %c10_i32_289 : i32
      %c6_i32_290 = arith.constant 6 : i32
      %1187 = arith.addi %1186, %c6_i32_290 : i32
      %1188 = arith.index_cast %1187 : i32 to index
      %1189 = memref.load %arg1[%1188] : memref<940xf32, #tpu.memory_space<smem>>
      %1190 = vector.broadcast %1189 : f32 to vector<8x128xf32>
      %1191 = arith.mulf %824, %1190 : vector<8x128xf32>
      %1192 = arith.addf %1185, %1191 : vector<8x128xf32>
      %c10_i32_291 = arith.constant 10 : i32
      %1193 = arith.addi %1064, %c10_i32_291 : i32
      %c7_i32_292 = arith.constant 7 : i32
      %1194 = arith.addi %1193, %c7_i32_292 : i32
      %1195 = arith.index_cast %1194 : i32 to index
      %1196 = memref.load %arg1[%1195] : memref<940xf32, #tpu.memory_space<smem>>
      %1197 = vector.broadcast %1196 : f32 to vector<8x128xf32>
      %1198 = arith.mulf %903, %1197 : vector<8x128xf32>
      %1199 = arith.addf %1192, %1198 : vector<8x128xf32>
      %c10_i32_293 = arith.constant 10 : i32
      %1200 = arith.addi %1064, %c10_i32_293 : i32
      %c8_i32_294 = arith.constant 8 : i32
      %1201 = arith.addi %1200, %c8_i32_294 : i32
      %1202 = arith.index_cast %1201 : i32 to index
      %1203 = memref.load %arg1[%1202] : memref<940xf32, #tpu.memory_space<smem>>
      %1204 = vector.broadcast %1203 : f32 to vector<8x128xf32>
      %1205 = arith.mulf %982, %1204 : vector<8x128xf32>
      %1206 = arith.addf %1199, %1205 : vector<8x128xf32>
      %c10_i32_295 = arith.constant 10 : i32
      %1207 = arith.addi %1064, %c10_i32_295 : i32
      %c9_i32_296 = arith.constant 9 : i32
      %1208 = arith.addi %1207, %c9_i32_296 : i32
      %1209 = arith.index_cast %1208 : i32 to index
      %1210 = memref.load %arg1[%1209] : memref<940xf32, #tpu.memory_space<smem>>
      %1211 = vector.broadcast %1210 : f32 to vector<8x128xf32>
      %1212 = arith.mulf %1061, %1211 : vector<8x128xf32>
      %1213 = arith.addf %1206, %1212 : vector<8x128xf32>
      %c1_i32_297 = arith.constant 1 : i32
      %1214 = arith.addi %1066, %c1_i32_297 : i32
      %1215 = arith.index_cast %1214 : i32 to index
      %1216 = memref.load %arg2[%1215] : memref<102xf32, #tpu.memory_space<smem>>
      %1217 = vector.broadcast %1216 : f32 to vector<8x128xf32>
      %1218 = arith.addf %1213, %1217 : vector<8x128xf32>
      %cst_298 = arith.constant 0.000000e+00 : f32
      %1219 = vector.broadcast %cst_298 : f32 to vector<8x128xf32>
      %1220 = arith.cmpf ogt, %1218, %1219 : vector<8x128xf32>
      %1221 = math.exp %1218 : vector<8x128xf32>
      %cst_299 = arith.constant 1.000000e+00 : f32
      %1222 = vector.broadcast %cst_299 : f32 to vector<8x128xf32>
      %1223 = arith.subf %1221, %1222 : vector<8x128xf32>
      %1224 = arith.select %1220, %1218, %1223 : vector<8x128xi1>, vector<8x128xf32>
      %c20_i32_300 = arith.constant 20 : i32
      %1225 = arith.addi %1064, %c20_i32_300 : i32
      %1226 = arith.index_cast %1225 : i32 to index
      %1227 = memref.load %arg1[%1226] : memref<940xf32, #tpu.memory_space<smem>>
      %1228 = vector.broadcast %1227 : f32 to vector<8x128xf32>
      %1229 = arith.mulf %350, %1228 : vector<8x128xf32>
      %c20_i32_301 = arith.constant 20 : i32
      %1230 = arith.addi %1064, %c20_i32_301 : i32
      %c1_i32_302 = arith.constant 1 : i32
      %1231 = arith.addi %1230, %c1_i32_302 : i32
      %1232 = arith.index_cast %1231 : i32 to index
      %1233 = memref.load %arg1[%1232] : memref<940xf32, #tpu.memory_space<smem>>
      %1234 = vector.broadcast %1233 : f32 to vector<8x128xf32>
      %1235 = arith.mulf %429, %1234 : vector<8x128xf32>
      %1236 = arith.addf %1229, %1235 : vector<8x128xf32>
      %c20_i32_303 = arith.constant 20 : i32
      %1237 = arith.addi %1064, %c20_i32_303 : i32
      %c2_i32_304 = arith.constant 2 : i32
      %1238 = arith.addi %1237, %c2_i32_304 : i32
      %1239 = arith.index_cast %1238 : i32 to index
      %1240 = memref.load %arg1[%1239] : memref<940xf32, #tpu.memory_space<smem>>
      %1241 = vector.broadcast %1240 : f32 to vector<8x128xf32>
      %1242 = arith.mulf %508, %1241 : vector<8x128xf32>
      %1243 = arith.addf %1236, %1242 : vector<8x128xf32>
      %c20_i32_305 = arith.constant 20 : i32
      %1244 = arith.addi %1064, %c20_i32_305 : i32
      %c3_i32_306 = arith.constant 3 : i32
      %1245 = arith.addi %1244, %c3_i32_306 : i32
      %1246 = arith.index_cast %1245 : i32 to index
      %1247 = memref.load %arg1[%1246] : memref<940xf32, #tpu.memory_space<smem>>
      %1248 = vector.broadcast %1247 : f32 to vector<8x128xf32>
      %1249 = arith.mulf %587, %1248 : vector<8x128xf32>
      %1250 = arith.addf %1243, %1249 : vector<8x128xf32>
      %c20_i32_307 = arith.constant 20 : i32
      %1251 = arith.addi %1064, %c20_i32_307 : i32
      %c4_i32_308 = arith.constant 4 : i32
      %1252 = arith.addi %1251, %c4_i32_308 : i32
      %1253 = arith.index_cast %1252 : i32 to index
      %1254 = memref.load %arg1[%1253] : memref<940xf32, #tpu.memory_space<smem>>
      %1255 = vector.broadcast %1254 : f32 to vector<8x128xf32>
      %1256 = arith.mulf %666, %1255 : vector<8x128xf32>
      %1257 = arith.addf %1250, %1256 : vector<8x128xf32>
      %c20_i32_309 = arith.constant 20 : i32
      %1258 = arith.addi %1064, %c20_i32_309 : i32
      %c5_i32_310 = arith.constant 5 : i32
      %1259 = arith.addi %1258, %c5_i32_310 : i32
      %1260 = arith.index_cast %1259 : i32 to index
      %1261 = memref.load %arg1[%1260] : memref<940xf32, #tpu.memory_space<smem>>
      %1262 = vector.broadcast %1261 : f32 to vector<8x128xf32>
      %1263 = arith.mulf %745, %1262 : vector<8x128xf32>
      %1264 = arith.addf %1257, %1263 : vector<8x128xf32>
      %c20_i32_311 = arith.constant 20 : i32
      %1265 = arith.addi %1064, %c20_i32_311 : i32
      %c6_i32_312 = arith.constant 6 : i32
      %1266 = arith.addi %1265, %c6_i32_312 : i32
      %1267 = arith.index_cast %1266 : i32 to index
      %1268 = memref.load %arg1[%1267] : memref<940xf32, #tpu.memory_space<smem>>
      %1269 = vector.broadcast %1268 : f32 to vector<8x128xf32>
      %1270 = arith.mulf %824, %1269 : vector<8x128xf32>
      %1271 = arith.addf %1264, %1270 : vector<8x128xf32>
      %c20_i32_313 = arith.constant 20 : i32
      %1272 = arith.addi %1064, %c20_i32_313 : i32
      %c7_i32_314 = arith.constant 7 : i32
      %1273 = arith.addi %1272, %c7_i32_314 : i32
      %1274 = arith.index_cast %1273 : i32 to index
      %1275 = memref.load %arg1[%1274] : memref<940xf32, #tpu.memory_space<smem>>
      %1276 = vector.broadcast %1275 : f32 to vector<8x128xf32>
      %1277 = arith.mulf %903, %1276 : vector<8x128xf32>
      %1278 = arith.addf %1271, %1277 : vector<8x128xf32>
      %c20_i32_315 = arith.constant 20 : i32
      %1279 = arith.addi %1064, %c20_i32_315 : i32
      %c8_i32_316 = arith.constant 8 : i32
      %1280 = arith.addi %1279, %c8_i32_316 : i32
      %1281 = arith.index_cast %1280 : i32 to index
      %1282 = memref.load %arg1[%1281] : memref<940xf32, #tpu.memory_space<smem>>
      %1283 = vector.broadcast %1282 : f32 to vector<8x128xf32>
      %1284 = arith.mulf %982, %1283 : vector<8x128xf32>
      %1285 = arith.addf %1278, %1284 : vector<8x128xf32>
      %c20_i32_317 = arith.constant 20 : i32
      %1286 = arith.addi %1064, %c20_i32_317 : i32
      %c9_i32_318 = arith.constant 9 : i32
      %1287 = arith.addi %1286, %c9_i32_318 : i32
      %1288 = arith.index_cast %1287 : i32 to index
      %1289 = memref.load %arg1[%1288] : memref<940xf32, #tpu.memory_space<smem>>
      %1290 = vector.broadcast %1289 : f32 to vector<8x128xf32>
      %1291 = arith.mulf %1061, %1290 : vector<8x128xf32>
      %1292 = arith.addf %1285, %1291 : vector<8x128xf32>
      %c2_i32_319 = arith.constant 2 : i32
      %1293 = arith.addi %1066, %c2_i32_319 : i32
      %1294 = arith.index_cast %1293 : i32 to index
      %1295 = memref.load %arg2[%1294] : memref<102xf32, #tpu.memory_space<smem>>
      %1296 = vector.broadcast %1295 : f32 to vector<8x128xf32>
      %1297 = arith.addf %1292, %1296 : vector<8x128xf32>
      %cst_320 = arith.constant 0.000000e+00 : f32
      %1298 = vector.broadcast %cst_320 : f32 to vector<8x128xf32>
      %1299 = arith.cmpf ogt, %1297, %1298 : vector<8x128xf32>
      %1300 = math.exp %1297 : vector<8x128xf32>
      %cst_321 = arith.constant 1.000000e+00 : f32
      %1301 = vector.broadcast %cst_321 : f32 to vector<8x128xf32>
      %1302 = arith.subf %1300, %1301 : vector<8x128xf32>
      %1303 = arith.select %1299, %1297, %1302 : vector<8x128xi1>, vector<8x128xf32>
      %c30_i32_322 = arith.constant 30 : i32
      %1304 = arith.addi %1064, %c30_i32_322 : i32
      %1305 = arith.index_cast %1304 : i32 to index
      %1306 = memref.load %arg1[%1305] : memref<940xf32, #tpu.memory_space<smem>>
      %1307 = vector.broadcast %1306 : f32 to vector<8x128xf32>
      %1308 = arith.mulf %350, %1307 : vector<8x128xf32>
      %c30_i32_323 = arith.constant 30 : i32
      %1309 = arith.addi %1064, %c30_i32_323 : i32
      %c1_i32_324 = arith.constant 1 : i32
      %1310 = arith.addi %1309, %c1_i32_324 : i32
      %1311 = arith.index_cast %1310 : i32 to index
      %1312 = memref.load %arg1[%1311] : memref<940xf32, #tpu.memory_space<smem>>
      %1313 = vector.broadcast %1312 : f32 to vector<8x128xf32>
      %1314 = arith.mulf %429, %1313 : vector<8x128xf32>
      %1315 = arith.addf %1308, %1314 : vector<8x128xf32>
      %c30_i32_325 = arith.constant 30 : i32
      %1316 = arith.addi %1064, %c30_i32_325 : i32
      %c2_i32_326 = arith.constant 2 : i32
      %1317 = arith.addi %1316, %c2_i32_326 : i32
      %1318 = arith.index_cast %1317 : i32 to index
      %1319 = memref.load %arg1[%1318] : memref<940xf32, #tpu.memory_space<smem>>
      %1320 = vector.broadcast %1319 : f32 to vector<8x128xf32>
      %1321 = arith.mulf %508, %1320 : vector<8x128xf32>
      %1322 = arith.addf %1315, %1321 : vector<8x128xf32>
      %c30_i32_327 = arith.constant 30 : i32
      %1323 = arith.addi %1064, %c30_i32_327 : i32
      %c3_i32_328 = arith.constant 3 : i32
      %1324 = arith.addi %1323, %c3_i32_328 : i32
      %1325 = arith.index_cast %1324 : i32 to index
      %1326 = memref.load %arg1[%1325] : memref<940xf32, #tpu.memory_space<smem>>
      %1327 = vector.broadcast %1326 : f32 to vector<8x128xf32>
      %1328 = arith.mulf %587, %1327 : vector<8x128xf32>
      %1329 = arith.addf %1322, %1328 : vector<8x128xf32>
      %c30_i32_329 = arith.constant 30 : i32
      %1330 = arith.addi %1064, %c30_i32_329 : i32
      %c4_i32_330 = arith.constant 4 : i32
      %1331 = arith.addi %1330, %c4_i32_330 : i32
      %1332 = arith.index_cast %1331 : i32 to index
      %1333 = memref.load %arg1[%1332] : memref<940xf32, #tpu.memory_space<smem>>
      %1334 = vector.broadcast %1333 : f32 to vector<8x128xf32>
      %1335 = arith.mulf %666, %1334 : vector<8x128xf32>
      %1336 = arith.addf %1329, %1335 : vector<8x128xf32>
      %c30_i32_331 = arith.constant 30 : i32
      %1337 = arith.addi %1064, %c30_i32_331 : i32
      %c5_i32_332 = arith.constant 5 : i32
      %1338 = arith.addi %1337, %c5_i32_332 : i32
      %1339 = arith.index_cast %1338 : i32 to index
      %1340 = memref.load %arg1[%1339] : memref<940xf32, #tpu.memory_space<smem>>
      %1341 = vector.broadcast %1340 : f32 to vector<8x128xf32>
      %1342 = arith.mulf %745, %1341 : vector<8x128xf32>
      %1343 = arith.addf %1336, %1342 : vector<8x128xf32>
      %c30_i32_333 = arith.constant 30 : i32
      %1344 = arith.addi %1064, %c30_i32_333 : i32
      %c6_i32_334 = arith.constant 6 : i32
      %1345 = arith.addi %1344, %c6_i32_334 : i32
      %1346 = arith.index_cast %1345 : i32 to index
      %1347 = memref.load %arg1[%1346] : memref<940xf32, #tpu.memory_space<smem>>
      %1348 = vector.broadcast %1347 : f32 to vector<8x128xf32>
      %1349 = arith.mulf %824, %1348 : vector<8x128xf32>
      %1350 = arith.addf %1343, %1349 : vector<8x128xf32>
      %c30_i32_335 = arith.constant 30 : i32
      %1351 = arith.addi %1064, %c30_i32_335 : i32
      %c7_i32_336 = arith.constant 7 : i32
      %1352 = arith.addi %1351, %c7_i32_336 : i32
      %1353 = arith.index_cast %1352 : i32 to index
      %1354 = memref.load %arg1[%1353] : memref<940xf32, #tpu.memory_space<smem>>
      %1355 = vector.broadcast %1354 : f32 to vector<8x128xf32>
      %1356 = arith.mulf %903, %1355 : vector<8x128xf32>
      %1357 = arith.addf %1350, %1356 : vector<8x128xf32>
      %c30_i32_337 = arith.constant 30 : i32
      %1358 = arith.addi %1064, %c30_i32_337 : i32
      %c8_i32_338 = arith.constant 8 : i32
      %1359 = arith.addi %1358, %c8_i32_338 : i32
      %1360 = arith.index_cast %1359 : i32 to index
      %1361 = memref.load %arg1[%1360] : memref<940xf32, #tpu.memory_space<smem>>
      %1362 = vector.broadcast %1361 : f32 to vector<8x128xf32>
      %1363 = arith.mulf %982, %1362 : vector<8x128xf32>
      %1364 = arith.addf %1357, %1363 : vector<8x128xf32>
      %c30_i32_339 = arith.constant 30 : i32
      %1365 = arith.addi %1064, %c30_i32_339 : i32
      %c9_i32_340 = arith.constant 9 : i32
      %1366 = arith.addi %1365, %c9_i32_340 : i32
      %1367 = arith.index_cast %1366 : i32 to index
      %1368 = memref.load %arg1[%1367] : memref<940xf32, #tpu.memory_space<smem>>
      %1369 = vector.broadcast %1368 : f32 to vector<8x128xf32>
      %1370 = arith.mulf %1061, %1369 : vector<8x128xf32>
      %1371 = arith.addf %1364, %1370 : vector<8x128xf32>
      %c3_i32_341 = arith.constant 3 : i32
      %1372 = arith.addi %1066, %c3_i32_341 : i32
      %1373 = arith.index_cast %1372 : i32 to index
      %1374 = memref.load %arg2[%1373] : memref<102xf32, #tpu.memory_space<smem>>
      %1375 = vector.broadcast %1374 : f32 to vector<8x128xf32>
      %1376 = arith.addf %1371, %1375 : vector<8x128xf32>
      %cst_342 = arith.constant 0.000000e+00 : f32
      %1377 = vector.broadcast %cst_342 : f32 to vector<8x128xf32>
      %1378 = arith.cmpf ogt, %1376, %1377 : vector<8x128xf32>
      %1379 = math.exp %1376 : vector<8x128xf32>
      %cst_343 = arith.constant 1.000000e+00 : f32
      %1380 = vector.broadcast %cst_343 : f32 to vector<8x128xf32>
      %1381 = arith.subf %1379, %1380 : vector<8x128xf32>
      %1382 = arith.select %1378, %1376, %1381 : vector<8x128xi1>, vector<8x128xf32>
      %c40_i32_344 = arith.constant 40 : i32
      %1383 = arith.addi %1064, %c40_i32_344 : i32
      %1384 = arith.index_cast %1383 : i32 to index
      %1385 = memref.load %arg1[%1384] : memref<940xf32, #tpu.memory_space<smem>>
      %1386 = vector.broadcast %1385 : f32 to vector<8x128xf32>
      %1387 = arith.mulf %350, %1386 : vector<8x128xf32>
      %c40_i32_345 = arith.constant 40 : i32
      %1388 = arith.addi %1064, %c40_i32_345 : i32
      %c1_i32_346 = arith.constant 1 : i32
      %1389 = arith.addi %1388, %c1_i32_346 : i32
      %1390 = arith.index_cast %1389 : i32 to index
      %1391 = memref.load %arg1[%1390] : memref<940xf32, #tpu.memory_space<smem>>
      %1392 = vector.broadcast %1391 : f32 to vector<8x128xf32>
      %1393 = arith.mulf %429, %1392 : vector<8x128xf32>
      %1394 = arith.addf %1387, %1393 : vector<8x128xf32>
      %c40_i32_347 = arith.constant 40 : i32
      %1395 = arith.addi %1064, %c40_i32_347 : i32
      %c2_i32_348 = arith.constant 2 : i32
      %1396 = arith.addi %1395, %c2_i32_348 : i32
      %1397 = arith.index_cast %1396 : i32 to index
      %1398 = memref.load %arg1[%1397] : memref<940xf32, #tpu.memory_space<smem>>
      %1399 = vector.broadcast %1398 : f32 to vector<8x128xf32>
      %1400 = arith.mulf %508, %1399 : vector<8x128xf32>
      %1401 = arith.addf %1394, %1400 : vector<8x128xf32>
      %c40_i32_349 = arith.constant 40 : i32
      %1402 = arith.addi %1064, %c40_i32_349 : i32
      %c3_i32_350 = arith.constant 3 : i32
      %1403 = arith.addi %1402, %c3_i32_350 : i32
      %1404 = arith.index_cast %1403 : i32 to index
      %1405 = memref.load %arg1[%1404] : memref<940xf32, #tpu.memory_space<smem>>
      %1406 = vector.broadcast %1405 : f32 to vector<8x128xf32>
      %1407 = arith.mulf %587, %1406 : vector<8x128xf32>
      %1408 = arith.addf %1401, %1407 : vector<8x128xf32>
      %c40_i32_351 = arith.constant 40 : i32
      %1409 = arith.addi %1064, %c40_i32_351 : i32
      %c4_i32_352 = arith.constant 4 : i32
      %1410 = arith.addi %1409, %c4_i32_352 : i32
      %1411 = arith.index_cast %1410 : i32 to index
      %1412 = memref.load %arg1[%1411] : memref<940xf32, #tpu.memory_space<smem>>
      %1413 = vector.broadcast %1412 : f32 to vector<8x128xf32>
      %1414 = arith.mulf %666, %1413 : vector<8x128xf32>
      %1415 = arith.addf %1408, %1414 : vector<8x128xf32>
      %c40_i32_353 = arith.constant 40 : i32
      %1416 = arith.addi %1064, %c40_i32_353 : i32
      %c5_i32_354 = arith.constant 5 : i32
      %1417 = arith.addi %1416, %c5_i32_354 : i32
      %1418 = arith.index_cast %1417 : i32 to index
      %1419 = memref.load %arg1[%1418] : memref<940xf32, #tpu.memory_space<smem>>
      %1420 = vector.broadcast %1419 : f32 to vector<8x128xf32>
      %1421 = arith.mulf %745, %1420 : vector<8x128xf32>
      %1422 = arith.addf %1415, %1421 : vector<8x128xf32>
      %c40_i32_355 = arith.constant 40 : i32
      %1423 = arith.addi %1064, %c40_i32_355 : i32
      %c6_i32_356 = arith.constant 6 : i32
      %1424 = arith.addi %1423, %c6_i32_356 : i32
      %1425 = arith.index_cast %1424 : i32 to index
      %1426 = memref.load %arg1[%1425] : memref<940xf32, #tpu.memory_space<smem>>
      %1427 = vector.broadcast %1426 : f32 to vector<8x128xf32>
      %1428 = arith.mulf %824, %1427 : vector<8x128xf32>
      %1429 = arith.addf %1422, %1428 : vector<8x128xf32>
      %c40_i32_357 = arith.constant 40 : i32
      %1430 = arith.addi %1064, %c40_i32_357 : i32
      %c7_i32_358 = arith.constant 7 : i32
      %1431 = arith.addi %1430, %c7_i32_358 : i32
      %1432 = arith.index_cast %1431 : i32 to index
      %1433 = memref.load %arg1[%1432] : memref<940xf32, #tpu.memory_space<smem>>
      %1434 = vector.broadcast %1433 : f32 to vector<8x128xf32>
      %1435 = arith.mulf %903, %1434 : vector<8x128xf32>
      %1436 = arith.addf %1429, %1435 : vector<8x128xf32>
      %c40_i32_359 = arith.constant 40 : i32
      %1437 = arith.addi %1064, %c40_i32_359 : i32
      %c8_i32_360 = arith.constant 8 : i32
      %1438 = arith.addi %1437, %c8_i32_360 : i32
      %1439 = arith.index_cast %1438 : i32 to index
      %1440 = memref.load %arg1[%1439] : memref<940xf32, #tpu.memory_space<smem>>
      %1441 = vector.broadcast %1440 : f32 to vector<8x128xf32>
      %1442 = arith.mulf %982, %1441 : vector<8x128xf32>
      %1443 = arith.addf %1436, %1442 : vector<8x128xf32>
      %c40_i32_361 = arith.constant 40 : i32
      %1444 = arith.addi %1064, %c40_i32_361 : i32
      %c9_i32_362 = arith.constant 9 : i32
      %1445 = arith.addi %1444, %c9_i32_362 : i32
      %1446 = arith.index_cast %1445 : i32 to index
      %1447 = memref.load %arg1[%1446] : memref<940xf32, #tpu.memory_space<smem>>
      %1448 = vector.broadcast %1447 : f32 to vector<8x128xf32>
      %1449 = arith.mulf %1061, %1448 : vector<8x128xf32>
      %1450 = arith.addf %1443, %1449 : vector<8x128xf32>
      %c4_i32_363 = arith.constant 4 : i32
      %1451 = arith.addi %1066, %c4_i32_363 : i32
      %1452 = arith.index_cast %1451 : i32 to index
      %1453 = memref.load %arg2[%1452] : memref<102xf32, #tpu.memory_space<smem>>
      %1454 = vector.broadcast %1453 : f32 to vector<8x128xf32>
      %1455 = arith.addf %1450, %1454 : vector<8x128xf32>
      %cst_364 = arith.constant 0.000000e+00 : f32
      %1456 = vector.broadcast %cst_364 : f32 to vector<8x128xf32>
      %1457 = arith.cmpf ogt, %1455, %1456 : vector<8x128xf32>
      %1458 = math.exp %1455 : vector<8x128xf32>
      %cst_365 = arith.constant 1.000000e+00 : f32
      %1459 = vector.broadcast %cst_365 : f32 to vector<8x128xf32>
      %1460 = arith.subf %1458, %1459 : vector<8x128xf32>
      %1461 = arith.select %1457, %1455, %1460 : vector<8x128xi1>, vector<8x128xf32>
      %c50_i32_366 = arith.constant 50 : i32
      %1462 = arith.addi %1064, %c50_i32_366 : i32
      %1463 = arith.index_cast %1462 : i32 to index
      %1464 = memref.load %arg1[%1463] : memref<940xf32, #tpu.memory_space<smem>>
      %1465 = vector.broadcast %1464 : f32 to vector<8x128xf32>
      %1466 = arith.mulf %350, %1465 : vector<8x128xf32>
      %c50_i32_367 = arith.constant 50 : i32
      %1467 = arith.addi %1064, %c50_i32_367 : i32
      %c1_i32_368 = arith.constant 1 : i32
      %1468 = arith.addi %1467, %c1_i32_368 : i32
      %1469 = arith.index_cast %1468 : i32 to index
      %1470 = memref.load %arg1[%1469] : memref<940xf32, #tpu.memory_space<smem>>
      %1471 = vector.broadcast %1470 : f32 to vector<8x128xf32>
      %1472 = arith.mulf %429, %1471 : vector<8x128xf32>
      %1473 = arith.addf %1466, %1472 : vector<8x128xf32>
      %c50_i32_369 = arith.constant 50 : i32
      %1474 = arith.addi %1064, %c50_i32_369 : i32
      %c2_i32_370 = arith.constant 2 : i32
      %1475 = arith.addi %1474, %c2_i32_370 : i32
      %1476 = arith.index_cast %1475 : i32 to index
      %1477 = memref.load %arg1[%1476] : memref<940xf32, #tpu.memory_space<smem>>
      %1478 = vector.broadcast %1477 : f32 to vector<8x128xf32>
      %1479 = arith.mulf %508, %1478 : vector<8x128xf32>
      %1480 = arith.addf %1473, %1479 : vector<8x128xf32>
      %c50_i32_371 = arith.constant 50 : i32
      %1481 = arith.addi %1064, %c50_i32_371 : i32
      %c3_i32_372 = arith.constant 3 : i32
      %1482 = arith.addi %1481, %c3_i32_372 : i32
      %1483 = arith.index_cast %1482 : i32 to index
      %1484 = memref.load %arg1[%1483] : memref<940xf32, #tpu.memory_space<smem>>
      %1485 = vector.broadcast %1484 : f32 to vector<8x128xf32>
      %1486 = arith.mulf %587, %1485 : vector<8x128xf32>
      %1487 = arith.addf %1480, %1486 : vector<8x128xf32>
      %c50_i32_373 = arith.constant 50 : i32
      %1488 = arith.addi %1064, %c50_i32_373 : i32
      %c4_i32_374 = arith.constant 4 : i32
      %1489 = arith.addi %1488, %c4_i32_374 : i32
      %1490 = arith.index_cast %1489 : i32 to index
      %1491 = memref.load %arg1[%1490] : memref<940xf32, #tpu.memory_space<smem>>
      %1492 = vector.broadcast %1491 : f32 to vector<8x128xf32>
      %1493 = arith.mulf %666, %1492 : vector<8x128xf32>
      %1494 = arith.addf %1487, %1493 : vector<8x128xf32>
      %c50_i32_375 = arith.constant 50 : i32
      %1495 = arith.addi %1064, %c50_i32_375 : i32
      %c5_i32_376 = arith.constant 5 : i32
      %1496 = arith.addi %1495, %c5_i32_376 : i32
      %1497 = arith.index_cast %1496 : i32 to index
      %1498 = memref.load %arg1[%1497] : memref<940xf32, #tpu.memory_space<smem>>
      %1499 = vector.broadcast %1498 : f32 to vector<8x128xf32>
      %1500 = arith.mulf %745, %1499 : vector<8x128xf32>
      %1501 = arith.addf %1494, %1500 : vector<8x128xf32>
      %c50_i32_377 = arith.constant 50 : i32
      %1502 = arith.addi %1064, %c50_i32_377 : i32
      %c6_i32_378 = arith.constant 6 : i32
      %1503 = arith.addi %1502, %c6_i32_378 : i32
      %1504 = arith.index_cast %1503 : i32 to index
      %1505 = memref.load %arg1[%1504] : memref<940xf32, #tpu.memory_space<smem>>
      %1506 = vector.broadcast %1505 : f32 to vector<8x128xf32>
      %1507 = arith.mulf %824, %1506 : vector<8x128xf32>
      %1508 = arith.addf %1501, %1507 : vector<8x128xf32>
      %c50_i32_379 = arith.constant 50 : i32
      %1509 = arith.addi %1064, %c50_i32_379 : i32
      %c7_i32_380 = arith.constant 7 : i32
      %1510 = arith.addi %1509, %c7_i32_380 : i32
      %1511 = arith.index_cast %1510 : i32 to index
      %1512 = memref.load %arg1[%1511] : memref<940xf32, #tpu.memory_space<smem>>
      %1513 = vector.broadcast %1512 : f32 to vector<8x128xf32>
      %1514 = arith.mulf %903, %1513 : vector<8x128xf32>
      %1515 = arith.addf %1508, %1514 : vector<8x128xf32>
      %c50_i32_381 = arith.constant 50 : i32
      %1516 = arith.addi %1064, %c50_i32_381 : i32
      %c8_i32_382 = arith.constant 8 : i32
      %1517 = arith.addi %1516, %c8_i32_382 : i32
      %1518 = arith.index_cast %1517 : i32 to index
      %1519 = memref.load %arg1[%1518] : memref<940xf32, #tpu.memory_space<smem>>
      %1520 = vector.broadcast %1519 : f32 to vector<8x128xf32>
      %1521 = arith.mulf %982, %1520 : vector<8x128xf32>
      %1522 = arith.addf %1515, %1521 : vector<8x128xf32>
      %c50_i32_383 = arith.constant 50 : i32
      %1523 = arith.addi %1064, %c50_i32_383 : i32
      %c9_i32_384 = arith.constant 9 : i32
      %1524 = arith.addi %1523, %c9_i32_384 : i32
      %1525 = arith.index_cast %1524 : i32 to index
      %1526 = memref.load %arg1[%1525] : memref<940xf32, #tpu.memory_space<smem>>
      %1527 = vector.broadcast %1526 : f32 to vector<8x128xf32>
      %1528 = arith.mulf %1061, %1527 : vector<8x128xf32>
      %1529 = arith.addf %1522, %1528 : vector<8x128xf32>
      %c5_i32_385 = arith.constant 5 : i32
      %1530 = arith.addi %1066, %c5_i32_385 : i32
      %1531 = arith.index_cast %1530 : i32 to index
      %1532 = memref.load %arg2[%1531] : memref<102xf32, #tpu.memory_space<smem>>
      %1533 = vector.broadcast %1532 : f32 to vector<8x128xf32>
      %1534 = arith.addf %1529, %1533 : vector<8x128xf32>
      %cst_386 = arith.constant 0.000000e+00 : f32
      %1535 = vector.broadcast %cst_386 : f32 to vector<8x128xf32>
      %1536 = arith.cmpf ogt, %1534, %1535 : vector<8x128xf32>
      %1537 = math.exp %1534 : vector<8x128xf32>
      %cst_387 = arith.constant 1.000000e+00 : f32
      %1538 = vector.broadcast %cst_387 : f32 to vector<8x128xf32>
      %1539 = arith.subf %1537, %1538 : vector<8x128xf32>
      %1540 = arith.select %1536, %1534, %1539 : vector<8x128xi1>, vector<8x128xf32>
      %c60_i32_388 = arith.constant 60 : i32
      %1541 = arith.addi %1064, %c60_i32_388 : i32
      %1542 = arith.index_cast %1541 : i32 to index
      %1543 = memref.load %arg1[%1542] : memref<940xf32, #tpu.memory_space<smem>>
      %1544 = vector.broadcast %1543 : f32 to vector<8x128xf32>
      %1545 = arith.mulf %350, %1544 : vector<8x128xf32>
      %c60_i32_389 = arith.constant 60 : i32
      %1546 = arith.addi %1064, %c60_i32_389 : i32
      %c1_i32_390 = arith.constant 1 : i32
      %1547 = arith.addi %1546, %c1_i32_390 : i32
      %1548 = arith.index_cast %1547 : i32 to index
      %1549 = memref.load %arg1[%1548] : memref<940xf32, #tpu.memory_space<smem>>
      %1550 = vector.broadcast %1549 : f32 to vector<8x128xf32>
      %1551 = arith.mulf %429, %1550 : vector<8x128xf32>
      %1552 = arith.addf %1545, %1551 : vector<8x128xf32>
      %c60_i32_391 = arith.constant 60 : i32
      %1553 = arith.addi %1064, %c60_i32_391 : i32
      %c2_i32_392 = arith.constant 2 : i32
      %1554 = arith.addi %1553, %c2_i32_392 : i32
      %1555 = arith.index_cast %1554 : i32 to index
      %1556 = memref.load %arg1[%1555] : memref<940xf32, #tpu.memory_space<smem>>
      %1557 = vector.broadcast %1556 : f32 to vector<8x128xf32>
      %1558 = arith.mulf %508, %1557 : vector<8x128xf32>
      %1559 = arith.addf %1552, %1558 : vector<8x128xf32>
      %c60_i32_393 = arith.constant 60 : i32
      %1560 = arith.addi %1064, %c60_i32_393 : i32
      %c3_i32_394 = arith.constant 3 : i32
      %1561 = arith.addi %1560, %c3_i32_394 : i32
      %1562 = arith.index_cast %1561 : i32 to index
      %1563 = memref.load %arg1[%1562] : memref<940xf32, #tpu.memory_space<smem>>
      %1564 = vector.broadcast %1563 : f32 to vector<8x128xf32>
      %1565 = arith.mulf %587, %1564 : vector<8x128xf32>
      %1566 = arith.addf %1559, %1565 : vector<8x128xf32>
      %c60_i32_395 = arith.constant 60 : i32
      %1567 = arith.addi %1064, %c60_i32_395 : i32
      %c4_i32_396 = arith.constant 4 : i32
      %1568 = arith.addi %1567, %c4_i32_396 : i32
      %1569 = arith.index_cast %1568 : i32 to index
      %1570 = memref.load %arg1[%1569] : memref<940xf32, #tpu.memory_space<smem>>
      %1571 = vector.broadcast %1570 : f32 to vector<8x128xf32>
      %1572 = arith.mulf %666, %1571 : vector<8x128xf32>
      %1573 = arith.addf %1566, %1572 : vector<8x128xf32>
      %c60_i32_397 = arith.constant 60 : i32
      %1574 = arith.addi %1064, %c60_i32_397 : i32
      %c5_i32_398 = arith.constant 5 : i32
      %1575 = arith.addi %1574, %c5_i32_398 : i32
      %1576 = arith.index_cast %1575 : i32 to index
      %1577 = memref.load %arg1[%1576] : memref<940xf32, #tpu.memory_space<smem>>
      %1578 = vector.broadcast %1577 : f32 to vector<8x128xf32>
      %1579 = arith.mulf %745, %1578 : vector<8x128xf32>
      %1580 = arith.addf %1573, %1579 : vector<8x128xf32>
      %c60_i32_399 = arith.constant 60 : i32
      %1581 = arith.addi %1064, %c60_i32_399 : i32
      %c6_i32_400 = arith.constant 6 : i32
      %1582 = arith.addi %1581, %c6_i32_400 : i32
      %1583 = arith.index_cast %1582 : i32 to index
      %1584 = memref.load %arg1[%1583] : memref<940xf32, #tpu.memory_space<smem>>
      %1585 = vector.broadcast %1584 : f32 to vector<8x128xf32>
      %1586 = arith.mulf %824, %1585 : vector<8x128xf32>
      %1587 = arith.addf %1580, %1586 : vector<8x128xf32>
      %c60_i32_401 = arith.constant 60 : i32
      %1588 = arith.addi %1064, %c60_i32_401 : i32
      %c7_i32_402 = arith.constant 7 : i32
      %1589 = arith.addi %1588, %c7_i32_402 : i32
      %1590 = arith.index_cast %1589 : i32 to index
      %1591 = memref.load %arg1[%1590] : memref<940xf32, #tpu.memory_space<smem>>
      %1592 = vector.broadcast %1591 : f32 to vector<8x128xf32>
      %1593 = arith.mulf %903, %1592 : vector<8x128xf32>
      %1594 = arith.addf %1587, %1593 : vector<8x128xf32>
      %c60_i32_403 = arith.constant 60 : i32
      %1595 = arith.addi %1064, %c60_i32_403 : i32
      %c8_i32_404 = arith.constant 8 : i32
      %1596 = arith.addi %1595, %c8_i32_404 : i32
      %1597 = arith.index_cast %1596 : i32 to index
      %1598 = memref.load %arg1[%1597] : memref<940xf32, #tpu.memory_space<smem>>
      %1599 = vector.broadcast %1598 : f32 to vector<8x128xf32>
      %1600 = arith.mulf %982, %1599 : vector<8x128xf32>
      %1601 = arith.addf %1594, %1600 : vector<8x128xf32>
      %c60_i32_405 = arith.constant 60 : i32
      %1602 = arith.addi %1064, %c60_i32_405 : i32
      %c9_i32_406 = arith.constant 9 : i32
      %1603 = arith.addi %1602, %c9_i32_406 : i32
      %1604 = arith.index_cast %1603 : i32 to index
      %1605 = memref.load %arg1[%1604] : memref<940xf32, #tpu.memory_space<smem>>
      %1606 = vector.broadcast %1605 : f32 to vector<8x128xf32>
      %1607 = arith.mulf %1061, %1606 : vector<8x128xf32>
      %1608 = arith.addf %1601, %1607 : vector<8x128xf32>
      %c6_i32_407 = arith.constant 6 : i32
      %1609 = arith.addi %1066, %c6_i32_407 : i32
      %1610 = arith.index_cast %1609 : i32 to index
      %1611 = memref.load %arg2[%1610] : memref<102xf32, #tpu.memory_space<smem>>
      %1612 = vector.broadcast %1611 : f32 to vector<8x128xf32>
      %1613 = arith.addf %1608, %1612 : vector<8x128xf32>
      %cst_408 = arith.constant 0.000000e+00 : f32
      %1614 = vector.broadcast %cst_408 : f32 to vector<8x128xf32>
      %1615 = arith.cmpf ogt, %1613, %1614 : vector<8x128xf32>
      %1616 = math.exp %1613 : vector<8x128xf32>
      %cst_409 = arith.constant 1.000000e+00 : f32
      %1617 = vector.broadcast %cst_409 : f32 to vector<8x128xf32>
      %1618 = arith.subf %1616, %1617 : vector<8x128xf32>
      %1619 = arith.select %1615, %1613, %1618 : vector<8x128xi1>, vector<8x128xf32>
      %c70_i32_410 = arith.constant 70 : i32
      %1620 = arith.addi %1064, %c70_i32_410 : i32
      %1621 = arith.index_cast %1620 : i32 to index
      %1622 = memref.load %arg1[%1621] : memref<940xf32, #tpu.memory_space<smem>>
      %1623 = vector.broadcast %1622 : f32 to vector<8x128xf32>
      %1624 = arith.mulf %350, %1623 : vector<8x128xf32>
      %c70_i32_411 = arith.constant 70 : i32
      %1625 = arith.addi %1064, %c70_i32_411 : i32
      %c1_i32_412 = arith.constant 1 : i32
      %1626 = arith.addi %1625, %c1_i32_412 : i32
      %1627 = arith.index_cast %1626 : i32 to index
      %1628 = memref.load %arg1[%1627] : memref<940xf32, #tpu.memory_space<smem>>
      %1629 = vector.broadcast %1628 : f32 to vector<8x128xf32>
      %1630 = arith.mulf %429, %1629 : vector<8x128xf32>
      %1631 = arith.addf %1624, %1630 : vector<8x128xf32>
      %c70_i32_413 = arith.constant 70 : i32
      %1632 = arith.addi %1064, %c70_i32_413 : i32
      %c2_i32_414 = arith.constant 2 : i32
      %1633 = arith.addi %1632, %c2_i32_414 : i32
      %1634 = arith.index_cast %1633 : i32 to index
      %1635 = memref.load %arg1[%1634] : memref<940xf32, #tpu.memory_space<smem>>
      %1636 = vector.broadcast %1635 : f32 to vector<8x128xf32>
      %1637 = arith.mulf %508, %1636 : vector<8x128xf32>
      %1638 = arith.addf %1631, %1637 : vector<8x128xf32>
      %c70_i32_415 = arith.constant 70 : i32
      %1639 = arith.addi %1064, %c70_i32_415 : i32
      %c3_i32_416 = arith.constant 3 : i32
      %1640 = arith.addi %1639, %c3_i32_416 : i32
      %1641 = arith.index_cast %1640 : i32 to index
      %1642 = memref.load %arg1[%1641] : memref<940xf32, #tpu.memory_space<smem>>
      %1643 = vector.broadcast %1642 : f32 to vector<8x128xf32>
      %1644 = arith.mulf %587, %1643 : vector<8x128xf32>
      %1645 = arith.addf %1638, %1644 : vector<8x128xf32>
      %c70_i32_417 = arith.constant 70 : i32
      %1646 = arith.addi %1064, %c70_i32_417 : i32
      %c4_i32_418 = arith.constant 4 : i32
      %1647 = arith.addi %1646, %c4_i32_418 : i32
      %1648 = arith.index_cast %1647 : i32 to index
      %1649 = memref.load %arg1[%1648] : memref<940xf32, #tpu.memory_space<smem>>
      %1650 = vector.broadcast %1649 : f32 to vector<8x128xf32>
      %1651 = arith.mulf %666, %1650 : vector<8x128xf32>
      %1652 = arith.addf %1645, %1651 : vector<8x128xf32>
      %c70_i32_419 = arith.constant 70 : i32
      %1653 = arith.addi %1064, %c70_i32_419 : i32
      %c5_i32_420 = arith.constant 5 : i32
      %1654 = arith.addi %1653, %c5_i32_420 : i32
      %1655 = arith.index_cast %1654 : i32 to index
      %1656 = memref.load %arg1[%1655] : memref<940xf32, #tpu.memory_space<smem>>
      %1657 = vector.broadcast %1656 : f32 to vector<8x128xf32>
      %1658 = arith.mulf %745, %1657 : vector<8x128xf32>
      %1659 = arith.addf %1652, %1658 : vector<8x128xf32>
      %c70_i32_421 = arith.constant 70 : i32
      %1660 = arith.addi %1064, %c70_i32_421 : i32
      %c6_i32_422 = arith.constant 6 : i32
      %1661 = arith.addi %1660, %c6_i32_422 : i32
      %1662 = arith.index_cast %1661 : i32 to index
      %1663 = memref.load %arg1[%1662] : memref<940xf32, #tpu.memory_space<smem>>
      %1664 = vector.broadcast %1663 : f32 to vector<8x128xf32>
      %1665 = arith.mulf %824, %1664 : vector<8x128xf32>
      %1666 = arith.addf %1659, %1665 : vector<8x128xf32>
      %c70_i32_423 = arith.constant 70 : i32
      %1667 = arith.addi %1064, %c70_i32_423 : i32
      %c7_i32_424 = arith.constant 7 : i32
      %1668 = arith.addi %1667, %c7_i32_424 : i32
      %1669 = arith.index_cast %1668 : i32 to index
      %1670 = memref.load %arg1[%1669] : memref<940xf32, #tpu.memory_space<smem>>
      %1671 = vector.broadcast %1670 : f32 to vector<8x128xf32>
      %1672 = arith.mulf %903, %1671 : vector<8x128xf32>
      %1673 = arith.addf %1666, %1672 : vector<8x128xf32>
      %c70_i32_425 = arith.constant 70 : i32
      %1674 = arith.addi %1064, %c70_i32_425 : i32
      %c8_i32_426 = arith.constant 8 : i32
      %1675 = arith.addi %1674, %c8_i32_426 : i32
      %1676 = arith.index_cast %1675 : i32 to index
      %1677 = memref.load %arg1[%1676] : memref<940xf32, #tpu.memory_space<smem>>
      %1678 = vector.broadcast %1677 : f32 to vector<8x128xf32>
      %1679 = arith.mulf %982, %1678 : vector<8x128xf32>
      %1680 = arith.addf %1673, %1679 : vector<8x128xf32>
      %c70_i32_427 = arith.constant 70 : i32
      %1681 = arith.addi %1064, %c70_i32_427 : i32
      %c9_i32_428 = arith.constant 9 : i32
      %1682 = arith.addi %1681, %c9_i32_428 : i32
      %1683 = arith.index_cast %1682 : i32 to index
      %1684 = memref.load %arg1[%1683] : memref<940xf32, #tpu.memory_space<smem>>
      %1685 = vector.broadcast %1684 : f32 to vector<8x128xf32>
      %1686 = arith.mulf %1061, %1685 : vector<8x128xf32>
      %1687 = arith.addf %1680, %1686 : vector<8x128xf32>
      %c7_i32_429 = arith.constant 7 : i32
      %1688 = arith.addi %1066, %c7_i32_429 : i32
      %1689 = arith.index_cast %1688 : i32 to index
      %1690 = memref.load %arg2[%1689] : memref<102xf32, #tpu.memory_space<smem>>
      %1691 = vector.broadcast %1690 : f32 to vector<8x128xf32>
      %1692 = arith.addf %1687, %1691 : vector<8x128xf32>
      %cst_430 = arith.constant 0.000000e+00 : f32
      %1693 = vector.broadcast %cst_430 : f32 to vector<8x128xf32>
      %1694 = arith.cmpf ogt, %1692, %1693 : vector<8x128xf32>
      %1695 = math.exp %1692 : vector<8x128xf32>
      %cst_431 = arith.constant 1.000000e+00 : f32
      %1696 = vector.broadcast %cst_431 : f32 to vector<8x128xf32>
      %1697 = arith.subf %1695, %1696 : vector<8x128xf32>
      %1698 = arith.select %1694, %1692, %1697 : vector<8x128xi1>, vector<8x128xf32>
      %c80_i32_432 = arith.constant 80 : i32
      %1699 = arith.addi %1064, %c80_i32_432 : i32
      %1700 = arith.index_cast %1699 : i32 to index
      %1701 = memref.load %arg1[%1700] : memref<940xf32, #tpu.memory_space<smem>>
      %1702 = vector.broadcast %1701 : f32 to vector<8x128xf32>
      %1703 = arith.mulf %350, %1702 : vector<8x128xf32>
      %c80_i32_433 = arith.constant 80 : i32
      %1704 = arith.addi %1064, %c80_i32_433 : i32
      %c1_i32_434 = arith.constant 1 : i32
      %1705 = arith.addi %1704, %c1_i32_434 : i32
      %1706 = arith.index_cast %1705 : i32 to index
      %1707 = memref.load %arg1[%1706] : memref<940xf32, #tpu.memory_space<smem>>
      %1708 = vector.broadcast %1707 : f32 to vector<8x128xf32>
      %1709 = arith.mulf %429, %1708 : vector<8x128xf32>
      %1710 = arith.addf %1703, %1709 : vector<8x128xf32>
      %c80_i32_435 = arith.constant 80 : i32
      %1711 = arith.addi %1064, %c80_i32_435 : i32
      %c2_i32_436 = arith.constant 2 : i32
      %1712 = arith.addi %1711, %c2_i32_436 : i32
      %1713 = arith.index_cast %1712 : i32 to index
      %1714 = memref.load %arg1[%1713] : memref<940xf32, #tpu.memory_space<smem>>
      %1715 = vector.broadcast %1714 : f32 to vector<8x128xf32>
      %1716 = arith.mulf %508, %1715 : vector<8x128xf32>
      %1717 = arith.addf %1710, %1716 : vector<8x128xf32>
      %c80_i32_437 = arith.constant 80 : i32
      %1718 = arith.addi %1064, %c80_i32_437 : i32
      %c3_i32_438 = arith.constant 3 : i32
      %1719 = arith.addi %1718, %c3_i32_438 : i32
      %1720 = arith.index_cast %1719 : i32 to index
      %1721 = memref.load %arg1[%1720] : memref<940xf32, #tpu.memory_space<smem>>
      %1722 = vector.broadcast %1721 : f32 to vector<8x128xf32>
      %1723 = arith.mulf %587, %1722 : vector<8x128xf32>
      %1724 = arith.addf %1717, %1723 : vector<8x128xf32>
      %c80_i32_439 = arith.constant 80 : i32
      %1725 = arith.addi %1064, %c80_i32_439 : i32
      %c4_i32_440 = arith.constant 4 : i32
      %1726 = arith.addi %1725, %c4_i32_440 : i32
      %1727 = arith.index_cast %1726 : i32 to index
      %1728 = memref.load %arg1[%1727] : memref<940xf32, #tpu.memory_space<smem>>
      %1729 = vector.broadcast %1728 : f32 to vector<8x128xf32>
      %1730 = arith.mulf %666, %1729 : vector<8x128xf32>
      %1731 = arith.addf %1724, %1730 : vector<8x128xf32>
      %c80_i32_441 = arith.constant 80 : i32
      %1732 = arith.addi %1064, %c80_i32_441 : i32
      %c5_i32_442 = arith.constant 5 : i32
      %1733 = arith.addi %1732, %c5_i32_442 : i32
      %1734 = arith.index_cast %1733 : i32 to index
      %1735 = memref.load %arg1[%1734] : memref<940xf32, #tpu.memory_space<smem>>
      %1736 = vector.broadcast %1735 : f32 to vector<8x128xf32>
      %1737 = arith.mulf %745, %1736 : vector<8x128xf32>
      %1738 = arith.addf %1731, %1737 : vector<8x128xf32>
      %c80_i32_443 = arith.constant 80 : i32
      %1739 = arith.addi %1064, %c80_i32_443 : i32
      %c6_i32_444 = arith.constant 6 : i32
      %1740 = arith.addi %1739, %c6_i32_444 : i32
      %1741 = arith.index_cast %1740 : i32 to index
      %1742 = memref.load %arg1[%1741] : memref<940xf32, #tpu.memory_space<smem>>
      %1743 = vector.broadcast %1742 : f32 to vector<8x128xf32>
      %1744 = arith.mulf %824, %1743 : vector<8x128xf32>
      %1745 = arith.addf %1738, %1744 : vector<8x128xf32>
      %c80_i32_445 = arith.constant 80 : i32
      %1746 = arith.addi %1064, %c80_i32_445 : i32
      %c7_i32_446 = arith.constant 7 : i32
      %1747 = arith.addi %1746, %c7_i32_446 : i32
      %1748 = arith.index_cast %1747 : i32 to index
      %1749 = memref.load %arg1[%1748] : memref<940xf32, #tpu.memory_space<smem>>
      %1750 = vector.broadcast %1749 : f32 to vector<8x128xf32>
      %1751 = arith.mulf %903, %1750 : vector<8x128xf32>
      %1752 = arith.addf %1745, %1751 : vector<8x128xf32>
      %c80_i32_447 = arith.constant 80 : i32
      %1753 = arith.addi %1064, %c80_i32_447 : i32
      %c8_i32_448 = arith.constant 8 : i32
      %1754 = arith.addi %1753, %c8_i32_448 : i32
      %1755 = arith.index_cast %1754 : i32 to index
      %1756 = memref.load %arg1[%1755] : memref<940xf32, #tpu.memory_space<smem>>
      %1757 = vector.broadcast %1756 : f32 to vector<8x128xf32>
      %1758 = arith.mulf %982, %1757 : vector<8x128xf32>
      %1759 = arith.addf %1752, %1758 : vector<8x128xf32>
      %c80_i32_449 = arith.constant 80 : i32
      %1760 = arith.addi %1064, %c80_i32_449 : i32
      %c9_i32_450 = arith.constant 9 : i32
      %1761 = arith.addi %1760, %c9_i32_450 : i32
      %1762 = arith.index_cast %1761 : i32 to index
      %1763 = memref.load %arg1[%1762] : memref<940xf32, #tpu.memory_space<smem>>
      %1764 = vector.broadcast %1763 : f32 to vector<8x128xf32>
      %1765 = arith.mulf %1061, %1764 : vector<8x128xf32>
      %1766 = arith.addf %1759, %1765 : vector<8x128xf32>
      %c8_i32_451 = arith.constant 8 : i32
      %1767 = arith.addi %1066, %c8_i32_451 : i32
      %1768 = arith.index_cast %1767 : i32 to index
      %1769 = memref.load %arg2[%1768] : memref<102xf32, #tpu.memory_space<smem>>
      %1770 = vector.broadcast %1769 : f32 to vector<8x128xf32>
      %1771 = arith.addf %1766, %1770 : vector<8x128xf32>
      %cst_452 = arith.constant 0.000000e+00 : f32
      %1772 = vector.broadcast %cst_452 : f32 to vector<8x128xf32>
      %1773 = arith.cmpf ogt, %1771, %1772 : vector<8x128xf32>
      %1774 = math.exp %1771 : vector<8x128xf32>
      %cst_453 = arith.constant 1.000000e+00 : f32
      %1775 = vector.broadcast %cst_453 : f32 to vector<8x128xf32>
      %1776 = arith.subf %1774, %1775 : vector<8x128xf32>
      %1777 = arith.select %1773, %1771, %1776 : vector<8x128xi1>, vector<8x128xf32>
      %c90_i32_454 = arith.constant 90 : i32
      %1778 = arith.addi %1064, %c90_i32_454 : i32
      %1779 = arith.index_cast %1778 : i32 to index
      %1780 = memref.load %arg1[%1779] : memref<940xf32, #tpu.memory_space<smem>>
      %1781 = vector.broadcast %1780 : f32 to vector<8x128xf32>
      %1782 = arith.mulf %350, %1781 : vector<8x128xf32>
      %c90_i32_455 = arith.constant 90 : i32
      %1783 = arith.addi %1064, %c90_i32_455 : i32
      %c1_i32_456 = arith.constant 1 : i32
      %1784 = arith.addi %1783, %c1_i32_456 : i32
      %1785 = arith.index_cast %1784 : i32 to index
      %1786 = memref.load %arg1[%1785] : memref<940xf32, #tpu.memory_space<smem>>
      %1787 = vector.broadcast %1786 : f32 to vector<8x128xf32>
      %1788 = arith.mulf %429, %1787 : vector<8x128xf32>
      %1789 = arith.addf %1782, %1788 : vector<8x128xf32>
      %c90_i32_457 = arith.constant 90 : i32
      %1790 = arith.addi %1064, %c90_i32_457 : i32
      %c2_i32_458 = arith.constant 2 : i32
      %1791 = arith.addi %1790, %c2_i32_458 : i32
      %1792 = arith.index_cast %1791 : i32 to index
      %1793 = memref.load %arg1[%1792] : memref<940xf32, #tpu.memory_space<smem>>
      %1794 = vector.broadcast %1793 : f32 to vector<8x128xf32>
      %1795 = arith.mulf %508, %1794 : vector<8x128xf32>
      %1796 = arith.addf %1789, %1795 : vector<8x128xf32>
      %c90_i32_459 = arith.constant 90 : i32
      %1797 = arith.addi %1064, %c90_i32_459 : i32
      %c3_i32_460 = arith.constant 3 : i32
      %1798 = arith.addi %1797, %c3_i32_460 : i32
      %1799 = arith.index_cast %1798 : i32 to index
      %1800 = memref.load %arg1[%1799] : memref<940xf32, #tpu.memory_space<smem>>
      %1801 = vector.broadcast %1800 : f32 to vector<8x128xf32>
      %1802 = arith.mulf %587, %1801 : vector<8x128xf32>
      %1803 = arith.addf %1796, %1802 : vector<8x128xf32>
      %c90_i32_461 = arith.constant 90 : i32
      %1804 = arith.addi %1064, %c90_i32_461 : i32
      %c4_i32_462 = arith.constant 4 : i32
      %1805 = arith.addi %1804, %c4_i32_462 : i32
      %1806 = arith.index_cast %1805 : i32 to index
      %1807 = memref.load %arg1[%1806] : memref<940xf32, #tpu.memory_space<smem>>
      %1808 = vector.broadcast %1807 : f32 to vector<8x128xf32>
      %1809 = arith.mulf %666, %1808 : vector<8x128xf32>
      %1810 = arith.addf %1803, %1809 : vector<8x128xf32>
      %c90_i32_463 = arith.constant 90 : i32
      %1811 = arith.addi %1064, %c90_i32_463 : i32
      %c5_i32_464 = arith.constant 5 : i32
      %1812 = arith.addi %1811, %c5_i32_464 : i32
      %1813 = arith.index_cast %1812 : i32 to index
      %1814 = memref.load %arg1[%1813] : memref<940xf32, #tpu.memory_space<smem>>
      %1815 = vector.broadcast %1814 : f32 to vector<8x128xf32>
      %1816 = arith.mulf %745, %1815 : vector<8x128xf32>
      %1817 = arith.addf %1810, %1816 : vector<8x128xf32>
      %c90_i32_465 = arith.constant 90 : i32
      %1818 = arith.addi %1064, %c90_i32_465 : i32
      %c6_i32_466 = arith.constant 6 : i32
      %1819 = arith.addi %1818, %c6_i32_466 : i32
      %1820 = arith.index_cast %1819 : i32 to index
      %1821 = memref.load %arg1[%1820] : memref<940xf32, #tpu.memory_space<smem>>
      %1822 = vector.broadcast %1821 : f32 to vector<8x128xf32>
      %1823 = arith.mulf %824, %1822 : vector<8x128xf32>
      %1824 = arith.addf %1817, %1823 : vector<8x128xf32>
      %c90_i32_467 = arith.constant 90 : i32
      %1825 = arith.addi %1064, %c90_i32_467 : i32
      %c7_i32_468 = arith.constant 7 : i32
      %1826 = arith.addi %1825, %c7_i32_468 : i32
      %1827 = arith.index_cast %1826 : i32 to index
      %1828 = memref.load %arg1[%1827] : memref<940xf32, #tpu.memory_space<smem>>
      %1829 = vector.broadcast %1828 : f32 to vector<8x128xf32>
      %1830 = arith.mulf %903, %1829 : vector<8x128xf32>
      %1831 = arith.addf %1824, %1830 : vector<8x128xf32>
      %c90_i32_469 = arith.constant 90 : i32
      %1832 = arith.addi %1064, %c90_i32_469 : i32
      %c8_i32_470 = arith.constant 8 : i32
      %1833 = arith.addi %1832, %c8_i32_470 : i32
      %1834 = arith.index_cast %1833 : i32 to index
      %1835 = memref.load %arg1[%1834] : memref<940xf32, #tpu.memory_space<smem>>
      %1836 = vector.broadcast %1835 : f32 to vector<8x128xf32>
      %1837 = arith.mulf %982, %1836 : vector<8x128xf32>
      %1838 = arith.addf %1831, %1837 : vector<8x128xf32>
      %c90_i32_471 = arith.constant 90 : i32
      %1839 = arith.addi %1064, %c90_i32_471 : i32
      %c9_i32_472 = arith.constant 9 : i32
      %1840 = arith.addi %1839, %c9_i32_472 : i32
      %1841 = arith.index_cast %1840 : i32 to index
      %1842 = memref.load %arg1[%1841] : memref<940xf32, #tpu.memory_space<smem>>
      %1843 = vector.broadcast %1842 : f32 to vector<8x128xf32>
      %1844 = arith.mulf %1061, %1843 : vector<8x128xf32>
      %1845 = arith.addf %1838, %1844 : vector<8x128xf32>
      %c9_i32_473 = arith.constant 9 : i32
      %1846 = arith.addi %1066, %c9_i32_473 : i32
      %1847 = arith.index_cast %1846 : i32 to index
      %1848 = memref.load %arg2[%1847] : memref<102xf32, #tpu.memory_space<smem>>
      %1849 = vector.broadcast %1848 : f32 to vector<8x128xf32>
      %1850 = arith.addf %1845, %1849 : vector<8x128xf32>
      %cst_474 = arith.constant 0.000000e+00 : f32
      %1851 = vector.broadcast %cst_474 : f32 to vector<8x128xf32>
      %1852 = arith.cmpf ogt, %1850, %1851 : vector<8x128xf32>
      %1853 = math.exp %1850 : vector<8x128xf32>
      %cst_475 = arith.constant 1.000000e+00 : f32
      %1854 = vector.broadcast %cst_475 : f32 to vector<8x128xf32>
      %1855 = arith.subf %1853, %1854 : vector<8x128xf32>
      %1856 = arith.select %1852, %1850, %1855 : vector<8x128xi1>, vector<8x128xf32>
      %c2_i32_476 = arith.constant 2 : i32
      %1857 = arith.addi %266, %c2_i32_476 : i32
      %c100_i32_477 = arith.constant 100 : i32
      %1858 = arith.muli %1857, %c100_i32_477 : i32
      %c20_i32_478 = arith.constant 20 : i32
      %1859 = arith.addi %c20_i32_478, %1858 : i32
      %c10_i32_479 = arith.constant 10 : i32
      %1860 = arith.muli %1857, %c10_i32_479 : i32
      %c10_i32_480 = arith.constant 10 : i32
      %1861 = arith.addi %c10_i32_480, %1860 : i32
      %c0_i32_481 = arith.constant 0 : i32
      %1862 = arith.addi %1859, %c0_i32_481 : i32
      %1863 = arith.index_cast %1862 : i32 to index
      %1864 = memref.load %arg1[%1863] : memref<940xf32, #tpu.memory_space<smem>>
      %1865 = vector.broadcast %1864 : f32 to vector<8x128xf32>
      %1866 = arith.mulf %1145, %1865 : vector<8x128xf32>
      %c0_i32_482 = arith.constant 0 : i32
      %1867 = arith.addi %1859, %c0_i32_482 : i32
      %c1_i32_483 = arith.constant 1 : i32
      %1868 = arith.addi %1867, %c1_i32_483 : i32
      %1869 = arith.index_cast %1868 : i32 to index
      %1870 = memref.load %arg1[%1869] : memref<940xf32, #tpu.memory_space<smem>>
      %1871 = vector.broadcast %1870 : f32 to vector<8x128xf32>
      %1872 = arith.mulf %1224, %1871 : vector<8x128xf32>
      %1873 = arith.addf %1866, %1872 : vector<8x128xf32>
      %c0_i32_484 = arith.constant 0 : i32
      %1874 = arith.addi %1859, %c0_i32_484 : i32
      %c2_i32_485 = arith.constant 2 : i32
      %1875 = arith.addi %1874, %c2_i32_485 : i32
      %1876 = arith.index_cast %1875 : i32 to index
      %1877 = memref.load %arg1[%1876] : memref<940xf32, #tpu.memory_space<smem>>
      %1878 = vector.broadcast %1877 : f32 to vector<8x128xf32>
      %1879 = arith.mulf %1303, %1878 : vector<8x128xf32>
      %1880 = arith.addf %1873, %1879 : vector<8x128xf32>
      %c0_i32_486 = arith.constant 0 : i32
      %1881 = arith.addi %1859, %c0_i32_486 : i32
      %c3_i32_487 = arith.constant 3 : i32
      %1882 = arith.addi %1881, %c3_i32_487 : i32
      %1883 = arith.index_cast %1882 : i32 to index
      %1884 = memref.load %arg1[%1883] : memref<940xf32, #tpu.memory_space<smem>>
      %1885 = vector.broadcast %1884 : f32 to vector<8x128xf32>
      %1886 = arith.mulf %1382, %1885 : vector<8x128xf32>
      %1887 = arith.addf %1880, %1886 : vector<8x128xf32>
      %c0_i32_488 = arith.constant 0 : i32
      %1888 = arith.addi %1859, %c0_i32_488 : i32
      %c4_i32_489 = arith.constant 4 : i32
      %1889 = arith.addi %1888, %c4_i32_489 : i32
      %1890 = arith.index_cast %1889 : i32 to index
      %1891 = memref.load %arg1[%1890] : memref<940xf32, #tpu.memory_space<smem>>
      %1892 = vector.broadcast %1891 : f32 to vector<8x128xf32>
      %1893 = arith.mulf %1461, %1892 : vector<8x128xf32>
      %1894 = arith.addf %1887, %1893 : vector<8x128xf32>
      %c0_i32_490 = arith.constant 0 : i32
      %1895 = arith.addi %1859, %c0_i32_490 : i32
      %c5_i32_491 = arith.constant 5 : i32
      %1896 = arith.addi %1895, %c5_i32_491 : i32
      %1897 = arith.index_cast %1896 : i32 to index
      %1898 = memref.load %arg1[%1897] : memref<940xf32, #tpu.memory_space<smem>>
      %1899 = vector.broadcast %1898 : f32 to vector<8x128xf32>
      %1900 = arith.mulf %1540, %1899 : vector<8x128xf32>
      %1901 = arith.addf %1894, %1900 : vector<8x128xf32>
      %c0_i32_492 = arith.constant 0 : i32
      %1902 = arith.addi %1859, %c0_i32_492 : i32
      %c6_i32_493 = arith.constant 6 : i32
      %1903 = arith.addi %1902, %c6_i32_493 : i32
      %1904 = arith.index_cast %1903 : i32 to index
      %1905 = memref.load %arg1[%1904] : memref<940xf32, #tpu.memory_space<smem>>
      %1906 = vector.broadcast %1905 : f32 to vector<8x128xf32>
      %1907 = arith.mulf %1619, %1906 : vector<8x128xf32>
      %1908 = arith.addf %1901, %1907 : vector<8x128xf32>
      %c0_i32_494 = arith.constant 0 : i32
      %1909 = arith.addi %1859, %c0_i32_494 : i32
      %c7_i32_495 = arith.constant 7 : i32
      %1910 = arith.addi %1909, %c7_i32_495 : i32
      %1911 = arith.index_cast %1910 : i32 to index
      %1912 = memref.load %arg1[%1911] : memref<940xf32, #tpu.memory_space<smem>>
      %1913 = vector.broadcast %1912 : f32 to vector<8x128xf32>
      %1914 = arith.mulf %1698, %1913 : vector<8x128xf32>
      %1915 = arith.addf %1908, %1914 : vector<8x128xf32>
      %c0_i32_496 = arith.constant 0 : i32
      %1916 = arith.addi %1859, %c0_i32_496 : i32
      %c8_i32_497 = arith.constant 8 : i32
      %1917 = arith.addi %1916, %c8_i32_497 : i32
      %1918 = arith.index_cast %1917 : i32 to index
      %1919 = memref.load %arg1[%1918] : memref<940xf32, #tpu.memory_space<smem>>
      %1920 = vector.broadcast %1919 : f32 to vector<8x128xf32>
      %1921 = arith.mulf %1777, %1920 : vector<8x128xf32>
      %1922 = arith.addf %1915, %1921 : vector<8x128xf32>
      %c0_i32_498 = arith.constant 0 : i32
      %1923 = arith.addi %1859, %c0_i32_498 : i32
      %c9_i32_499 = arith.constant 9 : i32
      %1924 = arith.addi %1923, %c9_i32_499 : i32
      %1925 = arith.index_cast %1924 : i32 to index
      %1926 = memref.load %arg1[%1925] : memref<940xf32, #tpu.memory_space<smem>>
      %1927 = vector.broadcast %1926 : f32 to vector<8x128xf32>
      %1928 = arith.mulf %1856, %1927 : vector<8x128xf32>
      %1929 = arith.addf %1922, %1928 : vector<8x128xf32>
      %c0_i32_500 = arith.constant 0 : i32
      %1930 = arith.addi %1861, %c0_i32_500 : i32
      %1931 = arith.index_cast %1930 : i32 to index
      %1932 = memref.load %arg2[%1931] : memref<102xf32, #tpu.memory_space<smem>>
      %1933 = vector.broadcast %1932 : f32 to vector<8x128xf32>
      %1934 = arith.addf %1929, %1933 : vector<8x128xf32>
      %cst_501 = arith.constant 0.000000e+00 : f32
      %1935 = vector.broadcast %cst_501 : f32 to vector<8x128xf32>
      %1936 = arith.cmpf ogt, %1934, %1935 : vector<8x128xf32>
      %1937 = math.exp %1934 : vector<8x128xf32>
      %cst_502 = arith.constant 1.000000e+00 : f32
      %1938 = vector.broadcast %cst_502 : f32 to vector<8x128xf32>
      %1939 = arith.subf %1937, %1938 : vector<8x128xf32>
      %1940 = arith.select %1936, %1934, %1939 : vector<8x128xi1>, vector<8x128xf32>
      %c10_i32_503 = arith.constant 10 : i32
      %1941 = arith.addi %1859, %c10_i32_503 : i32
      %1942 = arith.index_cast %1941 : i32 to index
      %1943 = memref.load %arg1[%1942] : memref<940xf32, #tpu.memory_space<smem>>
      %1944 = vector.broadcast %1943 : f32 to vector<8x128xf32>
      %1945 = arith.mulf %1145, %1944 : vector<8x128xf32>
      %c10_i32_504 = arith.constant 10 : i32
      %1946 = arith.addi %1859, %c10_i32_504 : i32
      %c1_i32_505 = arith.constant 1 : i32
      %1947 = arith.addi %1946, %c1_i32_505 : i32
      %1948 = arith.index_cast %1947 : i32 to index
      %1949 = memref.load %arg1[%1948] : memref<940xf32, #tpu.memory_space<smem>>
      %1950 = vector.broadcast %1949 : f32 to vector<8x128xf32>
      %1951 = arith.mulf %1224, %1950 : vector<8x128xf32>
      %1952 = arith.addf %1945, %1951 : vector<8x128xf32>
      %c10_i32_506 = arith.constant 10 : i32
      %1953 = arith.addi %1859, %c10_i32_506 : i32
      %c2_i32_507 = arith.constant 2 : i32
      %1954 = arith.addi %1953, %c2_i32_507 : i32
      %1955 = arith.index_cast %1954 : i32 to index
      %1956 = memref.load %arg1[%1955] : memref<940xf32, #tpu.memory_space<smem>>
      %1957 = vector.broadcast %1956 : f32 to vector<8x128xf32>
      %1958 = arith.mulf %1303, %1957 : vector<8x128xf32>
      %1959 = arith.addf %1952, %1958 : vector<8x128xf32>
      %c10_i32_508 = arith.constant 10 : i32
      %1960 = arith.addi %1859, %c10_i32_508 : i32
      %c3_i32_509 = arith.constant 3 : i32
      %1961 = arith.addi %1960, %c3_i32_509 : i32
      %1962 = arith.index_cast %1961 : i32 to index
      %1963 = memref.load %arg1[%1962] : memref<940xf32, #tpu.memory_space<smem>>
      %1964 = vector.broadcast %1963 : f32 to vector<8x128xf32>
      %1965 = arith.mulf %1382, %1964 : vector<8x128xf32>
      %1966 = arith.addf %1959, %1965 : vector<8x128xf32>
      %c10_i32_510 = arith.constant 10 : i32
      %1967 = arith.addi %1859, %c10_i32_510 : i32
      %c4_i32_511 = arith.constant 4 : i32
      %1968 = arith.addi %1967, %c4_i32_511 : i32
      %1969 = arith.index_cast %1968 : i32 to index
      %1970 = memref.load %arg1[%1969] : memref<940xf32, #tpu.memory_space<smem>>
      %1971 = vector.broadcast %1970 : f32 to vector<8x128xf32>
      %1972 = arith.mulf %1461, %1971 : vector<8x128xf32>
      %1973 = arith.addf %1966, %1972 : vector<8x128xf32>
      %c10_i32_512 = arith.constant 10 : i32
      %1974 = arith.addi %1859, %c10_i32_512 : i32
      %c5_i32_513 = arith.constant 5 : i32
      %1975 = arith.addi %1974, %c5_i32_513 : i32
      %1976 = arith.index_cast %1975 : i32 to index
      %1977 = memref.load %arg1[%1976] : memref<940xf32, #tpu.memory_space<smem>>
      %1978 = vector.broadcast %1977 : f32 to vector<8x128xf32>
      %1979 = arith.mulf %1540, %1978 : vector<8x128xf32>
      %1980 = arith.addf %1973, %1979 : vector<8x128xf32>
      %c10_i32_514 = arith.constant 10 : i32
      %1981 = arith.addi %1859, %c10_i32_514 : i32
      %c6_i32_515 = arith.constant 6 : i32
      %1982 = arith.addi %1981, %c6_i32_515 : i32
      %1983 = arith.index_cast %1982 : i32 to index
      %1984 = memref.load %arg1[%1983] : memref<940xf32, #tpu.memory_space<smem>>
      %1985 = vector.broadcast %1984 : f32 to vector<8x128xf32>
      %1986 = arith.mulf %1619, %1985 : vector<8x128xf32>
      %1987 = arith.addf %1980, %1986 : vector<8x128xf32>
      %c10_i32_516 = arith.constant 10 : i32
      %1988 = arith.addi %1859, %c10_i32_516 : i32
      %c7_i32_517 = arith.constant 7 : i32
      %1989 = arith.addi %1988, %c7_i32_517 : i32
      %1990 = arith.index_cast %1989 : i32 to index
      %1991 = memref.load %arg1[%1990] : memref<940xf32, #tpu.memory_space<smem>>
      %1992 = vector.broadcast %1991 : f32 to vector<8x128xf32>
      %1993 = arith.mulf %1698, %1992 : vector<8x128xf32>
      %1994 = arith.addf %1987, %1993 : vector<8x128xf32>
      %c10_i32_518 = arith.constant 10 : i32
      %1995 = arith.addi %1859, %c10_i32_518 : i32
      %c8_i32_519 = arith.constant 8 : i32
      %1996 = arith.addi %1995, %c8_i32_519 : i32
      %1997 = arith.index_cast %1996 : i32 to index
      %1998 = memref.load %arg1[%1997] : memref<940xf32, #tpu.memory_space<smem>>
      %1999 = vector.broadcast %1998 : f32 to vector<8x128xf32>
      %2000 = arith.mulf %1777, %1999 : vector<8x128xf32>
      %2001 = arith.addf %1994, %2000 : vector<8x128xf32>
      %c10_i32_520 = arith.constant 10 : i32
      %2002 = arith.addi %1859, %c10_i32_520 : i32
      %c9_i32_521 = arith.constant 9 : i32
      %2003 = arith.addi %2002, %c9_i32_521 : i32
      %2004 = arith.index_cast %2003 : i32 to index
      %2005 = memref.load %arg1[%2004] : memref<940xf32, #tpu.memory_space<smem>>
      %2006 = vector.broadcast %2005 : f32 to vector<8x128xf32>
      %2007 = arith.mulf %1856, %2006 : vector<8x128xf32>
      %2008 = arith.addf %2001, %2007 : vector<8x128xf32>
      %c1_i32_522 = arith.constant 1 : i32
      %2009 = arith.addi %1861, %c1_i32_522 : i32
      %2010 = arith.index_cast %2009 : i32 to index
      %2011 = memref.load %arg2[%2010] : memref<102xf32, #tpu.memory_space<smem>>
      %2012 = vector.broadcast %2011 : f32 to vector<8x128xf32>
      %2013 = arith.addf %2008, %2012 : vector<8x128xf32>
      %cst_523 = arith.constant 0.000000e+00 : f32
      %2014 = vector.broadcast %cst_523 : f32 to vector<8x128xf32>
      %2015 = arith.cmpf ogt, %2013, %2014 : vector<8x128xf32>
      %2016 = math.exp %2013 : vector<8x128xf32>
      %cst_524 = arith.constant 1.000000e+00 : f32
      %2017 = vector.broadcast %cst_524 : f32 to vector<8x128xf32>
      %2018 = arith.subf %2016, %2017 : vector<8x128xf32>
      %2019 = arith.select %2015, %2013, %2018 : vector<8x128xi1>, vector<8x128xf32>
      %c20_i32_525 = arith.constant 20 : i32
      %2020 = arith.addi %1859, %c20_i32_525 : i32
      %2021 = arith.index_cast %2020 : i32 to index
      %2022 = memref.load %arg1[%2021] : memref<940xf32, #tpu.memory_space<smem>>
      %2023 = vector.broadcast %2022 : f32 to vector<8x128xf32>
      %2024 = arith.mulf %1145, %2023 : vector<8x128xf32>
      %c20_i32_526 = arith.constant 20 : i32
      %2025 = arith.addi %1859, %c20_i32_526 : i32
      %c1_i32_527 = arith.constant 1 : i32
      %2026 = arith.addi %2025, %c1_i32_527 : i32
      %2027 = arith.index_cast %2026 : i32 to index
      %2028 = memref.load %arg1[%2027] : memref<940xf32, #tpu.memory_space<smem>>
      %2029 = vector.broadcast %2028 : f32 to vector<8x128xf32>
      %2030 = arith.mulf %1224, %2029 : vector<8x128xf32>
      %2031 = arith.addf %2024, %2030 : vector<8x128xf32>
      %c20_i32_528 = arith.constant 20 : i32
      %2032 = arith.addi %1859, %c20_i32_528 : i32
      %c2_i32_529 = arith.constant 2 : i32
      %2033 = arith.addi %2032, %c2_i32_529 : i32
      %2034 = arith.index_cast %2033 : i32 to index
      %2035 = memref.load %arg1[%2034] : memref<940xf32, #tpu.memory_space<smem>>
      %2036 = vector.broadcast %2035 : f32 to vector<8x128xf32>
      %2037 = arith.mulf %1303, %2036 : vector<8x128xf32>
      %2038 = arith.addf %2031, %2037 : vector<8x128xf32>
      %c20_i32_530 = arith.constant 20 : i32
      %2039 = arith.addi %1859, %c20_i32_530 : i32
      %c3_i32_531 = arith.constant 3 : i32
      %2040 = arith.addi %2039, %c3_i32_531 : i32
      %2041 = arith.index_cast %2040 : i32 to index
      %2042 = memref.load %arg1[%2041] : memref<940xf32, #tpu.memory_space<smem>>
      %2043 = vector.broadcast %2042 : f32 to vector<8x128xf32>
      %2044 = arith.mulf %1382, %2043 : vector<8x128xf32>
      %2045 = arith.addf %2038, %2044 : vector<8x128xf32>
      %c20_i32_532 = arith.constant 20 : i32
      %2046 = arith.addi %1859, %c20_i32_532 : i32
      %c4_i32_533 = arith.constant 4 : i32
      %2047 = arith.addi %2046, %c4_i32_533 : i32
      %2048 = arith.index_cast %2047 : i32 to index
      %2049 = memref.load %arg1[%2048] : memref<940xf32, #tpu.memory_space<smem>>
      %2050 = vector.broadcast %2049 : f32 to vector<8x128xf32>
      %2051 = arith.mulf %1461, %2050 : vector<8x128xf32>
      %2052 = arith.addf %2045, %2051 : vector<8x128xf32>
      %c20_i32_534 = arith.constant 20 : i32
      %2053 = arith.addi %1859, %c20_i32_534 : i32
      %c5_i32_535 = arith.constant 5 : i32
      %2054 = arith.addi %2053, %c5_i32_535 : i32
      %2055 = arith.index_cast %2054 : i32 to index
      %2056 = memref.load %arg1[%2055] : memref<940xf32, #tpu.memory_space<smem>>
      %2057 = vector.broadcast %2056 : f32 to vector<8x128xf32>
      %2058 = arith.mulf %1540, %2057 : vector<8x128xf32>
      %2059 = arith.addf %2052, %2058 : vector<8x128xf32>
      %c20_i32_536 = arith.constant 20 : i32
      %2060 = arith.addi %1859, %c20_i32_536 : i32
      %c6_i32_537 = arith.constant 6 : i32
      %2061 = arith.addi %2060, %c6_i32_537 : i32
      %2062 = arith.index_cast %2061 : i32 to index
      %2063 = memref.load %arg1[%2062] : memref<940xf32, #tpu.memory_space<smem>>
      %2064 = vector.broadcast %2063 : f32 to vector<8x128xf32>
      %2065 = arith.mulf %1619, %2064 : vector<8x128xf32>
      %2066 = arith.addf %2059, %2065 : vector<8x128xf32>
      %c20_i32_538 = arith.constant 20 : i32
      %2067 = arith.addi %1859, %c20_i32_538 : i32
      %c7_i32_539 = arith.constant 7 : i32
      %2068 = arith.addi %2067, %c7_i32_539 : i32
      %2069 = arith.index_cast %2068 : i32 to index
      %2070 = memref.load %arg1[%2069] : memref<940xf32, #tpu.memory_space<smem>>
      %2071 = vector.broadcast %2070 : f32 to vector<8x128xf32>
      %2072 = arith.mulf %1698, %2071 : vector<8x128xf32>
      %2073 = arith.addf %2066, %2072 : vector<8x128xf32>
      %c20_i32_540 = arith.constant 20 : i32
      %2074 = arith.addi %1859, %c20_i32_540 : i32
      %c8_i32_541 = arith.constant 8 : i32
      %2075 = arith.addi %2074, %c8_i32_541 : i32
      %2076 = arith.index_cast %2075 : i32 to index
      %2077 = memref.load %arg1[%2076] : memref<940xf32, #tpu.memory_space<smem>>
      %2078 = vector.broadcast %2077 : f32 to vector<8x128xf32>
      %2079 = arith.mulf %1777, %2078 : vector<8x128xf32>
      %2080 = arith.addf %2073, %2079 : vector<8x128xf32>
      %c20_i32_542 = arith.constant 20 : i32
      %2081 = arith.addi %1859, %c20_i32_542 : i32
      %c9_i32_543 = arith.constant 9 : i32
      %2082 = arith.addi %2081, %c9_i32_543 : i32
      %2083 = arith.index_cast %2082 : i32 to index
      %2084 = memref.load %arg1[%2083] : memref<940xf32, #tpu.memory_space<smem>>
      %2085 = vector.broadcast %2084 : f32 to vector<8x128xf32>
      %2086 = arith.mulf %1856, %2085 : vector<8x128xf32>
      %2087 = arith.addf %2080, %2086 : vector<8x128xf32>
      %c2_i32_544 = arith.constant 2 : i32
      %2088 = arith.addi %1861, %c2_i32_544 : i32
      %2089 = arith.index_cast %2088 : i32 to index
      %2090 = memref.load %arg2[%2089] : memref<102xf32, #tpu.memory_space<smem>>
      %2091 = vector.broadcast %2090 : f32 to vector<8x128xf32>
      %2092 = arith.addf %2087, %2091 : vector<8x128xf32>
      %cst_545 = arith.constant 0.000000e+00 : f32
      %2093 = vector.broadcast %cst_545 : f32 to vector<8x128xf32>
      %2094 = arith.cmpf ogt, %2092, %2093 : vector<8x128xf32>
      %2095 = math.exp %2092 : vector<8x128xf32>
      %cst_546 = arith.constant 1.000000e+00 : f32
      %2096 = vector.broadcast %cst_546 : f32 to vector<8x128xf32>
      %2097 = arith.subf %2095, %2096 : vector<8x128xf32>
      %2098 = arith.select %2094, %2092, %2097 : vector<8x128xi1>, vector<8x128xf32>
      %c30_i32_547 = arith.constant 30 : i32
      %2099 = arith.addi %1859, %c30_i32_547 : i32
      %2100 = arith.index_cast %2099 : i32 to index
      %2101 = memref.load %arg1[%2100] : memref<940xf32, #tpu.memory_space<smem>>
      %2102 = vector.broadcast %2101 : f32 to vector<8x128xf32>
      %2103 = arith.mulf %1145, %2102 : vector<8x128xf32>
      %c30_i32_548 = arith.constant 30 : i32
      %2104 = arith.addi %1859, %c30_i32_548 : i32
      %c1_i32_549 = arith.constant 1 : i32
      %2105 = arith.addi %2104, %c1_i32_549 : i32
      %2106 = arith.index_cast %2105 : i32 to index
      %2107 = memref.load %arg1[%2106] : memref<940xf32, #tpu.memory_space<smem>>
      %2108 = vector.broadcast %2107 : f32 to vector<8x128xf32>
      %2109 = arith.mulf %1224, %2108 : vector<8x128xf32>
      %2110 = arith.addf %2103, %2109 : vector<8x128xf32>
      %c30_i32_550 = arith.constant 30 : i32
      %2111 = arith.addi %1859, %c30_i32_550 : i32
      %c2_i32_551 = arith.constant 2 : i32
      %2112 = arith.addi %2111, %c2_i32_551 : i32
      %2113 = arith.index_cast %2112 : i32 to index
      %2114 = memref.load %arg1[%2113] : memref<940xf32, #tpu.memory_space<smem>>
      %2115 = vector.broadcast %2114 : f32 to vector<8x128xf32>
      %2116 = arith.mulf %1303, %2115 : vector<8x128xf32>
      %2117 = arith.addf %2110, %2116 : vector<8x128xf32>
      %c30_i32_552 = arith.constant 30 : i32
      %2118 = arith.addi %1859, %c30_i32_552 : i32
      %c3_i32_553 = arith.constant 3 : i32
      %2119 = arith.addi %2118, %c3_i32_553 : i32
      %2120 = arith.index_cast %2119 : i32 to index
      %2121 = memref.load %arg1[%2120] : memref<940xf32, #tpu.memory_space<smem>>
      %2122 = vector.broadcast %2121 : f32 to vector<8x128xf32>
      %2123 = arith.mulf %1382, %2122 : vector<8x128xf32>
      %2124 = arith.addf %2117, %2123 : vector<8x128xf32>
      %c30_i32_554 = arith.constant 30 : i32
      %2125 = arith.addi %1859, %c30_i32_554 : i32
      %c4_i32_555 = arith.constant 4 : i32
      %2126 = arith.addi %2125, %c4_i32_555 : i32
      %2127 = arith.index_cast %2126 : i32 to index
      %2128 = memref.load %arg1[%2127] : memref<940xf32, #tpu.memory_space<smem>>
      %2129 = vector.broadcast %2128 : f32 to vector<8x128xf32>
      %2130 = arith.mulf %1461, %2129 : vector<8x128xf32>
      %2131 = arith.addf %2124, %2130 : vector<8x128xf32>
      %c30_i32_556 = arith.constant 30 : i32
      %2132 = arith.addi %1859, %c30_i32_556 : i32
      %c5_i32_557 = arith.constant 5 : i32
      %2133 = arith.addi %2132, %c5_i32_557 : i32
      %2134 = arith.index_cast %2133 : i32 to index
      %2135 = memref.load %arg1[%2134] : memref<940xf32, #tpu.memory_space<smem>>
      %2136 = vector.broadcast %2135 : f32 to vector<8x128xf32>
      %2137 = arith.mulf %1540, %2136 : vector<8x128xf32>
      %2138 = arith.addf %2131, %2137 : vector<8x128xf32>
      %c30_i32_558 = arith.constant 30 : i32
      %2139 = arith.addi %1859, %c30_i32_558 : i32
      %c6_i32_559 = arith.constant 6 : i32
      %2140 = arith.addi %2139, %c6_i32_559 : i32
      %2141 = arith.index_cast %2140 : i32 to index
      %2142 = memref.load %arg1[%2141] : memref<940xf32, #tpu.memory_space<smem>>
      %2143 = vector.broadcast %2142 : f32 to vector<8x128xf32>
      %2144 = arith.mulf %1619, %2143 : vector<8x128xf32>
      %2145 = arith.addf %2138, %2144 : vector<8x128xf32>
      %c30_i32_560 = arith.constant 30 : i32
      %2146 = arith.addi %1859, %c30_i32_560 : i32
      %c7_i32_561 = arith.constant 7 : i32
      %2147 = arith.addi %2146, %c7_i32_561 : i32
      %2148 = arith.index_cast %2147 : i32 to index
      %2149 = memref.load %arg1[%2148] : memref<940xf32, #tpu.memory_space<smem>>
      %2150 = vector.broadcast %2149 : f32 to vector<8x128xf32>
      %2151 = arith.mulf %1698, %2150 : vector<8x128xf32>
      %2152 = arith.addf %2145, %2151 : vector<8x128xf32>
      %c30_i32_562 = arith.constant 30 : i32
      %2153 = arith.addi %1859, %c30_i32_562 : i32
      %c8_i32_563 = arith.constant 8 : i32
      %2154 = arith.addi %2153, %c8_i32_563 : i32
      %2155 = arith.index_cast %2154 : i32 to index
      %2156 = memref.load %arg1[%2155] : memref<940xf32, #tpu.memory_space<smem>>
      %2157 = vector.broadcast %2156 : f32 to vector<8x128xf32>
      %2158 = arith.mulf %1777, %2157 : vector<8x128xf32>
      %2159 = arith.addf %2152, %2158 : vector<8x128xf32>
      %c30_i32_564 = arith.constant 30 : i32
      %2160 = arith.addi %1859, %c30_i32_564 : i32
      %c9_i32_565 = arith.constant 9 : i32
      %2161 = arith.addi %2160, %c9_i32_565 : i32
      %2162 = arith.index_cast %2161 : i32 to index
      %2163 = memref.load %arg1[%2162] : memref<940xf32, #tpu.memory_space<smem>>
      %2164 = vector.broadcast %2163 : f32 to vector<8x128xf32>
      %2165 = arith.mulf %1856, %2164 : vector<8x128xf32>
      %2166 = arith.addf %2159, %2165 : vector<8x128xf32>
      %c3_i32_566 = arith.constant 3 : i32
      %2167 = arith.addi %1861, %c3_i32_566 : i32
      %2168 = arith.index_cast %2167 : i32 to index
      %2169 = memref.load %arg2[%2168] : memref<102xf32, #tpu.memory_space<smem>>
      %2170 = vector.broadcast %2169 : f32 to vector<8x128xf32>
      %2171 = arith.addf %2166, %2170 : vector<8x128xf32>
      %cst_567 = arith.constant 0.000000e+00 : f32
      %2172 = vector.broadcast %cst_567 : f32 to vector<8x128xf32>
      %2173 = arith.cmpf ogt, %2171, %2172 : vector<8x128xf32>
      %2174 = math.exp %2171 : vector<8x128xf32>
      %cst_568 = arith.constant 1.000000e+00 : f32
      %2175 = vector.broadcast %cst_568 : f32 to vector<8x128xf32>
      %2176 = arith.subf %2174, %2175 : vector<8x128xf32>
      %2177 = arith.select %2173, %2171, %2176 : vector<8x128xi1>, vector<8x128xf32>
      %c40_i32_569 = arith.constant 40 : i32
      %2178 = arith.addi %1859, %c40_i32_569 : i32
      %2179 = arith.index_cast %2178 : i32 to index
      %2180 = memref.load %arg1[%2179] : memref<940xf32, #tpu.memory_space<smem>>
      %2181 = vector.broadcast %2180 : f32 to vector<8x128xf32>
      %2182 = arith.mulf %1145, %2181 : vector<8x128xf32>
      %c40_i32_570 = arith.constant 40 : i32
      %2183 = arith.addi %1859, %c40_i32_570 : i32
      %c1_i32_571 = arith.constant 1 : i32
      %2184 = arith.addi %2183, %c1_i32_571 : i32
      %2185 = arith.index_cast %2184 : i32 to index
      %2186 = memref.load %arg1[%2185] : memref<940xf32, #tpu.memory_space<smem>>
      %2187 = vector.broadcast %2186 : f32 to vector<8x128xf32>
      %2188 = arith.mulf %1224, %2187 : vector<8x128xf32>
      %2189 = arith.addf %2182, %2188 : vector<8x128xf32>
      %c40_i32_572 = arith.constant 40 : i32
      %2190 = arith.addi %1859, %c40_i32_572 : i32
      %c2_i32_573 = arith.constant 2 : i32
      %2191 = arith.addi %2190, %c2_i32_573 : i32
      %2192 = arith.index_cast %2191 : i32 to index
      %2193 = memref.load %arg1[%2192] : memref<940xf32, #tpu.memory_space<smem>>
      %2194 = vector.broadcast %2193 : f32 to vector<8x128xf32>
      %2195 = arith.mulf %1303, %2194 : vector<8x128xf32>
      %2196 = arith.addf %2189, %2195 : vector<8x128xf32>
      %c40_i32_574 = arith.constant 40 : i32
      %2197 = arith.addi %1859, %c40_i32_574 : i32
      %c3_i32_575 = arith.constant 3 : i32
      %2198 = arith.addi %2197, %c3_i32_575 : i32
      %2199 = arith.index_cast %2198 : i32 to index
      %2200 = memref.load %arg1[%2199] : memref<940xf32, #tpu.memory_space<smem>>
      %2201 = vector.broadcast %2200 : f32 to vector<8x128xf32>
      %2202 = arith.mulf %1382, %2201 : vector<8x128xf32>
      %2203 = arith.addf %2196, %2202 : vector<8x128xf32>
      %c40_i32_576 = arith.constant 40 : i32
      %2204 = arith.addi %1859, %c40_i32_576 : i32
      %c4_i32_577 = arith.constant 4 : i32
      %2205 = arith.addi %2204, %c4_i32_577 : i32
      %2206 = arith.index_cast %2205 : i32 to index
      %2207 = memref.load %arg1[%2206] : memref<940xf32, #tpu.memory_space<smem>>
      %2208 = vector.broadcast %2207 : f32 to vector<8x128xf32>
      %2209 = arith.mulf %1461, %2208 : vector<8x128xf32>
      %2210 = arith.addf %2203, %2209 : vector<8x128xf32>
      %c40_i32_578 = arith.constant 40 : i32
      %2211 = arith.addi %1859, %c40_i32_578 : i32
      %c5_i32_579 = arith.constant 5 : i32
      %2212 = arith.addi %2211, %c5_i32_579 : i32
      %2213 = arith.index_cast %2212 : i32 to index
      %2214 = memref.load %arg1[%2213] : memref<940xf32, #tpu.memory_space<smem>>
      %2215 = vector.broadcast %2214 : f32 to vector<8x128xf32>
      %2216 = arith.mulf %1540, %2215 : vector<8x128xf32>
      %2217 = arith.addf %2210, %2216 : vector<8x128xf32>
      %c40_i32_580 = arith.constant 40 : i32
      %2218 = arith.addi %1859, %c40_i32_580 : i32
      %c6_i32_581 = arith.constant 6 : i32
      %2219 = arith.addi %2218, %c6_i32_581 : i32
      %2220 = arith.index_cast %2219 : i32 to index
      %2221 = memref.load %arg1[%2220] : memref<940xf32, #tpu.memory_space<smem>>
      %2222 = vector.broadcast %2221 : f32 to vector<8x128xf32>
      %2223 = arith.mulf %1619, %2222 : vector<8x128xf32>
      %2224 = arith.addf %2217, %2223 : vector<8x128xf32>
      %c40_i32_582 = arith.constant 40 : i32
      %2225 = arith.addi %1859, %c40_i32_582 : i32
      %c7_i32_583 = arith.constant 7 : i32
      %2226 = arith.addi %2225, %c7_i32_583 : i32
      %2227 = arith.index_cast %2226 : i32 to index
      %2228 = memref.load %arg1[%2227] : memref<940xf32, #tpu.memory_space<smem>>
      %2229 = vector.broadcast %2228 : f32 to vector<8x128xf32>
      %2230 = arith.mulf %1698, %2229 : vector<8x128xf32>
      %2231 = arith.addf %2224, %2230 : vector<8x128xf32>
      %c40_i32_584 = arith.constant 40 : i32
      %2232 = arith.addi %1859, %c40_i32_584 : i32
      %c8_i32_585 = arith.constant 8 : i32
      %2233 = arith.addi %2232, %c8_i32_585 : i32
      %2234 = arith.index_cast %2233 : i32 to index
      %2235 = memref.load %arg1[%2234] : memref<940xf32, #tpu.memory_space<smem>>
      %2236 = vector.broadcast %2235 : f32 to vector<8x128xf32>
      %2237 = arith.mulf %1777, %2236 : vector<8x128xf32>
      %2238 = arith.addf %2231, %2237 : vector<8x128xf32>
      %c40_i32_586 = arith.constant 40 : i32
      %2239 = arith.addi %1859, %c40_i32_586 : i32
      %c9_i32_587 = arith.constant 9 : i32
      %2240 = arith.addi %2239, %c9_i32_587 : i32
      %2241 = arith.index_cast %2240 : i32 to index
      %2242 = memref.load %arg1[%2241] : memref<940xf32, #tpu.memory_space<smem>>
      %2243 = vector.broadcast %2242 : f32 to vector<8x128xf32>
      %2244 = arith.mulf %1856, %2243 : vector<8x128xf32>
      %2245 = arith.addf %2238, %2244 : vector<8x128xf32>
      %c4_i32_588 = arith.constant 4 : i32
      %2246 = arith.addi %1861, %c4_i32_588 : i32
      %2247 = arith.index_cast %2246 : i32 to index
      %2248 = memref.load %arg2[%2247] : memref<102xf32, #tpu.memory_space<smem>>
      %2249 = vector.broadcast %2248 : f32 to vector<8x128xf32>
      %2250 = arith.addf %2245, %2249 : vector<8x128xf32>
      %cst_589 = arith.constant 0.000000e+00 : f32
      %2251 = vector.broadcast %cst_589 : f32 to vector<8x128xf32>
      %2252 = arith.cmpf ogt, %2250, %2251 : vector<8x128xf32>
      %2253 = math.exp %2250 : vector<8x128xf32>
      %cst_590 = arith.constant 1.000000e+00 : f32
      %2254 = vector.broadcast %cst_590 : f32 to vector<8x128xf32>
      %2255 = arith.subf %2253, %2254 : vector<8x128xf32>
      %2256 = arith.select %2252, %2250, %2255 : vector<8x128xi1>, vector<8x128xf32>
      %c50_i32_591 = arith.constant 50 : i32
      %2257 = arith.addi %1859, %c50_i32_591 : i32
      %2258 = arith.index_cast %2257 : i32 to index
      %2259 = memref.load %arg1[%2258] : memref<940xf32, #tpu.memory_space<smem>>
      %2260 = vector.broadcast %2259 : f32 to vector<8x128xf32>
      %2261 = arith.mulf %1145, %2260 : vector<8x128xf32>
      %c50_i32_592 = arith.constant 50 : i32
      %2262 = arith.addi %1859, %c50_i32_592 : i32
      %c1_i32_593 = arith.constant 1 : i32
      %2263 = arith.addi %2262, %c1_i32_593 : i32
      %2264 = arith.index_cast %2263 : i32 to index
      %2265 = memref.load %arg1[%2264] : memref<940xf32, #tpu.memory_space<smem>>
      %2266 = vector.broadcast %2265 : f32 to vector<8x128xf32>
      %2267 = arith.mulf %1224, %2266 : vector<8x128xf32>
      %2268 = arith.addf %2261, %2267 : vector<8x128xf32>
      %c50_i32_594 = arith.constant 50 : i32
      %2269 = arith.addi %1859, %c50_i32_594 : i32
      %c2_i32_595 = arith.constant 2 : i32
      %2270 = arith.addi %2269, %c2_i32_595 : i32
      %2271 = arith.index_cast %2270 : i32 to index
      %2272 = memref.load %arg1[%2271] : memref<940xf32, #tpu.memory_space<smem>>
      %2273 = vector.broadcast %2272 : f32 to vector<8x128xf32>
      %2274 = arith.mulf %1303, %2273 : vector<8x128xf32>
      %2275 = arith.addf %2268, %2274 : vector<8x128xf32>
      %c50_i32_596 = arith.constant 50 : i32
      %2276 = arith.addi %1859, %c50_i32_596 : i32
      %c3_i32_597 = arith.constant 3 : i32
      %2277 = arith.addi %2276, %c3_i32_597 : i32
      %2278 = arith.index_cast %2277 : i32 to index
      %2279 = memref.load %arg1[%2278] : memref<940xf32, #tpu.memory_space<smem>>
      %2280 = vector.broadcast %2279 : f32 to vector<8x128xf32>
      %2281 = arith.mulf %1382, %2280 : vector<8x128xf32>
      %2282 = arith.addf %2275, %2281 : vector<8x128xf32>
      %c50_i32_598 = arith.constant 50 : i32
      %2283 = arith.addi %1859, %c50_i32_598 : i32
      %c4_i32_599 = arith.constant 4 : i32
      %2284 = arith.addi %2283, %c4_i32_599 : i32
      %2285 = arith.index_cast %2284 : i32 to index
      %2286 = memref.load %arg1[%2285] : memref<940xf32, #tpu.memory_space<smem>>
      %2287 = vector.broadcast %2286 : f32 to vector<8x128xf32>
      %2288 = arith.mulf %1461, %2287 : vector<8x128xf32>
      %2289 = arith.addf %2282, %2288 : vector<8x128xf32>
      %c50_i32_600 = arith.constant 50 : i32
      %2290 = arith.addi %1859, %c50_i32_600 : i32
      %c5_i32_601 = arith.constant 5 : i32
      %2291 = arith.addi %2290, %c5_i32_601 : i32
      %2292 = arith.index_cast %2291 : i32 to index
      %2293 = memref.load %arg1[%2292] : memref<940xf32, #tpu.memory_space<smem>>
      %2294 = vector.broadcast %2293 : f32 to vector<8x128xf32>
      %2295 = arith.mulf %1540, %2294 : vector<8x128xf32>
      %2296 = arith.addf %2289, %2295 : vector<8x128xf32>
      %c50_i32_602 = arith.constant 50 : i32
      %2297 = arith.addi %1859, %c50_i32_602 : i32
      %c6_i32_603 = arith.constant 6 : i32
      %2298 = arith.addi %2297, %c6_i32_603 : i32
      %2299 = arith.index_cast %2298 : i32 to index
      %2300 = memref.load %arg1[%2299] : memref<940xf32, #tpu.memory_space<smem>>
      %2301 = vector.broadcast %2300 : f32 to vector<8x128xf32>
      %2302 = arith.mulf %1619, %2301 : vector<8x128xf32>
      %2303 = arith.addf %2296, %2302 : vector<8x128xf32>
      %c50_i32_604 = arith.constant 50 : i32
      %2304 = arith.addi %1859, %c50_i32_604 : i32
      %c7_i32_605 = arith.constant 7 : i32
      %2305 = arith.addi %2304, %c7_i32_605 : i32
      %2306 = arith.index_cast %2305 : i32 to index
      %2307 = memref.load %arg1[%2306] : memref<940xf32, #tpu.memory_space<smem>>
      %2308 = vector.broadcast %2307 : f32 to vector<8x128xf32>
      %2309 = arith.mulf %1698, %2308 : vector<8x128xf32>
      %2310 = arith.addf %2303, %2309 : vector<8x128xf32>
      %c50_i32_606 = arith.constant 50 : i32
      %2311 = arith.addi %1859, %c50_i32_606 : i32
      %c8_i32_607 = arith.constant 8 : i32
      %2312 = arith.addi %2311, %c8_i32_607 : i32
      %2313 = arith.index_cast %2312 : i32 to index
      %2314 = memref.load %arg1[%2313] : memref<940xf32, #tpu.memory_space<smem>>
      %2315 = vector.broadcast %2314 : f32 to vector<8x128xf32>
      %2316 = arith.mulf %1777, %2315 : vector<8x128xf32>
      %2317 = arith.addf %2310, %2316 : vector<8x128xf32>
      %c50_i32_608 = arith.constant 50 : i32
      %2318 = arith.addi %1859, %c50_i32_608 : i32
      %c9_i32_609 = arith.constant 9 : i32
      %2319 = arith.addi %2318, %c9_i32_609 : i32
      %2320 = arith.index_cast %2319 : i32 to index
      %2321 = memref.load %arg1[%2320] : memref<940xf32, #tpu.memory_space<smem>>
      %2322 = vector.broadcast %2321 : f32 to vector<8x128xf32>
      %2323 = arith.mulf %1856, %2322 : vector<8x128xf32>
      %2324 = arith.addf %2317, %2323 : vector<8x128xf32>
      %c5_i32_610 = arith.constant 5 : i32
      %2325 = arith.addi %1861, %c5_i32_610 : i32
      %2326 = arith.index_cast %2325 : i32 to index
      %2327 = memref.load %arg2[%2326] : memref<102xf32, #tpu.memory_space<smem>>
      %2328 = vector.broadcast %2327 : f32 to vector<8x128xf32>
      %2329 = arith.addf %2324, %2328 : vector<8x128xf32>
      %cst_611 = arith.constant 0.000000e+00 : f32
      %2330 = vector.broadcast %cst_611 : f32 to vector<8x128xf32>
      %2331 = arith.cmpf ogt, %2329, %2330 : vector<8x128xf32>
      %2332 = math.exp %2329 : vector<8x128xf32>
      %cst_612 = arith.constant 1.000000e+00 : f32
      %2333 = vector.broadcast %cst_612 : f32 to vector<8x128xf32>
      %2334 = arith.subf %2332, %2333 : vector<8x128xf32>
      %2335 = arith.select %2331, %2329, %2334 : vector<8x128xi1>, vector<8x128xf32>
      %c60_i32_613 = arith.constant 60 : i32
      %2336 = arith.addi %1859, %c60_i32_613 : i32
      %2337 = arith.index_cast %2336 : i32 to index
      %2338 = memref.load %arg1[%2337] : memref<940xf32, #tpu.memory_space<smem>>
      %2339 = vector.broadcast %2338 : f32 to vector<8x128xf32>
      %2340 = arith.mulf %1145, %2339 : vector<8x128xf32>
      %c60_i32_614 = arith.constant 60 : i32
      %2341 = arith.addi %1859, %c60_i32_614 : i32
      %c1_i32_615 = arith.constant 1 : i32
      %2342 = arith.addi %2341, %c1_i32_615 : i32
      %2343 = arith.index_cast %2342 : i32 to index
      %2344 = memref.load %arg1[%2343] : memref<940xf32, #tpu.memory_space<smem>>
      %2345 = vector.broadcast %2344 : f32 to vector<8x128xf32>
      %2346 = arith.mulf %1224, %2345 : vector<8x128xf32>
      %2347 = arith.addf %2340, %2346 : vector<8x128xf32>
      %c60_i32_616 = arith.constant 60 : i32
      %2348 = arith.addi %1859, %c60_i32_616 : i32
      %c2_i32_617 = arith.constant 2 : i32
      %2349 = arith.addi %2348, %c2_i32_617 : i32
      %2350 = arith.index_cast %2349 : i32 to index
      %2351 = memref.load %arg1[%2350] : memref<940xf32, #tpu.memory_space<smem>>
      %2352 = vector.broadcast %2351 : f32 to vector<8x128xf32>
      %2353 = arith.mulf %1303, %2352 : vector<8x128xf32>
      %2354 = arith.addf %2347, %2353 : vector<8x128xf32>
      %c60_i32_618 = arith.constant 60 : i32
      %2355 = arith.addi %1859, %c60_i32_618 : i32
      %c3_i32_619 = arith.constant 3 : i32
      %2356 = arith.addi %2355, %c3_i32_619 : i32
      %2357 = arith.index_cast %2356 : i32 to index
      %2358 = memref.load %arg1[%2357] : memref<940xf32, #tpu.memory_space<smem>>
      %2359 = vector.broadcast %2358 : f32 to vector<8x128xf32>
      %2360 = arith.mulf %1382, %2359 : vector<8x128xf32>
      %2361 = arith.addf %2354, %2360 : vector<8x128xf32>
      %c60_i32_620 = arith.constant 60 : i32
      %2362 = arith.addi %1859, %c60_i32_620 : i32
      %c4_i32_621 = arith.constant 4 : i32
      %2363 = arith.addi %2362, %c4_i32_621 : i32
      %2364 = arith.index_cast %2363 : i32 to index
      %2365 = memref.load %arg1[%2364] : memref<940xf32, #tpu.memory_space<smem>>
      %2366 = vector.broadcast %2365 : f32 to vector<8x128xf32>
      %2367 = arith.mulf %1461, %2366 : vector<8x128xf32>
      %2368 = arith.addf %2361, %2367 : vector<8x128xf32>
      %c60_i32_622 = arith.constant 60 : i32
      %2369 = arith.addi %1859, %c60_i32_622 : i32
      %c5_i32_623 = arith.constant 5 : i32
      %2370 = arith.addi %2369, %c5_i32_623 : i32
      %2371 = arith.index_cast %2370 : i32 to index
      %2372 = memref.load %arg1[%2371] : memref<940xf32, #tpu.memory_space<smem>>
      %2373 = vector.broadcast %2372 : f32 to vector<8x128xf32>
      %2374 = arith.mulf %1540, %2373 : vector<8x128xf32>
      %2375 = arith.addf %2368, %2374 : vector<8x128xf32>
      %c60_i32_624 = arith.constant 60 : i32
      %2376 = arith.addi %1859, %c60_i32_624 : i32
      %c6_i32_625 = arith.constant 6 : i32
      %2377 = arith.addi %2376, %c6_i32_625 : i32
      %2378 = arith.index_cast %2377 : i32 to index
      %2379 = memref.load %arg1[%2378] : memref<940xf32, #tpu.memory_space<smem>>
      %2380 = vector.broadcast %2379 : f32 to vector<8x128xf32>
      %2381 = arith.mulf %1619, %2380 : vector<8x128xf32>
      %2382 = arith.addf %2375, %2381 : vector<8x128xf32>
      %c60_i32_626 = arith.constant 60 : i32
      %2383 = arith.addi %1859, %c60_i32_626 : i32
      %c7_i32_627 = arith.constant 7 : i32
      %2384 = arith.addi %2383, %c7_i32_627 : i32
      %2385 = arith.index_cast %2384 : i32 to index
      %2386 = memref.load %arg1[%2385] : memref<940xf32, #tpu.memory_space<smem>>
      %2387 = vector.broadcast %2386 : f32 to vector<8x128xf32>
      %2388 = arith.mulf %1698, %2387 : vector<8x128xf32>
      %2389 = arith.addf %2382, %2388 : vector<8x128xf32>
      %c60_i32_628 = arith.constant 60 : i32
      %2390 = arith.addi %1859, %c60_i32_628 : i32
      %c8_i32_629 = arith.constant 8 : i32
      %2391 = arith.addi %2390, %c8_i32_629 : i32
      %2392 = arith.index_cast %2391 : i32 to index
      %2393 = memref.load %arg1[%2392] : memref<940xf32, #tpu.memory_space<smem>>
      %2394 = vector.broadcast %2393 : f32 to vector<8x128xf32>
      %2395 = arith.mulf %1777, %2394 : vector<8x128xf32>
      %2396 = arith.addf %2389, %2395 : vector<8x128xf32>
      %c60_i32_630 = arith.constant 60 : i32
      %2397 = arith.addi %1859, %c60_i32_630 : i32
      %c9_i32_631 = arith.constant 9 : i32
      %2398 = arith.addi %2397, %c9_i32_631 : i32
      %2399 = arith.index_cast %2398 : i32 to index
      %2400 = memref.load %arg1[%2399] : memref<940xf32, #tpu.memory_space<smem>>
      %2401 = vector.broadcast %2400 : f32 to vector<8x128xf32>
      %2402 = arith.mulf %1856, %2401 : vector<8x128xf32>
      %2403 = arith.addf %2396, %2402 : vector<8x128xf32>
      %c6_i32_632 = arith.constant 6 : i32
      %2404 = arith.addi %1861, %c6_i32_632 : i32
      %2405 = arith.index_cast %2404 : i32 to index
      %2406 = memref.load %arg2[%2405] : memref<102xf32, #tpu.memory_space<smem>>
      %2407 = vector.broadcast %2406 : f32 to vector<8x128xf32>
      %2408 = arith.addf %2403, %2407 : vector<8x128xf32>
      %cst_633 = arith.constant 0.000000e+00 : f32
      %2409 = vector.broadcast %cst_633 : f32 to vector<8x128xf32>
      %2410 = arith.cmpf ogt, %2408, %2409 : vector<8x128xf32>
      %2411 = math.exp %2408 : vector<8x128xf32>
      %cst_634 = arith.constant 1.000000e+00 : f32
      %2412 = vector.broadcast %cst_634 : f32 to vector<8x128xf32>
      %2413 = arith.subf %2411, %2412 : vector<8x128xf32>
      %2414 = arith.select %2410, %2408, %2413 : vector<8x128xi1>, vector<8x128xf32>
      %c70_i32_635 = arith.constant 70 : i32
      %2415 = arith.addi %1859, %c70_i32_635 : i32
      %2416 = arith.index_cast %2415 : i32 to index
      %2417 = memref.load %arg1[%2416] : memref<940xf32, #tpu.memory_space<smem>>
      %2418 = vector.broadcast %2417 : f32 to vector<8x128xf32>
      %2419 = arith.mulf %1145, %2418 : vector<8x128xf32>
      %c70_i32_636 = arith.constant 70 : i32
      %2420 = arith.addi %1859, %c70_i32_636 : i32
      %c1_i32_637 = arith.constant 1 : i32
      %2421 = arith.addi %2420, %c1_i32_637 : i32
      %2422 = arith.index_cast %2421 : i32 to index
      %2423 = memref.load %arg1[%2422] : memref<940xf32, #tpu.memory_space<smem>>
      %2424 = vector.broadcast %2423 : f32 to vector<8x128xf32>
      %2425 = arith.mulf %1224, %2424 : vector<8x128xf32>
      %2426 = arith.addf %2419, %2425 : vector<8x128xf32>
      %c70_i32_638 = arith.constant 70 : i32
      %2427 = arith.addi %1859, %c70_i32_638 : i32
      %c2_i32_639 = arith.constant 2 : i32
      %2428 = arith.addi %2427, %c2_i32_639 : i32
      %2429 = arith.index_cast %2428 : i32 to index
      %2430 = memref.load %arg1[%2429] : memref<940xf32, #tpu.memory_space<smem>>
      %2431 = vector.broadcast %2430 : f32 to vector<8x128xf32>
      %2432 = arith.mulf %1303, %2431 : vector<8x128xf32>
      %2433 = arith.addf %2426, %2432 : vector<8x128xf32>
      %c70_i32_640 = arith.constant 70 : i32
      %2434 = arith.addi %1859, %c70_i32_640 : i32
      %c3_i32_641 = arith.constant 3 : i32
      %2435 = arith.addi %2434, %c3_i32_641 : i32
      %2436 = arith.index_cast %2435 : i32 to index
      %2437 = memref.load %arg1[%2436] : memref<940xf32, #tpu.memory_space<smem>>
      %2438 = vector.broadcast %2437 : f32 to vector<8x128xf32>
      %2439 = arith.mulf %1382, %2438 : vector<8x128xf32>
      %2440 = arith.addf %2433, %2439 : vector<8x128xf32>
      %c70_i32_642 = arith.constant 70 : i32
      %2441 = arith.addi %1859, %c70_i32_642 : i32
      %c4_i32_643 = arith.constant 4 : i32
      %2442 = arith.addi %2441, %c4_i32_643 : i32
      %2443 = arith.index_cast %2442 : i32 to index
      %2444 = memref.load %arg1[%2443] : memref<940xf32, #tpu.memory_space<smem>>
      %2445 = vector.broadcast %2444 : f32 to vector<8x128xf32>
      %2446 = arith.mulf %1461, %2445 : vector<8x128xf32>
      %2447 = arith.addf %2440, %2446 : vector<8x128xf32>
      %c70_i32_644 = arith.constant 70 : i32
      %2448 = arith.addi %1859, %c70_i32_644 : i32
      %c5_i32_645 = arith.constant 5 : i32
      %2449 = arith.addi %2448, %c5_i32_645 : i32
      %2450 = arith.index_cast %2449 : i32 to index
      %2451 = memref.load %arg1[%2450] : memref<940xf32, #tpu.memory_space<smem>>
      %2452 = vector.broadcast %2451 : f32 to vector<8x128xf32>
      %2453 = arith.mulf %1540, %2452 : vector<8x128xf32>
      %2454 = arith.addf %2447, %2453 : vector<8x128xf32>
      %c70_i32_646 = arith.constant 70 : i32
      %2455 = arith.addi %1859, %c70_i32_646 : i32
      %c6_i32_647 = arith.constant 6 : i32
      %2456 = arith.addi %2455, %c6_i32_647 : i32
      %2457 = arith.index_cast %2456 : i32 to index
      %2458 = memref.load %arg1[%2457] : memref<940xf32, #tpu.memory_space<smem>>
      %2459 = vector.broadcast %2458 : f32 to vector<8x128xf32>
      %2460 = arith.mulf %1619, %2459 : vector<8x128xf32>
      %2461 = arith.addf %2454, %2460 : vector<8x128xf32>
      %c70_i32_648 = arith.constant 70 : i32
      %2462 = arith.addi %1859, %c70_i32_648 : i32
      %c7_i32_649 = arith.constant 7 : i32
      %2463 = arith.addi %2462, %c7_i32_649 : i32
      %2464 = arith.index_cast %2463 : i32 to index
      %2465 = memref.load %arg1[%2464] : memref<940xf32, #tpu.memory_space<smem>>
      %2466 = vector.broadcast %2465 : f32 to vector<8x128xf32>
      %2467 = arith.mulf %1698, %2466 : vector<8x128xf32>
      %2468 = arith.addf %2461, %2467 : vector<8x128xf32>
      %c70_i32_650 = arith.constant 70 : i32
      %2469 = arith.addi %1859, %c70_i32_650 : i32
      %c8_i32_651 = arith.constant 8 : i32
      %2470 = arith.addi %2469, %c8_i32_651 : i32
      %2471 = arith.index_cast %2470 : i32 to index
      %2472 = memref.load %arg1[%2471] : memref<940xf32, #tpu.memory_space<smem>>
      %2473 = vector.broadcast %2472 : f32 to vector<8x128xf32>
      %2474 = arith.mulf %1777, %2473 : vector<8x128xf32>
      %2475 = arith.addf %2468, %2474 : vector<8x128xf32>
      %c70_i32_652 = arith.constant 70 : i32
      %2476 = arith.addi %1859, %c70_i32_652 : i32
      %c9_i32_653 = arith.constant 9 : i32
      %2477 = arith.addi %2476, %c9_i32_653 : i32
      %2478 = arith.index_cast %2477 : i32 to index
      %2479 = memref.load %arg1[%2478] : memref<940xf32, #tpu.memory_space<smem>>
      %2480 = vector.broadcast %2479 : f32 to vector<8x128xf32>
      %2481 = arith.mulf %1856, %2480 : vector<8x128xf32>
      %2482 = arith.addf %2475, %2481 : vector<8x128xf32>
      %c7_i32_654 = arith.constant 7 : i32
      %2483 = arith.addi %1861, %c7_i32_654 : i32
      %2484 = arith.index_cast %2483 : i32 to index
      %2485 = memref.load %arg2[%2484] : memref<102xf32, #tpu.memory_space<smem>>
      %2486 = vector.broadcast %2485 : f32 to vector<8x128xf32>
      %2487 = arith.addf %2482, %2486 : vector<8x128xf32>
      %cst_655 = arith.constant 0.000000e+00 : f32
      %2488 = vector.broadcast %cst_655 : f32 to vector<8x128xf32>
      %2489 = arith.cmpf ogt, %2487, %2488 : vector<8x128xf32>
      %2490 = math.exp %2487 : vector<8x128xf32>
      %cst_656 = arith.constant 1.000000e+00 : f32
      %2491 = vector.broadcast %cst_656 : f32 to vector<8x128xf32>
      %2492 = arith.subf %2490, %2491 : vector<8x128xf32>
      %2493 = arith.select %2489, %2487, %2492 : vector<8x128xi1>, vector<8x128xf32>
      %c80_i32_657 = arith.constant 80 : i32
      %2494 = arith.addi %1859, %c80_i32_657 : i32
      %2495 = arith.index_cast %2494 : i32 to index
      %2496 = memref.load %arg1[%2495] : memref<940xf32, #tpu.memory_space<smem>>
      %2497 = vector.broadcast %2496 : f32 to vector<8x128xf32>
      %2498 = arith.mulf %1145, %2497 : vector<8x128xf32>
      %c80_i32_658 = arith.constant 80 : i32
      %2499 = arith.addi %1859, %c80_i32_658 : i32
      %c1_i32_659 = arith.constant 1 : i32
      %2500 = arith.addi %2499, %c1_i32_659 : i32
      %2501 = arith.index_cast %2500 : i32 to index
      %2502 = memref.load %arg1[%2501] : memref<940xf32, #tpu.memory_space<smem>>
      %2503 = vector.broadcast %2502 : f32 to vector<8x128xf32>
      %2504 = arith.mulf %1224, %2503 : vector<8x128xf32>
      %2505 = arith.addf %2498, %2504 : vector<8x128xf32>
      %c80_i32_660 = arith.constant 80 : i32
      %2506 = arith.addi %1859, %c80_i32_660 : i32
      %c2_i32_661 = arith.constant 2 : i32
      %2507 = arith.addi %2506, %c2_i32_661 : i32
      %2508 = arith.index_cast %2507 : i32 to index
      %2509 = memref.load %arg1[%2508] : memref<940xf32, #tpu.memory_space<smem>>
      %2510 = vector.broadcast %2509 : f32 to vector<8x128xf32>
      %2511 = arith.mulf %1303, %2510 : vector<8x128xf32>
      %2512 = arith.addf %2505, %2511 : vector<8x128xf32>
      %c80_i32_662 = arith.constant 80 : i32
      %2513 = arith.addi %1859, %c80_i32_662 : i32
      %c3_i32_663 = arith.constant 3 : i32
      %2514 = arith.addi %2513, %c3_i32_663 : i32
      %2515 = arith.index_cast %2514 : i32 to index
      %2516 = memref.load %arg1[%2515] : memref<940xf32, #tpu.memory_space<smem>>
      %2517 = vector.broadcast %2516 : f32 to vector<8x128xf32>
      %2518 = arith.mulf %1382, %2517 : vector<8x128xf32>
      %2519 = arith.addf %2512, %2518 : vector<8x128xf32>
      %c80_i32_664 = arith.constant 80 : i32
      %2520 = arith.addi %1859, %c80_i32_664 : i32
      %c4_i32_665 = arith.constant 4 : i32
      %2521 = arith.addi %2520, %c4_i32_665 : i32
      %2522 = arith.index_cast %2521 : i32 to index
      %2523 = memref.load %arg1[%2522] : memref<940xf32, #tpu.memory_space<smem>>
      %2524 = vector.broadcast %2523 : f32 to vector<8x128xf32>
      %2525 = arith.mulf %1461, %2524 : vector<8x128xf32>
      %2526 = arith.addf %2519, %2525 : vector<8x128xf32>
      %c80_i32_666 = arith.constant 80 : i32
      %2527 = arith.addi %1859, %c80_i32_666 : i32
      %c5_i32_667 = arith.constant 5 : i32
      %2528 = arith.addi %2527, %c5_i32_667 : i32
      %2529 = arith.index_cast %2528 : i32 to index
      %2530 = memref.load %arg1[%2529] : memref<940xf32, #tpu.memory_space<smem>>
      %2531 = vector.broadcast %2530 : f32 to vector<8x128xf32>
      %2532 = arith.mulf %1540, %2531 : vector<8x128xf32>
      %2533 = arith.addf %2526, %2532 : vector<8x128xf32>
      %c80_i32_668 = arith.constant 80 : i32
      %2534 = arith.addi %1859, %c80_i32_668 : i32
      %c6_i32_669 = arith.constant 6 : i32
      %2535 = arith.addi %2534, %c6_i32_669 : i32
      %2536 = arith.index_cast %2535 : i32 to index
      %2537 = memref.load %arg1[%2536] : memref<940xf32, #tpu.memory_space<smem>>
      %2538 = vector.broadcast %2537 : f32 to vector<8x128xf32>
      %2539 = arith.mulf %1619, %2538 : vector<8x128xf32>
      %2540 = arith.addf %2533, %2539 : vector<8x128xf32>
      %c80_i32_670 = arith.constant 80 : i32
      %2541 = arith.addi %1859, %c80_i32_670 : i32
      %c7_i32_671 = arith.constant 7 : i32
      %2542 = arith.addi %2541, %c7_i32_671 : i32
      %2543 = arith.index_cast %2542 : i32 to index
      %2544 = memref.load %arg1[%2543] : memref<940xf32, #tpu.memory_space<smem>>
      %2545 = vector.broadcast %2544 : f32 to vector<8x128xf32>
      %2546 = arith.mulf %1698, %2545 : vector<8x128xf32>
      %2547 = arith.addf %2540, %2546 : vector<8x128xf32>
      %c80_i32_672 = arith.constant 80 : i32
      %2548 = arith.addi %1859, %c80_i32_672 : i32
      %c8_i32_673 = arith.constant 8 : i32
      %2549 = arith.addi %2548, %c8_i32_673 : i32
      %2550 = arith.index_cast %2549 : i32 to index
      %2551 = memref.load %arg1[%2550] : memref<940xf32, #tpu.memory_space<smem>>
      %2552 = vector.broadcast %2551 : f32 to vector<8x128xf32>
      %2553 = arith.mulf %1777, %2552 : vector<8x128xf32>
      %2554 = arith.addf %2547, %2553 : vector<8x128xf32>
      %c80_i32_674 = arith.constant 80 : i32
      %2555 = arith.addi %1859, %c80_i32_674 : i32
      %c9_i32_675 = arith.constant 9 : i32
      %2556 = arith.addi %2555, %c9_i32_675 : i32
      %2557 = arith.index_cast %2556 : i32 to index
      %2558 = memref.load %arg1[%2557] : memref<940xf32, #tpu.memory_space<smem>>
      %2559 = vector.broadcast %2558 : f32 to vector<8x128xf32>
      %2560 = arith.mulf %1856, %2559 : vector<8x128xf32>
      %2561 = arith.addf %2554, %2560 : vector<8x128xf32>
      %c8_i32_676 = arith.constant 8 : i32
      %2562 = arith.addi %1861, %c8_i32_676 : i32
      %2563 = arith.index_cast %2562 : i32 to index
      %2564 = memref.load %arg2[%2563] : memref<102xf32, #tpu.memory_space<smem>>
      %2565 = vector.broadcast %2564 : f32 to vector<8x128xf32>
      %2566 = arith.addf %2561, %2565 : vector<8x128xf32>
      %cst_677 = arith.constant 0.000000e+00 : f32
      %2567 = vector.broadcast %cst_677 : f32 to vector<8x128xf32>
      %2568 = arith.cmpf ogt, %2566, %2567 : vector<8x128xf32>
      %2569 = math.exp %2566 : vector<8x128xf32>
      %cst_678 = arith.constant 1.000000e+00 : f32
      %2570 = vector.broadcast %cst_678 : f32 to vector<8x128xf32>
      %2571 = arith.subf %2569, %2570 : vector<8x128xf32>
      %2572 = arith.select %2568, %2566, %2571 : vector<8x128xi1>, vector<8x128xf32>
      %c90_i32_679 = arith.constant 90 : i32
      %2573 = arith.addi %1859, %c90_i32_679 : i32
      %2574 = arith.index_cast %2573 : i32 to index
      %2575 = memref.load %arg1[%2574] : memref<940xf32, #tpu.memory_space<smem>>
      %2576 = vector.broadcast %2575 : f32 to vector<8x128xf32>
      %2577 = arith.mulf %1145, %2576 : vector<8x128xf32>
      %c90_i32_680 = arith.constant 90 : i32
      %2578 = arith.addi %1859, %c90_i32_680 : i32
      %c1_i32_681 = arith.constant 1 : i32
      %2579 = arith.addi %2578, %c1_i32_681 : i32
      %2580 = arith.index_cast %2579 : i32 to index
      %2581 = memref.load %arg1[%2580] : memref<940xf32, #tpu.memory_space<smem>>
      %2582 = vector.broadcast %2581 : f32 to vector<8x128xf32>
      %2583 = arith.mulf %1224, %2582 : vector<8x128xf32>
      %2584 = arith.addf %2577, %2583 : vector<8x128xf32>
      %c90_i32_682 = arith.constant 90 : i32
      %2585 = arith.addi %1859, %c90_i32_682 : i32
      %c2_i32_683 = arith.constant 2 : i32
      %2586 = arith.addi %2585, %c2_i32_683 : i32
      %2587 = arith.index_cast %2586 : i32 to index
      %2588 = memref.load %arg1[%2587] : memref<940xf32, #tpu.memory_space<smem>>
      %2589 = vector.broadcast %2588 : f32 to vector<8x128xf32>
      %2590 = arith.mulf %1303, %2589 : vector<8x128xf32>
      %2591 = arith.addf %2584, %2590 : vector<8x128xf32>
      %c90_i32_684 = arith.constant 90 : i32
      %2592 = arith.addi %1859, %c90_i32_684 : i32
      %c3_i32_685 = arith.constant 3 : i32
      %2593 = arith.addi %2592, %c3_i32_685 : i32
      %2594 = arith.index_cast %2593 : i32 to index
      %2595 = memref.load %arg1[%2594] : memref<940xf32, #tpu.memory_space<smem>>
      %2596 = vector.broadcast %2595 : f32 to vector<8x128xf32>
      %2597 = arith.mulf %1382, %2596 : vector<8x128xf32>
      %2598 = arith.addf %2591, %2597 : vector<8x128xf32>
      %c90_i32_686 = arith.constant 90 : i32
      %2599 = arith.addi %1859, %c90_i32_686 : i32
      %c4_i32_687 = arith.constant 4 : i32
      %2600 = arith.addi %2599, %c4_i32_687 : i32
      %2601 = arith.index_cast %2600 : i32 to index
      %2602 = memref.load %arg1[%2601] : memref<940xf32, #tpu.memory_space<smem>>
      %2603 = vector.broadcast %2602 : f32 to vector<8x128xf32>
      %2604 = arith.mulf %1461, %2603 : vector<8x128xf32>
      %2605 = arith.addf %2598, %2604 : vector<8x128xf32>
      %c90_i32_688 = arith.constant 90 : i32
      %2606 = arith.addi %1859, %c90_i32_688 : i32
      %c5_i32_689 = arith.constant 5 : i32
      %2607 = arith.addi %2606, %c5_i32_689 : i32
      %2608 = arith.index_cast %2607 : i32 to index
      %2609 = memref.load %arg1[%2608] : memref<940xf32, #tpu.memory_space<smem>>
      %2610 = vector.broadcast %2609 : f32 to vector<8x128xf32>
      %2611 = arith.mulf %1540, %2610 : vector<8x128xf32>
      %2612 = arith.addf %2605, %2611 : vector<8x128xf32>
      %c90_i32_690 = arith.constant 90 : i32
      %2613 = arith.addi %1859, %c90_i32_690 : i32
      %c6_i32_691 = arith.constant 6 : i32
      %2614 = arith.addi %2613, %c6_i32_691 : i32
      %2615 = arith.index_cast %2614 : i32 to index
      %2616 = memref.load %arg1[%2615] : memref<940xf32, #tpu.memory_space<smem>>
      %2617 = vector.broadcast %2616 : f32 to vector<8x128xf32>
      %2618 = arith.mulf %1619, %2617 : vector<8x128xf32>
      %2619 = arith.addf %2612, %2618 : vector<8x128xf32>
      %c90_i32_692 = arith.constant 90 : i32
      %2620 = arith.addi %1859, %c90_i32_692 : i32
      %c7_i32_693 = arith.constant 7 : i32
      %2621 = arith.addi %2620, %c7_i32_693 : i32
      %2622 = arith.index_cast %2621 : i32 to index
      %2623 = memref.load %arg1[%2622] : memref<940xf32, #tpu.memory_space<smem>>
      %2624 = vector.broadcast %2623 : f32 to vector<8x128xf32>
      %2625 = arith.mulf %1698, %2624 : vector<8x128xf32>
      %2626 = arith.addf %2619, %2625 : vector<8x128xf32>
      %c90_i32_694 = arith.constant 90 : i32
      %2627 = arith.addi %1859, %c90_i32_694 : i32
      %c8_i32_695 = arith.constant 8 : i32
      %2628 = arith.addi %2627, %c8_i32_695 : i32
      %2629 = arith.index_cast %2628 : i32 to index
      %2630 = memref.load %arg1[%2629] : memref<940xf32, #tpu.memory_space<smem>>
      %2631 = vector.broadcast %2630 : f32 to vector<8x128xf32>
      %2632 = arith.mulf %1777, %2631 : vector<8x128xf32>
      %2633 = arith.addf %2626, %2632 : vector<8x128xf32>
      %c90_i32_696 = arith.constant 90 : i32
      %2634 = arith.addi %1859, %c90_i32_696 : i32
      %c9_i32_697 = arith.constant 9 : i32
      %2635 = arith.addi %2634, %c9_i32_697 : i32
      %2636 = arith.index_cast %2635 : i32 to index
      %2637 = memref.load %arg1[%2636] : memref<940xf32, #tpu.memory_space<smem>>
      %2638 = vector.broadcast %2637 : f32 to vector<8x128xf32>
      %2639 = arith.mulf %1856, %2638 : vector<8x128xf32>
      %2640 = arith.addf %2633, %2639 : vector<8x128xf32>
      %c9_i32_698 = arith.constant 9 : i32
      %2641 = arith.addi %1861, %c9_i32_698 : i32
      %2642 = arith.index_cast %2641 : i32 to index
      %2643 = memref.load %arg2[%2642] : memref<102xf32, #tpu.memory_space<smem>>
      %2644 = vector.broadcast %2643 : f32 to vector<8x128xf32>
      %2645 = arith.addf %2640, %2644 : vector<8x128xf32>
      %cst_699 = arith.constant 0.000000e+00 : f32
      %2646 = vector.broadcast %cst_699 : f32 to vector<8x128xf32>
      %2647 = arith.cmpf ogt, %2645, %2646 : vector<8x128xf32>
      %2648 = math.exp %2645 : vector<8x128xf32>
      %cst_700 = arith.constant 1.000000e+00 : f32
      %2649 = vector.broadcast %cst_700 : f32 to vector<8x128xf32>
      %2650 = arith.subf %2648, %2649 : vector<8x128xf32>
      %2651 = arith.select %2647, %2645, %2650 : vector<8x128xi1>, vector<8x128xf32>
      scf.yield %1940, %2019, %2098, %2177, %2256, %2335, %2414, %2493, %2572, %2651 : vector<8x128xf32>, vector<8x128xf32>, vector<8x128xf32>, vector<8x128xf32>, vector<8x128xf32>, vector<8x128xf32>, vector<8x128xf32>, vector<8x128xf32>, vector<8x128xf32>, vector<8x128xf32>
    }
    %c3_i32_35 = arith.constant 3 : i32
    %c920 = arith.constant 920 : index
    %166 = memref.load %arg1[%c920] : memref<940xf32, #tpu.memory_space<smem>>
    %167 = vector.broadcast %166 : f32 to vector<8x128xf32>
    %168 = arith.mulf %165#0, %167 : vector<8x128xf32>
    %c921 = arith.constant 921 : index
    %169 = memref.load %arg1[%c921] : memref<940xf32, #tpu.memory_space<smem>>
    %170 = vector.broadcast %169 : f32 to vector<8x128xf32>
    %171 = arith.mulf %165#1, %170 : vector<8x128xf32>
    %172 = arith.addf %168, %171 : vector<8x128xf32>
    %c922 = arith.constant 922 : index
    %173 = memref.load %arg1[%c922] : memref<940xf32, #tpu.memory_space<smem>>
    %174 = vector.broadcast %173 : f32 to vector<8x128xf32>
    %175 = arith.mulf %165#2, %174 : vector<8x128xf32>
    %176 = arith.addf %172, %175 : vector<8x128xf32>
    %c923 = arith.constant 923 : index
    %177 = memref.load %arg1[%c923] : memref<940xf32, #tpu.memory_space<smem>>
    %178 = vector.broadcast %177 : f32 to vector<8x128xf32>
    %179 = arith.mulf %165#3, %178 : vector<8x128xf32>
    %180 = arith.addf %176, %179 : vector<8x128xf32>
    %c924 = arith.constant 924 : index
    %181 = memref.load %arg1[%c924] : memref<940xf32, #tpu.memory_space<smem>>
    %182 = vector.broadcast %181 : f32 to vector<8x128xf32>
    %183 = arith.mulf %165#4, %182 : vector<8x128xf32>
    %184 = arith.addf %180, %183 : vector<8x128xf32>
    %c925 = arith.constant 925 : index
    %185 = memref.load %arg1[%c925] : memref<940xf32, #tpu.memory_space<smem>>
    %186 = vector.broadcast %185 : f32 to vector<8x128xf32>
    %187 = arith.mulf %165#5, %186 : vector<8x128xf32>
    %188 = arith.addf %184, %187 : vector<8x128xf32>
    %c926 = arith.constant 926 : index
    %189 = memref.load %arg1[%c926] : memref<940xf32, #tpu.memory_space<smem>>
    %190 = vector.broadcast %189 : f32 to vector<8x128xf32>
    %191 = arith.mulf %165#6, %190 : vector<8x128xf32>
    %192 = arith.addf %188, %191 : vector<8x128xf32>
    %c927 = arith.constant 927 : index
    %193 = memref.load %arg1[%c927] : memref<940xf32, #tpu.memory_space<smem>>
    %194 = vector.broadcast %193 : f32 to vector<8x128xf32>
    %195 = arith.mulf %165#7, %194 : vector<8x128xf32>
    %196 = arith.addf %192, %195 : vector<8x128xf32>
    %c928 = arith.constant 928 : index
    %197 = memref.load %arg1[%c928] : memref<940xf32, #tpu.memory_space<smem>>
    %198 = vector.broadcast %197 : f32 to vector<8x128xf32>
    %199 = arith.mulf %165#8, %198 : vector<8x128xf32>
    %200 = arith.addf %196, %199 : vector<8x128xf32>
    %c929 = arith.constant 929 : index
    %201 = memref.load %arg1[%c929] : memref<940xf32, #tpu.memory_space<smem>>
    %202 = vector.broadcast %201 : f32 to vector<8x128xf32>
    %203 = arith.mulf %165#9, %202 : vector<8x128xf32>
    %204 = arith.addf %200, %203 : vector<8x128xf32>
    %c100 = arith.constant 100 : index
    %205 = memref.load %arg2[%c100] : memref<102xf32, #tpu.memory_space<smem>>
    %206 = vector.broadcast %205 : f32 to vector<8x128xf32>
    %207 = arith.addf %204, %206 : vector<8x128xf32>
    %c930 = arith.constant 930 : index
    %208 = memref.load %arg1[%c930] : memref<940xf32, #tpu.memory_space<smem>>
    %209 = vector.broadcast %208 : f32 to vector<8x128xf32>
    %210 = arith.mulf %165#0, %209 : vector<8x128xf32>
    %c931 = arith.constant 931 : index
    %211 = memref.load %arg1[%c931] : memref<940xf32, #tpu.memory_space<smem>>
    %212 = vector.broadcast %211 : f32 to vector<8x128xf32>
    %213 = arith.mulf %165#1, %212 : vector<8x128xf32>
    %214 = arith.addf %210, %213 : vector<8x128xf32>
    %c932 = arith.constant 932 : index
    %215 = memref.load %arg1[%c932] : memref<940xf32, #tpu.memory_space<smem>>
    %216 = vector.broadcast %215 : f32 to vector<8x128xf32>
    %217 = arith.mulf %165#2, %216 : vector<8x128xf32>
    %218 = arith.addf %214, %217 : vector<8x128xf32>
    %c933 = arith.constant 933 : index
    %219 = memref.load %arg1[%c933] : memref<940xf32, #tpu.memory_space<smem>>
    %220 = vector.broadcast %219 : f32 to vector<8x128xf32>
    %221 = arith.mulf %165#3, %220 : vector<8x128xf32>
    %222 = arith.addf %218, %221 : vector<8x128xf32>
    %c934 = arith.constant 934 : index
    %223 = memref.load %arg1[%c934] : memref<940xf32, #tpu.memory_space<smem>>
    %224 = vector.broadcast %223 : f32 to vector<8x128xf32>
    %225 = arith.mulf %165#4, %224 : vector<8x128xf32>
    %226 = arith.addf %222, %225 : vector<8x128xf32>
    %c935 = arith.constant 935 : index
    %227 = memref.load %arg1[%c935] : memref<940xf32, #tpu.memory_space<smem>>
    %228 = vector.broadcast %227 : f32 to vector<8x128xf32>
    %229 = arith.mulf %165#5, %228 : vector<8x128xf32>
    %230 = arith.addf %226, %229 : vector<8x128xf32>
    %c936 = arith.constant 936 : index
    %231 = memref.load %arg1[%c936] : memref<940xf32, #tpu.memory_space<smem>>
    %232 = vector.broadcast %231 : f32 to vector<8x128xf32>
    %233 = arith.mulf %165#6, %232 : vector<8x128xf32>
    %234 = arith.addf %230, %233 : vector<8x128xf32>
    %c937 = arith.constant 937 : index
    %235 = memref.load %arg1[%c937] : memref<940xf32, #tpu.memory_space<smem>>
    %236 = vector.broadcast %235 : f32 to vector<8x128xf32>
    %237 = arith.mulf %165#7, %236 : vector<8x128xf32>
    %238 = arith.addf %234, %237 : vector<8x128xf32>
    %c938 = arith.constant 938 : index
    %239 = memref.load %arg1[%c938] : memref<940xf32, #tpu.memory_space<smem>>
    %240 = vector.broadcast %239 : f32 to vector<8x128xf32>
    %241 = arith.mulf %165#8, %240 : vector<8x128xf32>
    %242 = arith.addf %238, %241 : vector<8x128xf32>
    %c939 = arith.constant 939 : index
    %243 = memref.load %arg1[%c939] : memref<940xf32, #tpu.memory_space<smem>>
    %244 = vector.broadcast %243 : f32 to vector<8x128xf32>
    %245 = arith.mulf %165#9, %244 : vector<8x128xf32>
    %246 = arith.addf %242, %245 : vector<8x128xf32>
    %c101 = arith.constant 101 : index
    %247 = memref.load %arg2[%c101] : memref<102xf32, #tpu.memory_space<smem>>
    %248 = vector.broadcast %247 : f32 to vector<8x128xf32>
    %249 = arith.addf %246, %248 : vector<8x128xf32>
    %250 = arith.maximumf %207, %249 : vector<8x128xf32>
    %251 = arith.subf %207, %250 : vector<8x128xf32>
    %252 = math.exp %251 : vector<8x128xf32>
    %253 = arith.subf %249, %250 : vector<8x128xf32>
    %254 = math.exp %253 : vector<8x128xf32>
    %255 = arith.addf %252, %254 : vector<8x128xf32>
    %256 = math.log %255 : vector<8x128xf32>
    %257 = arith.addf %250, %256 : vector<8x128xf32>
    %258 = arith.subf %207, %257 : vector<8x128xf32>
    %c0_36 = arith.constant 0 : index
    %c0_37 = arith.constant 0 : index
    %c0_38 = arith.constant 0 : index
    %259 = vector.load %arg4[%c0_36, %c0_37, %c0_38] : memref<2x8x128xf32, #tpu.memory_space<vmem>>, vector<1x8x128xf32>
    %260 = vector.shape_cast %259 : vector<1x8x128xf32> to vector<8x128xf32>
    %261 = vector.shape_cast %258 : vector<8x128xf32> to vector<1x8x128xf32>
    tpu.vector_store %arg4[%c0_36, %c0_37, %c0_38], %261 {strides = array<i32>} : memref<2x8x128xf32, #tpu.memory_space<vmem>>, vector<1x8x128xf32>,
    %262 = arith.subf %249, %257 : vector<8x128xf32>
    %c1_39 = arith.constant 1 : index
    %c0_40 = arith.constant 0 : index
    %c0_41 = arith.constant 0 : index
    %263 = vector.load %arg4[%c1_39, %c0_40, %c0_41] : memref<2x8x128xf32, #tpu.memory_space<vmem>>, vector<1x8x128xf32>
    %264 = vector.shape_cast %263 : vector<1x8x128xf32> to vector<8x128xf32>
    %265 = vector.shape_cast %262 : vector<8x128xf32> to vector<1x8x128xf32>
    tpu.vector_store %arg4[%c1_39, %c0_40, %c0_41], %265 {strides = array<i32>} : memref<2x8x128xf32, #tpu.memory_space<vmem>>, vector<1x8x128xf32>,
    return
  }
  func.func @transform_0(%arg0: i32) -> i32 {
    %c0_i32 = arith.constant 0 : i32
    %c0_i32_0 = arith.constant 0 : i32
    return %c0_i32 : i32
  }
  func.func @transform_1(%arg0: i32) -> i32 {
    %c0_i32 = arith.constant 0 : i32
    %c0_i32_0 = arith.constant 0 : i32
    return %c0_i32 : i32
  }
  func.func @transform_2(%arg0: i32) -> (i32, i32, i32) {
    %c0_i32 = arith.constant 0 : i32
    %c0_i32_0 = arith.constant 0 : i32
    %c0_i32_1 = arith.constant 0 : i32
    return %c0_i32, %c0_i32_0, %arg0 : i32, i32, i32
  }
  func.func @transform_3(%arg0: i32) -> (i32, i32, i32) {
    %c0_i32 = arith.constant 0 : i32
    %c0_i32_0 = arith.constant 0 : i32
    %c0_i32_1 = arith.constant 0 : i32
    return %c0_i32, %c0_i32_0, %arg0 : i32, i32, i32
  }
}

</mosaic_0001>

<bundles_post_ra>
// kernel: net1_forward.1
= control target key start
LH: loop header
LB: loop body
LE: loop exit
PB: predicated region body
PF: predicated region fallthrough
CT: control target
= control target key end

     0   :  { %s4620_s0 = inlined_call_operand.vmem [shape: f32[940], index: 0, kind: input, shape index: {}]   ;;  %s4621_s1 = inlined_call_operand.vmem [shape: f32[102], index: 1, kind: input, shape index: {}]   ;;  %s4622_s2 = inlined_call_operand.vmem [shape: f32[2,8,128], index: 2, kind: input, shape index: {}]   ;;  %s4623_s3 = inlined_call_operand.vmem [shape: f32[2,8,128], index: 3, kind: output, shape index: {}]  }
   0x1   :  { %4630 = sst [smem:[#allocation21_spill]] %s4623_s3 }
   0x2   :  { %8 = vsyncpa [#allocation3], 0  ;;  %s16_s14 = sshll.u32 %s4620_s0, 4  ;;  %s17_s14 = int_to_ptr.vmem [resolvable:$true] %s16_s14 }
   0x3   :  { %9 = vsyncpa [#allocation5], 0  ;;  %s26_s17 = sshll.u32 %s4621_s1, 4  ;;  %s2366_s18 = scalar_lea.vmem %s17_s14, 128  ;;  %s27_s17 = int_to_ptr.vmem [resolvable:$true] %s26_s17 }
   0x4   :  { %p2367_p0 = scmp.ne.s32.totalorder %s17_s14, %s2366_s18  ;;  %p2371_p1 = scmp.lt.s32.totalorder %s17_s14, %s17_s14 }
   0x5   :  { %p2372_p2 = scmp.lt.s32.totalorder %s2366_s18, %s2366_s18 }
   0x7   :  { %p2373_p3 = por %p2372_p2, %p2371_p1 }
   0x9   :  { %p2374_p4 = pnand %p2373_p3, %p2367_p0 }
   0xb   :  { %2377 = shalt.err (!%p2374_p4)
}
   0xc   :  { %s2482_s19 = smov [#allocation2]   ;;  %s2378_s20 = scalar_lea.vmem %s27_s17, 16 }
   0xd   :  { %19 = dma.vmem_to_smem %s17_s14, 128, %s2482_s19, [#allocation3]  }
   0xe   :  { %p2379_p5 = scmp.ne.s32.totalorder %s27_s17, %s2378_s20  ;;  %p2383_p6 = scmp.lt.s32.totalorder %s27_s17, %s27_s17 }
   0xf   :  { %p2384_p7 = scmp.lt.s32.totalorder %s2378_s20, %s2378_s20 }
  0x11   :  { %p2385_p8 = por %p2384_p7, %p2383_p6 }
  0x13   :  { %p2386_p9 = pnand %p2385_p8, %p2379_p5 }
  0x15   :  { %2389 = shalt.err (!%p2386_p9)
}
  0x16   :  { %s2483_s0 = smov [#allocation4]  }
  0x17   :  { %29 = dma.vmem_to_smem %s27_s17, 16, %s2483_s0, [#allocation5]  }
  0x18   :  { %2434 = dma.done.wait [#allocation3], 128  }
  0x19   :  { %2435 = vsyncadd [#allocation3], 4294967168 }
  0x1a   :  { %2436 = dma.done.wait [#allocation5], 16  }
  0x1b   :  { %2437 = vsyncadd [#allocation5], 4294967280 }
  0x1c   :  { %38 = sfence }
  0x1d   :  { %s42_s1 = sld [smem:[#allocation2]]  ;;  %v2513_v0 = vld [vmem:[%s4622_s2] sm:$0xff]  ;;  %v2518_v1 = vld [vmem:[%s4622_s2 + $0x8] sm:$0xff]  ;;  %s2620_s24 = smov 0  }
  0x1e   :  { %s2099_s21 = sld [smem:[#allocation2 + $0x1]] }
  0x1f   :  { %s49_s22 = sld [smem:[#allocation4]] }
  0x20   :  { %s2101_s23 = sld [smem:[#allocation2 + $0x2]] }
  0x21   :  { %s2102_s26 = sld [smem:[#allocation2 + $0x3]] }
  0x22   :  { %s2103_s29 = sld [smem:[#allocation4 + $0x1]] }
  0x23   :  { %v43_v2 = vstv %s42_s1  ;;  %s2105_s30 = sld [smem:[#allocation2 + $0x4]] }
  0x24   :  { %v44_v3 = vmul.f32 %v43_v2, %v2513_v0  ;;  %v46_v4 = vstv %s2099_s21  ;;  %s2106_s4 = sld [smem:[#allocation2 + $0x5]] }
  0x25   :  { %v47_v5 = vmul.f32 %v2518_v1, %v46_v4  ;;  %s2522_s5 = sld [smem:[#allocation4 + $0x2]]  ;;  %v50_v6 = vstv %s49_s22 }
  0x26   :  { %v58_v7 = vstv %s2101_s23  ;;  %s2109_s6 = sld [smem:[#allocation2 + $0x6]] }
  0x27   :  { %v48_v8 = vadd.f32 %v47_v5, %v44_v3  ;;  %v59_v9 = vmul.f32 %v58_v7, %v2513_v0  ;;  %v61_v10 = vstv %s2102_s26  ;;  %s2110_s2 = sld [smem:[#allocation2 + $0x7]] }
  0x28   :  { %v62_v11 = vmul.f32 %v2518_v1, %v61_v10  ;;  %s2526_s7 = sld [smem:[#allocation4 + $0x3]]  ;;  %v65_v13 = vstv %s2103_s29 }
  0x29   :  { %v2528_v12 = vadd.f32 %v50_v6, %v48_v8  ;;  %v73_v14 = vstv %s2105_s30  ;;  %s2113_s8 = sld [smem:[#allocation2 + $0x8]] }
  0x2a   :  { %v63_v15 = vadd.f32 %v62_v11, %v59_v9  ;;  %v74_v16 = vmul.f32 %v73_v14, %v2513_v0  ;;  %v76_v17 = vstv %s2106_s4  ;;  %s2114_s9 = sld [smem:[#allocation2 + $0x9]] }
  0x2b   :  { %v53_v18 = vmul.f32 1.442695, %v2528_v12  ;;  %v77_v19 = vmul.f32 %v2518_v1, %v76_v17  ;;  %s2533_s10 = sld [smem:[#allocation4 + $0x4]]  ;;  %v80_v21 = vstv %s2522_s5  ;;  %vm52_vm0 = vcmp.gt.f32.partialorder %v2528_v12, 0.0 }
  0x2c   :  { %v2535_v20 = vadd.f32 %v65_v13, %v63_v15  ;;  %v88_v22 = vstv %s2109_s6  ;;  %s2117_s11 = sld [smem:[#allocation2 + $0xa]] }
  0x2d   :  { %2280 = vpow2.f32 %v53_v18  ;;  %v78_v23 = vadd.f32 %v77_v19, %v74_v16  ;;  %v89_v24 = vmul.f32 %v88_v22, %v2513_v0  ;;  %v91_v25 = vstv %s2110_s2  ;;  %s2118_s12 = sld [smem:[#allocation2 + $0xb]] }
  0x2e   :  { %v68_v26 = vmul.f32 1.442695, %v2535_v20  ;;  %v92_v27 = vmul.f32 %v2518_v1, %v91_v25  ;;  %s2541_s13 = sld [smem:[#allocation4 + $0x5]]  ;;  %v95_v29 = vstv %s2526_s7  ;;  %vm67_vm1 = vcmp.gt.f32.partialorder %v2535_v20, 0.0 }
  0x2f   :  { %v2543_v28 = vadd.f32 %v80_v21, %v78_v23  ;;  %v103_v30 = vstv %s2113_s8  ;;  %s2121_s14 = sld [smem:[#allocation2 + $0xc]] }
  0x30   :  { %2282 = vpow2.f32 %v68_v26  ;;  %v93_v31 = vadd.f32 %v92_v27, %v89_v24  ;;  %v104_v32 = vmul.f32 %v103_v30, %v2513_v0  ;;  %v106_v33 = vstv %s2114_s9  ;;  %s2122_s15 = sld [smem:[#allocation2 + $0xd]] }
  0x31   :  { %v83_v34 = vmul.f32 1.442695, %v2543_v28  ;;  %v107_v35 = vmul.f32 %v2518_v1, %v106_v33  ;;  %s2549_s16 = sld [smem:[#allocation4 + $0x6]]  ;;  %v110_v37 = vstv %s2533_s10  ;;  %vm82_vm2 = vcmp.gt.f32.partialorder %v2543_v28, 0.0 }
  0x32   :  { %v2551_v36 = vadd.f32 %v95_v29, %v93_v31  ;;  %v118_v38 = vstv %s2117_s11  ;;  %s2125_s17 = sld [smem:[#allocation2 + $0xe]] }
  0x33   :  { %2284 = vpow2.f32 %v83_v34  ;;  %v108_v39 = vadd.f32 %v107_v35, %v104_v32  ;;  %v119_v40 = vmul.f32 %v118_v38, %v2513_v0  ;;  %v121_v41 = vstv %s2118_s12  ;;  %s2126_s18 = sld [smem:[#allocation2 + $0xf]] }
  0x34   :  { %v98_v42 = vmul.f32 1.442695, %v2551_v36  ;;  %v122_v43 = vmul.f32 %v2518_v1, %v121_v41  ;;  %s2557_s19 = sld [smem:[#allocation4 + $0x7]]  ;;  %v125_v45 = vstv %s2541_s13  ;;  %vm97_vm3 = vcmp.gt.f32.partialorder %v2551_v36, 0.0 }
  0x35   :  { %v2559_v44 = vadd.f32 %v110_v37, %v108_v39  ;;  %v133_v46 = vstv %s2121_s14  ;;  %s2129_s20 = sld [smem:[#allocation2 + $0x10]] }
  0x36   :  { %2286 = vpow2.f32 %v98_v42  ;;  %v123_v47 = vadd.f32 %v122_v43, %v119_v40  ;;  %v134_v48 = vmul.f32 %v133_v46, %v2513_v0  ;;  %v136_v49 = vstv %s2122_s15  ;;  %s2130_s0 = sld [smem:[#allocation2 + $0x11]] }
  0x37   :  { %v113_v50 = vmul.f32 1.442695, %v2559_v44  ;;  %v137_v51 = vmul.f32 %v2518_v1, %v136_v49  ;;  %s2565_s1 = sld [smem:[#allocation4 + $0x8]]  ;;  %v140_v53 = vstv %s2549_s16  ;;  %vm112_vm4 = vcmp.gt.f32.partialorder %v2559_v44, 0.0 }
  0x38   :  { %v2567_v52 = vadd.f32 %v125_v45, %v123_v47  ;;  %v148_v54 = vstv %s2125_s17  ;;  %s2133_s21 = sld [smem:[#allocation2 + $0x12]] }
  0x39   :  { %2288 = vpow2.f32 %v113_v50  ;;  %v138_v55 = vadd.f32 %v137_v51, %v134_v48  ;;  %v149_v56 = vmul.f32 %v148_v54, %v2513_v0  ;;  %v151_v57 = vstv %s2126_s18  ;;  %s2571_s22 = sld [smem:[#allocation2 + $0x13]] }
  0x3a   :  { %v2281_v58 = vpop.eup %2280  ;;  %v128_v59 = vmul.f32 1.442695, %v2567_v52  ;;  %v152_v60 = vmul.f32 %v2518_v1, %v151_v57  ;;  %s2576_s23 = sld [smem:[#allocation4 + $0x9]]  ;;  %v155_v63 = vstv %s2557_s19  ;;  %vm127_vm5 = vcmp.gt.f32.partialorder %v2567_v52, 0.0 }
  0x3b   :  { %v2100_v61 = vadd.f32 -1.0, %v2281_v58  ;;  %v141_v62 = vadd.f32 %v140_v53, %v138_v55  ;;  %v163_v2 = vstv %s2129_s20 }
  0x3c   :  { %2290 = vpow2.f32 %v128_v59  ;;  %v153_v3 = vadd.f32 %v152_v60, %v149_v56  ;;  %v164_v4 = vmul.f32 %v163_v2, %v2513_v0  ;;  %v166_v5 = vstv %s2130_s0 }
  0x3d   :  { %v2283_v6 = vpop.eup %2282  ;;  %v2581_v7 = vsel %vm52_vm0, %v2528_v12, %v2100_v61   ;;  %v143_v8 = vmul.f32 1.442695, %v141_v62  ;;  %v167_v9 = vmul.f32 %v2518_v1, %v166_v5  ;;  %v170_v13 = vstv %s2565_s1 }
  0x3e   :  { %v2104_v10 = vadd.f32 -1.0, %v2283_v6  ;;  %v156_v11 = vadd.f32 %v155_v63, %v153_v3  ;;  %v178_v14 = vstv %s2133_s21  ;;  %vm142_vm6 = vcmp.gt.f32.partialorder %v141_v62, 0.0 }
  0x3f   :  { %2292 = vpow2.f32 %v143_v8  ;;  %v168_v15 = vadd.f32 %v167_v9, %v164_v4  ;;  %v179_v16 = vmul.f32 %v178_v14, %v2513_v0  ;;  %v181_v17 = vstv %s2571_s22 }
  0x40   :  { %v2285_v18 = vpop.eup %2284  ;;  %v71_v19 = vsel %vm67_vm1, %v2535_v20, %v2104_v10   ;;  %v158_v12 = vmul.f32 1.442695, %v156_v11  ;;  %v182_v21 = vmul.f32 %v2518_v1, %v181_v17  ;;  %v185_v24 = vstv %s2576_s23 }
  0x41   :  { %v2108_v22 = vadd.f32 -1.0, %v2285_v18  ;;  %v171_v23 = vadd.f32 %v170_v13, %v168_v15  ;;  %vm157_vm7 = vcmp.gt.f32.partialorder %v156_v11, 0.0 }
  0x42   :  { %2294 = vpow2.f32 %v158_v12  ;;  %v183_v25 = vadd.f32 %v182_v21, %v179_v16 }
  0x43   :  { %v2287_v26 = vpop.eup %2286  ;;  %v86_v27 = vsel %vm82_vm2, %v2543_v28, %v2108_v22   ;;  %v173_v0 = vmul.f32 1.442695, %v171_v23  ;;  %vm172_vm8 = vcmp.gt.f32.partialorder %v171_v23, 0.0 }
  0x44   :  { %v2112_v29 = vadd.f32 -1.0, %v2287_v26  ;;  %v186_v30 = vadd.f32 %v185_v24, %v183_v25 }
  0x45   :  { %2296 = vpow2.f32 %v173_v0 }
  0x46   :  { %v2289_v20 = vpop.eup %2288  ;;  %v101_v31 = vsel %vm97_vm3, %v2551_v36, %v2112_v29   ;;  %v188_v1 = vmul.f32 1.442695, %v186_v30  ;;  %vm187_vm9 = vcmp.gt.f32.partialorder %v186_v30, 0.0 }
  0x47   :  { %v2116_v32 = vadd.f32 -1.0, %v2289_v20 }
  0x48   :  { %2298 = vpow2.f32 %v188_v1 }
  0x49   :  { %v2291_v33 = vpop.eup %2290  ;;  %v116_v34 = vsel %vm112_vm4, %v2559_v44, %v2116_v32  }
  0x4a   :  { %v2120_v28 = vadd.f32 -1.0, %v2291_v33 }
  0x4c   :  { %v2293_v35 = vpop.eup %2292  ;;  %v131_v37 = vsel %vm127_vm5, %v2567_v52, %v2120_v28  }
  0x4d   :  { %v2124_v38 = vadd.f32 -1.0, %v2293_v35 }
  0x4f   :  { %v2295_v39 = vpop.eup %2294  ;;  %v146_v40 = vsel %vm142_vm6, %v141_v62, %v2124_v38  }
  0x50   :  { %v2128_v36 = vadd.f32 -1.0, %v2295_v39 }
  0x52   :  { %v2297_v41 = vpop.eup %2296  ;;  %v161_v42 = vsel %vm157_vm7, %v156_v11, %v2128_v36  }
  0x53   :  { %v2132_v43 = vadd.f32 -1.0, %v2297_v41 }
  0x55   :  { %v2299_v45 = vpop.eup %2298  ;;  %v176_v46 = vsel %vm172_vm8, %v171_v23, %v2132_v43  }
  0x56   :  { %v2136_v44 = vadd.f32 -1.0, %v2299_v45 }
  0x58   :  { %v191_v47 = vsel %vm187_vm9, %v186_v30, %v2136_v44  }
  0x59 LB: > { %4631 = sst [smem:[#allocation8_spill]] %s2480_s24  ;;  %s4624_s25 = smul.u32 3, %s2480_s24  ;;  %s2480_s24 = sphi %s2620_s24, %s197_s24   ;;  %v2476_v7 = vphi %v2581_v7, %v4685_v7   ;;  %v2472_v19 = vphi %v71_v19, %v4684_v19   ;;  %v2468_v27 = vphi %v86_v27, %v4683_v27   ;;  %v2464_v31 = vphi %v101_v31, %v4682_v31   ;;  %v2460_v34 = vphi %v116_v34, %v4681_v34   ;;  %v2456_v37 = vphi %v131_v37, %v4680_v37   ;;  %v2452_v40 = vphi %v146_v40, %v4679_v40   ;;  %v2448_v42 = vphi %v161_v42, %v4678_v42   ;;  %v2444_v46 = vphi %v176_v46, %v4677_v46   ;;  %v2440_v47 = vphi %v191_v47, %v4676_v47  }
  0x5a   : > { %s2657_s26 = smul.u32 300, %s2480_s24 }
  0x5b   : > { %s2660_s27 = smul.u32 30, %s2480_s24  ;;  %s2664_s28 = sadd.s32 1, %s4624_s25 }
  0x5c   : > { %4632 = sst [smem:[#allocation9_spill]] %s2664_s28  ;;  %s210_s29 = sadd.s32 20, %s2657_s26 }
  0x5d   : > { %s216_s30 = sadd.s32 21, %s2657_s26  ;;  %s212_s4 = sadd.s32 10, %s2660_s27 }
  0x5e   : > { %s2669_s5 = sld [smem:[#allocation2 + %s210_s29]]  ;;  %s221_s2 = sadd.s32 22, %s2657_s26 }
  0x5f   : > { %s2671_s6 = sld [smem:[#allocation2 + %s216_s30]]  ;;  %s226_s8 = sadd.s32 23, %s2657_s26 }
  0x60   : > { %s2674_s7 = sld [smem:[#allocation2 + %s221_s2]]  ;;  %s231_s10 = sadd.s32 24, %s2657_s26 }
  0x61   : > { %s2677_s9 = sld [smem:[#allocation2 + %s226_s8]]  ;;  %s236_s12 = sadd.s32 25, %s2657_s26 }
  0x62   : > { %s2680_s11 = sld [smem:[#allocation2 + %s231_s10]]  ;;  %s241_s14 = sadd.s32 26, %s2657_s26 }
  0x63   : > { %s2683_s13 = sld [smem:[#allocation2 + %s236_s12]]  ;;  %s246_s16 = sadd.s32 27, %s2657_s26 }
  0x64   : > { %s2686_s15 = sld [smem:[#allocation2 + %s241_s14]]  ;;  %s251_s18 = sadd.s32 28, %s2657_s26  ;;  %v214_v48 = vstv %s2669_s5 }
  0x65   : > { %s2689_s17 = sld [smem:[#allocation2 + %s246_s16]]  ;;  %s256_s20 = sadd.s32 29, %s2657_s26  ;;  %v218_v49 = vstv %s2671_s6  ;;  %v215_v50 = vmul.f32 %v2476_v7, %v214_v48 }
  0x66   : > { %s2692_s19 = sld [smem:[#allocation2 + %s251_s18]]  ;;  %s269_s1 = sadd.s32 30, %s2657_s26  ;;  %v219_v51 = vmul.f32 %v2472_v19, %v218_v49  ;;  %v223_v52 = vstv %s2674_s7 }
  0x67   : > { %s2695_s0 = sld [smem:[#allocation2 + %s256_s20]]  ;;  %s273_s22 = sadd.s32 31, %s2657_s26  ;;  %v224_v54 = vmul.f32 %v2468_v27, %v223_v52  ;;  %v228_v55 = vstv %s2677_s9 }
  0x68   : > { %s2698_s21 = sld [smem:[#allocation4 + %s212_s4]]  ;;  %s278_s29 = sadd.s32 32, %s2657_s26  ;;  %v220_v53 = vadd.f32 %v219_v51, %v215_v50  ;;  %v229_v59 = vmul.f32 %v2464_v31, %v228_v55  ;;  %v233_v60 = vstv %s2680_s11 }
  0x69   : > { %s2701_s23 = sld [smem:[#allocation2 + %s269_s1]]  ;;  %s283_s2 = sadd.s32 33, %s2657_s26  ;;  %v234_v3 = vmul.f32 %v2460_v34, %v233_v60  ;;  %v238_v4 = vstv %s2683_s13 }
  0x6a   : > { %s2704_s30 = sld [smem:[#allocation2 + %s273_s22]]  ;;  %s288_s10 = sadd.s32 34, %s2657_s26  ;;  %v225_v58 = vadd.f32 %v224_v54, %v220_v53  ;;  %v239_v10 = vmul.f32 %v2456_v37, %v238_v4  ;;  %v243_v14 = vstv %s2686_s15 }
  0x6b   : > { %s2707_s8 = sld [smem:[#allocation2 + %s278_s29]]  ;;  %s293_s14 = sadd.s32 35, %s2657_s26  ;;  %v244_v22 = vmul.f32 %v2452_v40, %v243_v14  ;;  %v248_v24 = vstv %s2689_s17 }
  0x6c   : > { %s2710_s12 = sld [smem:[#allocation2 + %s283_s2]]  ;;  %s298_s16 = sadd.s32 36, %s2657_s26  ;;  %v230_v2 = vadd.f32 %v229_v59, %v225_v58  ;;  %v249_v1 = vmul.f32 %v2448_v42, %v248_v24  ;;  %v253_v33 = vstv %s2692_s19 }
  0x6d   : > { %s2713_s4 = sld [smem:[#allocation2 + %s288_s10]]  ;;  %s303_s20 = sadd.s32 37, %s2657_s26  ;;  %v254_v43 = vmul.f32 %v2444_v46, %v253_v33  ;;  %v258_v45 = vstv %s2695_s0 }
  0x6e   : > { %4633 = sst [smem:[#allocation10_spill]] %s2698_s21  ;;  %s308_s22 = sadd.s32 38, %s2657_s26  ;;  %v235_v9 = vadd.f32 %v234_v3, %v230_v2  ;;  %v259_v55 = vmul.f32 %v2440_v47, %v258_v45 }
  0x6f   : > { %s2716_s18 = sld [smem:[#allocation2 + %s293_s14]]  ;;  %s313_s29 = sadd.s32 39, %s2657_s26  ;;  %v271_v56 = vstv %s2701_s23 }
  0x70   : > { %s2719_s1 = sld [smem:[#allocation2 + %s298_s16]]  ;;  %s318_s2 = sadd.s32 11, %s2660_s27  ;;  %v275_v57 = vstv %s2704_s30  ;;  %v272_v61 = vmul.f32 %v2476_v7, %v271_v56  ;;  %v240_v21 = vadd.f32 %v239_v10, %v235_v9 }
  0x71   : > { %s2722_s25 = sld [smem:[#allocation2 + %s303_s20]]  ;;  %s327_s14 = sadd.s32 40, %s2657_s26  ;;  %v276_v62 = vmul.f32 %v2472_v19, %v275_v57  ;;  %v280_v63 = vstv %s2707_s8 }
  0x72   : > { %s2725_s3 = sld [smem:[#allocation2 + %s308_s22]]  ;;  %s331_s16 = sadd.s32 41, %s2657_s26  ;;  %v281_v6 = vmul.f32 %v2468_v27, %v280_v63  ;;  %v285_v8 = vstv %s2710_s12  ;;  %v245_v20 = vadd.f32 %v244_v22, %v240_v21 }
  0x73   : > { %s2730_s10 = sld [smem:[#allocation2 + %s313_s29]]  ;;  %s336_s20 = sadd.s32 42, %s2657_s26  ;;  %v277_v5 = vadd.f32 %v276_v62, %v272_v61  ;;  %v286_v16 = vmul.f32 %v2464_v31, %v285_v8  ;;  %v290_v17 = vstv %s2713_s4 }
  0x74   : > { %s2733_s24 = sld [smem:[#allocation4 + %s318_s2]]  ;;  %s341_s6 = sadd.s32 43, %s2657_s26  ;;  %v291_v26 = vmul.f32 %v2460_v34, %v290_v17  ;;  %v250_v41 = vadd.f32 %v249_v1, %v245_v20 }
  0x75   : > { %s2736_s28 = sld [smem:[#allocation2 + %s327_s14]]  ;;  %s346_s29 = sadd.s32 44, %s2657_s26  ;;  %v282_v15 = vadd.f32 %v281_v6, %v277_v5  ;;  %v295_v0 = vstv %s2716_s18 }
  0x76   : > { %s2741_s5 = sld [smem:[#allocation2 + %s331_s16]]  ;;  %s351_s14 = sadd.s32 45, %s2657_s26  ;;  %v296_v35 = vmul.f32 %v2456_v37, %v295_v0  ;;  %v300_v38 = vstv %s2719_s1  ;;  %v255_v59 = vadd.f32 %v254_v43, %v250_v41 }
  0x77   : > { %4634 = sst [smem:[#allocation11_spill]] %s2722_s25  ;;  %s361_s21 = sadd.s32 47, %s2657_s26  ;;  %v287_v25 = vadd.f32 %v286_v16, %v282_v15  ;;  %v301_v49 = vmul.f32 %v2452_v40, %v300_v38 }
  0x78   : > { %4635 = sst [smem:[#allocation12_spill]] %s2725_s3  ;;  %s376_s25 = sadd.s32 12, %s2660_s27  ;;  %v260_v8 = vadd.f32 %v259_v55, %v255_v59 }
  0x79   : > { %4636 = sst [smem:[#allocation13_spill]] %s2730_s10  ;;  %s356_s10 = sadd.s32 46, %s2657_s26  ;;  %v292_v28 = vadd.f32 %v291_v26, %v287_v25 }
  0x7a   : > { %4637 = sst [smem:[#allocation14_spill]] %s2733_s24  ;;  %s389_s23 = sadd.s32 51, %s2657_s26 }
  0x7b   : > { %s2745_s22 = sld [smem:[#allocation2 + %s336_s20]]  ;;  %s366_s20 = sadd.s32 48, %s2657_s26  ;;  %v329_v11 = vstv %s2736_s28  ;;  %v297_v48 = vadd.f32 %v296_v35, %v292_v28 }
  0x7c   : > { %s2748_s2 = sld [smem:[#allocation2 + %s341_s6]]  ;;  %v333_v13 = vstv %s2741_s5  ;;  %s434_s28 = sadd.s32 13, %s2660_s27  ;;  %v330_v18 = vmul.f32 %v2476_v7, %v329_v11 }
  0x7d   : > { %s2751_s24 = sld [smem:[#allocation2 + %s346_s29]]  ;;  %s371_s29 = sadd.s32 49, %s2657_s26  ;;  %v334_v12 = vmul.f32 %v2472_v19, %v333_v13  ;;  %v302_v60 = vadd.f32 %v301_v49, %v297_v48 }
  0x7e   : > { %s2755_s16 = sld [smem:[#allocation2 + %s351_s14]]  ;;  %s394_s14 = sadd.s32 52, %s2657_s26 }
  0x7f   : > { %s2759_s7 = sld [smem:[#allocation2 + %s356_s10]]  ;;  %s385_s10 = sadd.s32 50, %s2657_s26  ;;  %v335_v29 = vadd.f32 %v334_v12, %v330_v18 }
  0x80   : > { %s2764_s6 = sld [smem:[#allocation2 + %s361_s21]]  ;;  %s443_s5 = sadd.s32 60, %s2657_s26 }
  0x81   : > { %s2767_s3 = sld [smem:[#allocation2 + %s366_s20]]  ;;  %v338_v23 = vstv %s2745_s22  ;;  %s447_s4 = sadd.s32 61, %s2657_s26 }
  0x82   : > { %s2771_s9 = sld [smem:[#allocation2 + %s371_s29]]  ;;  %s399_s29 = sadd.s32 53, %s2657_s26  ;;  %v339_v30 = vmul.f32 %v2468_v27, %v338_v23  ;;  %v343_v32 = vstv %s2748_s2 }
  0x83   : > { %s2777_s21 = sld [smem:[#allocation4 + %s376_s25]]  ;;  %s404_s25 = sadd.s32 54, %s2657_s26  ;;  %v344_v36 = vmul.f32 %v2464_v31, %v343_v32  ;;  %v348_v44 = vstv %s2751_s24 }
  0x84   : > { %s2781_s30 = sld [smem:[#allocation2 + %s385_s10]]  ;;  %s409_s10 = sadd.s32 55, %s2657_s26  ;;  %v340_v39 = vadd.f32 %v339_v30, %v335_v29  ;;  %v349_v54 = vmul.f32 %v2460_v34, %v348_v44  ;;  %v353_v56 = vstv %s2755_s16 }
  0x85   : > { %s2784_s20 = sld [smem:[#allocation2 + %s389_s23]]  ;;  %s462_s17 = sadd.s32 64, %s2657_s26  ;;  %v354_v3 = vmul.f32 %v2456_v37, %v353_v56  ;;  %v358_v4 = vstv %s2759_s7 }
  0x86   : > { %s2788_s11 = sld [smem:[#allocation2 + %s394_s14]]  ;;  %s419_s14 = sadd.s32 57, %s2657_s26  ;;  %v345_v53 = vadd.f32 %v344_v36, %v340_v39  ;;  %v359_v16 = vmul.f32 %v2452_v40, %v358_v4  ;;  %v363_v12 = vstv %s2764_s6 }
  0x87   : > { %s2793_s8 = sld [smem:[#allocation2 + %s399_s29]]  ;;  %s424_s29 = sadd.s32 58, %s2657_s26  ;;  %v364_v20 = vmul.f32 %v2448_v42, %v363_v12  ;;  %v368_v32 = vstv %s2767_s3 }
  0x88   : > { %4638 = sst [smem:[#allocation15_spill]] %s2771_s9  ;;  %s467_s18 = sadd.s32 65, %s2657_s26  ;;  %v350_v2 = vadd.f32 %v349_v54, %v345_v53  ;;  %v369_v49 = vmul.f32 %v2444_v46, %v368_v32 }
  0x89   : > { %4639 = sst [smem:[#allocation16_spill]] %s2777_s21  ;;  %s414_s21 = sadd.s32 56, %s2657_s26 }
  0x8a   : > { %s2797_s23 = sld [smem:[#allocation2 + %s404_s25]]  ;;  %s429_s25 = sadd.s32 59, %s2657_s26  ;;  %v387_v50 = vstv %s2781_s30  ;;  %v355_v15 = vadd.f32 %v354_v3, %v350_v2 }
  0x8b   : > { %s2800_s9 = sld [smem:[#allocation2 + %s409_s10]]  ;;  %s482_s19 = sadd.s32 68, %s2657_s26  ;;  %v391_v51 = vstv %s2784_s20  ;;  %v388_v57 = vmul.f32 %v2476_v7, %v387_v50 }
  0x8c   : > { %s2806_s13 = sld [smem:[#allocation2 + %s414_s21]]  ;;  %s501_s0 = sadd.s32 70, %s2657_s26  ;;  %v392_v58 = vmul.f32 %v2472_v19, %v391_v51  ;;  %v396_v62 = vstv %s2788_s11  ;;  %v360_v30 = vadd.f32 %v359_v16, %v355_v15 }
  0x8d   : > { %s2811_s12 = sld [smem:[#allocation2 + %s419_s14]]  ;;  %s510_s20 = sadd.s32 72, %s2657_s26  ;;  %v397_v6 = vmul.f32 %v2468_v27, %v396_v62  ;;  %v401_v11 = vstv %s2793_s8 }
  0x8e   : > { %s2815_s10 = sld [smem:[#allocation2 + %s424_s29]]  ;;  %s452_s29 = sadd.s32 62, %s2657_s26  ;;  %v393_v5 = vadd.f32 %v392_v58, %v388_v57  ;;  %v402_v22 = vmul.f32 %v2464_v31, %v401_v11  ;;  %v365_v48 = vadd.f32 %v364_v20, %v360_v30 }
  0x8f   : > { %s2820_s15 = sld [smem:[#allocation2 + %s429_s25]]  ;;  %s545_s8 = sadd.s32 79, %s2657_s26 }
  0x90   : > { %s2825_s21 = sld [smem:[#allocation4 + %s434_s28]]  ;;  %v398_v21 = vadd.f32 %v397_v6, %v393_v5  ;;  %v406_v26 = vstv %s2797_s23 }
  0x91   : > { %s2830_s14 = sld [smem:[#allocation2 + %s443_s5]]  ;;  %v407_v28 = vmul.f32 %v2460_v34, %v406_v26  ;;  %v411_v36 = vstv %s2800_s9  ;;  %s588_s9 = sadd.s32 86, %s2657_s26 }
  0x92   : > { %s2834_s25 = sld [smem:[#allocation2 + %s447_s4]]  ;;  %s472_s4 = sadd.s32 66, %s2657_s26  ;;  %v403_v33 = vadd.f32 %v402_v22, %v398_v21  ;;  %v412_v53 = vmul.f32 %v2456_v37, %v411_v36  ;;  %v416_v55 = vstv %s2806_s13 }
  0x93   : > { %s2838_s22 = sld [smem:[#allocation2 + %s452_s29]]  ;;  %s603_s13 = sadd.s32 89, %s2657_s26  ;;  %v417_v4 = vmul.f32 %v2452_v40, %v416_v55 }
  0x94   : > { %s2848_s5 = sld [smem:[#allocation2 + %s462_s17]]  ;;  %s487_s17 = sadd.s32 69, %s2657_s26 }
  0x95   : > { %4640 = sst [smem:[#allocation17_spill]] %s2820_s15  ;;  %s457_s15 = sadd.s32 63, %s2657_s26 }
  0x96   : > { %4641 = sst [smem:[#allocation18_spill]] %s2825_s21  ;;  %s477_s21 = sadd.s32 67, %s2657_s26 }
  0x97   : > { %s2843_s28 = sld [smem:[#allocation2 + %s457_s15]]  ;;  %v445_v17 = vstv %s2830_s14 }
  0x98   : > { %s2852_s29 = sld [smem:[#allocation2 + %s467_s18]]  ;;  %v449_v18 = vstv %s2834_s25  ;;  %s559_s25 = sadd.s32 80, %s2657_s26  ;;  %v446_v0 = vmul.f32 %v2476_v7, %v445_v17 }
  0x99   : > { %s4642_s2 = sld [smem:[#allocation11_spill]]  ;;  %v450_v29 = vmul.f32 %v2472_v19, %v449_v18  ;;  %v454_v1 = vstv %s2838_s22 }
  0x9a   : > { %s2856_s15 = sld [smem:[#allocation2 + %s472_s4]]  ;;  %s492_s4 = sadd.s32 14, %s2660_s27  ;;  %v455_v43 = vmul.f32 %v2468_v27, %v454_v1  ;;  %v464_v2 = vstv %s2848_s5 }
  0x9b   : > { %s2862_s1 = sld [smem:[#allocation2 + %s477_s21]]  ;;  %v451_v41 = vadd.f32 %v450_v29, %v446_v0  ;;  %v465_v15 = vmul.f32 %v2460_v34, %v464_v2 }
  0x9c   : > { %s2868_s18 = sld [smem:[#allocation2 + %s482_s19]]  ;;  %s515_s19 = sadd.s32 73, %s2657_s26 }
  0x9d   : > { %s4646_s24 = sld [smem:[#allocation12_spill]]  ;;  %v459_v50 = vstv %s2843_s28  ;;  %v456_v58 = vadd.f32 %v455_v43, %v451_v41 }
  0x9e   : > { %s2876_s21 = sld [smem:[#allocation4 + %s492_s4]]  ;;  %v460_v59 = vmul.f32 %v2464_v31, %v459_v50  ;;  %v469_v18 = vstv %s2852_s29 }
  0x9f   : > { %v305_v52 = vstv %s4642_s2  ;;  %s2883_s30 = sld [smem:[#allocation2 + %s501_s0]]  ;;  %v470_v32 = vmul.f32 %v2456_v37, %v469_v18 }
  0xa0   : > { %4643 = sst [smem:[#allocation11_spill]] %s2856_s15  ;;  %v306_v61 = vmul.f32 %v2448_v42, %v305_v52  ;;  %v408_v52 = vadd.f32 %v407_v28, %v403_v33 }
  0xa1   : > { %4644 = sst [smem:[#allocation19_spill]] %s2862_s1  ;;  %s505_s1 = sadd.s32 71, %s2657_s26 }
  0xa2   : > { %s2872_s15 = sld [smem:[#allocation2 + %s487_s17]]  ;;  %s520_s17 = sadd.s32 74, %s2657_s26  ;;  %v307_v9 = vadd.f32 %v306_v61, %v302_v60  ;;  %v370_v61 = vadd.f32 %v369_v49, %v365_v48  ;;  %v413_v3 = vadd.f32 %v412_v53, %v408_v52 }
  0xa3   : > { %s2888_s2 = sld [smem:[#allocation2 + %s505_s1]]  ;;  %v310_v63 = vstv %s4646_s24  ;;  %s530_s1 = sadd.s32 76, %s2657_s26 }
  0xa4   : > { %4647 = sst [smem:[#allocation12_spill]] %s2876_s21  ;;  %v311_v10 = vmul.f32 %v2444_v46, %v310_v63  ;;  %v418_v22 = vadd.f32 %v417_v4, %v413_v3 }
  0xa5   : > { %s2892_s16 = sld [smem:[#allocation2 + %s510_s20]]  ;;  %s535_s20 = sadd.s32 77, %s2657_s26  ;;  %v503_v45 = vstv %s2883_s30 }
  0xa6   : > { %s4648_s4 = sld [smem:[#allocation10_spill]]  ;;  %v312_v24 = vadd.f32 %v311_v10, %v307_v9  ;;  %v504_v56 = vmul.f32 %v2476_v7, %v503_v45  ;;  %v421_v9 = vstv %s2811_s12 }
  0xa7   : > { %s4649_s0 = sld [smem:[#allocation13_spill]] }
  0xa8   : > { %4645 = sst [smem:[#allocation20_spill]] %s2872_s15  ;;  %s525_s15 = sadd.s32 75, %s2657_s26 }
  0xa9   : > { %s2896_s21 = sld [smem:[#allocation2 + %s515_s19]]  ;;  %s540_s19 = sadd.s32 78, %s2657_s26  ;;  %v507_v44 = vstv %s2888_s2 }
  0xaa   : > { %s2901_s11 = sld [smem:[#allocation2 + %s520_s17]]  ;;  %s593_s2 = sadd.s32 87, %s2657_s26  ;;  %v508_v57 = vmul.f32 %v2472_v19, %v507_v44 }
  0xab   : > { %s2906_s24 = sld [smem:[#allocation2 + %s525_s15]]  ;;  %v512_v60 = vstv %s2892_s16 }
  0xac   : > { %v262_v13 = vstv %s4648_s4  ;;  %s2911_s7 = sld [smem:[#allocation2 + %s530_s1]]  ;;  %s550_s4 = sadd.s32 15, %s2660_s27  ;;  %v509_v10 = vadd.f32 %v508_v57, %v504_v56  ;;  %v513_v11 = vmul.f32 %v2468_v27, %v512_v60 }
  0xad   : > { %v315_v14 = vstv %s4649_s0  ;;  %s2917_s17 = sld [smem:[#allocation2 + %s535_s20]]  ;;  %v2925_v23 = vadd.f32 %v262_v13, %v260_v8  ;;  %s563_s1 = sadd.s32 81, %s2657_s26  ;;  %v426_v13 = vstv %s2815_s10 }
  0xae   : > { %s2922_s15 = sld [smem:[#allocation2 + %s540_s19]]  ;;  %v316_v25 = vmul.f32 %v2440_v47, %v315_v14  ;;  %s568_s20 = sadd.s32 82, %s2657_s26  ;;  %v461_v14 = vadd.f32 %v460_v59, %v456_v58  ;;  %v514_v29 = vadd.f32 %v513_v11, %v509_v10  ;;  %v427_v20 = vmul.f32 %v2444_v46, %v426_v13 }
  0xaf   : > { %s2929_s14 = sld [smem:[#allocation2 + %s545_s8]]  ;;  %s573_s8 = sadd.s32 83, %s2657_s26  ;;  %v265_v35 = vmul.f32 1.442695, %v2925_v23  ;;  %v517_v16 = vstv %s2896_s21  ;;  %v484_v10 = vstv %s2868_s18  ;;  %vm264_vm10 = vcmp.gt.f32.partialorder %v2925_v23, 0.0 }
  0xb0   : > { %s4650_s6 = sld [smem:[#allocation14_spill]]  ;;  %v317_v38 = vadd.f32 %v316_v25, %v312_v24  ;;  %v422_v24 = vmul.f32 %v2448_v42, %v421_v9  ;;  %s636_s21 = sadd.s32 94, %s2657_s26  ;;  %v518_v30 = vmul.f32 %v2464_v31, %v517_v16  ;;  %v466_v1 = vadd.f32 %v465_v15, %v461_v14 }
  0xb1   : > { %s2934_s0 = sld [smem:[#allocation4 + %s550_s4]]  ;;  %2300 = vpow2.f32 %v265_v35  ;;  %v522_v33 = vstv %s2901_s11  ;;  %v527_v52 = vstv %s2906_s24  ;;  %s675_s24 = sadd.s32 100, %s2657_s26 }
  0xb2   : > { %s2939_s23 = sld [smem:[#allocation2 + %s559_s25]]  ;;  %s578_s25 = sadd.s32 84, %s2657_s26  ;;  %v423_v36 = vadd.f32 %v422_v24, %v418_v22  ;;  %v519_v44 = vadd.f32 %v518_v30, %v514_v29  ;;  %v523_v48 = vmul.f32 %v2460_v34, %v522_v33  ;;  %v532_v11 = vstv %s2911_s7 }
  0xb3   : > { %s2944_s19 = sld [smem:[#allocation2 + %s563_s1]]  ;;  %s583_s1 = sadd.s32 85, %s2657_s26  ;;  %v537_v14 = vstv %s2917_s17  ;;  %v485_v22 = vmul.f32 %v2444_v46, %v484_v10 }
  0xb4   : > { %s4651_s4 = sld [smem:[#allocation15_spill]]  ;;  %v524_v4 = vadd.f32 %v523_v48, %v519_v44  ;;  %s699_s7 = sadd.s32 105, %s2657_s26 }
  0xb5   : > { %s2950_s22 = sld [smem:[#allocation2 + %s568_s20]] }
  0xb6   : > { %v320_v39 = vstv %s4650_s6  ;;  %s2956_s3 = sld [smem:[#allocation2 + %s573_s8]]  ;;  %s598_s8 = sadd.s32 88, %s2657_s26 }
  0xb7   : > { %s2961_s6 = sld [smem:[#allocation2 + %s578_s25]]  ;;  %v2969_v54 = vadd.f32 %v320_v39, %v317_v38 }
  0xb8   : > { %s2966_s20 = sld [smem:[#allocation2 + %s583_s1]]  ;;  %s608_s1 = sadd.s32 16, %s2660_s27  ;;  %v561_v5 = vstv %s2939_s23 }
  0xb9   : > { %s4652_s30 = sld [smem:[#allocation16_spill]]  ;;  %v565_v6 = vstv %s2944_s19  ;;  %v323_v8 = vmul.f32 1.442695, %v2969_v54  ;;  %v562_v12 = vmul.f32 %v2476_v7, %v561_v5  ;;  %v528_v5 = vmul.f32 %v2456_v37, %v527_v52 }
  0xba   : > { %v373_v51 = vstv %s4651_s4  ;;  %s2974_s28 = sld [smem:[#allocation2 + %s588_s9]]  ;;  %s617_s9 = sadd.s32 90, %s2657_s26  ;;  %v566_v21 = vmul.f32 %v2472_v19, %v565_v6  ;;  %vm322_vm11 = vcmp.gt.f32.partialorder %v2969_v54, 0.0 }
  0xbb   : > { %s2979_s4 = sld [smem:[#allocation2 + %s593_s2]]  ;;  %v374_v62 = vmul.f32 %v2440_v47, %v373_v51  ;;  %s621_s2 = sadd.s32 91, %s2657_s26  ;;  %v570_v26 = vstv %s2950_s22  ;;  %2302 = vpow2.f32 %v323_v8  ;;  %v471_v51 = vadd.f32 %v470_v32, %v466_v1 }
  0xbc   : > { %s2985_s25 = sld [smem:[#allocation2 + %s598_s8]]  ;;  %s626_s8 = sadd.s32 92, %s2657_s26  ;;  %v567_v38 = vadd.f32 %v566_v21, %v562_v12  ;;  %v571_v39 = vmul.f32 %v2468_v27, %v570_v26  ;;  %v575_v43 = vstv %s2956_s3  ;;  %v529_v24 = vadd.f32 %v528_v5, %v524_v4 }
  0xbd   : > { %s2991_s16 = sld [smem:[#allocation2 + %s603_s13]]  ;;  %v375_v17 = vadd.f32 %v374_v62, %v370_v61  ;;  %s631_s13 = sadd.s32 93, %s2657_s26  ;;  %v576_v60 = vmul.f32 %v2464_v31, %v575_v43  ;;  %v428_v61 = vadd.f32 %v427_v20, %v423_v36  ;;  %v580_v62 = vstv %s2961_s6 }
  0xbe   : > { %s2997_s5 = sld [smem:[#allocation4 + %s608_s1]]  ;;  %s641_s1 = sadd.s32 95, %s2657_s26  ;;  %v3054_v56 = vpop.eup %2300  ;;  %v572_v59 = vadd.f32 %v571_v39, %v567_v38  ;;  %v581_v16 = vmul.f32 %v2460_v34, %v580_v62  ;;  %v585_v18 = vstv %s2966_s20  ;;  %v538_v20 = vmul.f32 %v2448_v42, %v537_v14 }
  0xbf   : > { %v378_v63 = vstv %s4652_s30  ;;  %s4653_s30 = sld [smem:[#allocation17_spill]]  ;;  %s684_s6 = sadd.s32 102, %s2657_s26  ;;  %v542_v1 = vstv %s2922_s15  ;;  %v586_v33 = vmul.f32 %v2456_v37, %v585_v18 }
  0xc0   : > { %s4654_s23 = sld [smem:[#allocation11_spill]]  ;;  %v3029_v28 = vadd.f32 %v378_v63, %v375_v17  ;;  %v577_v15 = vadd.f32 %v576_v60, %v572_v59 }
  0xc1   : > { %s3003_s19 = sld [smem:[#allocation2 + %s617_s9]]  ;;  %s646_s9 = sadd.s32 96, %s2657_s26 }
  0xc2   : > { %s3009_s12 = sld [smem:[#allocation2 + %s621_s2]]  ;;  %s651_s2 = sadd.s32 97, %s2657_s26  ;;  %v3068_v3 = vmul.f32 1.442695, %v3029_v28  ;;  %v582_v32 = vadd.f32 %v581_v16, %v577_v15  ;;  %v600_v15 = vstv %s2985_s25  ;;  %vm380_vm12 = vcmp.gt.f32.partialorder %v3029_v28, 0.0 }
  0xc3   : > { %s3015_s10 = sld [smem:[#allocation2 + %s626_s8]] }
  0xc4   : > { %s3020_s29 = sld [smem:[#allocation2 + %s631_s13]]  ;;  %s656_s13 = sadd.s32 98, %s2657_s26  ;;  %2304 = vpow2.f32 %v3068_v3 }
  0xc5   : > { %v431_v25 = vstv %s4653_s30  ;;  %s3026_s22 = sld [smem:[#allocation2 + %s636_s21]] }
  0xc6   : > { %v474_v0 = vstv %s4654_s23  ;;  %v432_v35 = vmul.f32 %v2440_v47, %v431_v25  ;;  %s3033_s30 = sld [smem:[#allocation2 + %s641_s1]]  ;;  %s661_s1 = sadd.s32 99, %s2657_s26  ;;  %v533_v25 = vmul.f32 %v2452_v40, %v532_v11 }
  0xc7   : > { %v475_v41 = vmul.f32 %v2452_v40, %v474_v0  ;;  %v619_v45 = vstv %s3003_s19  ;;  %s4655_s11 = sld [smem:[#allocation18_spill]]  ;;  %s666_s19 = sadd.s32 17, %s2660_s27 }
  0xc8   : > { %s3039_s23 = sld [smem:[#allocation2 + %s646_s9]]  ;;  %v620_v49 = vmul.f32 %v2476_v7, %v619_v45  ;;  %v623_v50 = vstv %s3009_s12  ;;  %v433_v17 = vadd.f32 %v432_v35, %v428_v61  ;;  %v3098_v0 = vpop.eup %2302  ;;  %v590_v35 = vstv %s2974_s28 }
  0xc9   : > { %s4656_s8 = sld [smem:[#allocation19_spill]]  ;;  %v624_v53 = vmul.f32 %v2472_v19, %v623_v50  ;;  %v628_v55 = vstv %s3015_s10  ;;  %v476_v8 = vadd.f32 %v475_v41, %v471_v51  ;;  %v534_v45 = vadd.f32 %v533_v25, %v529_v24 }
  0xca   : > { %s3045_s21 = sld [smem:[#allocation2 + %s651_s2]]  ;;  %v629_v2 = vmul.f32 %v2468_v27, %v628_v55  ;;  %s679_s2 = sadd.s32 101, %s2657_s26  ;;  %v633_v6 = vstv %s3020_s29  ;;  %v543_v55 = vmul.f32 %v2444_v46, %v542_v1  ;;  %v591_v59 = vmul.f32 %v2452_v40, %v590_v35 }
  0xcb   : > { %s3051_s3 = sld [smem:[#allocation2 + %s656_s13]]  ;;  %v625_v63 = vadd.f32 %v624_v53, %v620_v49  ;;  %v634_v21 = vmul.f32 %v2464_v31, %v633_v6  ;;  %v638_v26 = vstv %s3026_s22  ;;  %v595_v61 = vstv %s2979_s4  ;;  %s752_s4 = sadd.s32 114, %s2657_s26 }
  0xcc   : > { %s3059_s12 = sld [smem:[#allocation2 + %s661_s1]]  ;;  %s689_s1 = sadd.s32 103, %s2657_s26  ;;  %v639_v36 = vmul.f32 %v2460_v34, %v638_v26  ;;  %v643_v44 = vstv %s3033_s30  ;;  %v596_v14 = vmul.f32 %v2448_v42, %v595_v61  ;;  %v601_v25 = vmul.f32 %v2444_v46, %v600_v15 }
  0xcd   : > { %v436_v57 = vstv %s4655_s11  ;;  %s4657_s10 = sld [smem:[#allocation20_spill]]  ;;  %v630_v12 = vadd.f32 %v629_v2, %v625_v63  ;;  %s733_s30 = sadd.s32 110, %s2657_s26  ;;  %v644_v63 = vmul.f32 %v2456_v37, %v643_v44  ;;  %v539_v2 = vadd.f32 %v538_v20, %v534_v45 }
  0xce   : > { %s3064_s9 = sld [smem:[#allocation4 + %s666_s19]]  ;;  %s694_s19 = sadd.s32 104, %s2657_s26  ;;  %v3126_v50 = vadd.f32 %v436_v57, %v433_v17  ;;  %v547_v57 = vstv %s2929_s14  ;;  %v648_v4 = vstv %s3039_s23  ;;  %v605_v26 = vstv %s2991_s16 }
  0xcf   : > { %v479_v58 = vstv %s4656_s8  ;;  %s3072_s8 = sld [smem:[#allocation2 + %s675_s24]]  ;;  %s704_s24 = sadd.s32 106, %s2657_s26  ;;  %v635_v39 = vadd.f32 %v634_v21, %v630_v12  ;;  %v548_v3 = vmul.f32 %v2440_v47, %v547_v57  ;;  %v649_v17 = vmul.f32 %v2452_v40, %v648_v4 }
  0xd0   : > { %v480_v9 = vmul.f32 %v2448_v42, %v479_v58  ;;  %s3078_s13 = sld [smem:[#allocation2 + %s679_s2]]  ;;  %s714_s2 = sadd.s32 108, %s2657_s26  ;;  %v587_v58 = vadd.f32 %v586_v33, %v582_v32  ;;  %v653_v18 = vstv %s3045_s21  ;;  %v544_v12 = vadd.f32 %v543_v55, %v539_v2 }
  0xd1   : > { %s3084_s29 = sld [smem:[#allocation2 + %s684_s6]]  ;;  %s719_s6 = sadd.s32 109, %s2657_s26  ;;  %v640_v62 = vadd.f32 %v639_v36, %v635_v39  ;;  %v552_v21 = vstv %s2934_s0  ;;  %v654_v1 = vmul.f32 %v2448_v42, %v653_v18  ;;  %v610_v18 = vstv %s2997_s5 }
  0xd2   : > { %s3089_s18 = sld [smem:[#allocation2 + %s689_s1]]  ;;  %v481_v29 = vadd.f32 %v480_v9, %v476_v8  ;;  %v3151_v8 = vmul.f32 1.442695, %v3126_v50  ;;  %v663_v57 = vstv %s3059_s12  ;;  %vm438_vm13 = vcmp.gt.f32.partialorder %v3126_v50, 0.0 }
  0xd3   : > { %v489_v13 = vstv %s4657_s10  ;;  %s3095_s17 = sld [smem:[#allocation2 + %s694_s19]]  ;;  %s709_s10 = sadd.s32 107, %s2657_s26  ;;  %v645_v16 = vadd.f32 %v644_v63, %v640_v62 }
  0xd4   : > { %v490_v30 = vmul.f32 %v2440_v47, %v489_v13  ;;  %s3103_s20 = sld [smem:[#allocation2 + %s699_s7]]  ;;  %v486_v51 = vadd.f32 %v485_v22, %v481_v29  ;;  %v592_v13 = vadd.f32 %v591_v59, %v587_v58  ;;  %2306 = vpow2.f32 %v3151_v8 }
  0xd5   : > { %v677_v38 = vstv %s3072_s8  ;;  %s3109_s22 = sld [smem:[#allocation2 + %s704_s24]]  ;;  %s724_s8 = sadd.s32 18, %s2660_s27  ;;  %v650_v35 = vadd.f32 %v649_v17, %v645_v16  ;;  %v664_v8 = vmul.f32 %v2440_v47, %v663_v57 }
  0xd6   : > { %v678_v41 = vmul.f32 %v2476_v7, %v677_v38  ;;  %v681_v43 = vstv %s3078_s13  ;;  %s3115_s15 = sld [smem:[#allocation2 + %s709_s10]]  ;;  %s747_s24 = sadd.s32 113, %s2657_s26  ;;  %v491_v11 = vadd.f32 %v490_v30, %v486_v51  ;;  %v597_v20 = vadd.f32 %v596_v14, %v592_v13 }
  0xd7   : > { %v682_v48 = vmul.f32 %v2472_v19, %v681_v43  ;;  %v686_v49 = vstv %s3084_s29  ;;  %s3121_s28 = sld [smem:[#allocation2 + %s714_s2]]  ;;  %s737_s29 = sadd.s32 111, %s2657_s26  ;;  %v658_v38 = vstv %s3051_s3 }
  0xd8   : > { %v687_v52 = vmul.f32 %v2468_v27, %v686_v49  ;;  %v691_v53 = vstv %s3089_s18  ;;  %s3130_s13 = sld [smem:[#allocation2 + %s719_s6]]  ;;  %s742_s18 = sadd.s32 112, %s2657_s26  ;;  %v602_v55 = vadd.f32 %v601_v25, %v597_v20  ;;  %v668_v20 = vstv %s3064_s9 }
  0xd9   : > { %v683_v60 = vadd.f32 %v682_v48, %v678_v41  ;;  %s3135_s1 = sld [smem:[#allocation4 + %s724_s8]]  ;;  %v692_v6 = vmul.f32 %v2464_v31, %v691_v53  ;;  %v696_v10 = vstv %s3095_s17  ;;  %s757_s10 = sadd.s32 115, %s2657_s26 }
  0xda   : > { %s4658_s11 = sld [smem:[#allocation12_spill]]  ;;  %s762_s2 = sadd.s32 116, %s2657_s26  ;;  %v697_v24 = vmul.f32 %v2460_v34, %v696_v10  ;;  %v701_v29 = vstv %s3103_s20 }
  0xdb   : > { %s3141_s19 = sld [smem:[#allocation2 + %s733_s30]]  ;;  %v688_v5 = vadd.f32 %v687_v52, %v683_v60  ;;  %s767_s6 = sadd.s32 117, %s2657_s26  ;;  %v702_v43 = vmul.f32 %v2456_v37, %v701_v29  ;;  %v706_v44 = vstv %s3109_s22  ;;  %v606_v52 = vmul.f32 %v2440_v47, %v605_v26 }
  0xdc   : > { %s3146_s7 = sld [smem:[#allocation2 + %s737_s29]]  ;;  %s772_s8 = sadd.s32 118, %s2657_s26  ;;  %v655_v60 = vadd.f32 %v654_v1, %v650_v35  ;;  %v707_v62 = vmul.f32 %v2452_v40, %v706_v44  ;;  %v711_v63 = vstv %s3115_s15 }
  0xdd   : > { %s3155_s14 = sld [smem:[#allocation2 + %s742_s18]]  ;;  %v693_v22 = vadd.f32 %v692_v6, %v688_v5  ;;  %s777_s29 = sadd.s32 119, %s2657_s26  ;;  %v712_v13 = vmul.f32 %v2448_v42, %v711_v63 }
  0xde   : > { %s3160_s23 = sld [smem:[#allocation2 + %s747_s24]]  ;;  %s782_s20 = sadd.s32 19, %s2660_s27  ;;  %v721_v29 = vstv %s3130_s13 }
  0xdf   : > { %s3166_s17 = sld [smem:[#allocation2 + %s752_s4]]  ;;  %v698_v41 = vadd.f32 %v697_v24, %v693_v22  ;;  %v722_v1 = vmul.f32 %v2440_v47, %v721_v29 }
  0xe0   : > { %v494_v9 = vstv %s4658_s11  ;;  %s3171_s25 = sld [smem:[#allocation2 + %s757_s10]] }
  0xe1   : > { %v735_v30 = vstv %s3141_s19  ;;  %s3178_s21 = sld [smem:[#allocation2 + %s762_s2]]  ;;  %v3209_v51 = vadd.f32 %v494_v9, %v491_v11  ;;  %v703_v61 = vadd.f32 %v702_v43, %v698_v41  ;;  %v2138_v41 = vadd.f32 -1.0, %v3098_v0 }
  0xe2   : > { %s4659_s30 = sld [smem:[#allocation9_spill]]  ;;  %v736_v32 = vmul.f32 %v2476_v7, %v735_v30  ;;  %v739_v33 = vstv %s3146_s7  ;;  %v726_v0 = vstv %s3135_s1 }
  0xe3   : > { %s3184_s11 = sld [smem:[#allocation2 + %s767_s6]]  ;;  %v740_v39 = vmul.f32 %v2472_v19, %v739_v33  ;;  %v744_v36 = vstv %s3155_s14  ;;  %v497_v6 = vmul.f32 1.442695, %v3209_v51  ;;  %v708_v11 = vadd.f32 %v707_v62, %v703_v61 }
  0xe4   : > { %s3190_s16 = sld [smem:[#allocation2 + %s772_s8]]  ;;  %v745_v7 = vmul.f32 %v2468_v27, %v744_v36  ;;  %v749_v45 = vstv %s3160_s23  ;;  %v549_v27 = vadd.f32 %v548_v3, %v544_v12  ;;  %v716_v3 = vstv %s3121_s28 }
  0xe5   : > { %s3196_s19 = sld [smem:[#allocation2 + %s777_s29]]  ;;  %v741_v48 = vadd.f32 %v740_v39, %v736_v32  ;;  %v750_v19 = vmul.f32 %v2464_v31, %v749_v45  ;;  %v754_v49 = vstv %s3166_s17  ;;  %v659_v31 = vmul.f32 %v2444_v46, %v658_v38 }
  0xe6   : > { %s3204_s27 = sld [smem:[#allocation4 + %s782_s20]]  ;;  %v759_v53 = vstv %s3171_s25  ;;  %v755_v59 = vmul.f32 %v2460_v34, %v754_v49  ;;  %v3231_v34 = vpop.eup %2304  ;;  %v3240_v9 = vadd.f32 %v552_v21, %v549_v27  ;;  %2308 = vpow2.f32 %v497_v6 }
  0xe7   : > { %v746_v58 = vadd.f32 %v745_v7, %v741_v48  ;;  %v760_v4 = vmul.f32 %v2456_v37, %v759_v53  ;;  %v764_v5 = vstv %s3178_s21  ;;  %v607_v37 = vadd.f32 %v606_v52, %v602_v55 }
  0xe8   : > { %s3199_s26 = smul.u32 100, %s4659_s30  ;;  %v765_v14 = vmul.f32 %v2452_v40, %v764_v5  ;;  %v660_v15 = vadd.f32 %v659_v31, %v655_v60  ;;  %v555_v40 = vmul.f32 1.442695, %v3240_v9  ;;  %v713_v12 = vadd.f32 %v712_v13, %v708_v11 }
  0xe9   : > { %s3207_s3 = smul.u32 10, %s4659_s30  ;;  %v751_v2 = vadd.f32 %v750_v19, %v746_v58  ;;  %v769_v17 = vstv %s3184_s11  ;;  %v717_v21 = vmul.f32 %v2444_v46, %v716_v3  ;;  %v3269_v25 = vadd.f32 %v610_v18, %v607_v37 }
  0xea   : > { %s793_s18 = sadd.s32 20, %s3199_s26  ;;  %s799_s22 = sadd.s32 21, %s3199_s26  ;;  %v770_v24 = vmul.f32 %v2448_v42, %v769_v17  ;;  %v665_v26 = vadd.f32 %v664_v8, %v660_v15  ;;  %v774_v30 = vstv %s3190_s16  ;;  %2310 = vpow2.f32 %v555_v40 }
  0xeb   : > { %s795_s7 = sadd.s32 10, %s3207_s3  ;;  %s3218_s24 = sld [smem:[#allocation2 + %s793_s18]]  ;;  %v756_v10 = vadd.f32 %v755_v59, %v751_v2  ;;  %v718_v42 = vadd.f32 %v717_v21, %v713_v12  ;;  %v775_v33 = vmul.f32 %v2444_v46, %v774_v30  ;;  %v613_v35 = vmul.f32 1.442695, %v3269_v25  ;;  %v2307_v46 = vpop.eup %2306 }
  0xec   : > { %s3222_s14 = sld [smem:[#allocation2 + %s799_s22]]  ;;  %s804_s4 = sadd.s32 22, %s3199_s26  ;;  %v3291_v38 = vadd.f32 %v668_v20, %v665_v26  ;;  %v779_v39 = vstv %s3196_s19  ;;  %v2137_v36 = vadd.f32 -1.0, %v3054_v56  ;;  %v2139_v48 = vadd.f32 -1.0, %v3231_v34 }
  0xed   : > { %s3228_s23 = sld [smem:[#allocation2 + %s804_s4]]  ;;  %s809_s10 = sadd.s32 23, %s3199_s26  ;;  %v761_v16 = vadd.f32 %v760_v4, %v756_v10  ;;  %v723_v43 = vadd.f32 %v722_v1, %v718_v42  ;;  %v780_v56 = vmul.f32 %v2440_v47, %v779_v39  ;;  %2312 = vpow2.f32 %v613_v35 }
  0xee   : > { %s3234_s12 = sld [smem:[#allocation2 + %s809_s10]]  ;;  %s814_s17 = sadd.s32 24, %s3199_s26  ;;  %v671_v45 = vmul.f32 1.442695, %v3291_v38  ;;  %v3317_v44 = vsel %vm264_vm10, %v2925_v23, %v2137_v36  ;;  %v3324_v47 = vsel %vm322_vm11, %v2969_v54, %v2138_v41  ;;  %v2140_v54 = vadd.f32 -1.0, %v2307_v46 }
  0xef   : > { %s3242_s15 = sld [smem:[#allocation2 + %s814_s17]]  ;;  %s819_s2 = sadd.s32 25, %s3199_s26  ;;  %v766_v22 = vadd.f32 %v765_v14, %v761_v16  ;;  %v3332_v27 = vadd.f32 %v726_v0, %v723_v43  ;;  %v784_v53 = vstv %s3204_s27  ;;  %v3345_v55 = vsel %vm380_vm12, %v3029_v28, %v2139_v48 }
  0xf0   : > { %s3248_s25 = sld [smem:[#allocation2 + %s819_s2]]  ;;  %s824_s0 = sadd.s32 26, %s3199_s26  ;;  %2314 = vpow2.f32 %v671_v45  ;;  %v3367_v62 = vsel %vm438_vm13, %v3126_v50, %v2140_v54  ;;  %vm496_vm14 = vcmp.gt.f32.partialorder %v3209_v51, 0.0  ;;  %vm554_vm15 = vcmp.gt.f32.partialorder %v3240_v9, 0.0 }
  0xf1   : > { %s3253_s6 = sld [smem:[#allocation2 + %s824_s0]]  ;;  %s829_s21 = sadd.s32 27, %s3199_s26  ;;  %v771_v32 = vadd.f32 %v770_v24, %v766_v22  ;;  %v797_v19 = vstv %s3218_s24  ;;  %v729_v61 = vmul.f32 1.442695, %v3332_v27  ;;  %vm612_vm0 = vcmp.gt.f32.partialorder %v3269_v25, 0.0 }
  0xf2   : > { %s3257_s8 = sld [smem:[#allocation2 + %s829_s21]]  ;;  %s834_s30 = sadd.s32 28, %s3199_s26  ;;  %v801_v49 = vstv %s3222_s14  ;;  %v798_v31 = vmul.f32 %v797_v19, %v3317_v44  ;;  %vm670_vm1 = vcmp.gt.f32.partialorder %v3291_v38, 0.0  ;;  %vm728_vm2 = vcmp.gt.f32.partialorder %v3332_v27, 0.0 }
  0xf3   : > { %s3261_s29 = sld [smem:[#allocation2 + %s834_s30]]  ;;  %s839_s28 = sadd.s32 29, %s3199_s26  ;;  %v776_v7 = vadd.f32 %v775_v33, %v771_v32  ;;  %v2309_v23 = vpop.eup %2308  ;;  %v802_v58 = vmul.f32 %v801_v49, %v3324_v47  ;;  %v806_v59 = vstv %s3228_s23  ;;  %2316 = vpow2.f32 %v729_v61 }
  0xf4   : > { %s3266_s5 = sld [smem:[#allocation2 + %s839_s28]]  ;;  %s852_s11 = sadd.s32 30, %s3199_s26  ;;  %v2141_v63 = vadd.f32 -1.0, %v2309_v23  ;;  %v807_v2 = vmul.f32 %v806_v59, %v3345_v55  ;;  %v811_v34 = vstv %s3234_s12 }
  0xf5   : > { %s3275_s20 = sld [smem:[#allocation4 + %s795_s7]]  ;;  %s856_s18 = sadd.s32 31, %s3199_s26  ;;  %v781_v52 = vadd.f32 %v780_v56, %v776_v7  ;;  %v803_v5 = vadd.f32 %v802_v58, %v798_v31  ;;  %v812_v15 = vmul.f32 %v811_v34, %v3367_v62  ;;  %v816_v17 = vstv %s3242_s15 }
  0xf6   : > { %s3279_s22 = sld [smem:[#allocation2 + %s852_s11]]  ;;  %s861_s4 = sadd.s32 32, %s3199_s26  ;;  %v3393_v13 = vsel %vm496_vm14, %v3209_v51, %v2141_v63  ;;  %v821_v42 = vstv %s3248_s25 }
  0xf7   : > { %s3282_s10 = sld [smem:[#allocation2 + %s856_s18]]  ;;  %s866_s17 = sadd.s32 33, %s3199_s26  ;;  %v3359_v28 = vadd.f32 %v784_v53, %v781_v52  ;;  %v2311_v4 = vpop.eup %2310  ;;  %v808_v16 = vadd.f32 %v807_v2, %v803_v5  ;;  %v817_v29 = vmul.f32 %v816_v17, %v3393_v13  ;;  %v826_v43 = vstv %s3253_s6 }
  0xf8   : > { %s3287_s13 = sld [smem:[#allocation2 + %s861_s4]]  ;;  %s871_s16 = sadd.s32 34, %s3199_s26  ;;  %v2142_v14 = vadd.f32 -1.0, %v2311_v4  ;;  %v831_v53 = vstv %s3257_s8 }
  0xf9   : > { %s3294_s9 = sld [smem:[#allocation2 + %s866_s17]]  ;;  %s876_s7 = sadd.s32 35, %s3199_s26  ;;  %v787_v10 = vmul.f32 1.442695, %v3359_v28  ;;  %v813_v20 = vadd.f32 %v812_v15, %v808_v16  ;;  %vm786_vm3 = vcmp.gt.f32.partialorder %v3359_v28, 0.0 }
  0xfa   : > { %s3298_s2 = sld [smem:[#allocation2 + %s871_s16]]  ;;  %s881_s0 = sadd.s32 36, %s3199_s26  ;;  %v2313_v3 = vpop.eup %2312  ;;  %v3416_v24 = vsel %vm554_vm15, %v3240_v9, %v2142_v14 }
  0xfb   : > { %s3303_s21 = sld [smem:[#allocation2 + %s876_s7]]  ;;  %s886_s19 = sadd.s32 37, %s3199_s26  ;;  %2318 = vpow2.f32 %v787_v10  ;;  %v2143_v26 = vadd.f32 -1.0, %v2313_v3  ;;  %v822_v41 = vmul.f32 %v821_v42, %v3416_v24  ;;  %v818_v7 = vadd.f32 %v817_v29, %v813_v20 }
  0xfc   : > { %s3308_s30 = sld [smem:[#allocation2 + %s881_s0]]  ;;  %s891_s28 = sadd.s32 38, %s3199_s26  ;;  %v854_v60 = vstv %s3279_s22 }
  0xfd   : > { %s3313_s11 = sld [smem:[#allocation2 + %s886_s19]]  ;;  %s896_s18 = sadd.s32 39, %s3199_s26  ;;  %v858_v57 = vstv %s3282_s10  ;;  %v855_v6 = vmul.f32 %v854_v60, %v3317_v44  ;;  %v2315_v30 = vpop.eup %2314  ;;  %v3441_v36 = vsel %vm612_vm0, %v3269_v25, %v2143_v26 }
  0xfe   : > { %s3320_s4 = sld [smem:[#allocation2 + %s891_s28]]  ;;  %s901_s17 = sadd.s32 11, %s3207_s3  ;;  %v859_v37 = vmul.f32 %v858_v57, %v3324_v47  ;;  %v863_v50 = vstv %s3287_s13  ;;  %v2144_v46 = vadd.f32 -1.0, %v2315_v30  ;;  %v827_v59 = vmul.f32 %v826_v43, %v3441_v36 }
  0xff   : > { %s3329_s1 = sld [smem:[#allocation2 + %s896_s18]]  ;;  %s910_s16 = sadd.s32 40, %s3199_s26  ;;  %v864_v40 = vmul.f32 %v863_v50, %v3345_v55  ;;  %v868_v51 = vstv %s3294_s9 }
 0x100   : > { %s3334_s7 = sld [smem:[#allocation4 + %s901_s17]]  ;;  %s914_s0 = sadd.s32 41, %s3199_s26  ;;  %v860_v18 = vadd.f32 %v859_v37, %v855_v6  ;;  %v869_v32 = vmul.f32 %v868_v51, %v3367_v62  ;;  %v873_v9 = vstv %s3298_s2  ;;  %v2317_v52 = vpop.eup %2316  ;;  %v3466_v54 = vsel %vm670_vm1, %v3291_v38, %v2144_v46 }
 0x101   : > { %s3339_s24 = sld [smem:[#allocation2 + %s910_s16]]  ;;  %s919_s14 = sadd.s32 42, %s3199_s26  ;;  %v874_v45 = vmul.f32 %v873_v9, %v3393_v13  ;;  %v878_v25 = vstv %s3303_s21  ;;  %v823_v38 = vadd.f32 %v822_v41, %v818_v7  ;;  %v2145_v5 = vadd.f32 -1.0, %v2317_v52 }
 0x102   : > { %s3350_s19 = sld [smem:[#allocation2 + %s914_s0]]  ;;  %s924_s28 = sadd.s32 43, %s3199_s26  ;;  %v865_v1 = vadd.f32 %v864_v40, %v860_v18  ;;  %v879_v57 = vmul.f32 %v878_v25, %v3416_v24  ;;  %v883_v63 = vstv %s3308_s30  ;;  %v832_v37 = vmul.f32 %v831_v53, %v3466_v54 }
 0x103   : > { %s3355_s27 = sld [smem:[#allocation2 + %s919_s14]]  ;;  %s929_s18 = sadd.s32 44, %s3199_s26  ;;  %v884_v14 = vmul.f32 %v883_v63, %v3441_v36  ;;  %v828_v3 = vadd.f32 %v827_v59, %v823_v38  ;;  %v888_v16 = vstv %s3313_s11  ;;  %v3508_v40 = vsel %vm728_vm2, %v3332_v27, %v2145_v5 }
 0x104   : > { %s3361_s17 = sld [smem:[#allocation2 + %s924_s28]]  ;;  %s934_s16 = sadd.s32 45, %s3199_s26  ;;  %v870_v56 = vadd.f32 %v869_v32, %v865_v1  ;;  %v889_v30 = vmul.f32 %v888_v16, %v3466_v54 }
 0x105   : > { %s3371_s23 = sld [smem:[#allocation2 + %s929_s18]]  ;;  %s939_s22 = sadd.s32 46, %s3199_s26  ;;  %v833_v1 = vadd.f32 %v832_v37, %v828_v3 }
 0x106   : > { %s3377_s10 = sld [smem:[#allocation2 + %s934_s16]]  ;;  %s944_s0 = sadd.s32 47, %s3199_s26  ;;  %v875_v60 = vadd.f32 %v874_v45, %v870_v56 }
 0x107   : > { %s3381_s14 = sld [smem:[#allocation2 + %s939_s22]]  ;;  %s949_s28 = sadd.s32 48, %s3199_s26  ;;  %v912_v8 = vstv %s3339_s24 }
 0x108   : > { %v916_v11 = vstv %s3350_s19  ;;  %s3387_s12 = sld [smem:[#allocation2 + %s944_s0]]  ;;  %s954_s18 = sadd.s32 49, %s3199_s26  ;;  %v913_v12 = vmul.f32 %v912_v8, %v3317_v44  ;;  %v2319_v6 = vpop.eup %2318  ;;  %v836_v8 = vstv %s3261_s29 }
 0x109   : > { %s3397_s13 = sld [smem:[#allocation2 + %s949_s28]]  ;;  %s959_s24 = sadd.s32 12, %s3207_s3  ;;  %v917_v21 = vmul.f32 %v916_v11, %v3324_v47  ;;  %v921_v22 = vstv %s3355_s27  ;;  %v880_v11 = vadd.f32 %v879_v57, %v875_v60  ;;  %v2146_v51 = vadd.f32 -1.0, %v2319_v6 }
 0x10a   : > { %s968_s19 = sadd.s32 50, %s3199_s26  ;;  %s3406_s16 = sld [smem:[#allocation2 + %s954_s18]]  ;;  %v922_v35 = vmul.f32 %v921_v22, %v3345_v55  ;;  %v926_v39 = vstv %s3361_s17  ;;  %v893_v22 = vstv %s3320_s4  ;;  %v837_v32 = vmul.f32 %v836_v8, %v3508_v40 }
 0x10b   : > { %s972_s22 = sadd.s32 51, %s3199_s26  ;;  %s3410_s15 = sld [smem:[#allocation2 + %s968_s19]]  ;;  %v918_v33 = vadd.f32 %v917_v21, %v913_v12  ;;  %v927_v19 = vmul.f32 %v926_v39, %v3367_v62  ;;  %v931_v23 = vstv %s3371_s23  ;;  %v841_v12 = vstv %s3266_s5 }
 0x10c   : > { %s977_s0 = sadd.s32 52, %s3199_s26  ;;  %s3420_s9 = sld [smem:[#allocation2 + %s972_s22]]  ;;  %v932_v4 = vmul.f32 %v931_v23, %v3393_v13  ;;  %v936_v34 = vstv %s3377_s10  ;;  %v885_v27 = vadd.f32 %v884_v14, %v880_v11  ;;  %v894_v39 = vmul.f32 %v893_v22, %v3508_v40 }
 0x10d   : > { %s982_s28 = sadd.s32 53, %s3199_s26  ;;  %s3425_s27 = sld [smem:[#allocation2 + %s977_s0]]  ;;  %v923_v48 = vadd.f32 %v922_v35, %v918_v33  ;;  %v937_v18 = vmul.f32 %v936_v34, %v3416_v24  ;;  %v941_v21 = vstv %s3381_s14  ;;  %v3535_v35 = vsel %vm786_vm3, %v3359_v28, %v2146_v51 }
 0x10e   : > { %s987_s18 = sadd.s32 54, %s3199_s26  ;;  %s3430_s19 = sld [smem:[#allocation4 + %s959_s24]]  ;;  %v942_v33 = vmul.f32 %v941_v21, %v3441_v36  ;;  %v946_v46 = vstv %s3387_s12  ;;  %v890_v28 = vadd.f32 %v889_v30, %v885_v27  ;;  %v845_v34 = vstv %s3275_s20 }
 0x10f   : > { %s992_s22 = sadd.s32 55, %s3199_s26  ;;  %s3435_s25 = sld [smem:[#allocation2 + %s982_s28]]  ;;  %v928_v2 = vadd.f32 %v927_v19, %v923_v48  ;;  %v838_v19 = vadd.f32 %v837_v32, %v833_v1  ;;  %v947_v52 = vmul.f32 %v946_v46, %v3466_v54  ;;  %v951_v53 = vstv %s3397_s13 }
 0x110   : > { %4660 = sst [smem:[#allocation10_spill]] %s3406_s16  ;;  %s997_s16 = sadd.s32 56, %s3199_s26  ;;  %v952_v5 = vmul.f32 %v951_v53, %v3508_v40  ;;  %v903_v6 = vstv %s3334_s7 }
 0x111   : > { %s3445_s2 = sld [smem:[#allocation2 + %s987_s18]]  ;;  %s1002_s24 = sadd.s32 57, %s3199_s26  ;;  %v970_v0 = vstv %s3410_s15  ;;  %v933_v17 = vadd.f32 %v932_v4, %v928_v2 }
 0x112   : > { %s3450_s17 = sld [smem:[#allocation2 + %s992_s22]]  ;;  %s1007_s0 = sadd.s32 58, %s3199_s26  ;;  %v974_v49 = vstv %s3420_s9  ;;  %v971_v31 = vmul.f32 %v970_v0, %v3317_v44  ;;  %v898_v0 = vstv %s3329_s1 }
 0x113   : > { %s3456_s6 = sld [smem:[#allocation2 + %s997_s16]]  ;;  %s1012_s28 = sadd.s32 59, %s3199_s26  ;;  %v975_v58 = vmul.f32 %v974_v49, %v3324_v47  ;;  %v979_v61 = vstv %s3425_s27  ;;  %v938_v9 = vadd.f32 %v937_v18, %v933_v17  ;;  %v842_v49 = vmul.f32 %v841_v12, %v3535_v35 }
 0x114   : > { %4661 = sst [smem:[#allocation13_spill]] %s3430_s19  ;;  %s1017_s19 = sadd.s32 13, %s3207_s3  ;;  %v980_v10 = vmul.f32 %v979_v61, %v3345_v55  ;;  %v895_v61 = vadd.f32 %v894_v39, %v890_v28  ;;  %v899_v38 = vmul.f32 %v898_v0, %v3535_v35 }
 0x115   : > { %s3460_s18 = sld [smem:[#allocation2 + %s1002_s24]]  ;;  %s1026_s23 = sadd.s32 60, %s3199_s26  ;;  %v976_v50 = vadd.f32 %v975_v58, %v971_v31  ;;  %v984_v15 = vstv %s3435_s25  ;;  %v943_v23 = vadd.f32 %v942_v33, %v938_v9  ;;  %v843_v2 = vadd.f32 %v842_v49, %v838_v19 }
 0x116   : > { %s3471_s21 = sld [smem:[#allocation2 + %s1007_s0]]  ;;  %s1030_s15 = sadd.s32 61, %s3199_s26  ;;  %v985_v29 = vmul.f32 %v984_v15, %v3367_v62  ;;  %v900_v15 = vadd.f32 %v899_v38, %v895_v61 }
 0x117   : > { %s3477_s16 = sld [smem:[#allocation2 + %s1012_s28]]  ;;  %s1035_s27 = sadd.s32 62, %s3199_s26  ;;  %v981_v26 = vadd.f32 %v980_v10, %v976_v50  ;;  %v989_v20 = vstv %s3445_s2  ;;  %v948_v4 = vadd.f32 %v947_v52, %v943_v23  ;;  %v3597_v18 = vadd.f32 %v845_v34, %v843_v2 }
 0x118   : > { %s3481_s8 = sld [smem:[#allocation4 + %s1017_s19]]  ;;  %s1040_s19 = sadd.s32 63, %s3199_s26  ;;  %v990_v7 = vmul.f32 %v989_v20, %v3393_v13  ;;  %v994_v25 = vstv %s3450_s17 }
 0x119   : > { %s3485_s9 = sld [smem:[#allocation2 + %s1026_s23]]  ;;  %s1045_s22 = sadd.s32 64, %s3199_s26  ;;  %v986_v43 = vadd.f32 %v985_v29, %v981_v26  ;;  %v999_v31 = vstv %s3456_s6  ;;  %v995_v59 = vmul.f32 %v994_v25, %v3416_v24  ;;  %v953_v51 = vadd.f32 %v952_v5, %v948_v4 }
 0x11a   : > { %s3491_s30 = sld [smem:[#allocation2 + %s1030_s15]]  ;;  %s1050_s0 = sadd.s32 65, %s3199_s26  ;;  %v1000_v50 = vmul.f32 %v999_v31, %v3441_v36  ;;  %v848_v46 = vmul.f32 1.442695, %v3597_v18  ;;  %vm847_vm4 = vcmp.gt.f32.partialorder %v3597_v18, 0.0 }
 0x11b   : > { %s3497_s10 = sld [smem:[#allocation2 + %s1035_s27]]  ;;  %s1055_s11 = sadd.s32 66, %s3199_s26  ;;  %v991_v58 = vadd.f32 %v990_v7, %v986_v43  ;;  %v1004_v8 = vstv %s3460_s18 }
 0x11c   : > { %s3502_s24 = sld [smem:[#allocation2 + %s1040_s19]]  ;;  %s1060_s28 = sadd.s32 67, %s3199_s26  ;;  %v1005_v22 = vmul.f32 %v1004_v8, %v3466_v54  ;;  %v1009_v7 = vstv %s3471_s21  ;;  %2320 = vpow2.f32 %v848_v46 }
 0x11d   : > { %s3512_s29 = sld [smem:[#allocation2 + %s1045_s22]]  ;;  %s1065_s14 = sadd.s32 68, %s3199_s26  ;;  %v996_v10 = vadd.f32 %v995_v59, %v991_v58  ;;  %v1014_v25 = vstv %s3477_s16  ;;  %v1010_v23 = vmul.f32 %v1009_v7, %v3508_v40 }
 0x11e   : > { %s3518_s25 = sld [smem:[#allocation2 + %s1050_s0]]  ;;  %s1070_s23 = sadd.s32 69, %s3199_s26 }
 0x11f   : > { %v1028_v42 = vstv %s3485_s9  ;;  %s3524_s5 = sld [smem:[#allocation2 + %s1055_s11]]  ;;  %s1075_s15 = sadd.s32 14, %s3207_s3  ;;  %v1001_v30 = vadd.f32 %v1000_v50, %v996_v10 }
 0x120   : > { %s3529_s4 = sld [smem:[#allocation2 + %s1060_s28]]  ;;  %v1032_v41 = vstv %s3491_s30  ;;  %v1029_v56 = vmul.f32 %v1028_v42, %v3317_v44  ;;  %s1084_s27 = sadd.s32 70, %s3199_s26 }
 0x121   : > { %s3540_s2 = sld [smem:[#allocation2 + %s1065_s14]]  ;;  %v1033_v45 = vmul.f32 %v1032_v41, %v3324_v47  ;;  %v1037_v48 = vstv %s3497_s10  ;;  %s1088_s30 = sadd.s32 71, %s3199_s26  ;;  %v3623_v41 = vadd.f32 %v903_v6, %v900_v15  ;;  %v1006_v49 = vadd.f32 %v1005_v22, %v1001_v30 }
 0x122   : > { %s3546_s9 = sld [smem:[#allocation2 + %s1070_s23]]  ;;  %s1093_s22 = sadd.s32 72, %s3199_s26  ;;  %v1038_v57 = vmul.f32 %v1037_v48, %v3345_v55  ;;  %v1042_v63 = vstv %s3502_s24 }
 0x123   : > { %s3552_s12 = sld [smem:[#allocation4 + %s1075_s15]]  ;;  %s1098_s17 = sadd.s32 73, %s3199_s26  ;;  %v1034_v60 = vadd.f32 %v1033_v45, %v1029_v56  ;;  %v1043_v14 = vmul.f32 %v1042_v63, %v3367_v62  ;;  %v1047_v3 = vstv %s3512_s29  ;;  %v906_v31 = vmul.f32 1.442695, %v3623_v41 }
 0x124   : > { %s3557_s19 = sld [smem:[#allocation2 + %s1084_s27]]  ;;  %s1103_s11 = sadd.s32 74, %s3199_s26  ;;  %v1048_v42 = vmul.f32 %v1047_v3, %v3393_v13  ;;  %v1052_v32 = vstv %s3518_s25  ;;  %v1011_v34 = vadd.f32 %v1010_v23, %v1006_v49  ;;  %vm905_vm5 = vcmp.gt.f32.partialorder %v3623_v41, 0.0 }
 0x125   : > { %s3562_s1 = sld [smem:[#allocation2 + %s1088_s30]]  ;;  %s1108_s6 = sadd.s32 75, %s3199_s26  ;;  %v1039_v11 = vadd.f32 %v1038_v57, %v1034_v60  ;;  %v1053_v19 = vmul.f32 %v1052_v32, %v3416_v24  ;;  %v1057_v52 = vstv %s3524_s5  ;;  %v1015_v60 = vmul.f32 %v1014_v25, %v3535_v35 }
 0x126   : > { %s4662_s10 = sld [smem:[#allocation10_spill]]  ;;  %s1113_s14 = sadd.s32 76, %s3199_s26  ;;  %v1058_v2 = vmul.f32 %v1057_v52, %v3441_v36  ;;  %v1062_v6 = vstv %s3529_s4  ;;  %2322 = vpow2.f32 %v906_v31 }
 0x127   : > { %s3567_s0 = sld [smem:[#allocation2 + %s1093_s22]]  ;;  %s1118_s23 = sadd.s32 77, %s3199_s26  ;;  %v1044_v20 = vadd.f32 %v1043_v14, %v1039_v11 }
 0x128   : > { %s3572_s13 = sld [smem:[#allocation2 + %s1098_s17]]  ;;  %s1123_s27 = sadd.s32 78, %s3199_s26 }
 0x129   : > { %s3576_s28 = sld [smem:[#allocation2 + %s1103_s11]]  ;;  %s1128_s7 = sadd.s32 79, %s3199_s26  ;;  %v1049_v48 = vadd.f32 %v1048_v42, %v1044_v20  ;;  %v1072_v20 = vstv %s3546_s9  ;;  %v3723_v52 = vpop.eup %2320 }
 0x12a   : > { %s3583_s24 = sld [smem:[#allocation2 + %s1108_s6]]  ;;  %v1086_v16 = vstv %s3557_s19  ;;  %s1133_s30 = sadd.s32 15, %s3207_s3 }
 0x12b   : > { %s3588_s15 = sld [smem:[#allocation2 + %s1113_s14]]  ;;  %v1090_v17 = vstv %s3562_s1  ;;  %v1087_v21 = vmul.f32 %v1086_v16, %v3317_v44  ;;  %s1142_s19 = sadd.s32 80, %s3199_s26  ;;  %v1054_v63 = vadd.f32 %v1053_v19, %v1049_v48 }
 0x12c   : > { %v956_v37 = vstv %s4662_s10  ;;  %s3594_s20 = sld [smem:[#allocation2 + %s1118_s23]]  ;;  %v1091_v26 = vmul.f32 %v1090_v17, %v3324_v47  ;;  %s1146_s17 = sadd.s32 81, %s3199_s26 }
 0x12d   : > { %v957_v12 = vmul.f32 %v956_v37, %v3535_v35  ;;  %s3601_s18 = sld [smem:[#allocation2 + %s1123_s27]]  ;;  %v1095_v29 = vstv %s3567_s0  ;;  %s1151_s0 = sadd.s32 82, %s3199_s26 }
 0x12e   : > { %v1100_v27 = vstv %s3572_s13  ;;  %s3608_s29 = sld [smem:[#allocation2 + %s1128_s7]]  ;;  %v1096_v1 = vmul.f32 %v1095_v29, %v3345_v55  ;;  %v1092_v9 = vadd.f32 %v1091_v26, %v1087_v21  ;;  %s1156_s25 = sadd.s32 83, %s3199_s26  ;;  %v1063_v21 = vmul.f32 %v1062_v6, %v3466_v54 }
 0x12f   : > { %s4663_s22 = sld [smem:[#allocation13_spill]]  ;;  %v1101_v33 = vmul.f32 %v1100_v27, %v3367_v62  ;;  %v1105_v39 = vstv %s3576_s28  ;;  %v958_v43 = vadd.f32 %v957_v12, %v953_v51  ;;  %s1161_s6 = sadd.s32 84, %s3199_s26  ;;  %v1019_v51 = vstv %s3481_s8 }
 0x130   : > { %s3613_s1 = sld [smem:[#allocation4 + %s1133_s30]]  ;;  %v1097_v45 = vadd.f32 %v1096_v1, %v1092_v9  ;;  %v1106_v28 = vmul.f32 %v1105_v39, %v3393_v13  ;;  %v1110_v0 = vstv %s3583_s24  ;;  %s1166_s21 = sadd.s32 85, %s3199_s26  ;;  %v1059_v12 = vadd.f32 %v1058_v2, %v1054_v63 }
 0x131   : > { %s3619_s10 = sld [smem:[#allocation2 + %s1142_s19]]  ;;  %s1171_s24 = sadd.s32 86, %s3199_s26  ;;  %v1111_v59 = vmul.f32 %v1110_v0, %v3416_v24  ;;  %v1115_v61 = vstv %s3588_s15  ;;  %v1016_v26 = vadd.f32 %v1015_v60, %v1011_v34  ;;  %v1067_v29 = vstv %s3540_s2 }
 0x132   : > { %s3626_s11 = sld [smem:[#allocation2 + %s1146_s17]]  ;;  %v1102_v53 = vadd.f32 %v1101_v33, %v1097_v45  ;;  %s1176_s23 = sadd.s32 87, %s3199_s26  ;;  %v1116_v8 = vmul.f32 %v1115_v61, %v3441_v36  ;;  %v1120_v15 = vstv %s3594_s20  ;;  %v1068_v7 = vmul.f32 %v1067_v29, %v3508_v40 }
 0x133   : > { %s3632_s13 = sld [smem:[#allocation2 + %s1151_s0]]  ;;  %s1181_s27 = sadd.s32 88, %s3199_s26  ;;  %v1121_v1 = vmul.f32 %v1120_v15, %v3466_v54  ;;  %v1125_v9 = vstv %s3601_s18  ;;  %v3710_v45 = vadd.f32 %v1019_v51, %v1016_v26 }
 0x134   : > { %s3637_s28 = sld [smem:[#allocation2 + %s1156_s25]]  ;;  %v1107_v57 = vadd.f32 %v1106_v28, %v1102_v53  ;;  %s1186_s30 = sadd.s32 89, %s3199_s26  ;;  %v1073_v28 = vmul.f32 %v1072_v20, %v3535_v35  ;;  %v1126_v19 = vmul.f32 %v1125_v9, %v3508_v40  ;;  %v1130_v61 = vstv %s3608_s29 }
 0x135   : > { %v961_v56 = vstv %s4663_s22  ;;  %s3642_s14 = sld [smem:[#allocation2 + %s1161_s6]]  ;;  %s1191_s19 = sadd.s32 16, %s3207_s3  ;;  %v1022_v2 = vmul.f32 1.442695, %v3710_v45  ;;  %vm1021_vm7 = vcmp.gt.f32.partialorder %v3710_v45, 0.0 }
 0x136   : > { %v3646_v58 = vadd.f32 %v961_v56, %v958_v43  ;;  %s3649_s16 = sld [smem:[#allocation2 + %s1166_s21]]  ;;  %v1112_v10 = vadd.f32 %v1111_v59, %v1107_v57  ;;  %s1200_s4 = sadd.s32 90, %s3199_s26  ;;  %v1064_v43 = vadd.f32 %v1063_v21, %v1059_v12  ;;  %v1077_v12 = vstv %s3552_s12 }
 0x137   : > { %v1144_v38 = vstv %s3619_s10  ;;  %s3655_s5 = sld [smem:[#allocation2 + %s1171_s24]]  ;;  %s1204_s10 = sadd.s32 91, %s3199_s26 }
 0x138   : > { %v1145_v4 = vmul.f32 %v1144_v38, %v3317_v44  ;;  %v1148_v5 = vstv %s3626_s11  ;;  %s3661_s7 = sld [smem:[#allocation2 + %s1176_s23]]  ;;  %s1209_s20 = sadd.s32 92, %s3199_s26  ;;  %v1117_v42 = vadd.f32 %v1116_v8, %v1112_v10  ;;  %v964_v46 = vmul.f32 1.442695, %v3646_v58 }
 0x139   : > { %v1149_v37 = vmul.f32 %v1148_v5, %v3324_v47  ;;  %v1153_v50 = vstv %s3632_s13  ;;  %s3667_s15 = sld [smem:[#allocation2 + %s1181_s27]]  ;;  %s1214_s25 = sadd.s32 93, %s3199_s26  ;;  %v1069_v57 = vadd.f32 %v1068_v7, %v1064_v43  ;;  %vm963_vm6 = vcmp.gt.f32.partialorder %v3646_v58, 0.0 }
 0x13a   : > { %v1154_v11 = vmul.f32 %v1153_v50, %v3345_v55  ;;  %v1158_v14 = vstv %s3637_s28  ;;  %s3673_s22 = sld [smem:[#allocation2 + %s1186_s30]]  ;;  %s1219_s13 = sadd.s32 94, %s3199_s26  ;;  %v1122_v48 = vadd.f32 %v1121_v1, %v1117_v42  ;;  %2324 = vpow2.f32 %v964_v46  ;;  %v3773_v42 = vpop.eup %2322 }
 0x13b   : > { %v1150_v3 = vadd.f32 %v1149_v37, %v1145_v4  ;;  %v1159_v16 = vmul.f32 %v1158_v14, %v3367_v62  ;;  %v1163_v17 = vstv %s3642_s14  ;;  %s3679_s17 = sld [smem:[#allocation4 + %s1191_s19]]  ;;  %s1224_s6 = sadd.s32 95, %s3199_s26  ;;  %2326 = vpow2.f32 %v1022_v2 }
 0x13c   : > { %v1168_v22 = vstv %s3649_s16  ;;  %s3685_s0 = sld [smem:[#allocation2 + %s1200_s4]]  ;;  %v1164_v30 = vmul.f32 %v1163_v17, %v3393_v13  ;;  %s1229_s28 = sadd.s32 96, %s3199_s26  ;;  %v1127_v8 = vadd.f32 %v1126_v19, %v1122_v48 }
 0x13d   : > { %v1155_v27 = vadd.f32 %v1154_v11, %v1150_v3  ;;  %s3690_s11 = sld [smem:[#allocation2 + %s1204_s10]]  ;;  %v1173_v32 = vstv %s3655_s5  ;;  %v1169_v39 = vmul.f32 %v1168_v22, %v3416_v24  ;;  %s1234_s21 = sadd.s32 97, %s3199_s26  ;;  %v1131_v11 = vmul.f32 %v1130_v61, %v3535_v35 }
 0x13e   : > { %s3696_s8 = sld [smem:[#allocation2 + %s1209_s20]]  ;;  %v1178_v56 = vstv %s3661_s7  ;;  %v1174_v25 = vmul.f32 %v1173_v32, %v3441_v36  ;;  %s1239_s24 = sadd.s32 98, %s3199_s26  ;;  %v1074_v3 = vadd.f32 %v1073_v28, %v1069_v57  ;;  %v1135_v32 = vstv %s3613_s1 }
 0x13f   : > { %v1160_v33 = vadd.f32 %v1159_v16, %v1155_v27  ;;  %s3701_s2 = sld [smem:[#allocation2 + %s1214_s25]]  ;;  %v1183_v49 = vstv %s3667_s15  ;;  %v1179_v31 = vmul.f32 %v1178_v56, %v3466_v54  ;;  %s1244_s23 = sadd.s32 99, %s3199_s26  ;;  %v1132_v20 = vadd.f32 %v1131_v11, %v1127_v8 }
 0x140   : > { %s3707_s9 = sld [smem:[#allocation2 + %s1219_s13]]  ;;  %s1249_s27 = sadd.s32 17, %s3207_s3  ;;  %v1184_v5 = vmul.f32 %v1183_v49, %v3508_v40  ;;  %v1188_v6 = vstv %s3673_s22  ;;  %v3775_v1 = vadd.f32 %v1077_v12, %v1074_v3 }
 0x141   : > { %v1165_v0 = vadd.f32 %v1164_v30, %v1160_v33  ;;  %s3714_s18 = sld [smem:[#allocation2 + %s1224_s6]]  ;;  %s1258_s30 = sadd.s32 100, %s3199_s26  ;;  %v1189_v21 = vmul.f32 %v1188_v6, %v3535_v35  ;;  %v3794_v48 = vadd.f32 %v1135_v32, %v1132_v20 }
 0x142   : > { %v1202_v23 = vstv %s3685_s0  ;;  %s3720_s14 = sld [smem:[#allocation2 + %s1229_s28]]  ;;  %s1262_s15 = sadd.s32 101, %s3199_s26  ;;  %v1080_v57 = vmul.f32 1.442695, %v3775_v1  ;;  %vm1079_vm8 = vcmp.gt.f32.partialorder %v3775_v1, 0.0 }
 0x143   : > { %v1170_v53 = vadd.f32 %v1169_v39, %v1165_v0  ;;  %v1203_v59 = vmul.f32 %v1202_v23, %v3317_v44  ;;  %v1206_v60 = vstv %s3690_s11  ;;  %s3728_s16 = sld [smem:[#allocation2 + %s1234_s21]]  ;;  %s1267_s4 = sadd.s32 102, %s3199_s26  ;;  %v1193_v39 = vstv %s3679_s17 }
 0x144   : > { %v1207_v38 = vmul.f32 %v1206_v60, %v3324_v47  ;;  %v1211_v63 = vstv %s3696_s8  ;;  %s3734_s5 = sld [smem:[#allocation2 + %s1239_s24]]  ;;  %s1272_s10 = sadd.s32 103, %s3199_s26  ;;  %2328 = vpow2.f32 %v1080_v57  ;;  %vm1137_vm9 = vcmp.gt.f32.partialorder %v3794_v48, 0.0 }
 0x145   : > { %v1175_v4 = vadd.f32 %v1174_v25, %v1170_v53  ;;  %v1212_v34 = vmul.f32 %v1211_v63, %v3345_v55  ;;  %s3740_s7 = sld [smem:[#allocation2 + %s1244_s23]]  ;;  %v1216_v50 = vstv %s3701_s2  ;;  %s1277_s20 = sadd.s32 104, %s3199_s26 }
 0x146   : > { %v1208_v37 = vadd.f32 %v1207_v38, %v1203_v59  ;;  %v1221_v10 = vstv %s3707_s9  ;;  %s3746_s29 = sld [smem:[#allocation4 + %s1249_s27]]  ;;  %v1217_v15 = vmul.f32 %v1216_v50, %v3367_v62  ;;  %s1282_s25 = sadd.s32 105, %s3199_s26  ;;  %v1138_v50 = vmul.f32 1.442695, %v3794_v48 }
 0x147   : > { %v1180_v14 = vadd.f32 %v1179_v31, %v1175_v4  ;;  %s3751_s19 = sld [smem:[#allocation2 + %s1258_s30]]  ;;  %v1222_v17 = vmul.f32 %v1221_v10, %v3393_v13  ;;  %v1226_v51 = vstv %s3714_s18  ;;  %s1287_s8 = sadd.s32 106, %s3199_s26  ;;  %v2325_v3 = vpop.eup %2324 }
 0x148   : > { %v1213_v16 = vadd.f32 %v1212_v34, %v1208_v37  ;;  %s3756_s22 = sld [smem:[#allocation2 + %s1262_s15]]  ;;  %v1231_v22 = vstv %s3720_s14  ;;  %v1227_v27 = vmul.f32 %v1226_v51, %v3416_v24  ;;  %s1292_s2 = sadd.s32 107, %s3199_s26  ;;  %2330 = vpow2.f32 %v1138_v50 }
 0x149   : > { %s3762_s0 = sld [smem:[#allocation2 + %s1267_s4]]  ;;  %v1185_v26 = vadd.f32 %v1184_v5, %v1180_v14  ;;  %v1236_v30 = vstv %s3728_s16  ;;  %v1232_v33 = vmul.f32 %v1231_v22, %v3441_v36  ;;  %s1297_s9 = sadd.s32 108, %s3199_s26  ;;  %v2327_v22 = vpop.eup %2326 }
 0x14a   : > { %v1218_v29 = vadd.f32 %v1217_v15, %v1213_v16  ;;  %s3767_s11 = sld [smem:[#allocation2 + %s1272_s10]]  ;;  %v1237_v46 = vmul.f32 %v1236_v30, %v3466_v54  ;;  %v1241_v43 = vstv %s3734_s5  ;;  %s1302_s28 = sadd.s32 109, %s3199_s26 }
 0x14b   : > { %s3770_s12 = sld [smem:[#allocation2 + %s1277_s20]]  ;;  %v1190_v56 = vadd.f32 %v1189_v21, %v1185_v26  ;;  %v1246_v19 = vstv %s3740_s7  ;;  %s1307_s18 = sadd.s32 18, %s3207_s3  ;;  %v1242_v31 = vmul.f32 %v1241_v43, %v3508_v40 }
 0x14c   : > { %v1223_v9 = vadd.f32 %v1222_v17, %v1218_v29  ;;  %s3779_s13 = sld [smem:[#allocation2 + %s1282_s25]]  ;;  %s1316_s14 = sadd.s32 110, %s3199_s26  ;;  %v1247_v5 = vmul.f32 %v1246_v19, %v3535_v35  ;;  %v1251_v11 = vstv %s3746_s29 }
 0x14d   : > { %v1260_v7 = vstv %s3751_s19  ;;  %s3786_s6 = sld [smem:[#allocation2 + %s1287_s8]]  ;;  %s1320_s16 = sadd.s32 111, %s3199_s26  ;;  %v3814_v2 = vadd.f32 %v1193_v39, %v1190_v56 }
 0x14e   : > { %v1228_v28 = vadd.f32 %v1227_v27, %v1223_v9  ;;  %v1261_v0 = vmul.f32 %v1260_v7, %v3317_v44  ;;  %v1264_v25 = vstv %s3756_s22  ;;  %s3791_s1 = sld [smem:[#allocation2 + %s1292_s2]]  ;;  %s1325_s5 = sadd.s32 112, %s3199_s26 }
 0x14f   : > { %v1265_v49 = vmul.f32 %v1264_v25, %v3324_v47  ;;  %v1269_v23 = vstv %s3762_s0  ;;  %s3799_s17 = sld [smem:[#allocation2 + %s1297_s9]]  ;;  %s1330_s7 = sadd.s32 113, %s3199_s26  ;;  %v1196_v16 = vmul.f32 1.442695, %v3814_v2  ;;  %vm1195_vm10 = vcmp.gt.f32.partialorder %v3814_v2, 0.0 }
 0x150   : > { %v1233_v53 = vadd.f32 %v1232_v33, %v1228_v28  ;;  %v1270_v59 = vmul.f32 %v1269_v23, %v3345_v55  ;;  %v1274_v60 = vstv %s3767_s11  ;;  %s3805_s21 = sld [smem:[#allocation2 + %s1302_s28]]  ;;  %s1335_s15 = sadd.s32 114, %s3199_s26  ;;  %v2148_v23 = vadd.f32 -1.0, %v3773_v42 }
 0x151   : > { %v1266_v61 = vadd.f32 %v1265_v49, %v1261_v0  ;;  %v1275_v38 = vmul.f32 %v1274_v60, %v3367_v62  ;;  %v1279_v63 = vstv %s3770_s12  ;;  %s3811_s24 = sld [smem:[#allocation4 + %s1307_s18]]  ;;  %s1340_s4 = sadd.s32 115, %s3199_s26  ;;  %2332 = vpow2.f32 %v1196_v16 }
 0x152   : > { %v1238_v4 = vadd.f32 %v1237_v46, %v1233_v53  ;;  %v1284_v34 = vstv %s3779_s13  ;;  %s3818_s23 = sld [smem:[#allocation2 + %s1316_s14]]  ;;  %v1280_v37 = vmul.f32 %v1279_v63, %v3393_v13  ;;  %s1345_s10 = sadd.s32 116, %s3199_s26  ;;  %v2150_v60 = vadd.f32 -1.0, %v2327_v22 }
 0x153   : > { %v1271_v6 = vadd.f32 %v1270_v59, %v1266_v61  ;;  %s3822_s27 = sld [smem:[#allocation2 + %s1320_s16]]  ;;  %v1289_v8 = vstv %s3786_s6  ;;  %v1285_v15 = vmul.f32 %v1284_v34, %v3416_v24  ;;  %s1350_s0 = sadd.s32 117, %s3199_s26  ;;  %v2149_v59 = vadd.f32 -1.0, %v2325_v3 }
 0x154   : > { %v1243_v10 = vadd.f32 %v1242_v31, %v1238_v4  ;;  %s3827_s30 = sld [smem:[#allocation2 + %s1325_s5]]  ;;  %v1294_v51 = vstv %s3791_s1  ;;  %v1290_v21 = vmul.f32 %v1289_v8, %v3441_v36  ;;  %s1355_s11 = sadd.s32 118, %s3199_s26  ;;  %v2329_v4 = vpop.eup %2328 }
 0x155   : > { %v1276_v14 = vadd.f32 %v1275_v38, %v1271_v6  ;;  %s3832_s19 = sld [smem:[#allocation2 + %s1330_s7]]  ;;  %v1299_v29 = vstv %s3799_s17  ;;  %v1295_v20 = vmul.f32 %v1294_v51, %v3466_v54  ;;  %s1360_s8 = sadd.s32 119, %s3199_s26  ;;  %v3915_v6 = vsel %vm905_vm5, %v3623_v41, %v2148_v23  ;;  %v2331_v8 = vpop.eup %2330 }
 0x156   : > { %v1248_v17 = vadd.f32 %v1247_v5, %v1243_v10  ;;  %s3837_s22 = sld [smem:[#allocation2 + %s1335_s15]]  ;;  %v1304_v33 = vstv %s3805_s21  ;;  %s1365_s13 = sadd.s32 19, %s3207_s3  ;;  %v1300_v7 = vmul.f32 %v1299_v29, %v3508_v40 }
 0x157   : > { %v1281_v12 = vadd.f32 %v1280_v37, %v1276_v14  ;;  %s3841_s29 = sld [smem:[#allocation2 + %s1340_s4]] }
 0x158   : > { %v3845_v26 = vadd.f32 %v1251_v11, %v1248_v17  ;;  %v1318_v27 = vstv %s3818_s23  ;;  %s3849_s20 = sld [smem:[#allocation2 + %s1345_s10]]  ;;  %v2151_v11 = vadd.f32 -1.0, %v2329_v4 }
 0x159   : > { %v1286_v30 = vadd.f32 %v1285_v15, %v1281_v12  ;;  %s4664_s25 = sld [smem:[#allocation8_spill]]  ;;  %v1319_v32 = vmul.f32 %v1318_v27, %v3317_v44  ;;  %v1322_v9 = vstv %s3822_s27 }
 0x15a   : > { %s3855_s12 = sld [smem:[#allocation2 + %s1350_s0]]  ;;  %v1323_v39 = vmul.f32 %v1322_v9, %v3324_v47  ;;  %v1327_v46 = vstv %s3827_s30  ;;  %v1254_v44 = vmul.f32 1.442695, %v3845_v26  ;;  %vm1253_vm11 = vcmp.gt.f32.partialorder %v3845_v26, 0.0 }
 0x15b   : > { %v1291_v43 = vadd.f32 %v1290_v21, %v1286_v30  ;;  %v1328_v56 = vmul.f32 %v1327_v46, %v3345_v55  ;;  %v1332_v28 = vstv %s3832_s19  ;;  %s3865_s2 = sld [smem:[#allocation2 + %s1355_s11]]  ;;  %v1305_v55 = vmul.f32 %v1304_v33, %v3535_v35 }
 0x15c   : > { %v1324_v0 = vadd.f32 %v1323_v39, %v1319_v32  ;;  %v1333_v25 = vmul.f32 %v1332_v28, %v3367_v62  ;;  %v1337_v19 = vstv %s3837_s22  ;;  %s3872_s26 = sld [smem:[#allocation2 + %s1360_s8]]  ;;  %v2147_v62 = vadd.f32 -1.0, %v3723_v52 }
 0x15d   : > { %v1296_v47 = vadd.f32 %v1295_v20, %v1291_v43  ;;  %v1342_v49 = vstv %s3841_s29  ;;  %s3879_s1 = sld [smem:[#allocation4 + %s1365_s13]]  ;;  %v1338_v31 = vmul.f32 %v1337_v19, %v3393_v13  ;;  %2334 = vpow2.f32 %v1254_v44 }
 0x15e   : > { %v1329_v53 = vadd.f32 %v1328_v56, %v1324_v0  ;;  %v1347_v61 = vstv %s3849_s20  ;;  %v1309_v52 = vstv %s3811_s24  ;;  %v1343_v42 = vmul.f32 %v1342_v49, %v3416_v24  ;;  %v2333_v17 = vpop.eup %2332 }
 0x15f   : > { %s4665_s6 = smul.u32 3, %s4664_s25  ;;  %v1301_v57 = vadd.f32 %v1300_v7, %v1296_v47  ;;  %v1348_v34 = vmul.f32 %v1347_v61, %v3441_v36  ;;  %v3910_v24 = vsel %vm847_vm4, %v3597_v18, %v2147_v62  ;;  %v3926_v36 = vsel %vm963_vm6, %v3646_v58, %v2149_v59 }
 0x160   : > { %v1334_v38 = vadd.f32 %v1333_v25, %v1329_v53  ;;  %v1352_v63 = vstv %s3855_s12  ;;  %v3931_v18 = vsel %vm1021_vm7, %v3710_v45, %v2150_v60  ;;  %v2152_v20 = vadd.f32 -1.0, %v2331_v8 }
 0x161   : > { %s1374_s9 = sadd.s32 2, %s4665_s6  ;;  %v1306_v13 = vadd.f32 %v1305_v55, %v1301_v57  ;;  %v1357_v50 = vstv %s3865_s2  ;;  %v1353_v10 = vmul.f32 %v1352_v63, %v3466_v54  ;;  %v2153_v46 = vadd.f32 -1.0, %v2333_v17 }
 0x162   : > { %s3874_s3 = smul.u32 100, %s1374_s9  ;;  %v1339_v5 = vadd.f32 %v1338_v31, %v1334_v38  ;;  %v1362_v58 = vstv %s3872_s26  ;;  %v1358_v3 = vmul.f32 %v1357_v50, %v3508_v40  ;;  %v3990_v28 = vsel %vm1137_vm9, %v3794_v48, %v2152_v20 }
 0x163   : > { %s3881_s28 = smul.u32 10, %s1374_s9  ;;  %v3917_v37 = vadd.f32 %v1309_v52, %v1306_v13  ;;  %v1363_v21 = vmul.f32 %v1362_v58, %v3535_v35  ;;  %v3970_v35 = vsel %vm1079_vm8, %v3775_v1, %v2151_v11  ;;  %v1367_v33 = vstv %s3879_s1 }
 0x164   : > { %s1376_s17 = sadd.s32 20, %s3874_s3  ;;  %s1382_s18 = sadd.s32 21, %s3874_s3  ;;  %v1344_v41 = vadd.f32 %v1343_v42, %v1339_v5  ;;  %v4003_v25 = vsel %vm1195_vm10, %v3814_v2, %v2153_v46 }
 0x165   : > { %s1378_s21 = sadd.s32 10, %s3881_s28  ;;  %s3890_s14 = sld [smem:[#allocation2 + %s1376_s17]]  ;;  %v1312_v14 = vmul.f32 1.442695, %v3917_v37  ;;  %vm1311_vm12 = vcmp.gt.f32.partialorder %v3917_v37, 0.0 }
 0x166   : > { %s3894_s16 = sld [smem:[#allocation2 + %s1382_s18]]  ;;  %s1387_s23 = sadd.s32 22, %s3874_s3  ;;  %v1349_v45 = vadd.f32 %v1348_v34, %v1344_v41 }
 0x167   : > { %s3900_s5 = sld [smem:[#allocation2 + %s1387_s23]]  ;;  %s1392_s27 = sadd.s32 23, %s3874_s3  ;;  %2336 = vpow2.f32 %v1312_v14 }
 0x168   : > { %s3904_s24 = sld [smem:[#allocation2 + %s1392_s27]]  ;;  %s1397_s7 = sadd.s32 24, %s3874_s3  ;;  %v1354_v40 = vadd.f32 %v1353_v10, %v1349_v45 }
 0x169   : > { %s3920_s30 = sld [smem:[#allocation2 + %s1397_s7]]  ;;  %s1402_s15 = sadd.s32 25, %s3874_s3 }
 0x16a   : > { %s3934_s19 = sld [smem:[#allocation2 + %s1402_s15]]  ;;  %s1407_s4 = sadd.s32 26, %s3874_s3  ;;  %v1359_v32 = vadd.f32 %v1358_v3, %v1354_v40  ;;  %v2335_v1 = vpop.eup %2334 }
 0x16b   : > { %v1380_v15 = vstv %s3890_s14  ;;  %s3940_s22 = sld [smem:[#allocation2 + %s1407_s4]]  ;;  %s1412_s10 = sadd.s32 27, %s3874_s3  ;;  %v2154_v48 = vadd.f32 -1.0, %v2335_v1 }
 0x16c   : > { %v1381_v54 = vmul.f32 %v1380_v15, %v3910_v24  ;;  %v1384_v16 = vstv %s3894_s16  ;;  %s3946_s29 = sld [smem:[#allocation2 + %s1412_s10]]  ;;  %s1417_s0 = sadd.s32 28, %s3874_s3  ;;  %v1364_v43 = vadd.f32 %v1363_v21, %v1359_v32 }
 0x16d   : > { %v1385_v51 = vmul.f32 %v1384_v16, %v3915_v6  ;;  %v1389_v12 = vstv %s3900_s5  ;;  %s3952_s20 = sld [smem:[#allocation2 + %s1417_s0]]  ;;  %s1422_s11 = sadd.s32 29, %s3874_s3  ;;  %v4035_v42 = vsel %vm1253_vm11, %v3845_v26, %v2154_v48 }
 0x16e   : > { %v1390_v22 = vmul.f32 %v1389_v12, %v3926_v36  ;;  %v1394_v29 = vstv %s3904_s24  ;;  %s3958_s12 = sld [smem:[#allocation2 + %s1422_s11]]  ;;  %s1435_s8 = sadd.s32 30, %s3874_s3  ;;  %v3992_v44 = vadd.f32 %v1367_v33, %v1364_v43 }
 0x16f   : > { %v1386_v27 = vadd.f32 %v1385_v51, %v1381_v54  ;;  %v1395_v30 = vmul.f32 %v1394_v29, %v3931_v18  ;;  %s3964_s13 = sld [smem:[#allocation4 + %s1378_s21]]  ;;  %s1439_s2 = sadd.s32 31, %s3874_s3  ;;  %v1399_v9 = vstv %s3920_s30 }
 0x170   : > { %s3973_s6 = sld [smem:[#allocation2 + %s1435_s8]]  ;;  %s1444_s9 = sadd.s32 32, %s3874_s3  ;;  %v1400_v56 = vmul.f32 %v1399_v9, %v3970_v35  ;;  %v1404_v0 = vstv %s3934_s19  ;;  %v1370_v19 = vmul.f32 1.442695, %v3992_v44  ;;  %vm1369_vm13 = vcmp.gt.f32.partialorder %v3992_v44, 0.0 }
 0x171   : > { %v1391_v39 = vadd.f32 %v1390_v22, %v1386_v27  ;;  %s3978_s26 = sld [smem:[#allocation2 + %s1439_s2]]  ;;  %s1449_s17 = sadd.s32 33, %s3874_s3  ;;  %v1405_v49 = vmul.f32 %v1404_v0, %v3990_v28  ;;  %v1409_v2 = vstv %s3940_s22 }
 0x172   : > { %s3981_s18 = sld [smem:[#allocation2 + %s1444_s9]]  ;;  %s1454_s21 = sadd.s32 34, %s3874_s3  ;;  %2338 = vpow2.f32 %v1370_v19  ;;  %v1410_v63 = vmul.f32 %v1409_v2, %v4003_v25  ;;  %v1414_v34 = vstv %s3946_s29 }
 0x173   : > { %v1396_v7 = vadd.f32 %v1395_v30, %v1391_v39  ;;  %s3986_s1 = sld [smem:[#allocation2 + %s1449_s17]]  ;;  %s1459_s14 = sadd.s32 35, %s3874_s3  ;;  %v1415_v14 = vmul.f32 %v1414_v34, %v4035_v42  ;;  %v1419_v45 = vstv %s3952_s20 }
 0x174   : > { %s3995_s16 = sld [smem:[#allocation2 + %s1454_s21]]  ;;  %s1464_s23 = sadd.s32 36, %s3874_s3  ;;  %v2337_v57 = vpop.eup %2336  ;;  %v1424_v16 = vstv %s3958_s12 }
 0x175   : > { %s3999_s5 = sld [smem:[#allocation2 + %s1459_s14]]  ;;  %s1469_s27 = sadd.s32 37, %s3874_s3  ;;  %v1401_v55 = vadd.f32 %v1400_v56, %v1396_v7  ;;  %v2155_v5 = vadd.f32 -1.0, %v2337_v57 }
 0x176   : > { %v1437_v47 = vstv %s3973_s6  ;;  %s4007_s24 = sld [smem:[#allocation2 + %s1464_s23]]  ;;  %s1474_s7 = sadd.s32 38, %s3874_s3 }
 0x177   : > { %v1438_v62 = vmul.f32 %v1437_v47, %v3910_v24  ;;  %v1441_v23 = vstv %s3978_s26  ;;  %s4013_s30 = sld [smem:[#allocation2 + %s1469_s27]]  ;;  %s1479_s15 = sadd.s32 39, %s3874_s3  ;;  %v1406_v13 = vadd.f32 %v1405_v49, %v1401_v55  ;;  %v4062_v15 = vsel %vm1311_vm12, %v3917_v37, %v2155_v5 }
 0x178   : > { %v1442_v53 = vmul.f32 %v1441_v23, %v3915_v6  ;;  %v1446_v31 = vstv %s3981_s18  ;;  %s4019_s19 = sld [smem:[#allocation2 + %s1474_s7]]  ;;  %s1484_s4 = sadd.s32 11, %s3881_s28  ;;  %v1420_v29 = vmul.f32 %v1419_v45, %v4062_v15 }
 0x179   : > { %v1447_v59 = vmul.f32 %v1446_v31, %v3926_v36  ;;  %v1451_v60 = vstv %s3986_s1  ;;  %s4024_s10 = sld [smem:[#allocation2 + %s1479_s15]]  ;;  %s1493_s0 = sadd.s32 40, %s3874_s3  ;;  %v1411_v11 = vadd.f32 %v1410_v63, %v1406_v13 }
 0x17a   : > { %v1443_v61 = vadd.f32 %v1442_v53, %v1438_v62  ;;  %v1452_v52 = vmul.f32 %v1451_v60, %v3931_v18  ;;  %v1456_v38 = vstv %s3995_s16  ;;  %s4029_s22 = sld [smem:[#allocation4 + %s1484_s4]]  ;;  %s1497_s11 = sadd.s32 41, %s3874_s3 }
 0x17b   : > { %v1461_v4 = vstv %s3999_s5  ;;  %s4039_s8 = sld [smem:[#allocation2 + %s1493_s0]]  ;;  %s1502_s2 = sadd.s32 42, %s3874_s3  ;;  %v1457_v41 = vmul.f32 %v1456_v38, %v3970_v35  ;;  %v1416_v22 = vadd.f32 %v1415_v14, %v1411_v11 }
 0x17c   : > { %v1448_v50 = vadd.f32 %v1447_v59, %v1443_v61  ;;  %s4044_s6 = sld [smem:[#allocation2 + %s1497_s11]]  ;;  %s1507_s9 = sadd.s32 43, %s3874_s3  ;;  %v1466_v26 = vstv %s4007_s24  ;;  %v1462_v8 = vmul.f32 %v1461_v4, %v3990_v28 }
 0x17d   : > { %s4049_s26 = sld [smem:[#allocation2 + %s1502_s2]]  ;;  %s1512_s17 = sadd.s32 44, %s3874_s3  ;;  %v1471_v58 = vstv %s4013_s30  ;;  %v1467_v54 = vmul.f32 %v1466_v26, %v4003_v25  ;;  %v1421_v19 = vadd.f32 %v1420_v29, %v1416_v22 }
 0x17e   : > { %v1453_v10 = vadd.f32 %v1452_v52, %v1448_v50  ;;  %s4053_s29 = sld [smem:[#allocation2 + %s1507_s9]]  ;;  %s1517_s18 = sadd.s32 45, %s3874_s3  ;;  %v1476_v17 = vstv %s4019_s19  ;;  %v1472_v37 = vmul.f32 %v1471_v58, %v4035_v42 }
 0x17f   : > { %s4058_s21 = sld [smem:[#allocation2 + %s1512_s17]]  ;;  %s1522_s1 = sadd.s32 46, %s3874_s3  ;;  %v1477_v32 = vmul.f32 %v1476_v17, %v4062_v15  ;;  %v2339_v39 = vpop.eup %2338  ;;  %v1481_v0 = vstv %s4024_s10 }
 0x180   : > { %v1458_v3 = vadd.f32 %v1457_v41, %v1453_v10  ;;  %s4066_s14 = sld [smem:[#allocation2 + %s1517_s18]]  ;;  %s1527_s16 = sadd.s32 47, %s3874_s3  ;;  %v2156_v7 = vadd.f32 -1.0, %v2339_v39  ;;  %v1486_v60 = vstv %s4029_s22 }
 0x181   : > { %v1495_v51 = vstv %s4039_s8  ;;  %s4072_s23 = sld [smem:[#allocation2 + %s1522_s1]]  ;;  %s1532_s5 = sadd.s32 48, %s3874_s3 }
 0x182   : > { %v1463_v12 = vadd.f32 %v1462_v8, %v1458_v3  ;;  %v1496_v40 = vmul.f32 %v1495_v51, %v3910_v24  ;;  %v1499_v21 = vstv %s4044_s6  ;;  %s4078_s20 = sld [smem:[#allocation2 + %s1527_s16]]  ;;  %s1537_s27 = sadd.s32 49, %s3874_s3  ;;  %v4109_v49 = vsel %vm1369_vm13, %v3992_v44, %v2156_v7 }
 0x183   : > { %v1500_v27 = vmul.f32 %v1499_v21, %v3915_v6  ;;  %v1504_v30 = vstv %s4049_s26  ;;  %s4084_s12 = sld [smem:[#allocation2 + %s1532_s5]]  ;;  %s1542_s24 = sadd.s32 12, %s3881_s28  ;;  %v1425_v2 = vmul.f32 %v1424_v16, %v4109_v49  ;;  %v1482_v53 = vmul.f32 %v1481_v0, %v4109_v49 }
 0x184   : > { %v1468_v20 = vadd.f32 %v1467_v54, %v1463_v12  ;;  %v1505_v9 = vmul.f32 %v1504_v30, %v3926_v36  ;;  %v1509_v33 = vstv %s4053_s29  ;;  %s1551_s7 = sadd.s32 50, %s3874_s3  ;;  %s4094_s30 = sld [smem:[#allocation2 + %s1537_s27]]  ;;  %v1428_v44 = vstv %s3964_s13 }
 0x185   : > { %v1501_v46 = vadd.f32 %v1500_v27, %v1496_v40  ;;  %v1510_v43 = vmul.f32 %v1509_v33, %v3931_v18  ;;  %v1514_v1 = vstv %s4058_s21  ;;  %s1555_s15 = sadd.s32 51, %s3874_s3  ;;  %s4099_s19 = sld [smem:[#allocation2 + %s1551_s7]]  ;;  %v1426_v61 = vadd.f32 %v1425_v2, %v1421_v19 }
 0x186   : > { %v1473_v56 = vadd.f32 %v1472_v37, %v1468_v20  ;;  %v1519_v48 = vstv %s4066_s14  ;;  %s1560_s4 = sadd.s32 52, %s3874_s3  ;;  %v1515_v55 = vmul.f32 %v1514_v1, %v3970_v35  ;;  %s4103_s0 = sld [smem:[#allocation2 + %s1555_s15]] }
 0x187   : > { %v1506_v47 = vadd.f32 %v1505_v9, %v1501_v46  ;;  %s1565_s11 = sadd.s32 53, %s3874_s3  ;;  %v1520_v23 = vmul.f32 %v1519_v48, %v3990_v28  ;;  %s4112_s10 = sld [smem:[#allocation2 + %s1560_s4]]  ;;  %v1524_v59 = vstv %s4072_s23  ;;  %v4136_v5 = vadd.f32 %v1428_v44, %v1426_v61 }
 0x188   : > { %v1478_v62 = vadd.f32 %v1477_v32, %v1473_v56  ;;  %s1570_s8 = sadd.s32 54, %s3874_s3  ;;  %s4118_s2 = sld [smem:[#allocation2 + %s1565_s11]]  ;;  %v1529_v57 = vstv %s4078_s20  ;;  %v1525_v13 = vmul.f32 %v1524_v59, %v4003_v25 }
 0x189   : > { %v1511_v31 = vadd.f32 %v1510_v43, %v1506_v47  ;;  %s1575_s6 = sadd.s32 55, %s3874_s3  ;;  %s4124_s9 = sld [smem:[#allocation2 + %s1570_s8]]  ;;  %v1534_v63 = vstv %s4084_s12  ;;  %v1530_v41 = vmul.f32 %v1529_v57, %v4035_v42  ;;  %v1431_v14 = vmul.f32 1.442695, %v4136_v5 }
 0x18a   : > { %s1580_s26 = sadd.s32 56, %s3874_s3  ;;  %v1483_v52 = vadd.f32 %v1482_v53, %v1478_v62  ;;  %s4127_s17 = sld [smem:[#allocation2 + %s1575_s6]]  ;;  %v1539_v26 = vstv %s4094_s30  ;;  %v1535_v45 = vmul.f32 %v1534_v63, %v4062_v15  ;;  %vm1430_vm14 = vcmp.gt.f32.partialorder %v4136_v5, 0.0 }
 0x18b   : > { %v1516_v38 = vadd.f32 %v1515_v55, %v1511_v31  ;;  %s1585_s29 = sadd.s32 57, %s3874_s3  ;;  %v1553_v4 = vstv %s4099_s19  ;;  %s4133_s13 = sld [smem:[#allocation2 + %s1580_s26]]  ;;  %2340 = vpow2.f32 %v1431_v14  ;;  %v1540_v51 = vmul.f32 %v1539_v26, %v4109_v49 }
 0x18c   : > { %s1590_s22 = sadd.s32 58, %s3874_s3  ;;  %v4138_v34 = vadd.f32 %v1486_v60, %v1483_v52  ;;  %s4143_s18 = sld [smem:[#allocation4 + %s1542_s24]]  ;;  %v1554_v10 = vmul.f32 %v1553_v4, %v3910_v24  ;;  %v1557_v8 = vstv %s4103_s0 }
 0x18d   : > { %v1521_v50 = vadd.f32 %v1520_v23, %v1516_v38  ;;  %s1595_s21 = sadd.s32 59, %s3874_s3  ;;  %v1562_v11 = vstv %s4112_s10  ;;  %s4150_s1 = sld [smem:[#allocation2 + %s1585_s29]]  ;;  %v1558_v54 = vmul.f32 %v1557_v8, %v3915_v6 }
 0x18e   : > { %s1600_s14 = sadd.s32 13, %s3881_s28  ;;  %v1489_v58 = vmul.f32 1.442695, %v4138_v34  ;;  %s4156_s16 = sld [smem:[#allocation2 + %s1590_s22]]  ;;  %v1563_v16 = vmul.f32 %v1562_v11, %v3926_v36  ;;  %v1567_v17 = vstv %s4118_s2  ;;  %vm1488_vm15 = vcmp.gt.f32.partialorder %v4138_v34, 0.0 }
 0x18f   : > { %v1526_v3 = vadd.f32 %v1525_v13, %v1521_v50  ;;  %s4161_s23 = sld [smem:[#allocation2 + %s1595_s21]]  ;;  %s1609_s5 = sadd.s32 60, %s3874_s3  ;;  %v1572_v12 = vstv %s4124_s9  ;;  %v1559_v40 = vadd.f32 %v1558_v54, %v1554_v10  ;;  %v1568_v21 = vmul.f32 %v1567_v17, %v3931_v18 }
 0x190   : > { %s4166_s20 = sld [smem:[#allocation4 + %s1600_s14]]  ;;  %s1613_s27 = sadd.s32 61, %s3874_s3  ;;  %2342 = vpow2.f32 %v1489_v58  ;;  %v1577_v22 = vstv %s4127_s17  ;;  %v1573_v30 = vmul.f32 %v1572_v12, %v3970_v35 }
 0x191   : > { %v1531_v37 = vadd.f32 %v1530_v41, %v1526_v3  ;;  %s1610_s12 = sld [smem:[#allocation2 + %s1609_s5]]  ;;  %s1618_s24 = sadd.s32 62, %s3874_s3  ;;  %v1564_v27 = vadd.f32 %v1563_v16, %v1559_v40  ;;  %v1582_v20 = vstv %s4133_s13  ;;  %v1578_v39 = vmul.f32 %v1577_v22, %v3990_v28 }
 0x192   : > { %s4172_s7 = sld [smem:[#allocation2 + %s1613_s27]]  ;;  %s1623_s30 = sadd.s32 63, %s3874_s3  ;;  %v1544_v32 = vstv %s4143_s18  ;;  %v1583_v46 = vmul.f32 %v1582_v20, %v4003_v25 }
 0x193   : > { %v1536_v29 = vadd.f32 %v1535_v45, %v1531_v37  ;;  %s4177_s15 = sld [smem:[#allocation2 + %s1618_s24]]  ;;  %s1628_s19 = sadd.s32 64, %s3874_s3  ;;  %v1569_v33 = vadd.f32 %v1568_v21, %v1564_v27  ;;  %v1587_v43 = vstv %s4150_s1 }
 0x194   : > { %s4181_s4 = sld [smem:[#allocation2 + %s1623_s30]]  ;;  %s1633_s0 = sadd.s32 65, %s3874_s3  ;;  %v1592_v56 = vstv %s4156_s16  ;;  %v1588_v62 = vmul.f32 %v1587_v43, %v4035_v42 }
 0x195   : > { %v1541_v9 = vadd.f32 %v1540_v51, %v1536_v29  ;;  %s4185_s11 = sld [smem:[#allocation2 + %s1628_s19]]  ;;  %s1638_s10 = sadd.s32 66, %s3874_s3  ;;  %v1574_v7 = vadd.f32 %v1573_v30, %v1569_v33  ;;  %v1593_v2 = vmul.f32 %v1592_v56, %v4062_v15  ;;  %v1597_v53 = vstv %s4161_s23 }
 0x196   : > { %s4190_s8 = sld [smem:[#allocation2 + %s1633_s0]]  ;;  %s1643_s2 = sadd.s32 67, %s3874_s3  ;;  %v1598_v4 = vmul.f32 %v1597_v53, %v4109_v49  ;;  %v1602_v16 = vstv %s4166_s20 }
 0x197   : > { %v4193_v1 = vadd.f32 %v1544_v32, %v1541_v9  ;;  %v1611_v0 = vstv %s1610_s12  ;;  %s4196_s6 = sld [smem:[#allocation2 + %s1638_s10]]  ;;  %s1648_s9 = sadd.s32 68, %s3874_s3  ;;  %v1579_v55 = vadd.f32 %v1578_v39, %v1574_v7 }
 0x198   : > { %v1612_v48 = vmul.f32 %v1611_v0, %v3910_v24  ;;  %v1615_v19 = vstv %s4172_s7  ;;  %s4201_s26 = sld [smem:[#allocation2 + %s1643_s2]]  ;;  %s1653_s17 = sadd.s32 69, %s3874_s3  ;;  %v2341_v13 = vpop.eup %2340 }
 0x199   : > { %v1547_v47 = vmul.f32 1.442695, %v4193_v1  ;;  %v1616_v23 = vmul.f32 %v1615_v19, %v3915_v6  ;;  %s4207_s29 = sld [smem:[#allocation2 + %s1648_s9]]  ;;  %s1658_s13 = sadd.s32 14, %s3881_s28  ;;  %v1620_v31 = vstv %s4177_s15  ;;  %v1584_v44 = vadd.f32 %v1583_v46, %v1579_v55 }
 0x19a   : > { %v1625_v59 = vstv %s4181_s4  ;;  %s4214_s22 = sld [smem:[#allocation2 + %s1653_s17]]  ;;  %s1667_s18 = sadd.s32 70, %s3874_s3  ;;  %v1621_v57 = vmul.f32 %v1620_v31, %v3926_v36  ;;  %v2157_v10 = vadd.f32 -1.0, %v2341_v13  ;;  %vm1546_vm0 = vcmp.gt.f32.partialorder %v4193_v1, 0.0 }
 0x19b   : > { %2344 = vpow2.f32 %v1547_v47  ;;  %v1617_v60 = vadd.f32 %v1616_v23, %v1612_v48  ;;  %s4218_s21 = sld [smem:[#allocation4 + %s1658_s13]]  ;;  %s1671_s1 = sadd.s32 71, %s3874_s3  ;;  %v1626_v61 = vmul.f32 %v1625_v59, %v3931_v18  ;;  %v1630_v52 = vstv %s4185_s11 }
 0x19c   : > { %v1635_v38 = vstv %s4190_s8  ;;  %s4225_s14 = sld [smem:[#allocation2 + %s1667_s18]]  ;;  %s1676_s16 = sadd.s32 72, %s3874_s3  ;;  %v1589_v63 = vadd.f32 %v1588_v62, %v1584_v44  ;;  %v1631_v41 = vmul.f32 %v1630_v52, %v3970_v35  ;;  %v4246_v7 = vsel %vm1430_vm14, %v4136_v5, %v2157_v10  }
 0x19d   : > { %v1622_v50 = vadd.f32 %v1621_v57, %v1617_v60  ;;  %s4230_s23 = sld [smem:[#allocation2 + %s1671_s1]]  ;;  %s1681_s5 = sadd.s32 73, %s3874_s3  ;;  %v2343_v26 = vpop.eup %2342  ;;  %v1636_v8 = vmul.f32 %v1635_v38, %v3990_v28  ;;  %v1640_v11 = vstv %s4196_s6  ;;  %v4666_v54 = vmov %v4246_v7 }
 0x19e   : > { %s4236_s27 = sld [smem:[#allocation2 + %s1676_s16]]  ;;  %s1686_s12 = sadd.s32 74, %s3874_s3  ;;  %v2158_v14 = vadd.f32 -1.0, %v2343_v26  ;;  %v1594_v58 = vadd.f32 %v1593_v2, %v1589_v63  ;;  %v1645_v3 = vstv %s4201_s26  ;;  %v1641_v37 = vmul.f32 %v1640_v11, %v4003_v25 }
 0x19f   : > { %v1627_v45 = vadd.f32 %v1626_v61, %v1622_v50  ;;  %s4240_s24 = sld [smem:[#allocation2 + %s1681_s5]]  ;;  %s1691_s7 = sadd.s32 75, %s3874_s3  ;;  %v1646_v5 = vmul.f32 %v1645_v3, %v4035_v42  ;;  %v1650_v40 = vstv %s4207_s29 }
 0x1a0   : > { %s4249_s30 = sld [smem:[#allocation2 + %s1686_s12]]  ;;  %s1696_s15 = sadd.s32 76, %s3874_s3  ;;  %v4253_v19 = vsel %vm1488_vm15, %v4138_v34, %v2158_v14   ;;  %v1599_v51 = vadd.f32 %v1598_v4, %v1594_v58  ;;  %v1655_v30 = vstv %s4214_s22  ;;  %v1651_v39 = vmul.f32 %v1650_v40, %v4062_v15 }
 0x1a1   : > { %v4667_v17 = vmov %v4253_v19  ;;  %v1632_v12 = vadd.f32 %v1631_v41, %v1627_v45  ;;  %s4256_s19 = sld [smem:[#allocation2 + %s1691_s7]]  ;;  %s1701_s4 = sadd.s32 77, %s3874_s3  ;;  %v1656_v48 = vmul.f32 %v1655_v30, %v4109_v49  ;;  %v1660_v59 = vstv %s4218_s21 }
 0x1a2   : > { %v1669_v21 = vstv %s4225_s14  ;;  %s4262_s20 = sld [smem:[#allocation2 + %s1696_s15]]  ;;  %s1706_s0 = sadd.s32 78, %s3874_s3  ;;  %v4265_v34 = vadd.f32 %v1602_v16, %v1599_v51 }
 0x1a3   : > { %v1637_v22 = vadd.f32 %v1636_v8, %v1632_v12  ;;  %v1670_v29 = vmul.f32 %v1669_v21, %v3910_v24  ;;  %v1673_v27 = vstv %s4230_s23  ;;  %s4269_s11 = sld [smem:[#allocation2 + %s1701_s4]]  ;;  %s1711_s10 = sadd.s32 79, %s3874_s3 }
 0x1a4   : > { %v1674_v20 = vmul.f32 %v1673_v27, %v3915_v6  ;;  %v1678_v32 = vstv %s4236_s27  ;;  %s4275_s8 = sld [smem:[#allocation2 + %s1706_s0]]  ;;  %s1716_s2 = sadd.s32 15, %s3881_s28  ;;  %v1605_v9 = vmul.f32 1.442695, %v4265_v34  ;;  %vm1604_vm1 = vcmp.gt.f32.partialorder %v4265_v34, 0.0 }
 0x1a5   : > { %v1642_v33 = vadd.f32 %v1641_v37, %v1637_v22  ;;  %v1679_v46 = vmul.f32 %v1678_v32, %v3926_v36  ;;  %s4281_s6 = sld [smem:[#allocation2 + %s1711_s10]]  ;;  %s1725_s9 = sadd.s32 80, %s3874_s3  ;;  %v1683_v7 = vstv %s4240_s24 }
 0x1a6   : > { %v1675_v43 = vadd.f32 %v1674_v20, %v1670_v29  ;;  %v1688_v56 = vstv %s4249_s30  ;;  %s4286_s26 = sld [smem:[#allocation4 + %s1716_s2]]  ;;  %s1729_s17 = sadd.s32 81, %s3874_s3  ;;  %2346 = vpow2.f32 %v1605_v9  ;;  %v1684_v19 = vmul.f32 %v1683_v7, %v3931_v18 }
 0x1a7   : > { %v1647_v0 = vadd.f32 %v1646_v5, %v1642_v33  ;;  %s4291_s29 = sld [smem:[#allocation2 + %s1725_s9]]  ;;  %s1734_s13 = sadd.s32 82, %s3874_s3  ;;  %v1689_v62 = vmul.f32 %v1688_v56, %v3970_v35  ;;  %v1693_v23 = vstv %s4256_s19 }
 0x1a8   : > { %v2345_v47 = vpop.eup %2344  ;;  %v1680_v55 = vadd.f32 %v1679_v46, %v1675_v43  ;;  %s4297_s22 = sld [smem:[#allocation2 + %s1729_s17]]  ;;  %s1739_s18 = sadd.s32 83, %s3874_s3  ;;  %v1698_v31 = vstv %s4262_s20  ;;  %v1694_v60 = vmul.f32 %v1693_v23, %v3990_v28 }
 0x1a9   : > { %v2159_v2 = vadd.f32 -1.0, %v2345_v47  ;;  %v1652_v53 = vadd.f32 %v1651_v39, %v1647_v0  ;;  %s4301_s1 = sld [smem:[#allocation2 + %s1734_s13]]  ;;  %s1744_s14 = sadd.s32 84, %s3874_s3  ;;  %v1703_v52 = vstv %s4269_s11  ;;  %v1699_v13 = vmul.f32 %v1698_v31, %v4003_v25 }
 0x1aa   : > { %v1685_v44 = vadd.f32 %v1684_v19, %v1680_v55  ;;  %s4306_s16 = sld [smem:[#allocation2 + %s1739_s18]]  ;;  %s1749_s23 = sadd.s32 85, %s3874_s3  ;;  %v1704_v41 = vmul.f32 %v1703_v52, %v4035_v42 }
 0x1ab   : > { %v4312_v27 = vsel %vm1546_vm0, %v4193_v1, %v2159_v2   ;;  %v1657_v61 = vadd.f32 %v1656_v48, %v1652_v53  ;;  %s4315_s5 = sld [smem:[#allocation2 + %s1744_s14]]  ;;  %s1754_s21 = sadd.s32 86, %s3874_s3  ;;  %v1708_v1 = vstv %s4275_s8  ;;  %v1713_v11 = vstv %s4281_s6 }
 0x1ac   : > { %v4668_v57 = vmov %v4312_v27  ;;  %v1690_v38 = vadd.f32 %v1689_v62, %v1685_v44  ;;  %s4319_s27 = sld [smem:[#allocation2 + %s1749_s23]]  ;;  %s1759_s12 = sadd.s32 87, %s3874_s3  ;;  %v1709_v3 = vmul.f32 %v1708_v1, %v4062_v15  ;;  %v1714_v21 = vmul.f32 %v1713_v11, %v4109_v49 }
 0x1ad   : > { %v4322_v63 = vadd.f32 %v1660_v59, %v1657_v61  ;;  %v1727_v4 = vstv %s4291_s29  ;;  %s4326_s24 = sld [smem:[#allocation2 + %s1754_s21]]  ;;  %s1764_s7 = sadd.s32 88, %s3874_s3  ;;  %v1718_v33 = vstv %s4286_s26 }
 0x1ae   : > { %v1695_v50 = vadd.f32 %v1694_v60, %v1690_v38  ;;  %v1728_v26 = vmul.f32 %v1727_v4, %v3910_v24  ;;  %v1731_v10 = vstv %s4297_s22  ;;  %s4332_s30 = sld [smem:[#allocation2 + %s1759_s12]]  ;;  %s1769_s15 = sadd.s32 89, %s3874_s3 }
 0x1af   : > { %v1663_v8 = vmul.f32 1.442695, %v4322_v63  ;;  %v1732_v14 = vmul.f32 %v1731_v10, %v3915_v6  ;;  %v1736_v58 = vstv %s4301_s1  ;;  %s4339_s19 = sld [smem:[#allocation2 + %s1764_s7]]  ;;  %s1774_s4 = sadd.s32 16, %s3881_s28  ;;  %vm1662_vm2 = vcmp.gt.f32.partialorder %v4322_v63, 0.0 }
 0x1b0   : > { %v1700_v45 = vadd.f32 %v1699_v13, %v1695_v50  ;;  %v1737_v16 = vmul.f32 %v1736_v58, %v3926_v36  ;;  %v1741_v51 = vstv %s4306_s16  ;;  %s4345_s20 = sld [smem:[#allocation2 + %s1769_s15]]  ;;  %s1783_s0 = sadd.s32 90, %s3874_s3 }
 0x1b1   : > { %2348 = vpow2.f32 %v1663_v8  ;;  %v1733_v12 = vadd.f32 %v1732_v14, %v1728_v26  ;;  %v1742_v37 = vmul.f32 %v1741_v51, %v3931_v18  ;;  %v1746_v5 = vstv %s4315_s5  ;;  %s4350_s11 = sld [smem:[#allocation4 + %s1774_s4]]  ;;  %s1787_s10 = sadd.s32 91, %s3874_s3 }
 0x1b2   : > { %v1705_v40 = vadd.f32 %v1704_v41, %v1700_v45  ;;  %v1751_v22 = vstv %s4319_s27  ;;  %s4355_s8 = sld [smem:[#allocation2 + %s1783_s0]]  ;;  %s1792_s2 = sadd.s32 92, %s3874_s3  ;;  %v1747_v27 = vmul.f32 %v1746_v5, %v3970_v35 }
 0x1b3   : > { %v1738_v29 = vadd.f32 %v1737_v16, %v1733_v12  ;;  %s4359_s6 = sld [smem:[#allocation2 + %s1787_s10]]  ;;  %s1797_s9 = sadd.s32 93, %s3874_s3  ;;  %v2347_v30 = vpop.eup %2346  ;;  %v1756_v32 = vstv %s4326_s24  ;;  %v1752_v46 = vmul.f32 %v1751_v22, %v3990_v28 }
 0x1b4   : > { %v1710_v20 = vadd.f32 %v1709_v3, %v1705_v40  ;;  %s4364_s17 = sld [smem:[#allocation2 + %s1792_s2]]  ;;  %s1802_s29 = sadd.s32 94, %s3874_s3  ;;  %v2160_v9 = vadd.f32 -1.0, %v2347_v30  ;;  %v1761_v7 = vstv %s4332_s30  ;;  %v1757_v48 = vmul.f32 %v1756_v32, %v4003_v25 }
 0x1b5   : > { %v1743_v39 = vadd.f32 %v1742_v37, %v1738_v29  ;;  %s4369_s13 = sld [smem:[#allocation2 + %s1797_s9]]  ;;  %s1807_s22 = sadd.s32 95, %s3874_s3  ;;  %v1766_v47 = vstv %s4339_s19 }
 0x1b6   : > { %v1715_v43 = vadd.f32 %v1714_v21, %v1710_v20  ;;  %s4373_s18 = sld [smem:[#allocation2 + %s1802_s29]]  ;;  %s1812_s1 = sadd.s32 96, %s3874_s3  ;;  %v4377_v31 = vsel %vm1604_vm1, %v4265_v34, %v2160_v9   ;;  %v1762_v34 = vmul.f32 %v1761_v7, %v4035_v42  ;;  %v1767_v61 = vmul.f32 %v1766_v47, %v4062_v15 }
 0x1b7   : > { %v4669_v56 = vmov %v4377_v31  ;;  %v1748_v0 = vadd.f32 %v1747_v27, %v1743_v39  ;;  %s4380_s26 = sld [smem:[#allocation2 + %s1807_s22]]  ;;  %s1817_s14 = sadd.s32 97, %s3874_s3  ;;  %v1771_v31 = vstv %s4345_s20  ;;  %v1776_v3 = vstv %s4350_s11 }
 0x1b8   : > { %v4383_v19 = vadd.f32 %v1718_v33, %v1715_v43  ;;  %v1785_v55 = vstv %s4355_s8  ;;  %s4387_s16 = sld [smem:[#allocation2 + %s1812_s1]]  ;;  %s1822_s23 = sadd.s32 98, %s3874_s3  ;;  %v1772_v41 = vmul.f32 %v1771_v31, %v4109_v49 }
 0x1b9   : > { %v1753_v62 = vadd.f32 %v1752_v46, %v1748_v0  ;;  %v1786_v23 = vmul.f32 %v1785_v55, %v3910_v24  ;;  %v1789_v2 = vstv %s4359_s6  ;;  %s4393_s5 = sld [smem:[#allocation2 + %s1817_s14]]  ;;  %s1827_s21 = sadd.s32 99, %s3874_s3 }
 0x1ba   : > { %v1721_v53 = vmul.f32 1.442695, %v4383_v19  ;;  %v1790_v59 = vmul.f32 %v1789_v2, %v3915_v6  ;;  %v1794_v44 = vstv %s4364_s17  ;;  %s4400_s27 = sld [smem:[#allocation2 + %s1822_s23]]  ;;  %s1832_s12 = sadd.s32 17, %s3881_s28  ;;  %vm1720_vm3 = vcmp.gt.f32.partialorder %v4383_v19, 0.0 }
 0x1bb   : > { %v1758_v60 = vadd.f32 %v1757_v48, %v1753_v62  ;;  %v1795_v52 = vmul.f32 %v1794_v44, %v3926_v36  ;;  %v1799_v38 = vstv %s4369_s13  ;;  %s4406_s24 = sld [smem:[#allocation2 + %s1827_s21]]  ;;  %s1841_s7 = sadd.s32 100, %s3874_s3 }
 0x1bc   : > { %2350 = vpow2.f32 %v1721_v53  ;;  %v1791_v13 = vadd.f32 %v1790_v59, %v1786_v23  ;;  %v1800_v1 = vmul.f32 %v1799_v38, %v3931_v18  ;;  %v1804_v4 = vstv %s4373_s18  ;;  %s4411_s30 = sld [smem:[#allocation4 + %s1832_s12]]  ;;  %s1845_s15 = sadd.s32 101, %s3874_s3 }
 0x1bd   : > { %v1763_v50 = vadd.f32 %v1762_v34, %v1758_v60  ;;  %v1809_v26 = vstv %s4380_s26  ;;  %s4416_s19 = sld [smem:[#allocation2 + %s1841_s7]]  ;;  %s1850_s4 = sadd.s32 102, %s3874_s3  ;;  %v1805_v11 = vmul.f32 %v1804_v4, %v3970_v35 }
 0x1be   : > { %v2349_v10 = vpop.eup %2348  ;;  %v1796_v8 = vadd.f32 %v1795_v52, %v1791_v13  ;;  %s4421_s20 = sld [smem:[#allocation2 + %s1845_s15]]  ;;  %s1855_s0 = sadd.s32 103, %s3874_s3  ;;  %v1814_v45 = vstv %s4387_s16  ;;  %v1810_v51 = vmul.f32 %v1809_v26, %v3990_v28 }
 0x1bf   : > { %v2161_v14 = vadd.f32 -1.0, %v2349_v10  ;;  %v1768_v58 = vadd.f32 %v1767_v61, %v1763_v50  ;;  %s4425_s10 = sld [smem:[#allocation2 + %s1850_s4]]  ;;  %s1860_s8 = sadd.s32 104, %s3874_s3  ;;  %v1819_v5 = vstv %s4393_s5  ;;  %v1815_v21 = vmul.f32 %v1814_v45, %v4003_v25 }
 0x1c0   : > { %v1801_v16 = vadd.f32 %v1800_v1, %v1796_v8  ;;  %s4430_s2 = sld [smem:[#allocation2 + %s1855_s0]]  ;;  %s1865_s6 = sadd.s32 105, %s3874_s3  ;;  %v1820_v30 = vmul.f32 %v1819_v5, %v4035_v42 }
 0x1c1   : > { %v4434_v34 = vsel %vm1662_vm2, %v4322_v63, %v2161_v14   ;;  %v1773_v37 = vadd.f32 %v1772_v41, %v1768_v58  ;;  %s4437_s9 = sld [smem:[#allocation2 + %s1860_s8]]  ;;  %s1870_s17 = sadd.s32 106, %s3874_s3  ;;  %v1824_v63 = vstv %s4400_s27  ;;  %v1829_v33 = vstv %s4406_s24 }
 0x1c2   : > { %v4670_v12 = vmov %v4434_v34  ;;  %v1806_v40 = vadd.f32 %v1805_v11, %v1801_v16  ;;  %s4441_s11 = sld [smem:[#allocation2 + %s1865_s6]]  ;;  %s1875_s29 = sadd.s32 107, %s3874_s3  ;;  %v1825_v7 = vmul.f32 %v1824_v63, %v4062_v15  ;;  %v1830_v23 = vmul.f32 %v1829_v33, %v4109_v49 }
 0x1c3   : > { %v4444_v22 = vadd.f32 %v1776_v3, %v1773_v37  ;;  %v1843_v29 = vstv %s4416_s19  ;;  %s4448_s13 = sld [smem:[#allocation2 + %s1870_s17]]  ;;  %s1880_s22 = sadd.s32 108, %s3874_s3  ;;  %v1834_v52 = vstv %s4411_s30 }
 0x1c4   : > { %v1811_v27 = vadd.f32 %v1810_v51, %v1806_v40  ;;  %v1844_v20 = vmul.f32 %v1843_v29, %v3910_v24  ;;  %v1847_v32 = vstv %s4421_s20  ;;  %s4454_s18 = sld [smem:[#allocation2 + %s1875_s29]]  ;;  %s1885_s1 = sadd.s32 109, %s3874_s3 }
 0x1c5   : > { %v1779_v9 = vmul.f32 1.442695, %v4444_v22  ;;  %v1848_v39 = vmul.f32 %v1847_v32, %v3915_v6  ;;  %v1852_v46 = vstv %s4425_s10  ;;  %s4461_s26 = sld [smem:[#allocation2 + %s1880_s22]]  ;;  %s1890_s14 = sadd.s32 18, %s3881_s28  ;;  %vm1778_vm4 = vcmp.gt.f32.partialorder %v4444_v22, 0.0 }
 0x1c6   : > { %v1816_v43 = vadd.f32 %v1815_v21, %v1811_v27  ;;  %v1853_v0 = vmul.f32 %v1852_v46, %v3926_v36  ;;  %v1857_v48 = vstv %s4430_s2  ;;  %s4467_s16 = sld [smem:[#allocation2 + %s1885_s1]]  ;;  %s1899_s23 = sadd.s32 110, %s3874_s3 }
 0x1c7   : > { %2352 = vpow2.f32 %v1779_v9  ;;  %v1849_v47 = vadd.f32 %v1848_v39, %v1844_v20  ;;  %v1858_v55 = vmul.f32 %v1857_v48, %v3931_v18  ;;  %v1862_v62 = vstv %s4437_s9  ;;  %s4472_s5 = sld [smem:[#allocation4 + %s1890_s14]]  ;;  %s1903_s21 = sadd.s32 111, %s3874_s3 }
 0x1c8   : > { %v1821_v34 = vadd.f32 %v1820_v30, %v1816_v43  ;;  %v1867_v2 = vstv %s4441_s11  ;;  %s4477_s27 = sld [smem:[#allocation2 + %s1899_s23]]  ;;  %s1908_s12 = sadd.s32 112, %s3874_s3  ;;  %v1863_v59 = vmul.f32 %v1862_v62, %v3970_v35 }
 0x1c9   : > { %v2351_v53 = vpop.eup %2350  ;;  %v1854_v31 = vadd.f32 %v1853_v0, %v1849_v47  ;;  %s4482_s24 = sld [smem:[#allocation2 + %s1903_s21]]  ;;  %s1913_s7 = sadd.s32 113, %s3874_s3  ;;  %v1872_v61 = vstv %s4448_s13  ;;  %v1868_v13 = vmul.f32 %v1867_v2, %v3990_v28 }
 0x1ca   : > { %v2162_v44 = vadd.f32 -1.0, %v2351_v53  ;;  %v1826_v60 = vadd.f32 %v1825_v7, %v1821_v34  ;;  %s4486_s15 = sld [smem:[#allocation2 + %s1908_s12]]  ;;  %s1918_s19 = sadd.s32 114, %s3874_s3  ;;  %v1877_v50 = vstv %s4454_s18  ;;  %v1873_v26 = vmul.f32 %v1872_v61, %v4003_v25 }
 0x1cb   : > { %v1859_v38 = vadd.f32 %v1858_v55, %v1854_v31  ;;  %s4491_s4 = sld [smem:[#allocation2 + %s1913_s7]]  ;;  %s1923_s20 = sadd.s32 115, %s3874_s3  ;;  %v1882_v8 = vstv %s4461_s26  ;;  %v1878_v14 = vmul.f32 %v1877_v50, %v4035_v42 }
 0x1cc   : > { %v4495_v37 = vsel %vm1720_vm3, %v4383_v19, %v2162_v44   ;;  %v1831_v4 = vadd.f32 %v1830_v23, %v1826_v60  ;;  %s4498_s0 = sld [smem:[#allocation2 + %s1918_s19]]  ;;  %s1928_s10 = sadd.s32 116, %s3874_s3  ;;  %v1887_v16 = vstv %s4467_s16  ;;  %v1883_v40 = vmul.f32 %v1882_v8, %v4062_v15 }
 0x1cd   : > { %v4671_v1 = vmov %v4495_v37  ;;  %v1864_v41 = vadd.f32 %v1863_v59, %v1859_v38  ;;  %s4502_s30 = sld [smem:[#allocation2 + %s1923_s20]]  ;;  %s1933_s8 = sadd.s32 117, %s3874_s3  ;;  %v1892_v43 = vstv %s4472_s5 }
 0x1ce   : > { %v1835_v10 = vadd.f32 %v1834_v52, %v1831_v4  ;;  %v1901_v11 = vstv %s4477_s27  ;;  %s4507_s2 = sld [smem:[#allocation2 + %s1928_s10]]  ;;  %s1938_s6 = sadd.s32 118, %s3874_s3 }
 0x1cf   : > { %v1869_v19 = vadd.f32 %v1868_v13, %v1864_v41  ;;  %v1902_v58 = vmul.f32 %v1901_v11, %v3910_v24  ;;  %v1905_v45 = vstv %s4482_s24  ;;  %s4513_s9 = sld [smem:[#allocation2 + %s1933_s8]]  ;;  %s1943_s17 = sadd.s32 119, %s3874_s3 }
 0x1d0   : > { %v1837_v3 = vmul.f32 1.442695, %v1835_v10  ;;  %v1906_v51 = vmul.f32 %v1905_v45, %v3915_v6  ;;  %v1910_v37 = vstv %s4486_s15  ;;  %s4522_s11 = sld [smem:[#allocation2 + %s1938_s6]]  ;;  %v1888_v6 = vmul.f32 %v1887_v16, %v4109_v49  ;;  %s1948_s29 = sadd.s32 19, %s3881_s28 }
 0x1d1   : > { %v1874_v5 = vadd.f32 %v1873_v26, %v1869_v19  ;;  %v1911_v21 = vmul.f32 %v1910_v37, %v3926_v36  ;;  %v1915_v63 = vstv %s4491_s4  ;;  %s1944_s3 = sld [smem:[#allocation2 + %s1943_s17]]  ;;  %vm1836_vm5 = vcmp.gt.f32.partialorder %v1835_v10, 0.0  ;;  %s197_s24 = sadd.s32 1, %s4664_s25  }
 0x1d2   : > { %2354 = vpow2.f32 %v1837_v3  ;;  %v1907_v24 = vadd.f32 %v1906_v51, %v1902_v58  ;;  %v1916_v29 = vmul.f32 %v1915_v63, %v3931_v18  ;;  %v1920_v27 = vstv %s4498_s0  ;;  %s1949_s13 = sld [smem:[#allocation4 + %s1948_s29]]  ;;  %p194_p10 = scmp.ge.s32.totalorder %s197_s24, 3  }
 0x1d3   : > { %v1879_v30 = vadd.f32 %v1878_v14, %v1874_v5  ;;  %v1925_v20 = vstv %s4502_s30  ;;  %v1921_v9 = vmul.f32 %v1920_v27, %v3970_v35  ;;  %v4680_v37 = vmov %v4671_v1  ;;  %s2167_s25 = sld [smem:[#allocation2 + $0x398]] (%p194_p10) }
 0x1d4   : > { %v2353_v32 = vpop.eup %2352  ;;  %v1912_v36 = vadd.f32 %v1911_v21, %v1907_v24  ;;  %v1930_v46 = vstv %s4507_s2  ;;  %v1926_v7 = vmul.f32 %v1925_v20, %v3990_v28  ;;  %v4683_v27 = vmov %v4668_v57  ;;  %s2168_s28 = sld [smem:[#allocation2 + $0x399]] (%p194_p10) }
 0x1d5   : > { %v2163_v33 = vadd.f32 -1.0, %v2353_v32  ;;  %v1884_v39 = vadd.f32 %v1883_v40, %v1879_v30  ;;  %v1935_v47 = vstv %s4513_s9  ;;  %v1931_v62 = vmul.f32 %v1930_v46, %v4003_v25  ;;  %s2169_s22 = sld [smem:[#allocation2 + $0x39a]] (%p194_p10) }
 0x1d6   : > { %v1917_v18 = vadd.f32 %v1916_v29, %v1912_v36  ;;  %v1940_v23 = vstv %s4522_s11  ;;  %v1936_v2 = vmul.f32 %v1935_v47, %v4035_v42  ;;  %v4684_v19 = vmov %v4667_v17  ;;  %s2170_s18 = sld [smem:[#allocation2 + $0x39b]] (%p194_p10) }
 0x1d7   : > { %v4535_v40 = vsel %vm1778_vm4, %v4444_v22, %v2163_v33   ;;  %v1889_v48 = vadd.f32 %v1888_v6, %v1884_v39  ;;  %v1945_v31 = vstv %s1944_s3  ;;  %v1941_v28 = vmul.f32 %v1940_v23, %v4062_v15  ;;  %s2171_s1 = sld [smem:[#allocation2 + $0x39c]] (%p194_p10) }
 0x1d8   : > { %v4672_v0 = vmov %v4535_v40  ;;  %v1922_v55 = vadd.f32 %v1921_v9, %v1917_v18  ;;  %v1946_v22 = vmul.f32 %v1945_v31, %v4109_v49  ;;  %v1950_v25 = vstv %s1949_s13  ;;  %s2172_s26 = sld [smem:[#allocation2 + $0x39d]] (%p194_p10) }
 0x1d9   : > { %v1893_v34 = vadd.f32 %v1892_v43, %v1889_v48  ;;  %v4679_v40 = vmov %v4672_v0  ;;  %v4682_v31 = vmov %v4669_v56  ;;  %s2173_s14 = sld [smem:[#allocation2 + $0x39e]] (%p194_p10) }
 0x1da   : > { %v1927_v35 = vadd.f32 %v1926_v7, %v1922_v55  ;;  %v4685_v7 = vmov %v4666_v54  ;;  %v1961_v58 = vstv (%p194_p10), %s2168_s28  ;;  %s4584_s16 = sld [smem:[#allocation2 + $0x39f]] (%p194_p10) }
 0x1db   : > { %v1895_v53 = vmul.f32 1.442695, %v1893_v34  ;;  %vm1894_vm6 = vcmp.gt.f32.partialorder %v1893_v34, 0.0  ;;  %v1962_v45 = vmul.f32 (%p194_p10), %v1961_v58, %v4667_v17  ;;  %v1965_v3 = vstv (%p194_p10), %s2169_s22  ;;  %s4587_s23 = sld [smem:[#allocation2 + $0x3a0]] (%p194_p10) }
 0x1dc   : > { %v1932_v59 = vadd.f32 %v1931_v62, %v1927_v35  ;;  %v1966_v16 = vmul.f32 (%p194_p10), %v1965_v3, %v4668_v57  ;;  %v1969_v51 = vstv (%p194_p10), %s2170_s18  ;;  %s4590_s5 = sld [smem:[#allocation2 + $0x3a1]] (%p194_p10) }
 0x1dd   : > { %2356 = vpow2.f32 %v1895_v53  ;;  %v1970_v19 = vmul.f32 (%p194_p10), %v1969_v51, %v4669_v56  ;;  %v1973_v37 = vstv (%p194_p10), %s2171_s1  ;;  %s2178_s21 = sld [smem:[#allocation2 + $0x3a2]] (%p194_p10) }
 0x1de   : > { %v1937_v44 = vadd.f32 %v1936_v2, %v1932_v59  ;;  %v1977_v5 = vstv (%p194_p10), %s2172_s26  ;;  %v1974_v21 = vmul.f32 (%p194_p10), %v1973_v37, %v4670_v12  ;;  %s2179_s27 = sld [smem:[#allocation2 + $0x3a3]] (%p194_p10) }
 0x1df   : > { %v2355_v60 = vpop.eup %2354  ;;  %s2180_s12 = sld [smem:[#allocation2 + $0x3a4]] (%p194_p10)  ;;  %v1978_v24 = vmul.f32 (%p194_p10), %v1977_v5, %v4671_v1  ;;  %v1981_v29 = vstv (%p194_p10), %s2173_s14 }
 0x1e0   : > { %v2164_v61 = vadd.f32 -1.0, %v2355_v60  ;;  %v1942_v52 = vadd.f32 %v1941_v28, %v1937_v44  ;;  %s2181_s24 = sld [smem:[#allocation2 + $0x3a5]] (%p194_p10)  ;;  %v1982_v30 = vmul.f32 (%p194_p10), %v1981_v29, %v4672_v0  ;;  %v1985_v6 = vstv (%p194_p10), %s4584_s16 }
 0x1e1   :  { %s2182_s7 = sld [smem:[#allocation2 + $0x3a6]] (%p194_p10) }
 0x1e2   : > { %v4543_v42 = vsel %vm1836_vm5, %v1835_v10, %v2164_v61   ;;  %v1947_v13 = vadd.f32 %v1946_v22, %v1942_v52  ;;  %v1958_v10 = vstv (%p194_p10), %s2167_s25  ;;  %s2183_s15 = sld [smem:[#allocation2 + $0x3a7]] (%p194_p10)  ;;  %v1993_v31 = vstv (%p194_p10), %s4590_s5 }
 0x1e3   : > { %v4673_v38 = vmov %v4543_v42  ;;  %v1959_v14 = vmul.f32 (%p194_p10), %v1958_v10, %v4666_v54  ;;  %v2000_v20 = vstv (%p194_p10), %s2178_s21  ;;  %s2184_s19 = sld [smem:[#allocation2 + $0x3a8]] (%p194_p10) }
 0x1e4   : > { %v1951_v4 = vadd.f32 %v1950_v25, %v1947_v13  ;;  %v4678_v42 = vmov %v4673_v38  ;;  %v2001_v36 = vmul.f32 (%p194_p10), %v2000_v20, %v4666_v54  ;;  %v2003_v9 = vstv (%p194_p10), %s2179_s27  ;;  %s4597_s4 = sld [smem:[#allocation2 + $0x3a9]] (%p194_p10) }
 0x1e5   :  { %v1963_v42 = vadd.f32 (%p194_p10), %v1962_v45, %v1959_v14  ;;  %v2004_v33 = vmul.f32 (%p194_p10), %v2003_v9, %v4667_v17  ;;  %v2007_v39 = vstv (%p194_p10), %s2180_s12  ;;  %s2186_s20 = sld [smem:[#allocation2 + $0x3aa]] (%p194_p10)  ;;  %v1989_v54 = vstv (%p194_p10), %s4587_s23 }
 0x1e6   : > { %v1953_v50 = vmul.f32 1.442695, %v1951_v4  ;;  %vm1952_vm7 = vcmp.gt.f32.partialorder %v1951_v4, 0.0  ;;  %v2008_v43 = vmul.f32 (%p194_p10), %v2007_v39, %v4668_v57  ;;  %v2011_v18 = vstv (%p194_p10), %s2181_s24  ;;  %s2187_s0 = sld [smem:[#allocation2 + $0x3ab]] (%p194_p10) }
 0x1e7   :  { %v1967_v40 = vadd.f32 (%p194_p10), %v1966_v16, %v1963_v42  ;;  %v2005_v48 = vadd.f32 (%p194_p10), %v2004_v33, %v2001_v36  ;;  %v2015_v55 = vstv (%p194_p10), %s2182_s7  ;;  %s2177_s10 = sld [smem:[#allocation4 + $0x64]] (%p194_p10) }
 0x1e8   : > { %2358 = vpow2.f32 %v1953_v50  ;;  %v2019_v62 = vstv (%p194_p10), %s2183_s15  ;;  %v2016_v17 = vmul.f32 (%p194_p10), %v2015_v55, %v4670_v12  ;;  %s2188_s30 = sld [smem:[#allocation4 + $0x65]] (%p194_p10) }
 0x1e9   :  { %v1971_v63 = vadd.f32 (%p194_p10), %v1970_v19, %v1967_v40  ;;  %v2023_v23 = vstv (%p194_p10), %s2184_s19  ;;  %v2020_v53 = vmul.f32 (%p194_p10), %v2019_v62, %v4671_v1  ;;  %s4686_s6 = sld [smem:[#allocation21_spill]] (%p194_p10) }
 0x1ea   : > { %v2357_v41 = vpop.eup %2356  ;;  %v2027_v59 = vstv (%p194_p10), %s4597_s4 }
 0x1eb   : > { %v2165_v26 = vadd.f32 -1.0, %v2357_v41  ;;  %v1975_v27 = vadd.f32 (%p194_p10), %v1974_v21, %v1971_v63  ;;  %v2031_v44 = vstv (%p194_p10), %s2186_s20 }
 0x1ec   :  { %v2035_v52 = vstv (%p194_p10), %s2187_s0 }
 0x1ed   : > { %v4545_v46 = vsel %vm1894_vm6, %v1893_v34, %v2165_v26   ;;  %v4681_v34 = vmov %v4670_v12  ;;  %v1979_v32 = vadd.f32 (%p194_p10), %v1978_v24, %v1975_v27  ;;  %v2028_v12 = vmul.f32 (%p194_p10), %v2027_v59, %v4673_v38 }
 0x1ee   : > { %v4674_v15 = vmov %v4545_v46  ;;  %v2009_v34 = vadd.f32 (%p194_p10), %v2008_v43, %v2005_v48  ;;  %v1997_v41 = vstv (%p194_p10), %s2177_s10 }
 0x1ef   : > { %v4677_v46 = vmov %v4674_v15  ;;  %v1983_v7 = vadd.f32 (%p194_p10), %v1982_v30, %v1979_v32  ;;  %v1990_v2 = vmul.f32 (%p194_p10), %v1989_v54, %v4674_v15  ;;  %v2032_v13 = vmul.f32 (%p194_p10), %v2031_v44, %v4674_v15 }
 0x1f0   :  { %v1986_v46 = vmul.f32 (%p194_p10), %v1985_v6, %v4673_v38 }
 0x1f2   :  { %v1987_v35 = vadd.f32 (%p194_p10), %v1986_v46, %v1983_v7 }
 0x1f4   :  { %v1991_v22 = vadd.f32 (%p194_p10), %v1990_v2, %v1987_v35 }
 0x1f5   : > { %v2359_v8 = vpop.eup %2358 }
 0x1f6   : > { %v2166_v11 = vadd.f32 -1.0, %v2359_v8  ;;  %196 = sbr.rel (!%p194_p10) target bundleno = 89 (0x59), region = 49  ;;  %v2039_v8 = vstv (%p194_p10), %s2188_s30 }
 0x1f8   : > { %v4547_v47 = vsel %vm1952_vm7, %v1951_v4, %v2166_v11  }
 0x1f9   : > { %v4675_v49 = vmov %v4547_v47 }
 0x1fa   : > { %v4676_v47 = vmov %v4675_v49  ;;  %v1994_v60 = vmul.f32 (%p194_p10), %v1993_v31, %v4675_v49  ;;  %v2036_v50 = vmul.f32 (%p194_p10), %v2035_v52, %v4675_v49 }
 0x1fb   :  { %v2012_v47 = vmul.f32 %v2011_v18, %v4669_v56  ;;  %v2024_v56 = vmul.f32 %v2023_v23, %v4672_v0 }
 0x1fc   :  { %v1995_v4 = vadd.f32 %v1994_v60, %v1991_v22 }
 0x1fd   :  { %v2013_v57 = vadd.f32 %v2012_v47, %v2009_v34 }
 0x1fe   :  { %v1998_v0 = vadd.f32 %v1997_v41, %v1995_v4 }
 0x1ff   :  { %v2017_v28 = vadd.f32 %v2016_v17, %v2013_v57 }
 0x201   :  { %v2021_v61 = vadd.f32 %v2020_v53, %v2017_v28 }
 0x203   :  { %v2025_v25 = vadd.f32 %v2024_v56, %v2021_v61 }
 0x205   :  { %v2029_v1 = vadd.f32 %v2028_v12, %v2025_v25 }
 0x207   :  { %v2033_v26 = vadd.f32 %v2032_v13, %v2029_v1 }
 0x209   :  { %v2037_v11 = vadd.f32 %v2036_v50, %v2033_v26 }
 0x20b   :  { %v2040_v10 = vadd.f32 %v2039_v8, %v2037_v11 }
 0x20d   :  { %v2041_v14 = vmax.f32 %v1998_v0, %v2040_v10 }
 0x20f   :  { %v2042_v58 = vsub.f32 %v1998_v0, %v2041_v14  ;;  %v2045_v45 = vsub.f32 %v2040_v10, %v2041_v14 }
 0x211   :  { %v2043_v3 = vmul.f32 1.442695, %v2042_v58  ;;  %v2046_v16 = vmul.f32 1.442695, %v2045_v45 }
 0x213   :  { %2360 = vpow2.f32 %v2043_v3 }
 0x214   :  { %2362 = vpow2.f32 %v2046_v16 }
 0x220   :  { %v2361_v38 = vpop.eup %2360 }
 0x221   :  { %v2363_v51 = vpop.eup %2362 }
 0x222   :  { %v2048_v15 = vadd.f32 %v2363_v51, %v2361_v38 }
 0x224   :  { %2364 = vlog2.f32 %v2048_v15 }
 0x231   :  { %v2365_v42 = vpop.eup %2364 }
 0x232   :  { %v2050_v19 = vmul.f32 0.6931472, %v2365_v42 }
 0x234   :  { %v2051_v49 = vadd.f32 %v2050_v19, %v2041_v14 }
 0x236   :  { %v2052_v37 = vsub.f32 %v1998_v0, %v2051_v49  ;;  %v2054_v5 = vsub.f32 %v2040_v10, %v2051_v49 }
 0x238   :  { %2053 = vst [vmem:[%s4686_s6] sm:$0xff] %v2052_v37  ;;  %2189 = vst [vmem:[%s4686_s6 + $0x8] sm:$0xff] %v2054_v5 }
 0x239   :  { %2061 = vsyncpa [#allocation3], 1 }
 0x23a   :  { %2062 = vsyncpa [#allocation5], 1 }

</bundles_post_ra>
